<compile_context>
chip_gen: v7x
topology: tpu7x:2x2x1
jax: 0.10.0
libtpu: 0.0.40
codegen_flags: <defaults>
</compile_context>

<pallas_src>
import functools
import math

import numpy as np
import jax
import jax.numpy as jnp
from jax.experimental import pallas as pl
from jax.experimental.pallas import tpu as pltpu

D_MODEL = 256
N_HEAD = 4
D_HEAD = D_MODEL // N_HEAD
FF_DIM = 1024
VOCAB = 81
VOCAB_PAD = 128           # lane-dense padded class dim for the loss kernel
CONV_K = 31
N_LAYERS = 6
LN_EPS = 1e-12            # ESPnet LayerNorm eps (encoder-internal norms)
AFTER_NORM_EPS = 1e-5     # torch.nn.LayerNorm default (after_norm1)
BN_EPS = 1e-5
NEG_INF = -1e9
SMOOTHING = 0.1
CONFIDENCE = 1.0 - SMOOTHING


def _layernorm(x, g, b, eps):
    mu = jnp.mean(x, axis=-1, keepdims=True)
    var = jnp.mean(jnp.square(x - mu), axis=-1, keepdims=True)
    return (x - mu) * jax.lax.rsqrt(var + eps) * g + b


# ==========================================================================
# Fused encoder layer kernel: macaron-FFN + rel-pos MHA + conv module + FFN
# + final LayerNorm.  Grid over batch (>= 2 steps -> both TCs on v7x).
# ==========================================================================
def _encoder_layer_kernel(
    x_ref, pos_ref, mask_ref,
    nfm_g_ref, nfm_b_ref, nmha_g_ref, nmha_b_ref, nconv_g_ref, nconv_b_ref,
    nff_g_ref, nff_b_ref, nfin_g_ref, nfin_b_ref,
    mac_w1_ref, mac_b1_ref, mac_w2_ref, mac_b2_ref,
    wqkv_ref, bqu_ref, bqv_ref, bk_ref, bv_ref, wo_ref, bo_ref,
    pw1_w_ref, pw1_b_ref, dw_w_ref, dw_b_ref, bn_s_ref, bn_sh_ref,
    pw2_w_ref, pw2_b_ref,
    ff_w1_ref, ff_b1_ref, ff_w2_ref, ff_b2_ref,
    o_ref,
    *, T, H, dk, K,
):
    D = H * dk
    scale = 1.0 / math.sqrt(dk)
    x = x_ref[0]                                                    # (T, D) f32

    def ffn(xin, g_ref, b_ref, w1_ref, b1_ref, w2_ref, b2_ref):
        h = _layernorm(xin, g_ref[...], b_ref[...], LN_EPS)
        h = jnp.dot(h.astype(jnp.bfloat16), w1_ref[...],
                    preferred_element_type=jnp.float32) + b1_ref[...]
        h = h * jax.nn.sigmoid(h)                                   # Swish
        return jnp.dot(h.astype(jnp.bfloat16), w2_ref[...],
                       preferred_element_type=jnp.float32) + b2_ref[...]

    # ------------------- macaron feed-forward -------------------
    x = x + 0.5 * ffn(x, nfm_g_ref, nfm_b_ref, mac_w1_ref, mac_b1_ref,
                      mac_w2_ref, mac_b2_ref)

    # ------------------- relative-position MHA -------------------
    xn = _layernorm(x, nmha_g_ref[...], nmha_b_ref[...], LN_EPS)
    # single fused QKV projection: (T,256) @ (256,768)
    qkv = jnp.dot(xn.astype(jnp.bfloat16), wqkv_ref[...],
                  preferred_element_type=jnp.float32)               # (T, 3D)
    q = qkv[:, :D]
    k = qkv[:, D:2 * D] + bk_ref[...]
    v = qkv[:, 2 * D:] + bv_ref[...]
    pos = pos_ref[...]                                              # (2T-1, D) bf16

    def heads(m):                                                   # (T,D)->(H,T,dk)
        return jnp.stack([m[:, h * dk:(h + 1) * dk] for h in range(H)], axis=0)

    qh, kh, vh = heads(q), heads(k), heads(v)
    ph = jnp.stack([pos[:, h * dk:(h + 1) * dk] for h in range(H)], axis=0)

    qu = (qh + bqu_ref[...]).astype(jnp.bfloat16)                   # (H,T,dk)
    qv = (qh + bqv_ref[...]).astype(jnp.bfloat16)
    khb = kh.astype(jnp.bfloat16)
    vhb = vh.astype(jnp.bfloat16)

    # batched over heads
    ac = jax.lax.dot_general(qu, khb, (((2,), (2,)), ((0,), (0,))),
                             preferred_element_type=jnp.float32)    # (H,T,T)
    bdf = jax.lax.dot_general(qv, ph, (((2,), (2,)), ((0,), (0,))),
                              preferred_element_type=jnp.float32)   # (H,T,2T-1)

    # relative shift: bd[h,i,j] = bdf[h,i,T-1-i+j]  -> T static lane slices
    bd = jnp.concatenate(
        [bdf[:, i:i + 1, T - 1 - i:2 * T - 1 - i] for i in range(T)], axis=1)

    keep = mask_ref[0] > 0.5                                        # (1, T)
    scores = jnp.where(keep, (ac + bd) * scale, NEG_INF)            # (H,T,T)
    m = jnp.max(scores, axis=-1, keepdims=True)
    e = jnp.exp(scores - m)
    attn = e / jnp.sum(e, axis=-1, keepdims=True)                   # exact division
    attn = jnp.where(keep, attn, 0.0)
    ctx = jax.lax.dot_general(attn.astype(jnp.bfloat16), vhb,
                              (((2,), (1,)), ((0,), (0,))),
                              preferred_element_type=jnp.float32)   # (H,T,dk)
    ctx = jnp.concatenate([ctx[h] for h in range(H)], axis=-1)      # (T, D)
    x = x + (jnp.dot(ctx.astype(jnp.bfloat16), wo_ref[...],
                     preferred_element_type=jnp.float32) + bo_ref[...])

    # ------------------- convolution module -------------------
    xn = _layernorm(x, nconv_g_ref[...], nconv_b_ref[...], LN_EPS)
    g2 = jnp.dot(xn.astype(jnp.bfloat16), pw1_w_ref[...],
                 preferred_element_type=jnp.float32) + pw1_b_ref[...]   # (T, 2D)
    h = g2[:, :D] * jax.nn.sigmoid(g2[:, D:])                        # GLU
    pad = (K - 1) // 2
    dw = dw_w_ref[...]                                               # (K, D) f32
    rows = jax.lax.broadcasted_iota(jnp.int32, (T, D), 0)
    acc = jnp.zeros((T, D), jnp.float32)
    # only taps whose window overlaps real data contribute
    for delta in range(-min(pad, T - 1), min(pad, T - 1) + 1):
        tap = dw[delta + pad:delta + pad + 1, :]                     # (1, D)
        shifted = h if delta == 0 else pltpu.roll(h, (-delta) % T, axis=0)
        valid = (rows + delta >= 0) & (rows + delta <= T - 1)
        acc = acc + jnp.where(valid, shifted, 0.0) * tap
    y = acc + dw_b_ref[...]
    y = y * bn_s_ref[...] + bn_sh_ref[...]                           # BN (eval)
    y = y * jax.nn.sigmoid(y)                                        # Swish
    x = x + (jnp.dot(y.astype(jnp.bfloat16), pw2_w_ref[...],
                     preferred_element_type=jnp.float32) + pw2_b_ref[...])

    # ------------------- feed-forward + final LayerNorm -------------------
    x = x + 0.5 * ffn(x, nff_g_ref, nff_b_ref, ff_w1_ref, ff_b1_ref,
                      ff_w2_ref, ff_b2_ref)
    o_ref[0] = _layernorm(x, nfin_g_ref[...], nfin_b_ref[...], LN_EPS)


_LAYER_WEIGHT_NAMES = [
    "nfm_g", "nfm_b", "nmha_g", "nmha_b", "nconv_g", "nconv_b",
    "nff_g", "nff_b", "nfin_g", "nfin_b",
    "mac_w1", "mac_b1", "mac_w2", "mac_b2",
    "wqkv", "bqu", "bqv", "bk", "bv", "wo", "bo",
    "pw1_w", "pw1_b", "dw_w", "dw_b", "bn_s", "bn_sh", "pw2_w", "pw2_b",
    "ff_w1", "ff_b1", "ff_w2", "ff_b2",
]


def encoder_layer_fused(x, mask_f, lw):
    B, T, D = x.shape
    P = 2 * T - 1

    def full_spec(a):
        nd = a.ndim
        return pl.BlockSpec(a.shape, lambda i, nd=nd: (0,) * nd)

    args = [x, lw["pos_proj"], mask_f]
    specs = [pl.BlockSpec((1, T, D), lambda i: (i, 0, 0)),
             pl.BlockSpec((P, D), lambda i: (0, 0)),
             pl.BlockSpec((1, 1, T), lambda i: (i, 0, 0))]
    for name in _LAYER_WEIGHT_NAMES:
        args.append(lw[name])
        specs.append(full_spec(lw[name]))

    return pl.pallas_call(
        functools.partial(_encoder_layer_kernel,
                          T=T, H=N_HEAD, dk=D_HEAD, K=CONV_K),
        grid=(B,),
        in_specs=specs,
        out_specs=pl.BlockSpec((1, T, D), lambda i: (i, 0, 0)),
        out_shape=jax.ShapeDtypeStruct((B, T, D), jnp.float32),
        compiler_params=pltpu.CompilerParams(dimension_semantics=("parallel",)),
    )(*args)


# ==========================================================================
# Fused after_norm1 + ctc_lo (padded to 128 lanes) + log-softmax + label
# smoothing KL.  Grid over row tiles; true_dist built in-kernel from the
# int32 target column (no (BT,128) f32 table in HBM).
# ==========================================================================
def _loss_kernel(y_ref, g_ref, b_ref, w_ref, bias_ref, tgt_ref, o_ref, *,
                 inv_denom):
    y = y_ref[...]
    yn = _layernorm(y, g_ref[...], b_ref[...], AFTER_NORM_EPS)
    logits = jnp.dot(yn.astype(jnp.bfloat16), w_ref[...],
                     preferred_element_type=jnp.float32) + bias_ref[...]   # (tm,128)
    classes = jax.lax.broadcasted_iota(jnp.int32, logits.shape, 1)
    valid_c = classes < VOCAB
    logits = jnp.where(valid_c, logits, NEG_INF)
    m = jnp.max(logits, axis=-1, keepdims=True)
    lse = jnp.log(jnp.sum(jnp.exp(logits - m), axis=-1, keepdims=True)) + m
    lsm = logits - lse

    tgt = tgt_ref[...]                                   # (tm, 1) int32
    ignore = tgt < 0
    tgt0 = jnp.where(ignore, 0, tgt)
    tdist = jnp.where(classes == tgt0, CONFIDENCE,
                      jnp.where(valid_c, SMOOTHING / (VOCAB - 1), 0.0))
    tdist = jnp.where(ignore, 0.0, tdist)
    kl = jnp.where(tdist > 0.0,
                   tdist * (jnp.log(jnp.maximum(tdist, 1e-30)) - lsm), 0.0)
    part = jnp.sum(jnp.sum(kl, axis=-1, keepdims=True), axis=0, keepdims=True)
    o_ref[...] = part.reshape(1, 1, 1) * inv_denom


def fused_after_norm_ctc_kl(y, tgt, an_g, an_b, ctc_w, ctc_b, batch_size):
    M, D = y.shape
    tm = 8 if M % 8 == 0 else M
    ntiles = M // tm
    partial = pl.pallas_call(
        functools.partial(_loss_kernel, inv_denom=1.0 / float(batch_size)),
        grid=(ntiles,),
        in_specs=[pl.BlockSpec((tm, D), lambda i: (i, 0)),
                  pl.BlockSpec((1, D), lambda i: (0, 0)),
                  pl.BlockSpec((1, D), lambda i: (0, 0)),
                  pl.BlockSpec((D, VOCAB_PAD), lambda i: (0, 0)),
                  pl.BlockSpec((1, VOCAB_PAD), lambda i: (0, 0)),
                  pl.BlockSpec((tm, 1), lambda i: (i, 0))],
        out_specs=pl.BlockSpec((1, 1, 1), lambda i: (i, 0, 0)),
        out_shape=jax.ShapeDtypeStruct((ntiles, 1, 1), jnp.float32),
        compiler_params=pltpu.CompilerParams(dimension_semantics=("parallel",)),
    )(y, an_g, an_b, ctc_w, ctc_b, tgt)
    return jnp.sum(partial)


# ==========================================================================
# Parameter init (deterministic, synthetic) and one-time weight packing.
# ==========================================================================
def _linear_params(key, n_in, n_out, bias=True, scale=0.02):
    kw, kb = jax.random.split(key)
    p = {"w": scale * jax.random.normal(kw, (n_in, n_out), jnp.float32)}
    if bias:
        p["b"] = scale * jax.random.normal(kb, (n_out,), jnp.float32)
    return p


def _ln_params():
    return {"g": jnp.ones((D_MODEL,), jnp.float32),
            "b": jnp.zeros((D_MODEL,), jnp.float32)}


def _init_conv_module(key):
    ks = jax.random.split(key, 3)
    return {
        "pw1": _linear_params(ks[0], D_MODEL, 2 * D_MODEL),
        "dw_w": 0.02 * jax.random.normal(ks[1], (CONV_K, D_MODEL), jnp.float32),
        "dw_b": jnp.zeros((D_MODEL,), jnp.float32),
        "bn_g": jnp.ones((D_MODEL,), jnp.float32),
        "bn_b": jnp.zeros((D_MODEL,), jnp.float32),
        "bn_rm": jnp.zeros((D_MODEL,), jnp.float32),
        "bn_rv": jnp.ones((D_MODEL,), jnp.float32),
        "pw2": _linear_params(ks[2], D_MODEL, D_MODEL),
    }


def _init_encoder_layer(key):
    ks = jax.random.split(key, 12)
    return {
        "norm_ff_macaron": _ln_params(), "norm_mha": _ln_params(),
        "norm_conv": _ln_params(), "norm_ff": _ln_params(), "norm_final": _ln_params(),
        "ffn_macaron": {"lin1": _linear_params(ks[0], D_MODEL, FF_DIM),
                        "lin2": _linear_params(ks[1], FF_DIM, D_MODEL)},
        "ffn": {"lin1": _linear_params(ks[2], D_MODEL, FF_DIM),
                "lin2": _linear_params(ks[3], FF_DIM, D_MODEL)},
        "attn": {"q": _linear_params(ks[4], D_MODEL, D_MODEL),
                 "k": _linear_params(ks[5], D_MODEL, D_MODEL),
                 "v": _linear_params(ks[6], D_MODEL, D_MODEL),
                 "out": _linear_params(ks[7], D_MODEL, D_MODEL),
                 "pos": _linear_params(ks[8], D_MODEL, D_MODEL, bias=False),
                 "pos_bias_u": 0.02 * jax.random.normal(ks[9], (N_HEAD, D_HEAD), jnp.float32),
                 "pos_bias_v": 0.02 * jax.random.normal(ks[10], (N_HEAD, D_HEAD), jnp.float32)},
        "conv": _init_conv_module(ks[11]),
    }


def init_params(key):
    ks = jax.random.split(key, 4)
    layers = [_init_encoder_layer(k) for k in jax.random.split(ks[0], N_LAYERS)]
    stacked_layers = jax.tree_util.tree_map(lambda *a: jnp.stack(a), *layers)
    return {
        "embedding": jax.random.normal(ks[1], (VOCAB, D_MODEL), jnp.float32),
        "layers": stacked_layers,
        "after_norm": {"g": jnp.ones((D_MODEL,), jnp.float32),
                       "b": jnp.zeros((D_MODEL,), jnp.float32)},
        "ctc_lo": _linear_params(ks[2], D_MODEL, VOCAB),
    }


def pack_params(params):
    """One-time weight packing: bf16 casts, QKV concat, bias folding, BN fold."""
    lp = params["layers"]
    L, D, H, dk, F = N_LAYERS, D_MODEL, N_HEAD, D_HEAD, FF_DIM
    bf = lambda a: a.astype(jnp.bfloat16)
    ln2 = lambda p: p.reshape(L, 1, D)

    attn, conv = lp["attn"], lp["conv"]
    bn_s = conv["bn_g"] * jax.lax.rsqrt(conv["bn_rv"] + BN_EPS)      # (L, D)
    bn_sh = conv["bn_b"] - conv["bn_rm"] * bn_s

    layers = {
        "nfm_g": ln2(lp["norm_ff_macaron"]["g"]), "nfm_b": ln2(lp["norm_ff_macaron"]["b"]),
        "nmha_g": ln2(lp["norm_mha"]["g"]), "nmha_b": ln2(lp["norm_mha"]["b"]),
        "nconv_g": ln2(lp["norm_conv"]["g"]), "nconv_b": ln2(lp["norm_conv"]["b"]),
        "nff_g": ln2(lp["norm_ff"]["g"]), "nff_b": ln2(lp["norm_ff"]["b"]),
        "nfin_g": ln2(lp["norm_final"]["g"]), "nfin_b": ln2(lp["norm_final"]["b"]),
        "mac_w1": bf(lp["ffn_macaron"]["lin1"]["w"]),
        "mac_b1": lp["ffn_macaron"]["lin1"]["b"].reshape(L, 1, F),
        "mac_w2": bf(lp["ffn_macaron"]["lin2"]["w"]),
        "mac_b2": lp["ffn_macaron"]["lin2"]["b"].reshape(L, 1, D),
        "ff_w1": bf(lp["ffn"]["lin1"]["w"]),
        "ff_b1": lp["ffn"]["lin1"]["b"].reshape(L, 1, F),
        "ff_w2": bf(lp["ffn"]["lin2"]["w"]),
        "ff_b2": lp["ffn"]["lin2"]["b"].reshape(L, 1, D),
        "wqkv": bf(jnp.concatenate([attn["q"]["w"], attn["k"]["w"], attn["v"]["w"]],
                                   axis=-1)),                        # (L, D, 3D)
        "bqu": attn["q"]["b"].reshape(L, H, 1, dk) + attn["pos_bias_u"][:, :, None, :],
        "bqv": attn["q"]["b"].reshape(L, H, 1, dk) + attn["pos_bias_v"][:, :, None, :],
        "bk": attn["k"]["b"].reshape(L, 1, D),
        "bv": attn["v"]["b"].reshape(L, 1, D),
        "wo": bf(attn["out"]["w"]),
        "bo": attn["out"]["b"].reshape(L, 1, D),
        "pw1_w": bf(conv["pw1"]["w"]),
        "pw1_b": conv["pw1"]["b"].reshape(L, 1, 2 * D),
        "dw_w": conv["dw_w"],
        "dw_b": conv["dw_b"].reshape(L, 1, D),
        "bn_s": bn_s.reshape(L, 1, D),
        "bn_sh": bn_sh.reshape(L, 1, D),
        "pw2_w": bf(conv["pw2"]["w"]),
        "pw2_b": conv["pw2"]["b"].reshape(L, 1, D),
    }
    ctc_w = jnp.zeros((D, VOCAB_PAD), jnp.float32).at[:, :VOCAB].set(params["ctc_lo"]["w"])
    ctc_b = jnp.zeros((1, VOCAB_PAD), jnp.float32).at[0, :VOCAB].set(params["ctc_lo"]["b"])
    return {
        "embedding": params["embedding"],
        "layers": layers,
        "pos_w": attn["pos"]["w"],                 # (L, D, D) f32, batch-independent
        "after_norm_g": params["after_norm"]["g"].reshape(1, D),
        "after_norm_b": params["after_norm"]["b"].reshape(1, D),
        "ctc_w": bf(ctc_w),
        "ctc_b": ctc_b,
    }


# ==========================================================================
# Model glue
# ==========================================================================
def _rel_pos_encoding(T, d):
    # ESPnet RelPositionalEncoding table, shape (2T-1, d)
    pos = np.arange(T, dtype=np.float64)[:, None]
    div = np.exp(np.arange(0, d, 2, dtype=np.float64) * -(math.log(10000.0) / d))
    pe_pos = np.zeros((T, d)); pe_neg = np.zeros((T, d))
    pe_pos[:, 0::2] = np.sin(pos * div); pe_pos[:, 1::2] = np.cos(pos * div)
    pe_neg[:, 0::2] = np.sin(-pos * div); pe_neg[:, 1::2] = np.cos(-pos * div)
    pe = np.concatenate([np.flip(pe_pos, 0), pe_neg[1:]], 0)
    return jnp.asarray(pe, jnp.float32)


def model_forward(packed, tensor_phone, lens_phone, tensor_text, lens_text,
                  tensor_phone_right):
    B, T = tensor_phone.shape
    encoder_mask = (tensor_phone_right >= 0)[:, None, :]                 # (B,1,T)
    mask_f = encoder_mask.astype(jnp.float32)

    # embedding lookup (gather) + RelPositionalEncoding scaling
    x = jnp.take(packed["embedding"], tensor_phone, axis=0)
    x = x * jnp.float32(math.sqrt(D_MODEL))                              # (B,T,D)

    # batch-independent positional projection for all 6 layers at once
    pos_table = _rel_pos_encoding(T, D_MODEL)                            # (2T-1, D)
    pos_proj = jnp.einsum("pd,lde->lpe", pos_table,
                          packed["pos_w"]).astype(jnp.bfloat16)          # (L,2T-1,D)

    layers_scan = dict(packed["layers"])
    layers_scan["pos_proj"] = pos_proj

    def scan_body(carry, lw):
        return encoder_layer_fused(carry, mask_f, lw), None

    x, _ = jax.lax.scan(scan_body, x, layers_scan)                       # 6 layers

    # LabelSmoothingLoss(size=81, padding_idx=-1, smoothing=0.1,
    #                    normalize_length=False) on ctc_lo(after_norm1(x))
    M = B * T
    tgt = tensor_phone_right.reshape(M, 1).astype(jnp.int32)
    ML = fused_after_norm_ctc_kl(x.reshape(M, D_MODEL), tgt,
                                 packed["after_norm_g"], packed["after_norm_b"],
                                 packed["ctc_w"], packed["ctc_b"], B)

    # TODO(synk): target_onehot / mask2 / `~ge(0)+x` / self.line / line_phone /
    # l2_loss / criterion_att2 in the reference forward are dead code (unused),
    # so they are not reproduced here.
    one_in_Loss = None
    return ML, encoder_mask, one_in_Loss


# ==========================================================================
if __name__ == "__main__":
    key = jax.random.PRNGKey(0)
    k_params, k_phone, k_right = jax.random.split(key, 3)
    params = init_params(k_params)
    packed = pack_params(params)          # one-time weight packing (outside jit/scan)

    B, T = 2, 8
    tensor_phone = jax.random.randint(k_phone, (B, T), 0, VOCAB, dtype=jnp.int32)
    tensor_phone_right = jax.random.randint(k_right, (B, T), 0, VOCAB, dtype=jnp.int32)
    tensor_phone_right = tensor_phone_right.at[1, -2:].set(-1)           # padding positions
    lens_phone = jnp.array([T, T - 2], jnp.int32)
    lens_text = jnp.array([T, T - 2], jnp.int32)
    tensor_text = jnp.zeros((B, T), jnp.int32)

    fwd = jax.jit(model_forward)
    ML, encoder_mask, one_in_Loss = fwd(packed, tensor_phone, lens_phone,
                                        tensor_text, lens_text, tensor_phone_right)
    jax.block_until_ready(ML)
    print("KERNEL_OK")
</pallas_src>

<mosaic_0001>
module attributes {stable_mosaic.version = 11 : i64} {
  func.func @_loss_kernel(%arg0: i32, %arg1: memref<8x256xf32, #tpu.memory_space<vmem>>, %arg2: memref<1x256xf32, #tpu.memory_space<vmem>>, %arg3: memref<1x256xf32, #tpu.memory_space<vmem>>, %arg4: memref<256x128xbf16, #tpu.memory_space<vmem>>, %arg5: memref<1x128xf32, #tpu.memory_space<vmem>>, %arg6: memref<8x1xi32, #tpu.memory_space<vmem>>, %arg7: memref<1x1x1xf32, #tpu.memory_space<vmem>>) attributes {dimension_semantics = [#tpu.dimension_semantics<parallel>], iteration_bounds = array<i64: 2>, scalar_prefetch = 0 : i64, scratch_operands = 0 : i64, tpu.core_type = #tpu.core_type<tc>, window_params = [{transform_indices = @transform_0, window_bounds = array<i64: 8, 256>}, {pipeline_mode = #tpu.pipeline_mode<synchronous>, transform_indices = @transform_1, window_bounds = array<i64: 1, 256>}, {pipeline_mode = #tpu.pipeline_mode<synchronous>, transform_indices = @transform_2, window_bounds = array<i64: 1, 256>}, {pipeline_mode = #tpu.pipeline_mode<synchronous>, transform_indices = @transform_3, window_bounds = array<i64: 256, 128>}, {pipeline_mode = #tpu.pipeline_mode<synchronous>, transform_indices = @transform_4, window_bounds = array<i64: 1, 128>}, {transform_indices = @transform_5, window_bounds = array<i64: 8, 1>}, {transform_indices = @transform_6, window_bounds = array<i64: 1, 1, 1>}]} {
    %c0 = arith.constant 0 : index
    %c0_0 = arith.constant 0 : index
    %0 = vector.load %arg1[%c0, %c0_0] : memref<8x256xf32, #tpu.memory_space<vmem>>, vector<8x256xf32>
    %c0_1 = arith.constant 0 : index
    %c0_2 = arith.constant 0 : index
    %1 = vector.load %arg2[%c0_1, %c0_2] : memref<1x256xf32, #tpu.memory_space<vmem>>, vector<1x256xf32>
    %c0_3 = arith.constant 0 : index
    %c0_4 = arith.constant 0 : index
    %2 = vector.load %arg3[%c0_3, %c0_4] : memref<1x256xf32, #tpu.memory_space<vmem>>, vector<1x256xf32>
    %cst = arith.constant dense<0.000000e+00> : vector<8xf32>
    %3 = vector.multi_reduction <add>, %0, %cst [1] : vector<8x256xf32> to vector<8xf32>
    %4 = vector.shape_cast %3 : vector<8xf32> to vector<8x1xf32>
    %cst_5 = arith.constant 2.560000e+02 : f32
    %5 = vector.broadcast %cst_5 : f32 to vector<8x1xf32>
    %6 = arith.divf %4, %5 : vector<8x1xf32>
    %7 = vector.broadcast %6 : vector<8x1xf32> to vector<8x256xf32>
    %8 = arith.subf %0, %7 : vector<8x256xf32>
    %9 = arith.mulf %8, %8 : vector<8x256xf32>
    %cst_6 = arith.constant dense<0.000000e+00> : vector<8xf32>
    %10 = vector.multi_reduction <add>, %9, %cst_6 [1] : vector<8x256xf32> to vector<8xf32>
    %11 = vector.shape_cast %10 : vector<8xf32> to vector<8x1xf32>
    %cst_7 = arith.constant 2.560000e+02 : f32
    %12 = vector.broadcast %cst_7 : f32 to vector<8x1xf32>
    %13 = arith.divf %11, %12 : vector<8x1xf32>
    %14 = vector.broadcast %6 : vector<8x1xf32> to vector<8x256xf32>
    %15 = arith.subf %0, %14 : vector<8x256xf32>
    %cst_8 = arith.constant 9.99999974E-6 : f32
    %16 = vector.broadcast %cst_8 : f32 to vector<8x1xf32>
    %17 = arith.addf %13, %16 : vector<8x1xf32>
    %18 = math.rsqrt %17 : vector<8x1xf32>
    %19 = vector.broadcast %18 : vector<8x1xf32> to vector<8x256xf32>
    %20 = arith.mulf %15, %19 : vector<8x256xf32>
    %21 = vector.broadcast %1 : vector<1x256xf32> to vector<8x256xf32>
    %22 = arith.mulf %20, %21 : vector<8x256xf32>
    %23 = vector.broadcast %2 : vector<1x256xf32> to vector<8x256xf32>
    %24 = arith.addf %22, %23 : vector<8x256xf32>
    %25 = arith.truncf %24 : vector<8x256xf32> to vector<8x256xbf16>
    %c0_9 = arith.constant 0 : index
    %c0_10 = arith.constant 0 : index
    %26 = vector.load %arg4[%c0_9, %c0_10] : memref<256x128xbf16, #tpu.memory_space<vmem>>, vector<256x128xbf16>
    %cst_11 = arith.constant dense<0.000000e+00> : vector<8x128xf32>
    %27 = tpu.matmul %25, %26, %cst_11 {dimension_numbers = #tpu.dot_dimension_numbers<[1], [0], [0], [1], [0, 0, 1, 1], [], []>} : vector<8x256xbf16>, vector<256x128xbf16>, vector<8x128xf32> -> vector<8x128xf32>
    %c0_12 = arith.constant 0 : index
    %c0_13 = arith.constant 0 : index
    %28 = vector.load %arg5[%c0_12, %c0_13] : memref<1x128xf32, #tpu.memory_space<vmem>>, vector<1x128xf32>
    %29 = vector.broadcast %28 : vector<1x128xf32> to vector<8x128xf32>
    %30 = arith.addf %27, %29 : vector<8x128xf32>
    %31 = tpu.iota {dimensions = array<i32: 1>} : vector<8x128xi32>
    %c81_i32 = arith.constant 81 : i32
    %32 = vector.broadcast %c81_i32 : i32 to vector<8x128xi32>
    %33 = arith.cmpi slt, %31, %32 : vector<8x128xi32>
    %cst_14 = arith.constant -1.000000e+09 : f32
    %34 = vector.broadcast %cst_14 : f32 to vector<8x128xf32>
    %35 = arith.select %33, %30, %34 : vector<8x128xi1>, vector<8x128xf32>
    %cst_15 = arith.constant dense<0xFF800000> : vector<8xf32>
    %36 = vector.multi_reduction <maximumf>, %35, %cst_15 [1] : vector<8x128xf32> to vector<8xf32>
    %37 = vector.shape_cast %36 : vector<8xf32> to vector<8x1xf32>
    %38 = vector.broadcast %37 : vector<8x1xf32> to vector<8x128xf32>
    %39 = arith.subf %35, %38 : vector<8x128xf32>
    %40 = math.exp %39 : vector<8x128xf32>
    %cst_16 = arith.constant dense<0.000000e+00> : vector<8xf32>
    %41 = vector.multi_reduction <add>, %40, %cst_16 [1] : vector<8x128xf32> to vector<8xf32>
    %42 = vector.shape_cast %41 : vector<8xf32> to vector<8x1xf32>
    %43 = math.log %42 : vector<8x1xf32>
    %44 = arith.addf %43, %37 : vector<8x1xf32>
    %45 = vector.broadcast %44 : vector<8x1xf32> to vector<8x128xf32>
    %46 = arith.subf %35, %45 : vector<8x128xf32>
    %c0_17 = arith.constant 0 : index
    %c0_18 = arith.constant 0 : index
    %47 = vector.load %arg6[%c0_17, %c0_18] : memref<8x1xi32, #tpu.memory_space<vmem>>, vector<8x1xi32>
    %c0_i32 = arith.constant 0 : i32
    %48 = vector.broadcast %c0_i32 : i32 to vector<8x1xi32>
    %49 = arith.cmpi slt, %47, %48 : vector<8x1xi32>
    %c0_i32_19 = arith.constant 0 : i32
    %50 = vector.broadcast %c0_i32_19 : i32 to vector<8x1xi32>
    %51 = arith.select %49, %50, %47 : vector<8x1xi1>, vector<8x1xi32>
    %52 = vector.broadcast %51 : vector<8x1xi32> to vector<8x128xi32>
    %53 = arith.cmpi eq, %31, %52 : vector<8x128xi32>
    %cst_20 = arith.constant 1.250000e-03 : f32
    %cst_21 = arith.constant 0.000000e+00 : f32
    %54 = vector.broadcast %cst_20 : f32 to vector<8x128xf32>
    %55 = vector.broadcast %cst_21 : f32 to vector<8x128xf32>
    %56 = arith.select %33, %54, %55 : vector<8x128xi1>, vector<8x128xf32>
    %cst_22 = arith.constant 0.899999976 : f32
    %57 = vector.broadcast %cst_22 : f32 to vector<8x128xf32>
    %58 = arith.select %53, %57, %56 : vector<8x128xi1>, vector<8x128xf32>
    %cst_23 = arith.constant 0.000000e+00 : f32
    %59 = vector.shape_cast %49 : vector<8x1xi1> to vector<8x1xi1>
    %60 = vector.broadcast %59 : vector<8x1xi1> to vector<8x128xi1>
    %61 = vector.broadcast %cst_23 : f32 to vector<8x128xf32>
    %62 = arith.select %60, %61, %58 : vector<8x128xi1>, vector<8x128xf32>
    %cst_24 = arith.constant 0.000000e+00 : f32
    %63 = vector.broadcast %cst_24 : f32 to vector<8x128xf32>
    %64 = arith.cmpf ogt, %62, %63 : vector<8x128xf32>
    %cst_25 = arith.constant 1.000000e-30 : f32
    %65 = vector.broadcast %cst_25 : f32 to vector<8x128xf32>
    %66 = arith.maximumf %62, %65 : vector<8x128xf32>
    %67 = math.log %66 : vector<8x128xf32>
    %68 = arith.subf %67, %46 : vector<8x128xf32>
    %69 = arith.mulf %62, %68 : vector<8x128xf32>
    %cst_26 = arith.constant 0.000000e+00 : f32
    %70 = vector.broadcast %cst_26 : f32 to vector<8x128xf32>
    %71 = arith.select %64, %69, %70 : vector<8x128xi1>, vector<8x128xf32>
    %cst_27 = arith.constant dense<0.000000e+00> : vector<8xf32>
    %72 = vector.multi_reduction <add>, %71, %cst_27 [1] : vector<8x128xf32> to vector<8xf32>
    %73 = vector.shape_cast %72 : vector<8xf32> to vector<8x1xf32>
    %cst_28 = arith.constant dense<0.000000e+00> : vector<1xf32>
    %74 = vector.multi_reduction <add>, %73, %cst_28 [0] : vector<8x1xf32> to vector<1xf32>
    %75 = vector.shape_cast %74 : vector<1xf32> to vector<1x1xf32>
    %76 = vector.shape_cast %75 : vector<1x1xf32> to vector<1x1x1xf32>
    %cst_29 = arith.constant 5.000000e-01 : f32
    %77 = vector.broadcast %cst_29 : f32 to vector<1x1x1xf32>
    %78 = arith.mulf %76, %77 : vector<1x1x1xf32>
    %c0_30 = arith.constant 0 : index
    %c0_31 = arith.constant 0 : index
    %c0_32 = arith.constant 0 : index
    %79 = vector.load %arg7[%c0_30, %c0_31, %c0_32] : memref<1x1x1xf32, #tpu.memory_space<vmem>>, vector<1x1x1xf32>
    tpu.vector_store %arg7[%c0_30, %c0_31, %c0_32], %78 {strides = array<i32>} : memref<1x1x1xf32, #tpu.memory_space<vmem>>, vector<1x1x1xf32>,
    return
  }
  func.func @transform_0(%arg0: i32) -> (i32, i32) {
    %c0_i32 = arith.constant 0 : i32
    %c0_i32_0 = arith.constant 0 : i32
    return %arg0, %c0_i32 : i32, i32
  }
  func.func @transform_1(%arg0: i32) -> (i32, i32) {
    %c0_i32 = arith.constant 0 : i32
    %c0_i32_0 = arith.constant 0 : i32
    %c0_i32_1 = arith.constant 0 : i32
    return %c0_i32, %c0_i32_0 : i32, i32
  }
  func.func @transform_2(%arg0: i32) -> (i32, i32) {
    %c0_i32 = arith.constant 0 : i32
    %c0_i32_0 = arith.constant 0 : i32
    %c0_i32_1 = arith.constant 0 : i32
    return %c0_i32, %c0_i32_0 : i32, i32
  }
  func.func @transform_3(%arg0: i32) -> (i32, i32) {
    %c0_i32 = arith.constant 0 : i32
    %c0_i32_0 = arith.constant 0 : i32
    %c0_i32_1 = arith.constant 0 : i32
    return %c0_i32, %c0_i32_0 : i32, i32
  }
  func.func @transform_4(%arg0: i32) -> (i32, i32) {
    %c0_i32 = arith.constant 0 : i32
    %c0_i32_0 = arith.constant 0 : i32
    %c0_i32_1 = arith.constant 0 : i32
    return %c0_i32, %c0_i32_0 : i32, i32
  }
  func.func @transform_5(%arg0: i32) -> (i32, i32) {
    %c0_i32 = arith.constant 0 : i32
    %c0_i32_0 = arith.constant 0 : i32
    return %arg0, %c0_i32 : i32, i32
  }
  func.func @transform_6(%arg0: i32) -> (i32, i32, i32) {
    %c0_i32 = arith.constant 0 : i32
    %c0_i32_0 = arith.constant 0 : i32
    %c0_i32_1 = arith.constant 0 : i32
    return %arg0, %c0_i32, %c0_i32_0 : i32, i32, i32
  }
}

module attributes {stable_mosaic.version = 11 : i64} {
  func.func @_encoder_layer_kernel(%arg0: i32, %arg1: memref<1x8x256xf32, #tpu.memory_space<vmem>>, %arg2: memref<15x256xbf16, #tpu.memory_space<vmem>>, %arg3: memref<1x1x8xf32, #tpu.memory_space<vmem>>, %arg4: memref<1x256xf32, #tpu.memory_space<vmem>>, %arg5: memref<1x256xf32, #tpu.memory_space<vmem>>, %arg6: memref<1x256xf32, #tpu.memory_space<vmem>>, %arg7: memref<1x256xf32, #tpu.memory_space<vmem>>, %arg8: memref<1x256xf32, #tpu.memory_space<vmem>>, %arg9: memref<1x256xf32, #tpu.memory_space<vmem>>, %arg10: memref<1x256xf32, #tpu.memory_space<vmem>>, %arg11: memref<1x256xf32, #tpu.memory_space<vmem>>, %arg12: memref<1x256xf32, #tpu.memory_space<vmem>>, %arg13: memref<1x256xf32, #tpu.memory_space<vmem>>, %arg14: memref<256x1024xbf16, #tpu.memory_space<vmem>>, %arg15: memref<1x1024xf32, #tpu.memory_space<vmem>>, %arg16: memref<1024x256xbf16, #tpu.memory_space<vmem>>, %arg17: memref<1x256xf32, #tpu.memory_space<vmem>>, %arg18: memref<256x768xbf16, #tpu.memory_space<vmem>>, %arg19: memref<4x1x64xf32, #tpu.memory_space<vmem>>, %arg20: memref<4x1x64xf32, #tpu.memory_space<vmem>>, %arg21: memref<1x256xf32, #tpu.memory_space<vmem>>, %arg22: memref<1x256xf32, #tpu.memory_space<vmem>>, %arg23: memref<256x256xbf16, #tpu.memory_space<vmem>>, %arg24: memref<1x256xf32, #tpu.memory_space<vmem>>, %arg25: memref<256x512xbf16, #tpu.memory_space<vmem>>, %arg26: memref<1x512xf32, #tpu.memory_space<vmem>>, %arg27: memref<31x256xf32, #tpu.memory_space<vmem>>, %arg28: memref<1x256xf32, #tpu.memory_space<vmem>>, %arg29: memref<1x256xf32, #tpu.memory_space<vmem>>, %arg30: memref<1x256xf32, #tpu.memory_space<vmem>>, %arg31: memref<256x256xbf16, #tpu.memory_space<vmem>>, %arg32: memref<1x256xf32, #tpu.memory_space<vmem>>, %arg33: memref<256x1024xbf16, #tpu.memory_space<vmem>>, %arg34: memref<1x1024xf32, #tpu.memory_space<vmem>>, %arg35: memref<1024x256xbf16, #tpu.memory_space<vmem>>, %arg36: memref<1x256xf32, #tpu.memory_space<vmem>>, %arg37: memref<1x8x256xf32, #tpu.memory_space<vmem>>) attributes {dimension_semantics = [#tpu.dimension_semantics<parallel>], iteration_bounds = array<i64: 2>, scalar_prefetch = 0 : i64, scratch_operands = 0 : i64, tpu.core_type = #tpu.core_type<tc>, window_params = [{transform_indices = @transform_0, window_bounds = array<i64: 1, 8, 256>}, {pipeline_mode = #tpu.pipeline_mode<synchronous>, transform_indices = @transform_1, window_bounds = array<i64: 15, 256>}, {transform_indices = @transform_2, window_bounds = array<i64: 1, 1, 8>}, {pipeline_mode = #tpu.pipeline_mode<synchronous>, transform_indices = @transform_3, window_bounds = array<i64: 1, 256>}, {pipeline_mode = #tpu.pipeline_mode<synchronous>, transform_indices = @transform_4, window_bounds = array<i64: 1, 256>}, {pipeline_mode = #tpu.pipeline_mode<synchronous>, transform_indices = @transform_5, window_bounds = array<i64: 1, 256>}, {pipeline_mode = #tpu.pipeline_mode<synchronous>, transform_indices = @transform_6, window_bounds = array<i64: 1, 256>}, {pipeline_mode = #tpu.pipeline_mode<synchronous>, transform_indices = @transform_7, window_bounds = array<i64: 1, 256>}, {pipeline_mode = #tpu.pipeline_mode<synchronous>, transform_indices = @transform_8, window_bounds = array<i64: 1, 256>}, {pipeline_mode = #tpu.pipeline_mode<synchronous>, transform_indices = @transform_9, window_bounds = array<i64: 1, 256>}, {pipeline_mode = #tpu.pipeline_mode<synchronous>, transform_indices = @transform_10, window_bounds = array<i64: 1, 256>}, {pipeline_mode = #tpu.pipeline_mode<synchronous>, transform_indices = @transform_11, window_bounds = array<i64: 1, 256>}, {pipeline_mode = #tpu.pipeline_mode<synchronous>, transform_indices = @transform_12, window_bounds = array<i64: 1, 256>}, {pipeline_mode = #tpu.pipeline_mode<synchronous>, transform_indices = @transform_13, window_bounds = array<i64: 256, 1024>}, {pipeline_mode = #tpu.pipeline_mode<synchronous>, transform_indices = @transform_14, window_bounds = array<i64: 1, 1024>}, {pipeline_mode = #tpu.pipeline_mode<synchronous>, transform_indices = @transform_15, window_bounds = array<i64: 1024, 256>}, {pipeline_mode = #tpu.pipeline_mode<synchronous>, transform_indices = @transform_16, window_bounds = array<i64: 1, 256>}, {pipeline_mode = #tpu.pipeline_mode<synchronous>, transform_indices = @transform_17, window_bounds = array<i64: 256, 768>}, {pipeline_mode = #tpu.pipeline_mode<synchronous>, transform_indices = @transform_18, window_bounds = array<i64: 4, 1, 64>}, {pipeline_mode = #tpu.pipeline_mode<synchronous>, transform_indices = @transform_19, window_bounds = array<i64: 4, 1, 64>}, {pipeline_mode = #tpu.pipeline_mode<synchronous>, transform_indices = @transform_20, window_bounds = array<i64: 1, 256>}, {pipeline_mode = #tpu.pipeline_mode<synchronous>, transform_indices = @transform_21, window_bounds = array<i64: 1, 256>}, {pipeline_mode = #tpu.pipeline_mode<synchronous>, transform_indices = @transform_22, window_bounds = array<i64: 256, 256>}, {pipeline_mode = #tpu.pipeline_mode<synchronous>, transform_indices = @transform_23, window_bounds = array<i64: 1, 256>}, {pipeline_mode = #tpu.pipeline_mode<synchronous>, transform_indices = @transform_24, window_bounds = array<i64: 256, 512>}, {pipeline_mode = #tpu.pipeline_mode<synchronous>, transform_indices = @transform_25, window_bounds = array<i64: 1, 512>}, {pipeline_mode = #tpu.pipeline_mode<synchronous>, transform_indices = @transform_26, window_bounds = array<i64: 31, 256>}, {pipeline_mode = #tpu.pipeline_mode<synchronous>, transform_indices = @transform_27, window_bounds = array<i64: 1, 256>}, {pipeline_mode = #tpu.pipeline_mode<synchronous>, transform_indices = @transform_28, window_bounds = array<i64: 1, 256>}, {pipeline_mode = #tpu.pipeline_mode<synchronous>, transform_indices = @transform_29, window_bounds = array<i64: 1, 256>}, {pipeline_mode = #tpu.pipeline_mode<synchronous>, transform_indices = @transform_30, window_bounds = array<i64: 256, 256>}, {pipeline_mode = #tpu.pipeline_mode<synchronous>, transform_indices = @transform_31, window_bounds = array<i64: 1, 256>}, {pipeline_mode = #tpu.pipeline_mode<synchronous>, transform_indices = @transform_32, window_bounds = array<i64: 256, 1024>}, {pipeline_mode = #tpu.pipeline_mode<synchronous>, transform_indices = @transform_33, window_bounds = array<i64: 1, 1024>}, {pipeline_mode = #tpu.pipeline_mode<synchronous>, transform_indices = @transform_34, window_bounds = array<i64: 1024, 256>}, {pipeline_mode = #tpu.pipeline_mode<synchronous>, transform_indices = @transform_35, window_bounds = array<i64: 1, 256>}, {transform_indices = @transform_36, window_bounds = array<i64: 1, 8, 256>}]} {
    %c0 = arith.constant 0 : index
    %c0_0 = arith.constant 0 : index
    %c0_1 = arith.constant 0 : index
    %0 = vector.load %arg1[%c0, %c0_0, %c0_1] : memref<1x8x256xf32, #tpu.memory_space<vmem>>, vector<1x8x256xf32>
    %1 = vector.shape_cast %0 : vector<1x8x256xf32> to vector<8x256xf32>
    %c0_2 = arith.constant 0 : index
    %c0_3 = arith.constant 0 : index
    %2 = vector.load %arg4[%c0_2, %c0_3] : memref<1x256xf32, #tpu.memory_space<vmem>>, vector<1x256xf32>
    %c0_4 = arith.constant 0 : index
    %c0_5 = arith.constant 0 : index
    %3 = vector.load %arg5[%c0_4, %c0_5] : memref<1x256xf32, #tpu.memory_space<vmem>>, vector<1x256xf32>
    %cst = arith.constant dense<0.000000e+00> : vector<8xf32>
    %4 = vector.multi_reduction <add>, %1, %cst [1] : vector<8x256xf32> to vector<8xf32>
    %5 = vector.shape_cast %4 : vector<8xf32> to vector<8x1xf32>
    %cst_6 = arith.constant 2.560000e+02 : f32
    %6 = vector.broadcast %cst_6 : f32 to vector<8x1xf32>
    %7 = arith.divf %5, %6 : vector<8x1xf32>
    %8 = vector.broadcast %7 : vector<8x1xf32> to vector<8x256xf32>
    %9 = arith.subf %1, %8 : vector<8x256xf32>
    %10 = arith.mulf %9, %9 : vector<8x256xf32>
    %cst_7 = arith.constant dense<0.000000e+00> : vector<8xf32>
    %11 = vector.multi_reduction <add>, %10, %cst_7 [1] : vector<8x256xf32> to vector<8xf32>
    %12 = vector.shape_cast %11 : vector<8xf32> to vector<8x1xf32>
    %cst_8 = arith.constant 2.560000e+02 : f32
    %13 = vector.broadcast %cst_8 : f32 to vector<8x1xf32>
    %14 = arith.divf %12, %13 : vector<8x1xf32>
    %15 = vector.broadcast %7 : vector<8x1xf32> to vector<8x256xf32>
    %16 = arith.subf %1, %15 : vector<8x256xf32>
    %cst_9 = arith.constant 9.99999996E-13 : f32
    %17 = vector.broadcast %cst_9 : f32 to vector<8x1xf32>
    %18 = arith.addf %14, %17 : vector<8x1xf32>
    %19 = math.rsqrt %18 : vector<8x1xf32>
    %20 = vector.broadcast %19 : vector<8x1xf32> to vector<8x256xf32>
    %21 = arith.mulf %16, %20 : vector<8x256xf32>
    %22 = vector.broadcast %2 : vector<1x256xf32> to vector<8x256xf32>
    %23 = arith.mulf %21, %22 : vector<8x256xf32>
    %24 = vector.broadcast %3 : vector<1x256xf32> to vector<8x256xf32>
    %25 = arith.addf %23, %24 : vector<8x256xf32>
    %26 = arith.truncf %25 : vector<8x256xf32> to vector<8x256xbf16>
    %c0_10 = arith.constant 0 : index
    %c0_11 = arith.constant 0 : index
    %27 = vector.load %arg14[%c0_10, %c0_11] : memref<256x1024xbf16, #tpu.memory_space<vmem>>, vector<256x1024xbf16>
    %cst_12 = arith.constant dense<0.000000e+00> : vector<8x1024xf32>
    %28 = tpu.matmul %26, %27, %cst_12 {dimension_numbers = #tpu.dot_dimension_numbers<[1], [0], [0], [1], [0, 0, 1, 1], [], []>} : vector<8x256xbf16>, vector<256x1024xbf16>, vector<8x1024xf32> -> vector<8x1024xf32>
    %c0_13 = arith.constant 0 : index
    %c0_14 = arith.constant 0 : index
    %29 = vector.load %arg15[%c0_13, %c0_14] : memref<1x1024xf32, #tpu.memory_space<vmem>>, vector<1x1024xf32>
    %30 = vector.broadcast %29 : vector<1x1024xf32> to vector<8x1024xf32>
    %31 = arith.addf %28, %30 : vector<8x1024xf32>
    %32 = arith.negf %31 : vector<8x1024xf32>
    %33 = math.exp %32 : vector<8x1024xf32>
    %cst_15 = arith.constant 1.000000e+00 : f32
    %34 = vector.broadcast %cst_15 : f32 to vector<8x1024xf32>
    %35 = arith.addf %34, %33 : vector<8x1024xf32>
    %36 = arith.divf %34, %35 : vector<8x1024xf32>
    %37 = arith.mulf %31, %36 : vector<8x1024xf32>
    %38 = arith.truncf %37 : vector<8x1024xf32> to vector<8x1024xbf16>
    %c0_16 = arith.constant 0 : index
    %c0_17 = arith.constant 0 : index
    %39 = vector.load %arg16[%c0_16, %c0_17] : memref<1024x256xbf16, #tpu.memory_space<vmem>>, vector<1024x256xbf16>
    %cst_18 = arith.constant dense<0.000000e+00> : vector<8x256xf32>
    %40 = tpu.matmul %38, %39, %cst_18 {dimension_numbers = #tpu.dot_dimension_numbers<[1], [0], [0], [1], [0, 0, 1, 1], [], []>} : vector<8x1024xbf16>, vector<1024x256xbf16>, vector<8x256xf32> -> vector<8x256xf32>
    %c0_19 = arith.constant 0 : index
    %c0_20 = arith.constant 0 : index
    %41 = vector.load %arg17[%c0_19, %c0_20] : memref<1x256xf32, #tpu.memory_space<vmem>>, vector<1x256xf32>
    %42 = vector.broadcast %41 : vector<1x256xf32> to vector<8x256xf32>
    %43 = arith.addf %40, %42 : vector<8x256xf32>
    %cst_21 = arith.constant 5.000000e-01 : f32
    %44 = vector.broadcast %cst_21 : f32 to vector<8x256xf32>
    %45 = arith.mulf %44, %43 : vector<8x256xf32>
    %46 = arith.addf %1, %45 : vector<8x256xf32>
    %c0_22 = arith.constant 0 : index
    %c0_23 = arith.constant 0 : index
    %47 = vector.load %arg6[%c0_22, %c0_23] : memref<1x256xf32, #tpu.memory_space<vmem>>, vector<1x256xf32>
    %c0_24 = arith.constant 0 : index
    %c0_25 = arith.constant 0 : index
    %48 = vector.load %arg7[%c0_24, %c0_25] : memref<1x256xf32, #tpu.memory_space<vmem>>, vector<1x256xf32>
    %cst_26 = arith.constant dense<0.000000e+00> : vector<8xf32>
    %49 = vector.multi_reduction <add>, %46, %cst_26 [1] : vector<8x256xf32> to vector<8xf32>
    %50 = vector.shape_cast %49 : vector<8xf32> to vector<8x1xf32>
    %cst_27 = arith.constant 2.560000e+02 : f32
    %51 = vector.broadcast %cst_27 : f32 to vector<8x1xf32>
    %52 = arith.divf %50, %51 : vector<8x1xf32>
    %53 = vector.broadcast %52 : vector<8x1xf32> to vector<8x256xf32>
    %54 = arith.subf %46, %53 : vector<8x256xf32>
    %55 = arith.mulf %54, %54 : vector<8x256xf32>
    %cst_28 = arith.constant dense<0.000000e+00> : vector<8xf32>
    %56 = vector.multi_reduction <add>, %55, %cst_28 [1] : vector<8x256xf32> to vector<8xf32>
    %57 = vector.shape_cast %56 : vector<8xf32> to vector<8x1xf32>
    %cst_29 = arith.constant 2.560000e+02 : f32
    %58 = vector.broadcast %cst_29 : f32 to vector<8x1xf32>
    %59 = arith.divf %57, %58 : vector<8x1xf32>
    %60 = vector.broadcast %52 : vector<8x1xf32> to vector<8x256xf32>
    %61 = arith.subf %46, %60 : vector<8x256xf32>
    %cst_30 = arith.constant 9.99999996E-13 : f32
    %62 = vector.broadcast %cst_30 : f32 to vector<8x1xf32>
    %63 = arith.addf %59, %62 : vector<8x1xf32>
    %64 = math.rsqrt %63 : vector<8x1xf32>
    %65 = vector.broadcast %64 : vector<8x1xf32> to vector<8x256xf32>
    %66 = arith.mulf %61, %65 : vector<8x256xf32>
    %67 = vector.broadcast %47 : vector<1x256xf32> to vector<8x256xf32>
    %68 = arith.mulf %66, %67 : vector<8x256xf32>
    %69 = vector.broadcast %48 : vector<1x256xf32> to vector<8x256xf32>
    %70 = arith.addf %68, %69 : vector<8x256xf32>
    %71 = arith.truncf %70 : vector<8x256xf32> to vector<8x256xbf16>
    %c0_31 = arith.constant 0 : index
    %c0_32 = arith.constant 0 : index
    %72 = vector.load %arg18[%c0_31, %c0_32] : memref<256x768xbf16, #tpu.memory_space<vmem>>, vector<256x768xbf16>
    %cst_33 = arith.constant dense<0.000000e+00> : vector<8x768xf32>
    %73 = tpu.matmul %71, %72, %cst_33 {dimension_numbers = #tpu.dot_dimension_numbers<[1], [0], [0], [1], [0, 0, 1, 1], [], []>} : vector<8x256xbf16>, vector<256x768xbf16>, vector<8x768xf32> -> vector<8x768xf32>
    %74 = vector.extract_strided_slice %73 {offsets = [0, 0], sizes = [8, 256], strides = [1, 1]} : vector<8x768xf32> to vector<8x256xf32>
    %75 = vector.extract_strided_slice %73 {offsets = [0, 256], sizes = [8, 256], strides = [1, 1]} : vector<8x768xf32> to vector<8x256xf32>
    %c0_34 = arith.constant 0 : index
    %c0_35 = arith.constant 0 : index
    %76 = vector.load %arg21[%c0_34, %c0_35] : memref<1x256xf32, #tpu.memory_space<vmem>>, vector<1x256xf32>
    %77 = vector.broadcast %76 : vector<1x256xf32> to vector<8x256xf32>
    %78 = arith.addf %75, %77 : vector<8x256xf32>
    %79 = vector.extract_strided_slice %73 {offsets = [0, 512], sizes = [8, 256], strides = [1, 1]} : vector<8x768xf32> to vector<8x256xf32>
    %c0_36 = arith.constant 0 : index
    %c0_37 = arith.constant 0 : index
    %80 = vector.load %arg22[%c0_36, %c0_37] : memref<1x256xf32, #tpu.memory_space<vmem>>, vector<1x256xf32>
    %81 = vector.broadcast %80 : vector<1x256xf32> to vector<8x256xf32>
    %82 = arith.addf %79, %81 : vector<8x256xf32>
    %c0_38 = arith.constant 0 : index
    %c0_39 = arith.constant 0 : index
    %83 = vector.load %arg2[%c0_38, %c0_39] : memref<15x256xbf16, #tpu.memory_space<vmem>>, vector<15x256xbf16>
    %84 = vector.extract_strided_slice %74 {offsets = [0, 0], sizes = [8, 64], strides = [1, 1]} : vector<8x256xf32> to vector<8x64xf32>
    %85 = vector.extract_strided_slice %74 {offsets = [0, 64], sizes = [8, 64], strides = [1, 1]} : vector<8x256xf32> to vector<8x64xf32>
    %86 = vector.extract_strided_slice %74 {offsets = [0, 128], sizes = [8, 64], strides = [1, 1]} : vector<8x256xf32> to vector<8x64xf32>
    %87 = vector.extract_strided_slice %74 {offsets = [0, 192], sizes = [8, 64], strides = [1, 1]} : vector<8x256xf32> to vector<8x64xf32>
    %88 = vector.shape_cast %84 : vector<8x64xf32> to vector<1x8x64xf32>
    %89 = vector.shape_cast %85 : vector<8x64xf32> to vector<1x8x64xf32>
    %90 = vector.shape_cast %86 : vector<8x64xf32> to vector<1x8x64xf32>
    %91 = vector.shape_cast %87 : vector<8x64xf32> to vector<1x8x64xf32>
    %92 = tpu.concatenate %88, %89, %90, %91 in 0 : vector<1x8x64xf32>, vector<1x8x64xf32>, vector<1x8x64xf32>, vector<1x8x64xf32> -> vector<4x8x64xf32>
    %93 = vector.extract_strided_slice %78 {offsets = [0, 0], sizes = [8, 64], strides = [1, 1]} : vector<8x256xf32> to vector<8x64xf32>
    %94 = vector.extract_strided_slice %78 {offsets = [0, 64], sizes = [8, 64], strides = [1, 1]} : vector<8x256xf32> to vector<8x64xf32>
    %95 = vector.extract_strided_slice %78 {offsets = [0, 128], sizes = [8, 64], strides = [1, 1]} : vector<8x256xf32> to vector<8x64xf32>
    %96 = vector.extract_strided_slice %78 {offsets = [0, 192], sizes = [8, 64], strides = [1, 1]} : vector<8x256xf32> to vector<8x64xf32>
    %97 = vector.shape_cast %93 : vector<8x64xf32> to vector<1x8x64xf32>
    %98 = vector.shape_cast %94 : vector<8x64xf32> to vector<1x8x64xf32>
    %99 = vector.shape_cast %95 : vector<8x64xf32> to vector<1x8x64xf32>
    %100 = vector.shape_cast %96 : vector<8x64xf32> to vector<1x8x64xf32>
    %101 = tpu.concatenate %97, %98, %99, %100 in 0 : vector<1x8x64xf32>, vector<1x8x64xf32>, vector<1x8x64xf32>, vector<1x8x64xf32> -> vector<4x8x64xf32>
    %102 = vector.extract_strided_slice %82 {offsets = [0, 0], sizes = [8, 64], strides = [1, 1]} : vector<8x256xf32> to vector<8x64xf32>
    %103 = vector.extract_strided_slice %82 {offsets = [0, 64], sizes = [8, 64], strides = [1, 1]} : vector<8x256xf32> to vector<8x64xf32>
    %104 = vector.extract_strided_slice %82 {offsets = [0, 128], sizes = [8, 64], strides = [1, 1]} : vector<8x256xf32> to vector<8x64xf32>
    %105 = vector.extract_strided_slice %82 {offsets = [0, 192], sizes = [8, 64], strides = [1, 1]} : vector<8x256xf32> to vector<8x64xf32>
    %106 = vector.shape_cast %102 : vector<8x64xf32> to vector<1x8x64xf32>
    %107 = vector.shape_cast %103 : vector<8x64xf32> to vector<1x8x64xf32>
    %108 = vector.shape_cast %104 : vector<8x64xf32> to vector<1x8x64xf32>
    %109 = vector.shape_cast %105 : vector<8x64xf32> to vector<1x8x64xf32>
    %110 = tpu.concatenate %106, %107, %108, %109 in 0 : vector<1x8x64xf32>, vector<1x8x64xf32>, vector<1x8x64xf32>, vector<1x8x64xf32> -> vector<4x8x64xf32>
    %111 = vector.extract_strided_slice %83 {offsets = [0, 0], sizes = [15, 64], strides = [1, 1]} : vector<15x256xbf16> to vector<15x64xbf16>
    %112 = vector.extract_strided_slice %83 {offsets = [0, 64], sizes = [15, 64], strides = [1, 1]} : vector<15x256xbf16> to vector<15x64xbf16>
    %113 = vector.extract_strided_slice %83 {offsets = [0, 128], sizes = [15, 64], strides = [1, 1]} : vector<15x256xbf16> to vector<15x64xbf16>
    %114 = vector.extract_strided_slice %83 {offsets = [0, 192], sizes = [15, 64], strides = [1, 1]} : vector<15x256xbf16> to vector<15x64xbf16>
    %115 = vector.shape_cast %111 : vector<15x64xbf16> to vector<1x15x64xbf16>
    %116 = vector.shape_cast %112 : vector<15x64xbf16> to vector<1x15x64xbf16>
    %117 = vector.shape_cast %113 : vector<15x64xbf16> to vector<1x15x64xbf16>
    %118 = vector.shape_cast %114 : vector<15x64xbf16> to vector<1x15x64xbf16>
    %119 = tpu.concatenate %115, %116, %117, %118 in 0 : vector<1x15x64xbf16>, vector<1x15x64xbf16>, vector<1x15x64xbf16>, vector<1x15x64xbf16> -> vector<4x15x64xbf16>
    %c0_40 = arith.constant 0 : index
    %c0_41 = arith.constant 0 : index
    %c0_42 = arith.constant 0 : index
    %120 = vector.load %arg19[%c0_40, %c0_41, %c0_42] : memref<4x1x64xf32, #tpu.memory_space<vmem>>, vector<4x1x64xf32>
    %121 = vector.broadcast %120 : vector<4x1x64xf32> to vector<4x8x64xf32>
    %122 = arith.addf %92, %121 : vector<4x8x64xf32>
    %123 = arith.truncf %122 : vector<4x8x64xf32> to vector<4x8x64xbf16>
    %c0_43 = arith.constant 0 : index
    %c0_44 = arith.constant 0 : index
    %c0_45 = arith.constant 0 : index
    %124 = vector.load %arg20[%c0_43, %c0_44, %c0_45] : memref<4x1x64xf32, #tpu.memory_space<vmem>>, vector<4x1x64xf32>
    %125 = vector.broadcast %124 : vector<4x1x64xf32> to vector<4x8x64xf32>
    %126 = arith.addf %92, %125 : vector<4x8x64xf32>
    %127 = arith.truncf %126 : vector<4x8x64xf32> to vector<4x8x64xbf16>
    %128 = arith.truncf %101 : vector<4x8x64xf32> to vector<4x8x64xbf16>
    %129 = arith.truncf %110 : vector<4x8x64xf32> to vector<4x8x64xbf16>
    %cst_46 = arith.constant dense<0.000000e+00> : vector<4x8x8xf32>
    %130 = tpu.matmul %123, %128, %cst_46 {dimension_numbers = #tpu.dot_dimension_numbers<[2], [2], [1], [1], [0, 0, 0, 1, 1, 1], [0], [0]>} : vector<4x8x64xbf16>, vector<4x8x64xbf16>, vector<4x8x8xf32> -> vector<4x8x8xf32>
    %cst_47 = arith.constant dense<0.000000e+00> : vector<4x8x15xf32>
    %131 = tpu.matmul %127, %119, %cst_47 {dimension_numbers = #tpu.dot_dimension_numbers<[2], [2], [1], [1], [0, 0, 0, 1, 1, 1], [0], [0]>} : vector<4x8x64xbf16>, vector<4x15x64xbf16>, vector<4x8x15xf32> -> vector<4x8x15xf32>
    %132 = vector.extract_strided_slice %131 {offsets = [0, 0, 7], sizes = [4, 1, 8], strides = [1, 1, 1]} : vector<4x8x15xf32> to vector<4x1x8xf32>
    %133 = vector.extract_strided_slice %131 {offsets = [0, 1, 6], sizes = [4, 1, 8], strides = [1, 1, 1]} : vector<4x8x15xf32> to vector<4x1x8xf32>
    %134 = vector.extract_strided_slice %131 {offsets = [0, 2, 5], sizes = [4, 1, 8], strides = [1, 1, 1]} : vector<4x8x15xf32> to vector<4x1x8xf32>
    %135 = vector.extract_strided_slice %131 {offsets = [0, 3, 4], sizes = [4, 1, 8], strides = [1, 1, 1]} : vector<4x8x15xf32> to vector<4x1x8xf32>
    %136 = vector.extract_strided_slice %131 {offsets = [0, 4, 3], sizes = [4, 1, 8], strides = [1, 1, 1]} : vector<4x8x15xf32> to vector<4x1x8xf32>
    %137 = vector.extract_strided_slice %131 {offsets = [0, 5, 2], sizes = [4, 1, 8], strides = [1, 1, 1]} : vector<4x8x15xf32> to vector<4x1x8xf32>
    %138 = vector.extract_strided_slice %131 {offsets = [0, 6, 1], sizes = [4, 1, 8], strides = [1, 1, 1]} : vector<4x8x15xf32> to vector<4x1x8xf32>
    %139 = vector.extract_strided_slice %131 {offsets = [0, 7, 0], sizes = [4, 1, 8], strides = [1, 1, 1]} : vector<4x8x15xf32> to vector<4x1x8xf32>
    %140 = tpu.concatenate %132, %133, %134, %135, %136, %137, %138, %139 in 1 : vector<4x1x8xf32>, vector<4x1x8xf32>, vector<4x1x8xf32>, vector<4x1x8xf32>, vector<4x1x8xf32>, vector<4x1x8xf32>, vector<4x1x8xf32>, vector<4x1x8xf32> -> vector<4x8x8xf32>
    %c0_48 = arith.constant 0 : index
    %c0_49 = arith.constant 0 : index
    %c0_50 = arith.constant 0 : index
    %141 = vector.load %arg3[%c0_48, %c0_49, %c0_50] : memref<1x1x8xf32, #tpu.memory_space<vmem>>, vector<1x1x8xf32>
    %142 = vector.shape_cast %141 : vector<1x1x8xf32> to vector<1x8xf32>
    %cst_51 = arith.constant 5.000000e-01 : f32
    %143 = vector.broadcast %cst_51 : f32 to vector<1x8xf32>
    %144 = arith.cmpf ogt, %142, %143 : vector<1x8xf32>
    %145 = arith.addf %130, %140 : vector<4x8x8xf32>
    %cst_52 = arith.constant 1.250000e-01 : f32
    %146 = vector.broadcast %cst_52 : f32 to vector<4x8x8xf32>
    %147 = arith.mulf %145, %146 : vector<4x8x8xf32>
    %cst_53 = arith.constant -1.000000e+09 : f32
    %148 = vector.shape_cast %144 : vector<1x8xi1> to vector<1x1x8xi1>
    %149 = vector.broadcast %148 : vector<1x1x8xi1> to vector<4x8x8xi1>
    %150 = vector.broadcast %cst_53 : f32 to vector<4x8x8xf32>
    %151 = arith.select %149, %147, %150 : vector<4x8x8xi1>, vector<4x8x8xf32>
    %cst_54 = arith.constant dense<0xFF800000> : vector<4x8xf32>
    %152 = vector.multi_reduction <maximumf>, %151, %cst_54 [2] : vector<4x8x8xf32> to vector<4x8xf32>
    %153 = vector.shape_cast %152 : vector<4x8xf32> to vector<4x8x1xf32>
    %154 = vector.broadcast %153 : vector<4x8x1xf32> to vector<4x8x8xf32>
    %155 = arith.subf %151, %154 : vector<4x8x8xf32>
    %156 = math.exp %155 : vector<4x8x8xf32>
    %cst_55 = arith.constant dense<0.000000e+00> : vector<4x8xf32>
    %157 = vector.multi_reduction <add>, %156, %cst_55 [2] : vector<4x8x8xf32> to vector<4x8xf32>
    %158 = vector.shape_cast %157 : vector<4x8xf32> to vector<4x8x1xf32>
    %159 = vector.broadcast %158 : vector<4x8x1xf32> to vector<4x8x8xf32>
    %160 = arith.divf %156, %159 : vector<4x8x8xf32>
    %cst_56 = arith.constant 0.000000e+00 : f32
    %161 = vector.shape_cast %144 : vector<1x8xi1> to vector<1x1x8xi1>
    %162 = vector.broadcast %161 : vector<1x1x8xi1> to vector<4x8x8xi1>
    %163 = vector.broadcast %cst_56 : f32 to vector<4x8x8xf32>
    %164 = arith.select %162, %160, %163 : vector<4x8x8xi1>, vector<4x8x8xf32>
    %165 = arith.truncf %164 : vector<4x8x8xf32> to vector<4x8x8xbf16>
    %cst_57 = arith.constant dense<0.000000e+00> : vector<4x8x64xf32>
    %166 = tpu.matmul %165, %129, %cst_57 {dimension_numbers = #tpu.dot_dimension_numbers<[2], [1], [1], [2], [0, 0, 0, 1, 1, 2], [0], [0]>} : vector<4x8x8xbf16>, vector<4x8x64xbf16>, vector<4x8x64xf32> -> vector<4x8x64xf32>
    %167 = vector.extract_strided_slice %166 {offsets = [0, 0, 0], sizes = [1, 8, 64], strides = [1, 1, 1]} : vector<4x8x64xf32> to vector<1x8x64xf32>
    %168 = vector.shape_cast %167 : vector<1x8x64xf32> to vector<8x64xf32>
    %169 = vector.extract_strided_slice %166 {offsets = [1, 0, 0], sizes = [1, 8, 64], strides = [1, 1, 1]} : vector<4x8x64xf32> to vector<1x8x64xf32>
    %170 = vector.shape_cast %169 : vector<1x8x64xf32> to vector<8x64xf32>
    %171 = vector.extract_strided_slice %166 {offsets = [2, 0, 0], sizes = [1, 8, 64], strides = [1, 1, 1]} : vector<4x8x64xf32> to vector<1x8x64xf32>
    %172 = vector.shape_cast %171 : vector<1x8x64xf32> to vector<8x64xf32>
    %173 = vector.extract_strided_slice %166 {offsets = [3, 0, 0], sizes = [1, 8, 64], strides = [1, 1, 1]} : vector<4x8x64xf32> to vector<1x8x64xf32>
    %174 = vector.shape_cast %173 : vector<1x8x64xf32> to vector<8x64xf32>
    %175 = tpu.concatenate %168, %170, %172, %174 in 1 : vector<8x64xf32>, vector<8x64xf32>, vector<8x64xf32>, vector<8x64xf32> -> vector<8x256xf32>
    %176 = arith.truncf %175 : vector<8x256xf32> to vector<8x256xbf16>
    %c0_58 = arith.constant 0 : index
    %c0_59 = arith.constant 0 : index
    %177 = vector.load %arg23[%c0_58, %c0_59] : memref<256x256xbf16, #tpu.memory_space<vmem>>, vector<256x256xbf16>
    %cst_60 = arith.constant dense<0.000000e+00> : vector<8x256xf32>
    %178 = tpu.matmul %176, %177, %cst_60 {dimension_numbers = #tpu.dot_dimension_numbers<[1], [0], [0], [1], [0, 0, 1, 1], [], []>} : vector<8x256xbf16>, vector<256x256xbf16>, vector<8x256xf32> -> vector<8x256xf32>
    %c0_61 = arith.constant 0 : index
    %c0_62 = arith.constant 0 : index
    %179 = vector.load %arg24[%c0_61, %c0_62] : memref<1x256xf32, #tpu.memory_space<vmem>>, vector<1x256xf32>
    %180 = vector.broadcast %179 : vector<1x256xf32> to vector<8x256xf32>
    %181 = arith.addf %178, %180 : vector<8x256xf32>
    %182 = arith.addf %46, %181 : vector<8x256xf32>
    %c0_63 = arith.constant 0 : index
    %c0_64 = arith.constant 0 : index
    %183 = vector.load %arg8[%c0_63, %c0_64] : memref<1x256xf32, #tpu.memory_space<vmem>>, vector<1x256xf32>
    %c0_65 = arith.constant 0 : index
    %c0_66 = arith.constant 0 : index
    %184 = vector.load %arg9[%c0_65, %c0_66] : memref<1x256xf32, #tpu.memory_space<vmem>>, vector<1x256xf32>
    %cst_67 = arith.constant dense<0.000000e+00> : vector<8xf32>
    %185 = vector.multi_reduction <add>, %182, %cst_67 [1] : vector<8x256xf32> to vector<8xf32>
    %186 = vector.shape_cast %185 : vector<8xf32> to vector<8x1xf32>
    %cst_68 = arith.constant 2.560000e+02 : f32
    %187 = vector.broadcast %cst_68 : f32 to vector<8x1xf32>
    %188 = arith.divf %186, %187 : vector<8x1xf32>
    %189 = vector.broadcast %188 : vector<8x1xf32> to vector<8x256xf32>
    %190 = arith.subf %182, %189 : vector<8x256xf32>
    %191 = arith.mulf %190, %190 : vector<8x256xf32>
    %cst_69 = arith.constant dense<0.000000e+00> : vector<8xf32>
    %192 = vector.multi_reduction <add>, %191, %cst_69 [1] : vector<8x256xf32> to vector<8xf32>
    %193 = vector.shape_cast %192 : vector<8xf32> to vector<8x1xf32>
    %cst_70 = arith.constant 2.560000e+02 : f32
    %194 = vector.broadcast %cst_70 : f32 to vector<8x1xf32>
    %195 = arith.divf %193, %194 : vector<8x1xf32>
    %196 = vector.broadcast %188 : vector<8x1xf32> to vector<8x256xf32>
    %197 = arith.subf %182, %196 : vector<8x256xf32>
    %cst_71 = arith.constant 9.99999996E-13 : f32
    %198 = vector.broadcast %cst_71 : f32 to vector<8x1xf32>
    %199 = arith.addf %195, %198 : vector<8x1xf32>
    %200 = math.rsqrt %199 : vector<8x1xf32>
    %201 = vector.broadcast %200 : vector<8x1xf32> to vector<8x256xf32>
    %202 = arith.mulf %197, %201 : vector<8x256xf32>
    %203 = vector.broadcast %183 : vector<1x256xf32> to vector<8x256xf32>
    %204 = arith.mulf %202, %203 : vector<8x256xf32>
    %205 = vector.broadcast %184 : vector<1x256xf32> to vector<8x256xf32>
    %206 = arith.addf %204, %205 : vector<8x256xf32>
    %207 = arith.truncf %206 : vector<8x256xf32> to vector<8x256xbf16>
    %c0_72 = arith.constant 0 : index
    %c0_73 = arith.constant 0 : index
    %208 = vector.load %arg25[%c0_72, %c0_73] : memref<256x512xbf16, #tpu.memory_space<vmem>>, vector<256x512xbf16>
    %cst_74 = arith.constant dense<0.000000e+00> : vector<8x512xf32>
    %209 = tpu.matmul %207, %208, %cst_74 {dimension_numbers = #tpu.dot_dimension_numbers<[1], [0], [0], [1], [0, 0, 1, 1], [], []>} : vector<8x256xbf16>, vector<256x512xbf16>, vector<8x512xf32> -> vector<8x512xf32>
    %c0_75 = arith.constant 0 : index
    %c0_76 = arith.constant 0 : index
    %210 = vector.load %arg26[%c0_75, %c0_76] : memref<1x512xf32, #tpu.memory_space<vmem>>, vector<1x512xf32>
    %211 = vector.broadcast %210 : vector<1x512xf32> to vector<8x512xf32>
    %212 = arith.addf %209, %211 : vector<8x512xf32>
    %213 = vector.extract_strided_slice %212 {offsets = [0, 0], sizes = [8, 256], strides = [1, 1]} : vector<8x512xf32> to vector<8x256xf32>
    %214 = vector.extract_strided_slice %212 {offsets = [0, 256], sizes = [8, 256], strides = [1, 1]} : vector<8x512xf32> to vector<8x256xf32>
    %215 = arith.negf %214 : vector<8x256xf32>
    %216 = math.exp %215 : vector<8x256xf32>
    %cst_77 = arith.constant 1.000000e+00 : f32
    %217 = vector.broadcast %cst_77 : f32 to vector<8x256xf32>
    %218 = arith.addf %217, %216 : vector<8x256xf32>
    %219 = arith.divf %217, %218 : vector<8x256xf32>
    %220 = arith.mulf %213, %219 : vector<8x256xf32>
    %c0_78 = arith.constant 0 : index
    %c0_79 = arith.constant 0 : index
    %221 = vector.load %arg27[%c0_78, %c0_79] : memref<31x256xf32, #tpu.memory_space<vmem>>, vector<31x256xf32>
    %222 = tpu.iota {dimensions = array<i32: 0>} : vector<8x256xi32>
    %cst_80 = arith.constant 0.000000e+00 : f32
    %223 = vector.broadcast %cst_80 : f32 to vector<8x256xf32>
    %224 = vector.extract_strided_slice %221 {offsets = [8, 0], sizes = [1, 256], strides = [1, 1]} : vector<31x256xf32> to vector<1x256xf32>
    %c7_i32 = arith.constant 7 : i32
    %225 = tpu.dynamic_rotate %220 by %c7_i32 dim 0 : vector<8x256xf32>, i32 -> vector<8x256xf32>
    %c-7_i32 = arith.constant -7 : i32
    %226 = vector.broadcast %c-7_i32 : i32 to vector<8x256xi32>
    %227 = arith.addi %222, %226 : vector<8x256xi32>
    %c0_i32 = arith.constant 0 : i32
    %228 = vector.broadcast %c0_i32 : i32 to vector<8x256xi32>
    %229 = arith.cmpi sge, %227, %228 : vector<8x256xi32>
    %c-7_i32_81 = arith.constant -7 : i32
    %230 = vector.broadcast %c-7_i32_81 : i32 to vector<8x256xi32>
    %231 = arith.addi %222, %230 : vector<8x256xi32>
    %c7_i32_82 = arith.constant 7 : i32
    %232 = vector.broadcast %c7_i32_82 : i32 to vector<8x256xi32>
    %233 = arith.cmpi sle, %231, %232 : vector<8x256xi32>
    %234 = arith.andi %229, %233 : vector<8x256xi1>
    %cst_83 = arith.constant 0.000000e+00 : f32
    %235 = vector.broadcast %cst_83 : f32 to vector<8x256xf32>
    %236 = arith.select %234, %225, %235 : vector<8x256xi1>, vector<8x256xf32>
    %237 = vector.broadcast %224 : vector<1x256xf32> to vector<8x256xf32>
    %238 = arith.mulf %236, %237 : vector<8x256xf32>
    %239 = arith.addf %223, %238 : vector<8x256xf32>
    %240 = vector.extract_strided_slice %221 {offsets = [9, 0], sizes = [1, 256], strides = [1, 1]} : vector<31x256xf32> to vector<1x256xf32>
    %c6_i32 = arith.constant 6 : i32
    %241 = tpu.dynamic_rotate %220 by %c6_i32 dim 0 : vector<8x256xf32>, i32 -> vector<8x256xf32>
    %c-6_i32 = arith.constant -6 : i32
    %242 = vector.broadcast %c-6_i32 : i32 to vector<8x256xi32>
    %243 = arith.addi %222, %242 : vector<8x256xi32>
    %c0_i32_84 = arith.constant 0 : i32
    %244 = vector.broadcast %c0_i32_84 : i32 to vector<8x256xi32>
    %245 = arith.cmpi sge, %243, %244 : vector<8x256xi32>
    %c-6_i32_85 = arith.constant -6 : i32
    %246 = vector.broadcast %c-6_i32_85 : i32 to vector<8x256xi32>
    %247 = arith.addi %222, %246 : vector<8x256xi32>
    %c7_i32_86 = arith.constant 7 : i32
    %248 = vector.broadcast %c7_i32_86 : i32 to vector<8x256xi32>
    %249 = arith.cmpi sle, %247, %248 : vector<8x256xi32>
    %250 = arith.andi %245, %249 : vector<8x256xi1>
    %cst_87 = arith.constant 0.000000e+00 : f32
    %251 = vector.broadcast %cst_87 : f32 to vector<8x256xf32>
    %252 = arith.select %250, %241, %251 : vector<8x256xi1>, vector<8x256xf32>
    %253 = vector.broadcast %240 : vector<1x256xf32> to vector<8x256xf32>
    %254 = arith.mulf %252, %253 : vector<8x256xf32>
    %255 = arith.addf %239, %254 : vector<8x256xf32>
    %256 = vector.extract_strided_slice %221 {offsets = [10, 0], sizes = [1, 256], strides = [1, 1]} : vector<31x256xf32> to vector<1x256xf32>
    %c5_i32 = arith.constant 5 : i32
    %257 = tpu.dynamic_rotate %220 by %c5_i32 dim 0 : vector<8x256xf32>, i32 -> vector<8x256xf32>
    %c-5_i32 = arith.constant -5 : i32
    %258 = vector.broadcast %c-5_i32 : i32 to vector<8x256xi32>
    %259 = arith.addi %222, %258 : vector<8x256xi32>
    %c0_i32_88 = arith.constant 0 : i32
    %260 = vector.broadcast %c0_i32_88 : i32 to vector<8x256xi32>
    %261 = arith.cmpi sge, %259, %260 : vector<8x256xi32>
    %c-5_i32_89 = arith.constant -5 : i32
    %262 = vector.broadcast %c-5_i32_89 : i32 to vector<8x256xi32>
    %263 = arith.addi %222, %262 : vector<8x256xi32>
    %c7_i32_90 = arith.constant 7 : i32
    %264 = vector.broadcast %c7_i32_90 : i32 to vector<8x256xi32>
    %265 = arith.cmpi sle, %263, %264 : vector<8x256xi32>
    %266 = arith.andi %261, %265 : vector<8x256xi1>
    %cst_91 = arith.constant 0.000000e+00 : f32
    %267 = vector.broadcast %cst_91 : f32 to vector<8x256xf32>
    %268 = arith.select %266, %257, %267 : vector<8x256xi1>, vector<8x256xf32>
    %269 = vector.broadcast %256 : vector<1x256xf32> to vector<8x256xf32>
    %270 = arith.mulf %268, %269 : vector<8x256xf32>
    %271 = arith.addf %255, %270 : vector<8x256xf32>
    %272 = vector.extract_strided_slice %221 {offsets = [11, 0], sizes = [1, 256], strides = [1, 1]} : vector<31x256xf32> to vector<1x256xf32>
    %c4_i32 = arith.constant 4 : i32
    %273 = tpu.dynamic_rotate %220 by %c4_i32 dim 0 : vector<8x256xf32>, i32 -> vector<8x256xf32>
    %c-4_i32 = arith.constant -4 : i32
    %274 = vector.broadcast %c-4_i32 : i32 to vector<8x256xi32>
    %275 = arith.addi %222, %274 : vector<8x256xi32>
    %c0_i32_92 = arith.constant 0 : i32
    %276 = vector.broadcast %c0_i32_92 : i32 to vector<8x256xi32>
    %277 = arith.cmpi sge, %275, %276 : vector<8x256xi32>
    %c-4_i32_93 = arith.constant -4 : i32
    %278 = vector.broadcast %c-4_i32_93 : i32 to vector<8x256xi32>
    %279 = arith.addi %222, %278 : vector<8x256xi32>
    %c7_i32_94 = arith.constant 7 : i32
    %280 = vector.broadcast %c7_i32_94 : i32 to vector<8x256xi32>
    %281 = arith.cmpi sle, %279, %280 : vector<8x256xi32>
    %282 = arith.andi %277, %281 : vector<8x256xi1>
    %cst_95 = arith.constant 0.000000e+00 : f32
    %283 = vector.broadcast %cst_95 : f32 to vector<8x256xf32>
    %284 = arith.select %282, %273, %283 : vector<8x256xi1>, vector<8x256xf32>
    %285 = vector.broadcast %272 : vector<1x256xf32> to vector<8x256xf32>
    %286 = arith.mulf %284, %285 : vector<8x256xf32>
    %287 = arith.addf %271, %286 : vector<8x256xf32>
    %288 = vector.extract_strided_slice %221 {offsets = [12, 0], sizes = [1, 256], strides = [1, 1]} : vector<31x256xf32> to vector<1x256xf32>
    %c3_i32 = arith.constant 3 : i32
    %289 = tpu.dynamic_rotate %220 by %c3_i32 dim 0 : vector<8x256xf32>, i32 -> vector<8x256xf32>
    %c-3_i32 = arith.constant -3 : i32
    %290 = vector.broadcast %c-3_i32 : i32 to vector<8x256xi32>
    %291 = arith.addi %222, %290 : vector<8x256xi32>
    %c0_i32_96 = arith.constant 0 : i32
    %292 = vector.broadcast %c0_i32_96 : i32 to vector<8x256xi32>
    %293 = arith.cmpi sge, %291, %292 : vector<8x256xi32>
    %c-3_i32_97 = arith.constant -3 : i32
    %294 = vector.broadcast %c-3_i32_97 : i32 to vector<8x256xi32>
    %295 = arith.addi %222, %294 : vector<8x256xi32>
    %c7_i32_98 = arith.constant 7 : i32
    %296 = vector.broadcast %c7_i32_98 : i32 to vector<8x256xi32>
    %297 = arith.cmpi sle, %295, %296 : vector<8x256xi32>
    %298 = arith.andi %293, %297 : vector<8x256xi1>
    %cst_99 = arith.constant 0.000000e+00 : f32
    %299 = vector.broadcast %cst_99 : f32 to vector<8x256xf32>
    %300 = arith.select %298, %289, %299 : vector<8x256xi1>, vector<8x256xf32>
    %301 = vector.broadcast %288 : vector<1x256xf32> to vector<8x256xf32>
    %302 = arith.mulf %300, %301 : vector<8x256xf32>
    %303 = arith.addf %287, %302 : vector<8x256xf32>
    %304 = vector.extract_strided_slice %221 {offsets = [13, 0], sizes = [1, 256], strides = [1, 1]} : vector<31x256xf32> to vector<1x256xf32>
    %c2_i32 = arith.constant 2 : i32
    %305 = tpu.dynamic_rotate %220 by %c2_i32 dim 0 : vector<8x256xf32>, i32 -> vector<8x256xf32>
    %c-2_i32 = arith.constant -2 : i32
    %306 = vector.broadcast %c-2_i32 : i32 to vector<8x256xi32>
    %307 = arith.addi %222, %306 : vector<8x256xi32>
    %c0_i32_100 = arith.constant 0 : i32
    %308 = vector.broadcast %c0_i32_100 : i32 to vector<8x256xi32>
    %309 = arith.cmpi sge, %307, %308 : vector<8x256xi32>
    %c-2_i32_101 = arith.constant -2 : i32
    %310 = vector.broadcast %c-2_i32_101 : i32 to vector<8x256xi32>
    %311 = arith.addi %222, %310 : vector<8x256xi32>
    %c7_i32_102 = arith.constant 7 : i32
    %312 = vector.broadcast %c7_i32_102 : i32 to vector<8x256xi32>
    %313 = arith.cmpi sle, %311, %312 : vector<8x256xi32>
    %314 = arith.andi %309, %313 : vector<8x256xi1>
    %cst_103 = arith.constant 0.000000e+00 : f32
    %315 = vector.broadcast %cst_103 : f32 to vector<8x256xf32>
    %316 = arith.select %314, %305, %315 : vector<8x256xi1>, vector<8x256xf32>
    %317 = vector.broadcast %304 : vector<1x256xf32> to vector<8x256xf32>
    %318 = arith.mulf %316, %317 : vector<8x256xf32>
    %319 = arith.addf %303, %318 : vector<8x256xf32>
    %320 = vector.extract_strided_slice %221 {offsets = [14, 0], sizes = [1, 256], strides = [1, 1]} : vector<31x256xf32> to vector<1x256xf32>
    %c1_i32 = arith.constant 1 : i32
    %321 = tpu.dynamic_rotate %220 by %c1_i32 dim 0 : vector<8x256xf32>, i32 -> vector<8x256xf32>
    %c-1_i32 = arith.constant -1 : i32
    %322 = vector.broadcast %c-1_i32 : i32 to vector<8x256xi32>
    %323 = arith.addi %222, %322 : vector<8x256xi32>
    %c0_i32_104 = arith.constant 0 : i32
    %324 = vector.broadcast %c0_i32_104 : i32 to vector<8x256xi32>
    %325 = arith.cmpi sge, %323, %324 : vector<8x256xi32>
    %c-1_i32_105 = arith.constant -1 : i32
    %326 = vector.broadcast %c-1_i32_105 : i32 to vector<8x256xi32>
    %327 = arith.addi %222, %326 : vector<8x256xi32>
    %c7_i32_106 = arith.constant 7 : i32
    %328 = vector.broadcast %c7_i32_106 : i32 to vector<8x256xi32>
    %329 = arith.cmpi sle, %327, %328 : vector<8x256xi32>
    %330 = arith.andi %325, %329 : vector<8x256xi1>
    %cst_107 = arith.constant 0.000000e+00 : f32
    %331 = vector.broadcast %cst_107 : f32 to vector<8x256xf32>
    %332 = arith.select %330, %321, %331 : vector<8x256xi1>, vector<8x256xf32>
    %333 = vector.broadcast %320 : vector<1x256xf32> to vector<8x256xf32>
    %334 = arith.mulf %332, %333 : vector<8x256xf32>
    %335 = arith.addf %319, %334 : vector<8x256xf32>
    %336 = vector.extract_strided_slice %221 {offsets = [15, 0], sizes = [1, 256], strides = [1, 1]} : vector<31x256xf32> to vector<1x256xf32>
    %c0_i32_108 = arith.constant 0 : i32
    %337 = vector.broadcast %c0_i32_108 : i32 to vector<8x256xi32>
    %338 = arith.addi %222, %337 : vector<8x256xi32>
    %c0_i32_109 = arith.constant 0 : i32
    %339 = vector.broadcast %c0_i32_109 : i32 to vector<8x256xi32>
    %340 = arith.cmpi sge, %338, %339 : vector<8x256xi32>
    %c0_i32_110 = arith.constant 0 : i32
    %341 = vector.broadcast %c0_i32_110 : i32 to vector<8x256xi32>
    %342 = arith.addi %222, %341 : vector<8x256xi32>
    %c7_i32_111 = arith.constant 7 : i32
    %343 = vector.broadcast %c7_i32_111 : i32 to vector<8x256xi32>
    %344 = arith.cmpi sle, %342, %343 : vector<8x256xi32>
    %345 = arith.andi %340, %344 : vector<8x256xi1>
    %cst_112 = arith.constant 0.000000e+00 : f32
    %346 = vector.broadcast %cst_112 : f32 to vector<8x256xf32>
    %347 = arith.select %345, %220, %346 : vector<8x256xi1>, vector<8x256xf32>
    %348 = vector.broadcast %336 : vector<1x256xf32> to vector<8x256xf32>
    %349 = arith.mulf %347, %348 : vector<8x256xf32>
    %350 = arith.addf %335, %349 : vector<8x256xf32>
    %351 = vector.extract_strided_slice %221 {offsets = [16, 0], sizes = [1, 256], strides = [1, 1]} : vector<31x256xf32> to vector<1x256xf32>
    %c7_i32_113 = arith.constant 7 : i32
    %352 = tpu.dynamic_rotate %220 by %c7_i32_113 dim 0 : vector<8x256xf32>, i32 -> vector<8x256xf32>
    %c1_i32_114 = arith.constant 1 : i32
    %353 = vector.broadcast %c1_i32_114 : i32 to vector<8x256xi32>
    %354 = arith.addi %222, %353 : vector<8x256xi32>
    %c0_i32_115 = arith.constant 0 : i32
    %355 = vector.broadcast %c0_i32_115 : i32 to vector<8x256xi32>
    %356 = arith.cmpi sge, %354, %355 : vector<8x256xi32>
    %c1_i32_116 = arith.constant 1 : i32
    %357 = vector.broadcast %c1_i32_116 : i32 to vector<8x256xi32>
    %358 = arith.addi %222, %357 : vector<8x256xi32>
    %c7_i32_117 = arith.constant 7 : i32
    %359 = vector.broadcast %c7_i32_117 : i32 to vector<8x256xi32>
    %360 = arith.cmpi sle, %358, %359 : vector<8x256xi32>
    %361 = arith.andi %356, %360 : vector<8x256xi1>
    %cst_118 = arith.constant 0.000000e+00 : f32
    %362 = vector.broadcast %cst_118 : f32 to vector<8x256xf32>
    %363 = arith.select %361, %352, %362 : vector<8x256xi1>, vector<8x256xf32>
    %364 = vector.broadcast %351 : vector<1x256xf32> to vector<8x256xf32>
    %365 = arith.mulf %363, %364 : vector<8x256xf32>
    %366 = arith.addf %350, %365 : vector<8x256xf32>
    %367 = vector.extract_strided_slice %221 {offsets = [17, 0], sizes = [1, 256], strides = [1, 1]} : vector<31x256xf32> to vector<1x256xf32>
    %c6_i32_119 = arith.constant 6 : i32
    %368 = tpu.dynamic_rotate %220 by %c6_i32_119 dim 0 : vector<8x256xf32>, i32 -> vector<8x256xf32>
    %c2_i32_120 = arith.constant 2 : i32
    %369 = vector.broadcast %c2_i32_120 : i32 to vector<8x256xi32>
    %370 = arith.addi %222, %369 : vector<8x256xi32>
    %c0_i32_121 = arith.constant 0 : i32
    %371 = vector.broadcast %c0_i32_121 : i32 to vector<8x256xi32>
    %372 = arith.cmpi sge, %370, %371 : vector<8x256xi32>
    %c2_i32_122 = arith.constant 2 : i32
    %373 = vector.broadcast %c2_i32_122 : i32 to vector<8x256xi32>
    %374 = arith.addi %222, %373 : vector<8x256xi32>
    %c7_i32_123 = arith.constant 7 : i32
    %375 = vector.broadcast %c7_i32_123 : i32 to vector<8x256xi32>
    %376 = arith.cmpi sle, %374, %375 : vector<8x256xi32>
    %377 = arith.andi %372, %376 : vector<8x256xi1>
    %cst_124 = arith.constant 0.000000e+00 : f32
    %378 = vector.broadcast %cst_124 : f32 to vector<8x256xf32>
    %379 = arith.select %377, %368, %378 : vector<8x256xi1>, vector<8x256xf32>
    %380 = vector.broadcast %367 : vector<1x256xf32> to vector<8x256xf32>
    %381 = arith.mulf %379, %380 : vector<8x256xf32>
    %382 = arith.addf %366, %381 : vector<8x256xf32>
    %383 = vector.extract_strided_slice %221 {offsets = [18, 0], sizes = [1, 256], strides = [1, 1]} : vector<31x256xf32> to vector<1x256xf32>
    %c5_i32_125 = arith.constant 5 : i32
    %384 = tpu.dynamic_rotate %220 by %c5_i32_125 dim 0 : vector<8x256xf32>, i32 -> vector<8x256xf32>
    %c3_i32_126 = arith.constant 3 : i32
    %385 = vector.broadcast %c3_i32_126 : i32 to vector<8x256xi32>
    %386 = arith.addi %222, %385 : vector<8x256xi32>
    %c0_i32_127 = arith.constant 0 : i32
    %387 = vector.broadcast %c0_i32_127 : i32 to vector<8x256xi32>
    %388 = arith.cmpi sge, %386, %387 : vector<8x256xi32>
    %c3_i32_128 = arith.constant 3 : i32
    %389 = vector.broadcast %c3_i32_128 : i32 to vector<8x256xi32>
    %390 = arith.addi %222, %389 : vector<8x256xi32>
    %c7_i32_129 = arith.constant 7 : i32
    %391 = vector.broadcast %c7_i32_129 : i32 to vector<8x256xi32>
    %392 = arith.cmpi sle, %390, %391 : vector<8x256xi32>
    %393 = arith.andi %388, %392 : vector<8x256xi1>
    %cst_130 = arith.constant 0.000000e+00 : f32
    %394 = vector.broadcast %cst_130 : f32 to vector<8x256xf32>
    %395 = arith.select %393, %384, %394 : vector<8x256xi1>, vector<8x256xf32>
    %396 = vector.broadcast %383 : vector<1x256xf32> to vector<8x256xf32>
    %397 = arith.mulf %395, %396 : vector<8x256xf32>
    %398 = arith.addf %382, %397 : vector<8x256xf32>
    %399 = vector.extract_strided_slice %221 {offsets = [19, 0], sizes = [1, 256], strides = [1, 1]} : vector<31x256xf32> to vector<1x256xf32>
    %c4_i32_131 = arith.constant 4 : i32
    %400 = tpu.dynamic_rotate %220 by %c4_i32_131 dim 0 : vector<8x256xf32>, i32 -> vector<8x256xf32>
    %c4_i32_132 = arith.constant 4 : i32
    %401 = vector.broadcast %c4_i32_132 : i32 to vector<8x256xi32>
    %402 = arith.addi %222, %401 : vector<8x256xi32>
    %c0_i32_133 = arith.constant 0 : i32
    %403 = vector.broadcast %c0_i32_133 : i32 to vector<8x256xi32>
    %404 = arith.cmpi sge, %402, %403 : vector<8x256xi32>
    %c4_i32_134 = arith.constant 4 : i32
    %405 = vector.broadcast %c4_i32_134 : i32 to vector<8x256xi32>
    %406 = arith.addi %222, %405 : vector<8x256xi32>
    %c7_i32_135 = arith.constant 7 : i32
    %407 = vector.broadcast %c7_i32_135 : i32 to vector<8x256xi32>
    %408 = arith.cmpi sle, %406, %407 : vector<8x256xi32>
    %409 = arith.andi %404, %408 : vector<8x256xi1>
    %cst_136 = arith.constant 0.000000e+00 : f32
    %410 = vector.broadcast %cst_136 : f32 to vector<8x256xf32>
    %411 = arith.select %409, %400, %410 : vector<8x256xi1>, vector<8x256xf32>
    %412 = vector.broadcast %399 : vector<1x256xf32> to vector<8x256xf32>
    %413 = arith.mulf %411, %412 : vector<8x256xf32>
    %414 = arith.addf %398, %413 : vector<8x256xf32>
    %415 = vector.extract_strided_slice %221 {offsets = [20, 0], sizes = [1, 256], strides = [1, 1]} : vector<31x256xf32> to vector<1x256xf32>
    %c3_i32_137 = arith.constant 3 : i32
    %416 = tpu.dynamic_rotate %220 by %c3_i32_137 dim 0 : vector<8x256xf32>, i32 -> vector<8x256xf32>
    %c5_i32_138 = arith.constant 5 : i32
    %417 = vector.broadcast %c5_i32_138 : i32 to vector<8x256xi32>
    %418 = arith.addi %222, %417 : vector<8x256xi32>
    %c0_i32_139 = arith.constant 0 : i32
    %419 = vector.broadcast %c0_i32_139 : i32 to vector<8x256xi32>
    %420 = arith.cmpi sge, %418, %419 : vector<8x256xi32>
    %c5_i32_140 = arith.constant 5 : i32
    %421 = vector.broadcast %c5_i32_140 : i32 to vector<8x256xi32>
    %422 = arith.addi %222, %421 : vector<8x256xi32>
    %c7_i32_141 = arith.constant 7 : i32
    %423 = vector.broadcast %c7_i32_141 : i32 to vector<8x256xi32>
    %424 = arith.cmpi sle, %422, %423 : vector<8x256xi32>
    %425 = arith.andi %420, %424 : vector<8x256xi1>
    %cst_142 = arith.constant 0.000000e+00 : f32
    %426 = vector.broadcast %cst_142 : f32 to vector<8x256xf32>
    %427 = arith.select %425, %416, %426 : vector<8x256xi1>, vector<8x256xf32>
    %428 = vector.broadcast %415 : vector<1x256xf32> to vector<8x256xf32>
    %429 = arith.mulf %427, %428 : vector<8x256xf32>
    %430 = arith.addf %414, %429 : vector<8x256xf32>
    %431 = vector.extract_strided_slice %221 {offsets = [21, 0], sizes = [1, 256], strides = [1, 1]} : vector<31x256xf32> to vector<1x256xf32>
    %c2_i32_143 = arith.constant 2 : i32
    %432 = tpu.dynamic_rotate %220 by %c2_i32_143 dim 0 : vector<8x256xf32>, i32 -> vector<8x256xf32>
    %c6_i32_144 = arith.constant 6 : i32
    %433 = vector.broadcast %c6_i32_144 : i32 to vector<8x256xi32>
    %434 = arith.addi %222, %433 : vector<8x256xi32>
    %c0_i32_145 = arith.constant 0 : i32
    %435 = vector.broadcast %c0_i32_145 : i32 to vector<8x256xi32>
    %436 = arith.cmpi sge, %434, %435 : vector<8x256xi32>
    %c6_i32_146 = arith.constant 6 : i32
    %437 = vector.broadcast %c6_i32_146 : i32 to vector<8x256xi32>
    %438 = arith.addi %222, %437 : vector<8x256xi32>
    %c7_i32_147 = arith.constant 7 : i32
    %439 = vector.broadcast %c7_i32_147 : i32 to vector<8x256xi32>
    %440 = arith.cmpi sle, %438, %439 : vector<8x256xi32>
    %441 = arith.andi %436, %440 : vector<8x256xi1>
    %cst_148 = arith.constant 0.000000e+00 : f32
    %442 = vector.broadcast %cst_148 : f32 to vector<8x256xf32>
    %443 = arith.select %441, %432, %442 : vector<8x256xi1>, vector<8x256xf32>
    %444 = vector.broadcast %431 : vector<1x256xf32> to vector<8x256xf32>
    %445 = arith.mulf %443, %444 : vector<8x256xf32>
    %446 = arith.addf %430, %445 : vector<8x256xf32>
    %447 = vector.extract_strided_slice %221 {offsets = [22, 0], sizes = [1, 256], strides = [1, 1]} : vector<31x256xf32> to vector<1x256xf32>
    %c1_i32_149 = arith.constant 1 : i32
    %448 = tpu.dynamic_rotate %220 by %c1_i32_149 dim 0 : vector<8x256xf32>, i32 -> vector<8x256xf32>
    %c7_i32_150 = arith.constant 7 : i32
    %449 = vector.broadcast %c7_i32_150 : i32 to vector<8x256xi32>
    %450 = arith.addi %222, %449 : vector<8x256xi32>
    %c0_i32_151 = arith.constant 0 : i32
    %451 = vector.broadcast %c0_i32_151 : i32 to vector<8x256xi32>
    %452 = arith.cmpi sge, %450, %451 : vector<8x256xi32>
    %c7_i32_152 = arith.constant 7 : i32
    %453 = vector.broadcast %c7_i32_152 : i32 to vector<8x256xi32>
    %454 = arith.addi %222, %453 : vector<8x256xi32>
    %c7_i32_153 = arith.constant 7 : i32
    %455 = vector.broadcast %c7_i32_153 : i32 to vector<8x256xi32>
    %456 = arith.cmpi sle, %454, %455 : vector<8x256xi32>
    %457 = arith.andi %452, %456 : vector<8x256xi1>
    %cst_154 = arith.constant 0.000000e+00 : f32
    %458 = vector.broadcast %cst_154 : f32 to vector<8x256xf32>
    %459 = arith.select %457, %448, %458 : vector<8x256xi1>, vector<8x256xf32>
    %460 = vector.broadcast %447 : vector<1x256xf32> to vector<8x256xf32>
    %461 = arith.mulf %459, %460 : vector<8x256xf32>
    %462 = arith.addf %446, %461 : vector<8x256xf32>
    %c0_155 = arith.constant 0 : index
    %c0_156 = arith.constant 0 : index
    %463 = vector.load %arg28[%c0_155, %c0_156] : memref<1x256xf32, #tpu.memory_space<vmem>>, vector<1x256xf32>
    %464 = vector.broadcast %463 : vector<1x256xf32> to vector<8x256xf32>
    %465 = arith.addf %462, %464 : vector<8x256xf32>
    %c0_157 = arith.constant 0 : index
    %c0_158 = arith.constant 0 : index
    %466 = vector.load %arg29[%c0_157, %c0_158] : memref<1x256xf32, #tpu.memory_space<vmem>>, vector<1x256xf32>
    %467 = vector.broadcast %466 : vector<1x256xf32> to vector<8x256xf32>
    %468 = arith.mulf %465, %467 : vector<8x256xf32>
    %c0_159 = arith.constant 0 : index
    %c0_160 = arith.constant 0 : index
    %469 = vector.load %arg30[%c0_159, %c0_160] : memref<1x256xf32, #tpu.memory_space<vmem>>, vector<1x256xf32>
    %470 = vector.broadcast %469 : vector<1x256xf32> to vector<8x256xf32>
    %471 = arith.addf %468, %470 : vector<8x256xf32>
    %472 = arith.negf %471 : vector<8x256xf32>
    %473 = math.exp %472 : vector<8x256xf32>
    %cst_161 = arith.constant 1.000000e+00 : f32
    %474 = vector.broadcast %cst_161 : f32 to vector<8x256xf32>
    %475 = arith.addf %474, %473 : vector<8x256xf32>
    %476 = arith.divf %474, %475 : vector<8x256xf32>
    %477 = arith.mulf %471, %476 : vector<8x256xf32>
    %478 = arith.truncf %477 : vector<8x256xf32> to vector<8x256xbf16>
    %c0_162 = arith.constant 0 : index
    %c0_163 = arith.constant 0 : index
    %479 = vector.load %arg31[%c0_162, %c0_163] : memref<256x256xbf16, #tpu.memory_space<vmem>>, vector<256x256xbf16>
    %cst_164 = arith.constant dense<0.000000e+00> : vector<8x256xf32>
    %480 = tpu.matmul %478, %479, %cst_164 {dimension_numbers = #tpu.dot_dimension_numbers<[1], [0], [0], [1], [0, 0, 1, 1], [], []>} : vector<8x256xbf16>, vector<256x256xbf16>, vector<8x256xf32> -> vector<8x256xf32>
    %c0_165 = arith.constant 0 : index
    %c0_166 = arith.constant 0 : index
    %481 = vector.load %arg32[%c0_165, %c0_166] : memref<1x256xf32, #tpu.memory_space<vmem>>, vector<1x256xf32>
    %482 = vector.broadcast %481 : vector<1x256xf32> to vector<8x256xf32>
    %483 = arith.addf %480, %482 : vector<8x256xf32>
    %484 = arith.addf %182, %483 : vector<8x256xf32>
    %c0_167 = arith.constant 0 : index
    %c0_168 = arith.constant 0 : index
    %485 = vector.load %arg10[%c0_167, %c0_168] : memref<1x256xf32, #tpu.memory_space<vmem>>, vector<1x256xf32>
    %c0_169 = arith.constant 0 : index
    %c0_170 = arith.constant 0 : index
    %486 = vector.load %arg11[%c0_169, %c0_170] : memref<1x256xf32, #tpu.memory_space<vmem>>, vector<1x256xf32>
    %cst_171 = arith.constant dense<0.000000e+00> : vector<8xf32>
    %487 = vector.multi_reduction <add>, %484, %cst_171 [1] : vector<8x256xf32> to vector<8xf32>
    %488 = vector.shape_cast %487 : vector<8xf32> to vector<8x1xf32>
    %cst_172 = arith.constant 2.560000e+02 : f32
    %489 = vector.broadcast %cst_172 : f32 to vector<8x1xf32>
    %490 = arith.divf %488, %489 : vector<8x1xf32>
    %491 = vector.broadcast %490 : vector<8x1xf32> to vector<8x256xf32>
    %492 = arith.subf %484, %491 : vector<8x256xf32>
    %493 = arith.mulf %492, %492 : vector<8x256xf32>
    %cst_173 = arith.constant dense<0.000000e+00> : vector<8xf32>
    %494 = vector.multi_reduction <add>, %493, %cst_173 [1] : vector<8x256xf32> to vector<8xf32>
    %495 = vector.shape_cast %494 : vector<8xf32> to vector<8x1xf32>
    %cst_174 = arith.constant 2.560000e+02 : f32
    %496 = vector.broadcast %cst_174 : f32 to vector<8x1xf32>
    %497 = arith.divf %495, %496 : vector<8x1xf32>
    %498 = vector.broadcast %490 : vector<8x1xf32> to vector<8x256xf32>
    %499 = arith.subf %484, %498 : vector<8x256xf32>
    %cst_175 = arith.constant 9.99999996E-13 : f32
    %500 = vector.broadcast %cst_175 : f32 to vector<8x1xf32>
    %501 = arith.addf %497, %500 : vector<8x1xf32>
    %502 = math.rsqrt %501 : vector<8x1xf32>
    %503 = vector.broadcast %502 : vector<8x1xf32> to vector<8x256xf32>
    %504 = arith.mulf %499, %503 : vector<8x256xf32>
    %505 = vector.broadcast %485 : vector<1x256xf32> to vector<8x256xf32>
    %506 = arith.mulf %504, %505 : vector<8x256xf32>
    %507 = vector.broadcast %486 : vector<1x256xf32> to vector<8x256xf32>
    %508 = arith.addf %506, %507 : vector<8x256xf32>
    %509 = arith.truncf %508 : vector<8x256xf32> to vector<8x256xbf16>
    %c0_176 = arith.constant 0 : index
    %c0_177 = arith.constant 0 : index
    %510 = vector.load %arg33[%c0_176, %c0_177] : memref<256x1024xbf16, #tpu.memory_space<vmem>>, vector<256x1024xbf16>
    %cst_178 = arith.constant dense<0.000000e+00> : vector<8x1024xf32>
    %511 = tpu.matmul %509, %510, %cst_178 {dimension_numbers = #tpu.dot_dimension_numbers<[1], [0], [0], [1], [0, 0, 1, 1], [], []>} : vector<8x256xbf16>, vector<256x1024xbf16>, vector<8x1024xf32> -> vector<8x1024xf32>
    %c0_179 = arith.constant 0 : index
    %c0_180 = arith.constant 0 : index
    %512 = vector.load %arg34[%c0_179, %c0_180] : memref<1x1024xf32, #tpu.memory_space<vmem>>, vector<1x1024xf32>
    %513 = vector.broadcast %512 : vector<1x1024xf32> to vector<8x1024xf32>
    %514 = arith.addf %511, %513 : vector<8x1024xf32>
    %515 = arith.negf %514 : vector<8x1024xf32>
    %516 = math.exp %515 : vector<8x1024xf32>
    %cst_181 = arith.constant 1.000000e+00 : f32
    %517 = vector.broadcast %cst_181 : f32 to vector<8x1024xf32>
    %518 = arith.addf %517, %516 : vector<8x1024xf32>
    %519 = arith.divf %517, %518 : vector<8x1024xf32>
    %520 = arith.mulf %514, %519 : vector<8x1024xf32>
    %521 = arith.truncf %520 : vector<8x1024xf32> to vector<8x1024xbf16>
    %c0_182 = arith.constant 0 : index
    %c0_183 = arith.constant 0 : index
    %522 = vector.load %arg35[%c0_182, %c0_183] : memref<1024x256xbf16, #tpu.memory_space<vmem>>, vector<1024x256xbf16>
    %cst_184 = arith.constant dense<0.000000e+00> : vector<8x256xf32>
    %523 = tpu.matmul %521, %522, %cst_184 {dimension_numbers = #tpu.dot_dimension_numbers<[1], [0], [0], [1], [0, 0, 1, 1], [], []>} : vector<8x1024xbf16>, vector<1024x256xbf16>, vector<8x256xf32> -> vector<8x256xf32>
    %c0_185 = arith.constant 0 : index
    %c0_186 = arith.constant 0 : index
    %524 = vector.load %arg36[%c0_185, %c0_186] : memref<1x256xf32, #tpu.memory_space<vmem>>, vector<1x256xf32>
    %525 = vector.broadcast %524 : vector<1x256xf32> to vector<8x256xf32>
    %526 = arith.addf %523, %525 : vector<8x256xf32>
    %cst_187 = arith.constant 5.000000e-01 : f32
    %527 = vector.broadcast %cst_187 : f32 to vector<8x256xf32>
    %528 = arith.mulf %527, %526 : vector<8x256xf32>
    %529 = arith.addf %484, %528 : vector<8x256xf32>
    %c0_188 = arith.constant 0 : index
    %c0_189 = arith.constant 0 : index
    %530 = vector.load %arg12[%c0_188, %c0_189] : memref<1x256xf32, #tpu.memory_space<vmem>>, vector<1x256xf32>
    %c0_190 = arith.constant 0 : index
    %c0_191 = arith.constant 0 : index
    %531 = vector.load %arg13[%c0_190, %c0_191] : memref<1x256xf32, #tpu.memory_space<vmem>>, vector<1x256xf32>
    %cst_192 = arith.constant dense<0.000000e+00> : vector<8xf32>
    %532 = vector.multi_reduction <add>, %529, %cst_192 [1] : vector<8x256xf32> to vector<8xf32>
    %533 = vector.shape_cast %532 : vector<8xf32> to vector<8x1xf32>
    %cst_193 = arith.constant 2.560000e+02 : f32
    %534 = vector.broadcast %cst_193 : f32 to vector<8x1xf32>
    %535 = arith.divf %533, %534 : vector<8x1xf32>
    %536 = vector.broadcast %535 : vector<8x1xf32> to vector<8x256xf32>
    %537 = arith.subf %529, %536 : vector<8x256xf32>
    %538 = arith.mulf %537, %537 : vector<8x256xf32>
    %cst_194 = arith.constant dense<0.000000e+00> : vector<8xf32>
    %539 = vector.multi_reduction <add>, %538, %cst_194 [1] : vector<8x256xf32> to vector<8xf32>
    %540 = vector.shape_cast %539 : vector<8xf32> to vector<8x1xf32>
    %cst_195 = arith.constant 2.560000e+02 : f32
    %541 = vector.broadcast %cst_195 : f32 to vector<8x1xf32>
    %542 = arith.divf %540, %541 : vector<8x1xf32>
    %543 = vector.broadcast %535 : vector<8x1xf32> to vector<8x256xf32>
    %544 = arith.subf %529, %543 : vector<8x256xf32>
    %cst_196 = arith.constant 9.99999996E-13 : f32
    %545 = vector.broadcast %cst_196 : f32 to vector<8x1xf32>
    %546 = arith.addf %542, %545 : vector<8x1xf32>
    %547 = math.rsqrt %546 : vector<8x1xf32>
    %548 = vector.broadcast %547 : vector<8x1xf32> to vector<8x256xf32>
    %549 = arith.mulf %544, %548 : vector<8x256xf32>
    %550 = vector.broadcast %530 : vector<1x256xf32> to vector<8x256xf32>
    %551 = arith.mulf %549, %550 : vector<8x256xf32>
    %552 = vector.broadcast %531 : vector<1x256xf32> to vector<8x256xf32>
    %553 = arith.addf %551, %552 : vector<8x256xf32>
    %c0_197 = arith.constant 0 : index
    %c0_198 = arith.constant 0 : index
    %c0_199 = arith.constant 0 : index
    %554 = vector.load %arg37[%c0_197, %c0_198, %c0_199] : memref<1x8x256xf32, #tpu.memory_space<vmem>>, vector<1x8x256xf32>
    %555 = vector.shape_cast %554 : vector<1x8x256xf32> to vector<8x256xf32>
    %556 = vector.shape_cast %553 : vector<8x256xf32> to vector<1x8x256xf32>
    tpu.vector_store %arg37[%c0_197, %c0_198, %c0_199], %556 {strides = array<i32>} : memref<1x8x256xf32, #tpu.memory_space<vmem>>, vector<1x8x256xf32>,
    return
  }
  func.func @transform_0(%arg0: i32) -> (i32, i32, i32) {
    %c0_i32 = arith.constant 0 : i32
    %c0_i32_0 = arith.constant 0 : i32
    %c0_i32_1 = arith.constant 0 : i32
    return %arg0, %c0_i32, %c0_i32_0 : i32, i32, i32
  }
  func.func @transform_1(%arg0: i32) -> (i32, i32) {
    %c0_i32 = arith.constant 0 : i32
    %c0_i32_0 = arith.constant 0 : i32
    %c0_i32_1 = arith.constant 0 : i32
    return %c0_i32, %c0_i32_0 : i32, i32
  }
  func.func @transform_2(%arg0: i32) -> (i32, i32, i32) {
    %c0_i32 = arith.constant 0 : i32
    %c0_i32_0 = arith.constant 0 : i32
    %c0_i32_1 = arith.constant 0 : i32
    return %arg0, %c0_i32, %c0_i32_0 : i32, i32, i32
  }
  func.func @transform_3(%arg0: i32) -> (i32, i32) {
    %c0_i32 = arith.constant 0 : i32
    %c0_i32_0 = arith.constant 0 : i32
    %c0_i32_1 = arith.constant 0 : i32
    return %c0_i32, %c0_i32_0 : i32, i32
  }
  func.func @transform_4(%arg0: i32) -> (i32, i32) {
    %c0_i32 = arith.constant 0 : i32
    %c0_i32_0 = arith.constant 0 : i32
    %c0_i32_1 = arith.constant 0 : i32
    return %c0_i32, %c0_i32_0 : i32, i32
  }
  func.func @transform_5(%arg0: i32) -> (i32, i32) {
    %c0_i32 = arith.constant 0 : i32
    %c0_i32_0 = arith.constant 0 : i32
    %c0_i32_1 = arith.constant 0 : i32
    return %c0_i32, %c0_i32_0 : i32, i32
  }
  func.func @transform_6(%arg0: i32) -> (i32, i32) {
    %c0_i32 = arith.constant 0 : i32
    %c0_i32_0 = arith.constant 0 : i32
    %c0_i32_1 = arith.constant 0 : i32
    return %c0_i32, %c0_i32_0 : i32, i32
  }
  func.func @transform_7(%arg0: i32) -> (i32, i32) {
    %c0_i32 = arith.constant 0 : i32
    %c0_i32_0 = arith.constant 0 : i32
    %c0_i32_1 = arith.constant 0 : i32
    return %c0_i32, %c0_i32_0 : i32, i32
  }
  func.func @transform_8(%arg0: i32) -> (i32, i32) {
    %c0_i32 = arith.constant 0 : i32
    %c0_i32_0 = arith.constant 0 : i32
    %c0_i32_1 = arith.constant 0 : i32
    return %c0_i32, %c0_i32_0 : i32, i32
  }
  func.func @transform_9(%arg0: i32) -> (i32, i32) {
    %c0_i32 = arith.constant 0 : i32
    %c0_i32_0 = arith.constant 0 : i32
    %c0_i32_1 = arith.constant 0 : i32
    return %c0_i32, %c0_i32_0 : i32, i32
  }
  func.func @transform_10(%arg0: i32) -> (i32, i32) {
    %c0_i32 = arith.constant 0 : i32
    %c0_i32_0 = arith.constant 0 : i32
    %c0_i32_1 = arith.constant 0 : i32
    return %c0_i32, %c0_i32_0 : i32, i32
  }
  func.func @transform_11(%arg0: i32) -> (i32, i32) {
    %c0_i32 = arith.constant 0 : i32
    %c0_i32_0 = arith.constant 0 : i32
    %c0_i32_1 = arith.constant 0 : i32
    return %c0_i32, %c0_i32_0 : i32, i32
  }
  func.func @transform_12(%arg0: i32) -> (i32, i32) {
    %c0_i32 = arith.constant 0 : i32
    %c0_i32_0 = arith.constant 0 : i32
    %c0_i32_1 = arith.constant 0 : i32
    return %c0_i32, %c0_i32_0 : i32, i32
  }
  func.func @transform_13(%arg0: i32) -> (i32, i32) {
    %c0_i32 = arith.constant 0 : i32
    %c0_i32_0 = arith.constant 0 : i32
    %c0_i32_1 = arith.constant 0 : i32
    return %c0_i32, %c0_i32_0 : i32, i32
  }
  func.func @transform_14(%arg0: i32) -> (i32, i32) {
    %c0_i32 = arith.constant 0 : i32
    %c0_i32_0 = arith.constant 0 : i32
    %c0_i32_1 = arith.constant 0 : i32
    return %c0_i32, %c0_i32_0 : i32, i32
  }
  func.func @transform_15(%arg0: i32) -> (i32, i32) {
    %c0_i32 = arith.constant 0 : i32
    %c0_i32_0 = arith.constant 0 : i32
    %c0_i32_1 = arith.constant 0 : i32
    return %c0_i32, %c0_i32_0 : i32, i32
  }
  func.func @transform_16(%arg0: i32) -> (i32, i32) {
    %c0_i32 = arith.constant 0 : i32
    %c0_i32_0 = arith.constant 0 : i32
    %c0_i32_1 = arith.constant 0 : i32
    return %c0_i32, %c0_i32_0 : i32, i32
  }
  func.func @transform_17(%arg0: i32) -> (i32, i32) {
    %c0_i32 = arith.constant 0 : i32
    %c0_i32_0 = arith.constant 0 : i32
    %c0_i32_1 = arith.constant 0 : i32
    return %c0_i32, %c0_i32_0 : i32, i32
  }
  func.func @transform_18(%arg0: i32) -> (i32, i32, i32) {
    %c0_i32 = arith.constant 0 : i32
    %c0_i32_0 = arith.constant 0 : i32
    %c0_i32_1 = arith.constant 0 : i32
    %c0_i32_2 = arith.constant 0 : i32
    return %c0_i32, %c0_i32_0, %c0_i32_1 : i32, i32, i32
  }
  func.func @transform_19(%arg0: i32) -> (i32, i32, i32) {
    %c0_i32 = arith.constant 0 : i32
    %c0_i32_0 = arith.constant 0 : i32
    %c0_i32_1 = arith.constant 0 : i32
    %c0_i32_2 = arith.constant 0 : i32
    return %c0_i32, %c0_i32_0, %c0_i32_1 : i32, i32, i32
  }
  func.func @transform_20(%arg0: i32) -> (i32, i32) {
    %c0_i32 = arith.constant 0 : i32
    %c0_i32_0 = arith.constant 0 : i32
    %c0_i32_1 = arith.constant 0 : i32
    return %c0_i32, %c0_i32_0 : i32, i32
  }
  func.func @transform_21(%arg0: i32) -> (i32, i32) {
    %c0_i32 = arith.constant 0 : i32
    %c0_i32_0 = arith.constant 0 : i32
    %c0_i32_1 = arith.constant 0 : i32
    return %c0_i32, %c0_i32_0 : i32, i32
  }
  func.func @transform_22(%arg0: i32) -> (i32, i32) {
    %c0_i32 = arith.constant 0 : i32
    %c0_i32_0 = arith.constant 0 : i32
    %c0_i32_1 = arith.constant 0 : i32
    return %c0_i32, %c0_i32_0 : i32, i32
  }
  func.func @transform_23(%arg0: i32) -> (i32, i32) {
    %c0_i32 = arith.constant 0 : i32
    %c0_i32_0 = arith.constant 0 : i32
    %c0_i32_1 = arith.constant 0 : i32
    return %c0_i32, %c0_i32_0 : i32, i32
  }
  func.func @transform_24(%arg0: i32) -> (i32, i32) {
    %c0_i32 = arith.constant 0 : i32
    %c0_i32_0 = arith.constant 0 : i32
    %c0_i32_1 = arith.constant 0 : i32
    return %c0_i32, %c0_i32_0 : i32, i32
  }
  func.func @transform_25(%arg0: i32) -> (i32, i32) {
    %c0_i32 = arith.constant 0 : i32
    %c0_i32_0 = arith.constant 0 : i32
    %c0_i32_1 = arith.constant 0 : i32
    return %c0_i32, %c0_i32_0 : i32, i32
  }
  func.func @transform_26(%arg0: i32) -> (i32, i32) {
    %c0_i32 = arith.constant 0 : i32
    %c0_i32_0 = arith.constant 0 : i32
    %c0_i32_1 = arith.constant 0 : i32
    return %c0_i32, %c0_i32_0 : i32, i32
  }
  func.func @transform_27(%arg0: i32) -> (i32, i32) {
    %c0_i32 = arith.constant 0 : i32
    %c0_i32_0 = arith.constant 0 : i32
    %c0_i32_1 = arith.constant 0 : i32
    return %c0_i32, %c0_i32_0 : i32, i32
  }
  func.func @transform_28(%arg0: i32) -> (i32, i32) {
    %c0_i32 = arith.constant 0 : i32
    %c0_i32_0 = arith.constant 0 : i32
    %c0_i32_1 = arith.constant 0 : i32
    return %c0_i32, %c0_i32_0 : i32, i32
  }
  func.func @transform_29(%arg0: i32) -> (i32, i32) {
    %c0_i32 = arith.constant 0 : i32
    %c0_i32_0 = arith.constant 0 : i32
    %c0_i32_1 = arith.constant 0 : i32
    return %c0_i32, %c0_i32_0 : i32, i32
  }
  func.func @transform_30(%arg0: i32) -> (i32, i32) {
    %c0_i32 = arith.constant 0 : i32
    %c0_i32_0 = arith.constant 0 : i32
    %c0_i32_1 = arith.constant 0 : i32
    return %c0_i32, %c0_i32_0 : i32, i32
  }
  func.func @transform_31(%arg0: i32) -> (i32, i32) {
    %c0_i32 = arith.constant 0 : i32
    %c0_i32_0 = arith.constant 0 : i32
    %c0_i32_1 = arith.constant 0 : i32
    return %c0_i32, %c0_i32_0 : i32, i32
  }
  func.func @transform_32(%arg0: i32) -> (i32, i32) {
    %c0_i32 = arith.constant 0 : i32
    %c0_i32_0 = arith.constant 0 : i32
    %c0_i32_1 = arith.constant 0 : i32
    return %c0_i32, %c0_i32_0 : i32, i32
  }
  func.func @transform_33(%arg0: i32) -> (i32, i32) {
    %c0_i32 = arith.constant 0 : i32
    %c0_i32_0 = arith.constant 0 : i32
    %c0_i32_1 = arith.constant 0 : i32
    return %c0_i32, %c0_i32_0 : i32, i32
  }
  func.func @transform_34(%arg0: i32) -> (i32, i32) {
    %c0_i32 = arith.constant 0 : i32
    %c0_i32_0 = arith.constant 0 : i32
    %c0_i32_1 = arith.constant 0 : i32
    return %c0_i32, %c0_i32_0 : i32, i32
  }
  func.func @transform_35(%arg0: i32) -> (i32, i32) {
    %c0_i32 = arith.constant 0 : i32
    %c0_i32_0 = arith.constant 0 : i32
    %c0_i32_1 = arith.constant 0 : i32
    return %c0_i32, %c0_i32_0 : i32, i32
  }
  func.func @transform_36(%arg0: i32) -> (i32, i32, i32) {
    %c0_i32 = arith.constant 0 : i32
    %c0_i32_0 = arith.constant 0 : i32
    %c0_i32_1 = arith.constant 0 : i32
    return %arg0, %c0_i32, %c0_i32_0 : i32, i32, i32
  }
}

</mosaic_0001>

<bundles_post_ra>
// kernel: model_forward.1
= control target key start
LH: loop header
LB: loop body
LE: loop exit
PB: predicated region body
PF: predicated region fallthrough
CT: control target
= control target key end

     0   :  { %s728_s21 = smov 0   ;;  %s812_s0 = inlined_call_operand.vmem [shape: f32[16,256], index: 0, kind: input, shape index: {}]   ;;  %s813_s1 = inlined_call_operand.vmem [shape: f32[1,256], index: 1, kind: input, shape index: {}]   ;;  %s814_s2 = inlined_call_operand.vmem [shape: f32[1,256], index: 2, kind: input, shape index: {}]   ;;  %s815_s3 = inlined_call_operand.vmem [shape: bf16[256,128], index: 3, kind: input, shape index: {}]   ;;  %s816_s4 = inlined_call_operand.vmem [shape: f32[1,128], index: 4, kind: input, shape index: {}]   ;;  %s817_s5 = inlined_call_operand.vmem [shape: s32[16,1], index: 5, kind: input, shape index: {}]   ;;  %s818_s6 = inlined_call_operand.vmem [shape: f32[2,1,1], index: 6, kind: output, shape index: {}]  }
   0x1 LB: > { %s597_s22 = sadd.s32 4294967295, %s689_s21   ;;  %p601_p0 = scmp.ge.s32.totalorder %s689_s21, 1  ;;  %s689_s21 = sphi %s728_s21, %s16_s21  }
   0x2   : > { %p221_p1 = scmp.lt.s32.totalorder %s689_s21, 3 }
   0x4   : > { %p222_p2 = pnand %p601_p0, %p221_p1 }
   0x5   : > { %p253_p3 = scmp.lt.s32.totalorder (!%p222_p2), %s597_s22, 1  ;;  %v659_v3 = vld [vmem:[%s815_s3 + $0x40] sm:$0xff] (!%p222_p2)   ;;  %v661_v5 = vld [vmem:[%s815_s3 + $0x48] sm:$0xff] (!%p222_p2)   ;;  %v663_v14 = vld [vmem:[%s815_s3 + $0x50] sm:$0xff] (!%p222_p2)   ;;  %v288_v28 = vlaneseq (!%p222_p2)  ;;  %v691_v57 = vmov (!%p222_p2), 0   ;;  %vm536_vm5 = vcmask (!%p222_p2), 0  }
   0x6   : > { %225 = sbr.rel (%p222_p2) target bundleno = 1035 (0x40b), region = 44  ;;  %v660_v4 = vld [vmem:[%s815_s3] sm:$0xff] (!%p222_p2)   ;;  %625 = vmatprep.subr.bf16.mxu0 (!%p222_p2), %v659_v3  ;;  %v662_v6 = vld [vmem:[%s815_s3 + $0x8] sm:$0xff] (!%p222_p2)   ;;  %v664_v15 = vld [vmem:[%s815_s3 + $0x10] sm:$0xff] (!%p222_p2)   ;;  %657 = vset.pattern.permute.xlu0 (!%p222_p2), %v691_v57  ;;  %v692_v3 = vmov (!%p222_p2), 0.0  }
   0x7   : > { %626 = vmatpush3.bf16.msra.mxu0 (!%p222_p2), %v660_v4  ;;  %v665_v16 = vld [vmem:[%s815_s3 + $0x58] sm:$0xff] (!%p222_p2)   ;;  %v667_v18 = vld [vmem:[%s815_s3 + $0x60] sm:$0xff] (!%p222_p2)   ;;  %v669_v20 = vld [vmem:[%s815_s3 + $0x68] sm:$0xff] (!%p222_p2)   ;;  %v289_v30 = vshrl.u32 (!%p222_p2), %v288_v28, 7  ;;  %v491_v48 = vand.u32 (!%p222_p2), 127, %v288_v28  ;;  %658 = vset.pattern.permute.xlu1 (!%p222_p2), %v691_v57 }
   0x8   : > { %627 = vmatprep.subr.bf16.mxu0 (!%p222_p2), %v661_v5  ;;  %v666_v17 = vld [vmem:[%s815_s3 + $0x18] sm:$0xff] (!%p222_p2)   ;;  %v668_v19 = vld [vmem:[%s815_s3 + $0x20] sm:$0xff] (!%p222_p2)   ;;  %v670_v21 = vld [vmem:[%s815_s3 + $0x28] sm:$0xff] (!%p222_p2)  }
   0x9   : > { %v671_v22 = vld [vmem:[%s815_s3 + $0x70] sm:$0xff] (!%p222_p2)   ;;  %v673_v24 = vld [vmem:[%s815_s3 + $0x78] sm:$0xff] (!%p222_p2)   ;;  %v290_v31 = vsub.s32 (!%p222_p2), 0, %v289_v30  ;;  %v294_v32 = vsub.s32 (!%p222_p2), 1, %v289_v30  ;;  %v268_v33 = vld [vmem:[%s813_s1] sm:$0x3] (!%p222_p2) }
   0xa   : > { %v672_v23 = vld [vmem:[%s815_s3 + $0x30] sm:$0xff] (!%p222_p2)   ;;  %v674_v25 = vld [vmem:[%s815_s3 + $0x38] sm:$0xff] (!%p222_p2)   ;;  %v269_v34 = vld [vmem:[%s814_s2] sm:$0x3] (!%p222_p2)  ;;  %vm492_vm0 = vcmp.lt.s32.totalorder (!%p222_p2), %v491_v48, 81 }
   0xb   : > { %628 = vmatpush3.bf16.msra.mxu0 (!%p222_p2), %v662_v6  ;;  %v291_v35 = vrot.slane (!%p222_p2), %v268_v33, %v290_v31  ;;  %v295_v36 = vrot.slane (!%p222_p2), %v268_v33, %v294_v32  ;;  %v304_v39 = vrot.slane (!%p222_p2), %v269_v34, %v290_v31  ;;  %v308_v40 = vrot.slane (!%p222_p2), %v269_v34, %v294_v32  ;;  %v605_v50 = vld [vmem:[%s816_s4] ss:$0 sm:$0xff] (!%p222_p2) }
   0xc   : > { %629 = vmatprep.subr.bf16.mxu0 (!%p222_p2), %v663_v14  ;;  %v512_v4 = vsel (!%p222_p2), %vm492_vm0, 0.00125, %v692_v3 }
   0xd   : > { %s820_s22 = smov (!%p253_p3, %s597_s22), 1 }
   0xe   : > { %s624_s23 = sshll.u32 %s820_s22, 4  ;;  %s604_s19 = sshll.u32 %s820_s22, 3 }
   0xf   : > { %s257_s26 = scalar_lea.vmem %s812_s0, %s624_s23  ;;  %630 = vmatpush3.bf16.msra.mxu0 %v664_v15  ;;  %s261_s24 = scalar_lea.vmem %s817_s5, %s604_s19 }
  0x10   : > { %v266_v0 = vld [vmem:[%s257_s26] sm:$0xff]  ;;  %v267_v1 = vld [vmem:[%s257_s26 + $0x8] sm:$0xff]  ;;  %631 = vmatprep.subr.bf16.mxu0 %v665_v16  ;;  %s264_s27 = scalar_lea.vmem %s818_s6, %s820_s22 }
  0x11   : > { %v270_v2 = vadd.f32 %v267_v1, %v266_v0  ;;  %v505_v58 = vld [vmem:[%s261_s24] sm:$0xff] }
  0x12   : > { %vm506_vm1 = vcmp.lt.s32.totalorder %v505_v58, 0 }
  0x13   : > { %271 = vadd.xlane.f32.xlu0 %v270_v2  ;;  %632 = vmatpush3.bf16.msra.mxu0 %v666_v17  ;;  %v507_v59 = vsel %vm506_vm1, 0, %v505_v58  ;;  %v514_v60 = vsel %vm506_vm1, 1, %v691_v57 }
  0x14   : > { %633 = vmatprep.subr.bf16.mxu0 %v667_v18 }
  0x17   : > { %634 = vmatpush3.bf16.msra.mxu0 %v668_v19 }
  0x18   : > { %635 = vmatprep.subr.bf16.mxu0 %v669_v20 }
  0x1b   : > { %636 = vmatpush3.bf16.msra.mxu0 %v670_v21 }
  0x1c   : > { %637 = vmatprep.subr.bf16.mxu0 %v671_v22 }
  0x1f   : > { %638 = vmatpush3.bf16.msra.mxu0 %v672_v23 }
  0x20   : > { %639 = vmatprep.subr.bf16.mxu0 %v673_v24 }
  0x23   : > { %640 = vmatpush3.bf16.msra.mxu0 %v674_v25 }
  0xa0   : > { %v272_v7 = vpop.xlane.xlu0 %271 }
  0xa1   : > { %v274_v8 = vmul.f32 0.00390625, %v272_v7 }
  0xa3   : > { %v275_v9 = vsub.f32 %v266_v0, %v274_v8  ;;  %v276_v10 = vsub.f32 %v267_v1, %v274_v8 }
  0xa5   : > { %v277_v11 = vmul.f32 %v275_v9, %v275_v9  ;;  %v278_v12 = vmul.f32 %v276_v10, %v276_v10 }
  0xa7   : > { %v279_v13 = vadd.f32 %v278_v12, %v277_v11 }
  0xa9   : > { %280 = vadd.xlane.f32.xlu0 %v279_v13 }
  0xbf   : > { %509 = vperm.xlu0 %657, %v507_v59  }
 0x136   : > { %v281_v26 = vpop.xlane.xlu0 %280 }
 0x137   : > { %v282_v27 = vmul.f32 0.00390625, %v281_v26 }
 0x139   : > { %v283_v29 = vadd.f32 1e-05, %v282_v27 }
 0x13b   : > { %675 = vrsqrt.f32 %v283_v29 }
 0x13e   : > { %v510_v1 = vpop.permute.xlu0 %509 }
 0x13f   : > { %vm511_vm2 = vcmp.eq.s32.totalorder %v491_v48, %v510_v1 }
 0x140   : > { %v513_v5 = vsel %vm511_vm2, 0.9, %v512_v4 }
 0x145   : > { %v676_v37 = vpop.eup %675 }
 0x146   : > { %v286_v38 = vmul.f32 %v676_v37, %v276_v10  ;;  %v285_v41 = vmul.f32 %v676_v37, %v275_v9 }
 0x148   : > { %v299_v42 = vmul.f32 %v295_v36, %v286_v38  ;;  %v298_v43 = vmul.f32 %v291_v35, %v285_v41 }
 0x14a   : > { %v312_v44 = vadd.f32 %v308_v40, %v299_v42  ;;  %v311_v45 = vadd.f32 %v304_v39, %v298_v43 }
 0x14c   : > { %v314_v46 = vpack.c.bf16 %v312_v44, %v312_v44  ;;  %v313_v47 = vpack.c.bf16 %v311_v45, %v311_v45 }
 0x14e   : > { %482 = vmatprep.mubr.bf16.mxu0 %v314_v46 }
 0x14f   : > { %483 = vmatmul.mubr.bf16.vlgmr.msra.gmra.mrb[0].mxu0 %v313_v47 }
 0x222   : > { %v641_v49 = vpop.f32.mrb[0].mxu0 }
 0x223   : > { %v642_v51 = vpop.f32.mrb[1].mxu0 }
 0x224   : > { %v643_v52 = vadd.f32 %v642_v51, %v641_v49  ;;  %v644_v53 = vpop.f32.mrb[2].mxu0 }
 0x225   : > { %v645_v54 = vpop.f32.mrb[3].mxu0 }
 0x226   : > { %v485_v55 = vadd.f32 %v643_v52, %v605_v50 }
 0x228   : > { %v493_v56 = vsel %vm492_vm0, %v485_v55, -1e+09 }
 0x229   : > { %494 = vmax.xlane.f32.xlu1 %v493_v56 }
 0x2b6   : > { %v495_v61 = vpop.xlane.xlu1 %494 }
 0x2b7   : > { %v496_v62 = vsub.f32 %v493_v56, %v495_v61 }
 0x2b9   : > { %v497_v63 = vmul.f32 1.442695, %v496_v62 }
 0x2bb   : > { %677 = vpow2.f32 %v497_v63 }
 0x2c5   : > { %v678_v0 = vpop.eup %677 }
 0x2c6   : > { %499 = vadd.xlane.f32.xlu1 %v678_v0 }
 0x2d7   : > { %516 = vperm.xlu1 %658, %v514_v60  }
 0x353   : > { %v500_v2 = vpop.xlane.xlu1 %499 }
 0x354   : > { %679 = vlog2.f32 %v500_v2 }
 0x357   : > { %v517_v6 = vpop.permute.xlu1 %516 }
 0x358   : > { %vm518_vm3 = vcmp.eq.s32.totalorder %v517_v6, 1 }
 0x359   : > { %v519_v7 = vsel %vm518_vm3, 0.0, %v513_v5 }
 0x35a   : > { %v521_v8 = vmax.f32 %v519_v7, 1e-30  ;;  %vm520_vm4 = vcmp.gt.f32.partialorder %v519_v7, 0.0 }
 0x35c   : > { %681 = vlog2.f32 %v521_v8 }
 0x35e   : > { %v680_v9 = vpop.eup %679 }
 0x35f   : > { %v502_v10 = vmul.f32 0.6931472, %v680_v9 }
 0x361   : > { %v503_v11 = vadd.f32 %v502_v10, %v495_v61 }
 0x363   : > { %v504_v13 = vsub.f32 %v493_v56, %v503_v11 }
 0x366   : > { %v682_v12 = vpop.eup %681 }
 0x367   : > { %v523_v14 = vmul.f32 0.6931472, %v682_v12 }
 0x369   : > { %v524_v15 = vsub.f32 %v523_v14, %v504_v13 }
 0x36b   : > { %v525_v16 = vmul.f32 %v524_v15, %v519_v7 }
 0x36d   : > { %v526_v17 = vsel %vm520_vm4, %v525_v16, 0.0 }
 0x36e   : > { %527 = vadd.xlane.f32.xlu1 %v526_v17 }
 0x3fb   : > { %v528_v18 = vpop.xlane.xlu1 %527 }
 0x3fc   : > { %v529_v19 = vrot.slane %v528_v18, 4 }
 0x3fe   : > { %v530_v20 = vadd.f32 %v529_v19, %v528_v18 }
 0x400   : > { %v531_v21 = vrot.slane %v530_v20, 2 }
 0x402   : > { %v532_v22 = vadd.f32 %v531_v21, %v530_v20 }
 0x404   : > { %v533_v23 = vrot.slane %v532_v22, 1 }
 0x406   : > { %v534_v24 = vadd.f32 %v533_v23, %v532_v22 }
 0x408   : > { %v535_v25 = vmul.f32 0.5, %v534_v24 }
 0x40a   : > { %537 = vst.msk [vmem:[%s264_s27] sm:$0x1] %vm536_vm5, %v535_v25 }
 0x40b PF: > { %s16_s21 = sadd.s32 1, %s689_s21  }
 0x40c   : > { %p13_p4 = scmp.ge.s32.totalorder %s16_s21, 4  }
 0x40e   :  { %15 = sbr.rel (!%p13_p4) target bundleno = 1 (0x1), region = 77 }

// kernel: closed_call.4
= control target key start
LH: loop header
LB: loop body
LE: loop exit
PB: predicated region body
PF: predicated region fallthrough
CT: control target
= control target key end

     0   :  { %s10205_s6 = smov 1   ;;  %s10206_s10 = smov 2   ;;  %s11921_s0 = inlined_call_operand.smem [shape: u32[37], index: -1, kind: input, shape index: {}] }
   0x1   :  { %s10261_s5 = sld [smem:[%s11921_s0]]   ;;  %s10207_s14 = smov 3  }
   0x2   :  { %s10266_s9 = sld [smem:[%s11921_s0 + %s10205_s6]]   ;;  %s10208_s18 = smov 4  }
   0x3   :  { %s10271_s13 = sld [smem:[%s11921_s0 + %s10206_s10]]   ;;  %s10209_s22 = smov 5  }
   0x4   :  { %s10276_s17 = sld [smem:[%s11921_s0 + %s10207_s14]]   ;;  %s10210_s26 = smov 6  }
   0x5   :  { %s10281_s21 = sld [smem:[%s11921_s0 + %s10208_s18]]   ;;  %s10211_s30 = smov 7  }
   0x6   :  { %s10286_s25 = sld [smem:[%s11921_s0 + %s10209_s22]]   ;;  %s10212_s4 = smov 8  }
   0x7   :  { %s10291_s29 = sld [smem:[%s11921_s0 + %s10210_s26]]   ;;  %s10213_s10 = smov 9  }
   0x8   :  { %s10296_s3 = sld [smem:[%s11921_s0 + %s10211_s30]]   ;;  %s10214_s15 = smov 10  }
   0x9   :  { %11930 = sst [smem:[#allocation2_spill]] %s10271_s13  ;;  %s10215_s20 = smov 11  }
   0xa   :  { %s10301_s8 = sld [smem:[%s11921_s0 + %s10212_s4]]   ;;  %s10216_s26 = smov 12  }
   0xb   :  { %s10306_s14 = sld [smem:[%s11921_s0 + %s10213_s10]]   ;;  %s10217_s1 = smov 13  }
   0xc   :  { %s10311_s19 = sld [smem:[%s11921_s0 + %s10214_s15]]   ;;  %s10218_s7 = smov 14  }
   0xd   :  { %s10316_s24 = sld [smem:[%s11921_s0 + %s10215_s20]]   ;;  %s10219_s15 = smov 15  }
   0xe   :  { %11931 = sst [smem:[#allocation3_spill]] %s10296_s3  ;;  %s10220_s22 = smov 16  }
   0xf   :  { %s10321_s30 = sld [smem:[%s11921_s0 + %s10216_s26]]   ;;  %s10221_s28 = smov 17  }
  0x10   :  { %11932 = sst [smem:[#allocation4_spill]] %s10301_s8 }
  0x11   :  { %11933 = sst [smem:[#allocation5_spill]] %s10306_s14 }
  0x12   :  { %11934 = sst [smem:[#allocation6_spill]] %s10311_s19 }
  0x13   :  { %11935 = sst [smem:[#allocation7_spill]] %s10316_s24 }
  0x14   :  { %s10326_s6 = sld [smem:[%s11921_s0 + %s10217_s1]]  }
  0x15   :  { %11936 = sst [smem:[#allocation8_spill]] %s10321_s30 }
  0x16   :  { %s10331_s12 = sld [smem:[%s11921_s0 + %s10218_s7]]   ;;  %s10222_s7 = smov 18  }
  0x17   :  { %s10336_s20 = sld [smem:[%s11921_s0 + %s10219_s15]]   ;;  %s10223_s15 = smov 19  }
  0x18   :  { %s10341_s27 = sld [smem:[%s11921_s0 + %s10220_s22]]   ;;  %s10224_s22 = smov 20  }
  0x19   :  { %s10346_s4 = sld [smem:[%s11921_s0 + %s10221_s28]]   ;;  %s10225_s28 = smov 21  }
  0x1a   :  { %s10351_s30 = sld [smem:[%s11921_s0 + %s10222_s7]]   ;;  %s10226_s7 = smov 22  }
  0x1b   :  { %s10356_s24 = sld [smem:[%s11921_s0 + %s10223_s15]]   ;;  %s10227_s15 = smov 23  }
  0x1c   :  { %s10361_s19 = sld [smem:[%s11921_s0 + %s10224_s22]]   ;;  %s10228_s22 = smov 24  }
  0x1d   :  { %s10366_s14 = sld [smem:[%s11921_s0 + %s10225_s28]]   ;;  %s10229_s28 = smov 25  }
  0x1e   :  { %s10371_s8 = sld [smem:[%s11921_s0 + %s10226_s7]]   ;;  %s10230_s7 = smov 26  }
  0x1f   :  { %s10376_s3 = sld [smem:[%s11921_s0 + %s10227_s15]]   ;;  %s10231_s15 = smov 27  }
  0x20   :  { %11937 = sst [smem:[#allocation9_spill]] %s10351_s30 }
  0x21   :  { %s10381_s13 = sld [smem:[%s11921_s0 + %s10228_s22]]   ;;  %s10232_s22 = smov 28  }
  0x22   :  { %s10386_s30 = sld [smem:[%s11921_s0 + %s10229_s28]]   ;;  %s10233_s28 = smov 29  }
  0x24   :  { %11938 = sst [smem:[#allocation10_spill]] %s10371_s8 }
  0x25   :  { %11939 = sst [smem:[#allocation11_spill]] %s10376_s3 }
  0x26   :  { %s10391_s8 = sld [smem:[%s11921_s0 + %s10230_s7]]   ;;  %s10234_s7 = smov 30  }
  0x27   :  { %11940 = sst [smem:[#allocation12_spill]] %s10381_s13 }
  0x28   :  { %11941 = sst [smem:[#allocation13_spill]] %s10386_s30 }
  0x29   :  { %s10396_s3 = sld [smem:[%s11921_s0 + %s10231_s15]]   ;;  %s10235_s15 = smov 31  }
  0x2a   :  { %s10401_s13 = sld [smem:[%s11921_s0 + %s10232_s22]]   ;;  %s10236_s22 = smov 32  }
  0x2b   :  { %s10406_s30 = sld [smem:[%s11921_s0 + %s10233_s28]]   ;;  %s10237_s28 = smov 33  }
  0x2c   :  { %11942 = sst [smem:[#allocation14_spill]] %s10391_s8 }
  0x2d   :  { %s10411_s8 = sld [smem:[%s11921_s0 + %s10234_s7]]   ;;  %s10238_s7 = smov 34  }
  0x2f   :  { %11943 = sst [smem:[#allocation15_spill]] %s10396_s3 }
  0x30   :  { %11944 = sst [smem:[#allocation16_spill]] %s10401_s13 }
  0x31   :  { %11945 = sst [smem:[#allocation17_spill]] %s10406_s30 }
  0x32   :  { %s10416_s3 = sld [smem:[%s11921_s0 + %s10235_s15]]   ;;  %s10239_s15 = smov 35  }
  0x33   :  { %11946 = sst [smem:[#allocation18_spill]] %s10411_s8 }
  0x34   :  { %s10421_s13 = sld [smem:[%s11921_s0 + %s10236_s22]]   ;;  %s10240_s22 = smov 36  }
  0x35   :  { %s10426_s30 = sld [smem:[%s11921_s0 + %s10237_s28]]   ;;  %s10443_s28 = smov 0  }
  0x36   :  { %s10431_s8 = sld [smem:[%s11921_s0 + %s10238_s7]]  }
  0x38   :  { %11947 = sst [smem:[#allocation19_spill]] %s10416_s3 }
  0x39   :  { %s10436_s3 = sld [smem:[%s11921_s0 + %s10239_s15]]  }
  0x3a   :  { %11948 = sst [smem:[#allocation20_spill]] %s10421_s13 }
  0x3b   :  { %s10441_s13 = sld [smem:[%s11921_s0 + %s10240_s22]]  }
  0x3c LB: > { %s8390_s1 = sadd.s32 4294967295, %s10203_s28   ;;  %p8394_p0 = scmp.ge.s32.totalorder %s10203_s28, 1  ;;  %s10203_s28 = sphi %s10443_s28, %s83_s28  }
  0x3d   : > { %p1007_p1 = scmp.lt.s32.totalorder %s10203_s28, 3 }
  0x3f   : > { %p1008_p2 = pnand %p8394_p0, %p1007_p1 }
  0x40   : > { %p1100_p3 = scmp.lt.s32.totalorder (!%p1008_p2), %s8390_s1, 1  ;;  %v1163_v3 = vld [vmem:[%s10326_s6] sm:$0xff] (!%p1008_p2)  ;;  %s10241_s7 = smov (!%p1008_p2), 64   ;;  %vm10243_vm0 = vmmov (!%p1008_p2), 0   ;;  %vm4041_vm1 = vcmask (!%p1008_p2), 523264   ;;  %vm4338_vm2 = vcmask (!%p1008_p2), 1043456  }
  0x41   : > { %1011 = sbr.rel (%p1008_p2) target bundleno = 5199 (0x144f), region = 164  ;;  %v1167_v4 = vld [vmem:[%s10326_s6 + $0x20] sm:$0xff] (!%p1008_p2)  ;;  %s11949_s10 = sld [smem:[#allocation9_spill]] (!%p1008_p2)  ;;  %vm4323_vm3 = vcmask (!%p1008_p2), 1040384   ;;  %vm4328_vm4 = vcmask (!%p1008_p2), 1041408   ;;  %vm4333_vm5 = vcmask (!%p1008_p2), 1042432  }
  0x42   : > { %v1171_v5 = vld [vmem:[%s10326_s6 + $0x40] sm:$0xff] (!%p1008_p2)  ;;  %v8400_v6 = vcombine.high (!%p1008_p2), %v1163_v3, %v1167_v4  ;;  %v8399_v7 = vcombine.low (!%p1008_p2), %v1163_v3, %v1167_v4  ;;  %s10244_s11 = smov (!%p1008_p2), 2   ;;  %s10245_s15 = smov (!%p1008_p2), 1   ;;  %vm4343_vm6 = vcmask (!%p1008_p2), 1044480   ;;  %vm4348_vm7 = vcmask (!%p1008_p2), 1045504  }
  0x43   : > { %v1175_v8 = vld [vmem:[%s10326_s6 + $0x60] sm:$0xff] (!%p1008_p2)  ;;  %s10246_s16 = smov (!%p1008_p2), 4   ;;  %s10247_s18 = smov (!%p1008_p2), 3   ;;  %vm4353_vm8 = vcmask (!%p1008_p2), 1046528   ;;  %vm4574_vm11 = vcmask (!%p1008_p2), 64512  }
  0x44   : > { %v8408_v9 = vcombine.high (!%p1008_p2), %v1171_v5, %v1175_v8  ;;  %v1179_v10 = vld [vmem:[%s10326_s6 + $0x80] sm:$0xff] (!%p1008_p2)  ;;  %1973 = vmatprep.subr.bf16.mxu1 (!%p1008_p2), %v8400_v6  ;;  %v8407_v12 = vcombine.low (!%p1008_p2), %v1171_v5, %v1175_v8  ;;  %s10248_s22 = smov (!%p1008_p2), 6   ;;  %s10249_s23 = smov (!%p1008_p2), 5  }
  0x45   : > { %v1183_v11 = vld [vmem:[%s10326_s6 + $0xa0] sm:$0xff] (!%p1008_p2)  ;;  %1974 = vmatpush1.bf16.msra.mxu1 (!%p1008_p2), %v8399_v7  ;;  %s10250_s26 = smov (!%p1008_p2), 7  }
  0x46   : > { %1975 = vmatprep.subr.bf16.mxu1 (!%p1008_p2), %v8408_v9  ;;  %v8416_v13 = vcombine.high (!%p1008_p2), %v1179_v10, %v1183_v11  ;;  %v1187_v14 = vld [vmem:[%s10326_s6 + $0xc0] sm:$0xff] (!%p1008_p2)  ;;  %v8415_v16 = vcombine.low (!%p1008_p2), %v1179_v10, %v1183_v11  ;;  %v1164_v10 = vld [vmem:[%s10326_s6 + $0x8] sm:$0xff] (!%p1008_p2) }
  0x47   : > { %v1191_v15 = vld [vmem:[%s10326_s6 + $0xe0] sm:$0xff] (!%p1008_p2)  ;;  %v1168_v11 = vld [vmem:[%s10326_s6 + $0x28] sm:$0xff] (!%p1008_p2) }
  0x48   : > { %s11974_s1 = smov (!%p1100_p3, %s8390_s1), 1  ;;  %v1195_v17 = vld [vmem:[%s10326_s6 + $0x100] sm:$0xff]  ;;  %v8424_v19 = vcombine.high %v1187_v14, %v1191_v15  ;;  %v8423_v20 = vcombine.low %v1187_v14, %v1191_v15 }
  0x49   : > { %s9181_s0 = sshll.u32 %s11974_s1, 4  ;;  %1976 = vmatpush1.bf16.msra.mxu1 %v8407_v12  ;;  %v1199_v18 = vld [vmem:[%s10326_s6 + $0x120] sm:$0xff]  ;;  %v8402_v12 = vcombine.high %v1164_v10, %v1168_v11 }
  0x4a   : > { %s10457_s2 = scalar_lea.vmem %s10261_s5, %s9181_s0  ;;  %1977 = vmatprep.subr.bf16.mxu1 %v8416_v13  ;;  %v1203_v21 = vld [vmem:[%s10326_s6 + $0x140] sm:$0xff]  ;;  %v8432_v23 = vcombine.high %v1195_v17, %v1199_v18  ;;  %v8431_v24 = vcombine.low %v1195_v17, %v1199_v18  ;;  %v8401_v13 = vcombine.low %v1164_v10, %v1168_v11  ;;  %v1252_v11 = vld [vmem:[%s10326_s6 + $0x2c8] sm:$0xff] }
  0x4b   : > { %v10460_v0 = vld [vmem:[%s10457_s2] sm:$0xff]  ;;  %v10463_v1 = vld [vmem:[%s10457_s2 + $0x8] sm:$0xff] }
  0x4c   : > { %v1118_v2 = vadd.f32 %v10463_v1, %v10460_v0  ;;  %v1207_v22 = vld [vmem:[%s10326_s6 + $0x160] sm:$0xff] }
  0x4d   : > { %1978 = vmatpush1.bf16.msra.mxu1 %v8415_v16  ;;  %v1211_v25 = vld [vmem:[%s10326_s6 + $0x180] sm:$0xff]  ;;  %v8440_v27 = vcombine.high %v1203_v21, %v1207_v22  ;;  %v8439_v28 = vcombine.low %v1203_v21, %v1207_v22  ;;  %v1136_v16 = vlaneseq }
  0x4e   : > { %1119 = vadd.xlane.f32.xlu0 %v1118_v2  ;;  %1979 = vmatprep.subr.bf16.mxu1 %v8424_v19  ;;  %v1215_v26 = vld [vmem:[%s10326_s6 + $0x1a0] sm:$0xff] }
  0x4f   : > { %v1219_v29 = vld [vmem:[%s10326_s6 + $0x1c0] sm:$0xff]  ;;  %v8448_v31 = vcombine.high %v1211_v25, %v1215_v26  ;;  %v8447_v32 = vcombine.low %v1211_v25, %v1215_v26  ;;  %v10503_v18 = vshrl.u32 %v1136_v16, 7  ;;  %v1264_v16 = vld [vmem:[%s10326_s6 + $0x328] sm:$0xff] }
  0x50   : > { %v1223_v30 = vld [vmem:[%s10326_s6 + $0x1e0] sm:$0xff] }
  0x51   : > { %1980 = vmatpush1.bf16.msra.mxu1 %v8423_v20  ;;  %v1227_v33 = vld [vmem:[%s10326_s6 + $0x200] sm:$0xff]  ;;  %v8456_v35 = vcombine.high %v1219_v29, %v1223_v30  ;;  %v8455_v36 = vcombine.low %v1219_v29, %v1223_v30  ;;  %v10506_v19 = vsub.s32 0, %v10503_v18  ;;  %v10509_v20 = vsub.s32 1, %v10503_v18 }
  0x52   : > { %1981 = vmatprep.subr.bf16.mxu1 %v8432_v23  ;;  %v1231_v34 = vld [vmem:[%s10326_s6 + $0x220] sm:$0xff] }
  0x53   : > { %v1235_v37 = vld [vmem:[%s10326_s6 + $0x240] sm:$0xff]  ;;  %v8464_v39 = vcombine.high %v1227_v33, %v1231_v34  ;;  %v8463_v40 = vcombine.low %v1227_v33, %v1231_v34  ;;  %v1172_v34 = vld [vmem:[%s10326_s6 + $0x48] sm:$0xff] }
  0x54   : > { %v1239_v38 = vld [vmem:[%s10326_s6 + $0x260] sm:$0xff] }
  0x55   : > { %1982 = vmatpush1.bf16.msra.mxu1 %v8431_v24  ;;  %v1243_v41 = vld [vmem:[%s10326_s6 + $0x280] sm:$0xff]  ;;  %v8472_v43 = vcombine.high %v1235_v37, %v1239_v38  ;;  %v8471_v44 = vcombine.low %v1235_v37, %v1239_v38 }
  0x56   : > { %1983 = vmatprep.subr.bf16.mxu1 %v8440_v27  ;;  %v1247_v42 = vld [vmem:[%s10326_s6 + $0x2a0] sm:$0xff] }
  0x57   : > { %v8480_v45 = vcombine.high %v1243_v41, %v1247_v42  ;;  %v8479_v53 = vcombine.low %v1243_v41, %v1247_v42  ;;  %v1251_v54 = vld [vmem:[%s10326_s6 + $0x2c0] sm:$0xff] }
  0x58   : > { %v1255_v55 = vld [vmem:[%s10326_s6 + $0x2e0] sm:$0xff] }
  0x59   : > { %1984 = vmatpush1.bf16.msra.mxu1 %v8439_v28  ;;  %v8488_v56 = vcombine.high %v1251_v54, %v1255_v55  ;;  %v8487_v57 = vcombine.low %v1251_v54, %v1255_v55  ;;  %v1259_v58 = vld [vmem:[%s10326_s6 + $0x300] sm:$0xff]  ;;  %v1212_v55 = vld [vmem:[%s10326_s6 + $0x188] sm:$0xff] }
  0x5a   : > { %1985 = vmatprep.subr.bf16.mxu1 %v8448_v31  ;;  %v1263_v59 = vld [vmem:[%s10326_s6 + $0x320] sm:$0xff] }
  0x5b   : > { %v1267_v60 = vld [vmem:[%s10326_s6 + $0x340] sm:$0xff]  ;;  %v8496_v61 = vcombine.high %v1259_v58, %v1263_v59  ;;  %v8495_v62 = vcombine.low %v1259_v58, %v1263_v59  ;;  %v1220_v59 = vld [vmem:[%s10326_s6 + $0x1c8] sm:$0xff] }
  0x5c   : > { %v1271_v63 = vld [vmem:[%s10326_s6 + $0x360] sm:$0xff] }
  0x5d   : > { %1986 = vmatpush1.bf16.msra.mxu1 %v8447_v32  ;;  %v1279_v2 = vld [vmem:[%s10326_s6 + $0x3a0] sm:$0xff]  ;;  %v8503_v3 = vcombine.low %v1267_v60, %v1271_v63 }
  0x5e   : > { %1987 = vmatprep.subr.bf16.mxu1 %v8456_v35  ;;  %v1283_v5 = vld [vmem:[%s10326_s6 + $0x3c0] sm:$0xff]  ;;  %v1176_v35 = vld [vmem:[%s10326_s6 + $0x68] sm:$0xff] }
  0x5f   : > { %v1287_v6 = vld [vmem:[%s10326_s6 + $0x3e0] sm:$0xff]  ;;  %v8410_v38 = vcombine.high %v1172_v34, %v1176_v35  ;;  %v8409_v41 = vcombine.low %v1172_v34, %v1176_v35 }
  0x60   : > { %v8520_v8 = vcombine.high %v1283_v5, %v1287_v6  ;;  %v8519_v9 = vcombine.low %v1283_v5, %v1287_v6  ;;  %v1116_v21 = vld [vmem:[%s10276_s17] sm:$0x3] }
  0x61   : > { %1988 = vmatpush1.bf16.msra.mxu1 %v8455_v36  ;;  %v1117_v22 = vld [vmem:[%s10281_s21] sm:$0x3]  ;;  %v1143_v23 = vrot.slane %v1116_v21, %v10509_v20  ;;  %v1139_v24 = vrot.slane %v1116_v21, %v10506_v19 }
  0x62   : > { %1989 = vmatprep.subr.bf16.mxu1 %v8464_v39  ;;  %v1156_v27 = vrot.slane %v1117_v22, %v10509_v20  ;;  %v1152_v29 = vrot.slane %v1117_v22, %v10506_v19  ;;  %v1180_v39 = vld [vmem:[%s10326_s6 + $0x88] sm:$0xff] }
  0x63   : > { %v1268_v22 = vld [vmem:[%s10326_s6 + $0x348] sm:$0xff] }
  0x64   : > { %v9370_v34 = vld [vmem:[%s10336_s20] ss:$8 sps:$4 sm:$0xff]  }
  0x65   : > { %1990 = vmatpush1.bf16.msra.mxu1 %v8463_v40  ;;  %v1184_v40 = vld [vmem:[%s10326_s6 + $0xa8] sm:$0xff] }
  0x66   : > { %1991 = vmatprep.subr.bf16.mxu1 %v8472_v43  ;;  %v8418_v42 = vcombine.high %v1180_v39, %v1184_v40  ;;  %v1188_v43 = vld [vmem:[%s10326_s6 + $0xc8] sm:$0xff] }
  0x69   : > { %1992 = vmatpush1.bf16.msra.mxu1 %v8471_v44  ;;  %v1192_v44 = vld [vmem:[%s10326_s6 + $0xe8] sm:$0xff] }
  0x6a   : > { %1993 = vmatprep.subr.bf16.mxu1 %v8480_v45  ;;  %v8417_v45 = vcombine.low %v1180_v39, %v1184_v40  ;;  %v1169_v39 = vld [vmem:[%s10326_s6 + $0x30] sm:$0xff] }
  0x6b   : > { %v9371_v40 = vld [vmem:[%s10336_s20 + $0x14] ss:$8 sps:$4 sm:$0xff]  }
  0x6d   : > { %1994 = vmatpush1.bf16.msra.mxu1 %v8479_v53 }
  0x6e   : > { %1995 = vmatprep.subr.bf16.mxu1 %v8488_v56  ;;  %v1216_v56 = vld [vmem:[%s10326_s6 + $0x1a8] sm:$0xff] }
  0x6f   : > { %v8450_v58 = vcombine.high %v1212_v55, %v1216_v56 }
  0x71   : > { %1996 = vmatpush1.bf16.msra.mxu1 %v8487_v57 }
  0x72   : > { %1997 = vmatprep.subr.bf16.mxu1 %v8496_v61  ;;  %v8449_v61 = vcombine.low %v1212_v55, %v1216_v56 }
  0x75   : > { %1998 = vmatpush1.bf16.msra.mxu1 %v8495_v62 }
  0xdb   : > { %v1120_v46 = vpop.xlane.xlu0 %1119 }
  0xdc   : > { %v1122_v47 = vmul.f32 0.00390625, %v1120_v46  ;;  %v8426_v46 = vcombine.high %v1188_v43, %v1192_v44 }
  0xde   : > { %v1123_v48 = vsub.f32 %v10460_v0, %v1122_v47  ;;  %v1124_v49 = vsub.f32 %v10463_v1, %v1122_v47  ;;  %v8504_v0 = vcombine.high %v1267_v60, %v1271_v63  ;;  %v1275_v1 = vld [vmem:[%s10326_s6 + $0x380] sm:$0xff]  ;;  %v1196_v47 = vld [vmem:[%s10326_s6 + $0x108] sm:$0xff] }
  0xdf   : > { %v8512_v4 = vcombine.high %v1275_v1, %v1279_v2  ;;  %v8511_v7 = vcombine.low %v1275_v1, %v1279_v2  ;;  %v1224_v60 = vld [vmem:[%s10326_s6 + $0x1e8] sm:$0xff] }
  0xe0   : > { %v1125_v50 = vmul.f32 %v1123_v48, %v1123_v48  ;;  %v1126_v51 = vmul.f32 %v1124_v49, %v1124_v49  ;;  %1999 = vmatprep.subr.bf16.mxu1 %v8504_v0  ;;  %v8458_v62 = vcombine.high %v1220_v59, %v1224_v60  ;;  %v1228_v63 = vld [vmem:[%s10326_s6 + $0x208] sm:$0xff]  ;;  %v8457_v1 = vcombine.low %v1220_v59, %v1224_v60  ;;  %v9383_v60 = vld [vmem:[%s10336_s20 + $0x54] ss:$8 sps:$4 sm:$0xff]  }
  0xe1   : > { %2000 = vmatpush1.bf16.msra.mxu1 %v8503_v3  ;;  %v1232_v0 = vld [vmem:[%s10326_s6 + $0x228] sm:$0xff] }
  0xe2   : > { %v1127_v52 = vadd.f32 %v1126_v51, %v1125_v50  ;;  %2001 = vmatprep.subr.bf16.mxu1 %v8512_v4  ;;  %v1204_v51 = vld [vmem:[%s10326_s6 + $0x148] sm:$0xff]  ;;  %v8466_v2 = vcombine.high %v1228_v63, %v1232_v0  ;;  %v8465_v5 = vcombine.low %v1228_v63, %v1232_v0  ;;  %v1197_v63 = vld [vmem:[%s10326_s6 + $0x110] sm:$0xff] }
  0xe3   : > { %v1236_v3 = vld [vmem:[%s10326_s6 + $0x248] sm:$0xff]  ;;  %v1201_v0 = vld [vmem:[%s10326_s6 + $0x130] sm:$0xff] }
  0xe4   : > { %1128 = vadd.xlane.f32.xlu0 %v1127_v52  ;;  %v1208_v52 = vld [vmem:[%s10326_s6 + $0x168] sm:$0xff] }
  0xe5   : > { %2002 = vmatpush1.bf16.msra.mxu1 %v8511_v7  ;;  %v8442_v54 = vcombine.high %v1204_v51, %v1208_v52  ;;  %v8441_v57 = vcombine.low %v1204_v51, %v1208_v52  ;;  %v1240_v4 = vld [vmem:[%s10326_s6 + $0x268] sm:$0xff]  ;;  %v1185_v51 = vld [vmem:[%s10326_s6 + $0xb0] sm:$0xff] }
  0xe6   : > { %2003 = vmatprep.subr.bf16.mxu1 %v8520_v8  ;;  %v8474_v6 = vcombine.high %v1236_v3, %v1240_v4  ;;  %v1244_v7 = vld [vmem:[%s10326_s6 + $0x288] sm:$0xff]  ;;  %v9377_v52 = vld [vmem:[%s10336_s20 + $0x34] ss:$8 sps:$4 sm:$0xff]  }
  0xe7   : > { %v1248_v8 = vld [vmem:[%s10326_s6 + $0x2a8] sm:$0xff] }
  0xe8   : > { %v8482_v10 = vcombine.high %v1244_v7, %v1248_v8  ;;  %v9382_v59 = vld [vmem:[%s10336_s20 + $0x40] ss:$8 sps:$4 sm:$0xff]  }
  0xe9   : > { %2004 = vmatpush1.bf16.msra.mxu1 %v8519_v9  ;;  %v8473_v9 = vcombine.low %v1236_v3, %v1240_v4  ;;  %v8436_v4 = vcombine.high %v1197_v63, %v1201_v0 }
  0xea   : > { %2014 = vmatprep.subr.bf16.mxu1 %v8402_v12  ;;  %v1256_v12 = vld [vmem:[%s10326_s6 + $0x2e8] sm:$0xff] }
 0x171   : > { %v1129_v14 = vpop.xlane.xlu0 %1128 }
 0x172   : > { %v1130_v15 = vmul.f32 0.00390625, %v1129_v14  ;;  %v8490_v14 = vcombine.high %v1252_v11, %v1256_v12 }
 0x174   : > { %v1131_v17 = vadd.f32 1e-12, %v1130_v15  ;;  %v1260_v15 = vld [vmem:[%s10326_s6 + $0x308] sm:$0xff] }
 0x175   : > { %v8498_v21 = vcombine.high %v1260_v15, %v1264_v16 }
 0x176   : > { %10089 = vrsqrt.f32 %v1131_v17  ;;  %v8489_v17 = vcombine.low %v1252_v11, %v1256_v12  ;;  %v1213_v11 = vld [vmem:[%s10326_s6 + $0x190] sm:$0xff] }
 0x177   : > { %v1217_v12 = vld [vmem:[%s10326_s6 + $0x1b0] sm:$0xff] }
 0x180   : > { %v10090_v25 = vpop.eup %10089 }
 0x181   : > { %v1134_v26 = vmul.f32 %v10090_v25, %v1124_v49  ;;  %v1133_v28 = vmul.f32 %v10090_v25, %v1123_v48  ;;  %v1200_v48 = vld [vmem:[%s10326_s6 + $0x128] sm:$0xff]  ;;  %v8425_v49 = vcombine.low %v1188_v43, %v1192_v44  ;;  %v1173_v44 = vld [vmem:[%s10326_s6 + $0x50] sm:$0xff] }
 0x182   : > { %v8434_v50 = vcombine.high %v1196_v47, %v1200_v48  ;;  %v8433_v53 = vcombine.low %v1196_v47, %v1200_v48  ;;  %v9376_v48 = vld [vmem:[%s10336_s20 + $0x20] ss:$8 sps:$4 sm:$0xff]  }
 0x183   : > { %v1147_v30 = vmul.f32 %v1143_v23, %v1134_v26  ;;  %v1146_v31 = vmul.f32 %v1139_v24, %v1133_v28  ;;  %v1272_v23 = vld [vmem:[%s10326_s6 + $0x368] sm:$0xff]  ;;  %v8497_v24 = vcombine.low %v1260_v15, %v1264_v16  ;;  %v8452_v15 = vcombine.high %v1213_v11, %v1217_v12  ;;  %v1221_v16 = vld [vmem:[%s10326_s6 + $0x1d0] sm:$0xff] }
 0x184   : > { %v8506_v25 = vcombine.high %v1268_v22, %v1272_v23  ;;  %v1276_v26 = vld [vmem:[%s10326_s6 + $0x388] sm:$0xff]  ;;  %v8505_v28 = vcombine.low %v1268_v22, %v1272_v23  ;;  %v8451_v22 = vcombine.low %v1213_v11, %v1217_v12  ;;  %v1170_v11 = vld [vmem:[%s10326_s6 + $0x38] sm:$0xff] }
 0x185   : > { %v1160_v32 = vadd.f32 %v1156_v27, %v1147_v30  ;;  %v1159_v33 = vadd.f32 %v1152_v29, %v1146_v31  ;;  %v1280_v27 = vld [vmem:[%s10326_s6 + $0x3a8] sm:$0xff] }
 0x186   : > { %v8514_v29 = vcombine.high %v1276_v26, %v1280_v27  ;;  %v1284_v30 = vld [vmem:[%s10326_s6 + $0x3c8] sm:$0xff] }
 0x187   : > { %v10519_v36 = vpack.c.bf16 %v1160_v32, %v1160_v32  ;;  %v10521_v37 = vpack.c.bf16 %v1159_v33, %v1159_v33  ;;  %v1288_v31 = vld [vmem:[%s10326_s6 + $0x3e8] sm:$0xff]  ;;  %v8513_v33 = vcombine.low %v1276_v26, %v1280_v27  ;;  %v1233_v26 = vld [vmem:[%s10326_s6 + $0x230] sm:$0xff] }
 0x188   : > { %v9368_v32 = vld [vmem:[%s10336_s20 + $0x4] ss:$8 sps:$4 sm:$0xff]   ;;  %v8522_v35 = vcombine.high %v1284_v30, %v1288_v31  ;;  %v9394_v23 = vld [vmem:[%s10336_s20 + $0x80] ss:$8 sps:$4 sm:$0xff]   ;;  %v9395_v27 = vld [vmem:[%s10336_s20 + $0x94] ss:$8 sps:$4 sm:$0xff]  }
 0x189   : > { %2005 = vmatprep.mubr.bf16.mxu1 %v10519_v36  ;;  %2981 = vmatprep.subr.bf16.mxu0 %v9368_v32  ;;  %v1241_v32 = vld [vmem:[%s10326_s6 + $0x270] sm:$0xff] }
 0x18a   : > { %2006 = vmatmul.mubr.bf16.vlgmr.msra.gmra.mrb[0].mxu1 %v10521_v37  ;;  %2982 = vmatpush1.bf16.msra.mxu0 %v9370_v34 }
 0x18b   : > { %2015 = vmatpush1.bf16.msra.mxu1 %v8401_v13  ;;  %2046 = vmatprep.mubr.bf16.mxu1 %v10519_v36  ;;  %v8481_v13 = vcombine.low %v1244_v7, %v1248_v8  ;;  %v9388_v7 = vld [vmem:[%s10336_s20 + $0x60] ss:$8 sps:$4 sm:$0xff]   ;;  %v9389_v8 = vld [vmem:[%s10336_s20 + $0x74] ss:$8 sps:$4 sm:$0xff]  }
 0x18c   : > { %2016 = vmatprep.subr.bf16.mxu1 %v8410_v38  ;;  %v1165_v38 = vld [vmem:[%s10326_s6 + $0x10] sm:$0xff]  ;;  %2983 = vmatprep.subr.bf16.mxu0 %v9371_v40 }
 0x18d   : > { %v8404_v43 = vcombine.high %v1165_v38, %v1169_v39  ;;  %v8403_v47 = vcombine.low %v1165_v38, %v1169_v39  ;;  %v1245_v39 = vld [vmem:[%s10326_s6 + $0x290] sm:$0xff] }
 0x18e   : > { %v1249_v40 = vld [vmem:[%s10326_s6 + $0x2b0] sm:$0xff] }
 0x18f   : > { %2017 = vmatpush1.bf16.msra.mxu1 %v8409_v41  ;;  %v8521_v41 = vcombine.low %v1284_v30, %v1288_v31  ;;  %v1237_v31 = vld [vmem:[%s10326_s6 + $0x250] sm:$0xff] }
 0x190   : > { %2018 = vmatprep.subr.bf16.mxu1 %v8418_v42  ;;  %v9373_v42 = vld [vmem:[%s10336_s20 + $0x10] ss:$8 sps:$4 sm:$0xff]   ;;  %v8476_v38 = vcombine.high %v1237_v31, %v1241_v32 }
 0x191   : > { %2984 = vmatpush1.bf16.msra.mxu0 %v9373_v42  ;;  %v8475_v42 = vcombine.low %v1237_v31, %v1241_v32  ;;  %v1206_v32 = vld [vmem:[%s10326_s6 + $0x158] sm:$0xff] }
 0x193   : > { %2019 = vmatpush1.bf16.msra.mxu1 %v8417_v45  ;;  %v1177_v45 = vld [vmem:[%s10326_s6 + $0x70] sm:$0xff] }
 0x194   : > { %2020 = vmatprep.subr.bf16.mxu1 %v8426_v46  ;;  %v9374_v46 = vld [vmem:[%s10336_s20 + $0x24] ss:$8 sps:$4 sm:$0xff]   ;;  %v8411_v55 = vcombine.low %v1173_v44, %v1177_v45 }
 0x195   : > { %2985 = vmatprep.subr.bf16.mxu0 %v9374_v46  ;;  %v1257_v46 = vld [vmem:[%s10326_s6 + $0x2f0] sm:$0xff] }
 0x196   : > { %2986 = vmatpush1.bf16.msra.mxu0 %v9376_v48  ;;  %v8483_v48 = vcombine.low %v1245_v39, %v1249_v40 }
 0x197   : > { %2021 = vmatpush1.bf16.msra.mxu1 %v8425_v49  ;;  %v8412_v49 = vcombine.high %v1173_v44, %v1177_v45  ;;  %2987 = vmatprep.subr.bf16.mxu0 %v9377_v52  ;;  %v8484_v44 = vcombine.high %v1245_v39, %v1249_v40  ;;  %v1253_v45 = vld [vmem:[%s10326_s6 + $0x2d0] sm:$0xff]  ;;  %v1218_v39 = vld [vmem:[%s10326_s6 + $0x1b8] sm:$0xff] }
 0x198   : > { %2022 = vmatprep.subr.bf16.mxu1 %v8434_v50  ;;  %v1181_v50 = vld [vmem:[%s10326_s6 + $0x90] sm:$0xff] }
 0x199   : > { %v8420_v56 = vcombine.high %v1181_v50, %v1185_v51  ;;  %v1265_v52 = vld [vmem:[%s10326_s6 + $0x330] sm:$0xff] }
 0x19b   : > { %2023 = vmatpush1.bf16.msra.mxu1 %v8433_v53  ;;  %v9379_v53 = vld [vmem:[%s10336_s20 + $0x30] ss:$8 sps:$4 sm:$0xff]  }
 0x19c   : > { %2024 = vmatprep.subr.bf16.mxu1 %v8442_v54  ;;  %v9380_v54 = vld [vmem:[%s10336_s20 + $0x44] ss:$8 sps:$4 sm:$0xff]   ;;  %2988 = vmatpush1.bf16.msra.mxu0 %v9379_v53  ;;  %v9407_v53 = vld [vmem:[%s10336_s20 + $0xd4] ss:$8 sps:$4 sm:$0xff]  }
 0x19d   : > { %2989 = vmatprep.subr.bf16.mxu0 %v9380_v54  ;;  %v8491_v54 = vcombine.low %v1253_v45, %v1257_v46 }
 0x19f   : > { %2025 = vmatpush1.bf16.msra.mxu1 %v8441_v57  ;;  %v1189_v57 = vld [vmem:[%s10326_s6 + $0xd0] sm:$0xff] }
 0x1a0   : > { %2026 = vmatprep.subr.bf16.mxu1 %v8450_v58  ;;  %v1193_v58 = vld [vmem:[%s10326_s6 + $0xf0] sm:$0xff]  ;;  %2990 = vmatpush1.bf16.msra.mxu0 %v9382_v59  ;;  %v9410_v59 = vld [vmem:[%s10336_s20 + $0xe4] ss:$8 sps:$4 sm:$0xff]  }
 0x1a1   : > { %2991 = vmatprep.subr.bf16.mxu0 %v9383_v60  ;;  %v8427_v3 = vcombine.low %v1189_v57, %v1193_v58 }
 0x1a3   : > { %2027 = vmatpush1.bf16.msra.mxu1 %v8449_v61  ;;  %v8419_v61 = vcombine.low %v1181_v50, %v1185_v51  ;;  %v8492_v50 = vcombine.high %v1253_v45, %v1257_v46  ;;  %v1261_v51 = vld [vmem:[%s10326_s6 + $0x310] sm:$0xff]  ;;  %v1230_v46 = vld [vmem:[%s10326_s6 + $0x218] sm:$0xff] }
 0x1a4   : > { %2028 = vmatprep.subr.bf16.mxu1 %v8458_v62  ;;  %v8428_v62 = vcombine.high %v1189_v57, %v1193_v58  ;;  %v1269_v57 = vld [vmem:[%s10326_s6 + $0x350] sm:$0xff]  ;;  %v8499_v60 = vcombine.low %v1261_v51, %v1265_v52 }
 0x1a5   : > { %v1273_v58 = vld [vmem:[%s10326_s6 + $0x370] sm:$0xff] }
 0x1a7   : > { %2029 = vmatpush1.bf16.msra.mxu1 %v8457_v1  ;;  %v9385_v1 = vld [vmem:[%s10336_s20 + $0x50] ss:$8 sps:$4 sm:$0xff]  }
 0x1a8   : > { %2030 = vmatprep.subr.bf16.mxu1 %v8466_v2  ;;  %v9386_v2 = vld [vmem:[%s10336_s20 + $0x64] ss:$8 sps:$4 sm:$0xff]   ;;  %2992 = vmatpush1.bf16.msra.mxu0 %v9385_v1  ;;  %v9413_v1 = vld [vmem:[%s10336_s20 + $0xf4] ss:$8 sps:$4 sm:$0xff]  }
 0x1a9   : > { %2993 = vmatprep.subr.bf16.mxu0 %v9386_v2  ;;  %v8507_v2 = vcombine.low %v1269_v57, %v1273_v58 }
 0x1ab   : > { %2031 = vmatpush1.bf16.msra.mxu1 %v8465_v5  ;;  %v1205_v5 = vld [vmem:[%s10326_s6 + $0x150] sm:$0xff] }
 0x1ac   : > { %2032 = vmatprep.subr.bf16.mxu1 %v8474_v6  ;;  %v1209_v6 = vld [vmem:[%s10326_s6 + $0x170] sm:$0xff]  ;;  %2994 = vmatpush1.bf16.msra.mxu0 %v9388_v7  ;;  %v9418_v7 = vld [vmem:[%s10336_s20 + $0x104] ss:$8 sps:$4 sm:$0xff]  }
 0x1ad   : > { %2995 = vmatprep.subr.bf16.mxu0 %v9389_v8 }
 0x1af   : > { %2033 = vmatpush1.bf16.msra.mxu1 %v8473_v9  ;;  %v8435_v9 = vcombine.low %v1197_v63, %v1201_v0  ;;  %v1277_v63 = vld [vmem:[%s10326_s6 + $0x390] sm:$0xff] }
 0x1b0   : > { %2034 = vmatprep.subr.bf16.mxu1 %v8482_v10  ;;  %v8444_v10 = vcombine.high %v1205_v5, %v1209_v6  ;;  %v1281_v0 = vld [vmem:[%s10326_s6 + $0x3b0] sm:$0xff] }
 0x1b1   : > { %v8515_v8 = vcombine.low %v1277_v63, %v1281_v0 }
 0x1b3   : > { %2035 = vmatpush1.bf16.msra.mxu1 %v8481_v13  ;;  %v9391_v13 = vld [vmem:[%s10336_s20 + $0x70] ss:$8 sps:$4 sm:$0xff]  }
 0x1b4   : > { %2036 = vmatprep.subr.bf16.mxu1 %v8490_v14  ;;  %v8443_v14 = vcombine.low %v1205_v5, %v1209_v6  ;;  %2996 = vmatpush1.bf16.msra.mxu0 %v9391_v13  ;;  %v1285_v5 = vld [vmem:[%s10326_s6 + $0x3d0] sm:$0xff] }
 0x1b5   : > { %v1289_v6 = vld [vmem:[%s10326_s6 + $0x3f0] sm:$0xff] }
 0x1b6   : > { %v8523_v12 = vcombine.low %v1285_v5, %v1289_v6 }
 0x1b7   : > { %2037 = vmatpush1.bf16.msra.mxu1 %v8489_v17  ;;  %v1225_v17 = vld [vmem:[%s10326_s6 + $0x1f0] sm:$0xff] }
 0x1b8   : > { %2038 = vmatprep.subr.bf16.mxu1 %v8498_v21  ;;  %v9392_v21 = vld [vmem:[%s10336_s20 + $0x84] ss:$8 sps:$4 sm:$0xff]  }
 0x1b9   : > { %2997 = vmatprep.subr.bf16.mxu0 %v9392_v21  ;;  %v1182_v21 = vld [vmem:[%s10326_s6 + $0x98] sm:$0xff] }
 0x1ba   : > { %2998 = vmatpush1.bf16.msra.mxu0 %v9394_v23 }
 0x1bb   : > { %2039 = vmatpush1.bf16.msra.mxu1 %v8497_v24  ;;  %v8460_v24 = vcombine.high %v1221_v16, %v1225_v17  ;;  %2999 = vmatprep.subr.bf16.mxu0 %v9395_v27 }
 0x1bc   : > { %2040 = vmatprep.subr.bf16.mxu1 %v8506_v25  ;;  %v1229_v25 = vld [vmem:[%s10326_s6 + $0x210] sm:$0xff] }
 0x1bd   : > { %v8468_v30 = vcombine.high %v1229_v25, %v1233_v26  ;;  %v8467_v34 = vcombine.low %v1229_v25, %v1233_v26  ;;  %v1190_v25 = vld [vmem:[%s10326_s6 + $0xd8] sm:$0xff] }
 0x1be   : > { %v1194_v26 = vld [vmem:[%s10326_s6 + $0xf8] sm:$0xff] }
 0x1bf   : > { %2041 = vmatpush1.bf16.msra.mxu1 %v8505_v28  ;;  %v8459_v28 = vcombine.low %v1221_v16, %v1225_v17  ;;  %v8429_v31 = vcombine.low %v1190_v25, %v1194_v26 }
 0x1c0   : > { %2042 = vmatprep.subr.bf16.mxu1 %v8514_v29  ;;  %v9397_v29 = vld [vmem:[%s10336_s20 + $0x90] ss:$8 sps:$4 sm:$0xff]  }
 0x1c1   : > { %3000 = vmatpush1.bf16.msra.mxu0 %v9397_v29  ;;  %v1198_v29 = vld [vmem:[%s10326_s6 + $0x118] sm:$0xff] }
 0x1c3   : > { %2043 = vmatpush1.bf16.msra.mxu1 %v8513_v33  ;;  %v9398_v33 = vld [vmem:[%s10336_s20 + $0xa4] ss:$8 sps:$4 sm:$0xff]  }
 0x1c4   : > { %2044 = vmatprep.subr.bf16.mxu1 %v8522_v35  ;;  %v9400_v35 = vld [vmem:[%s10336_s20 + $0xa0] ss:$8 sps:$4 sm:$0xff]   ;;  %3001 = vmatprep.subr.bf16.mxu0 %v9398_v33  ;;  %v1210_v33 = vld [vmem:[%s10326_s6 + $0x178] sm:$0xff] }
 0x1c5   : > { %3002 = vmatpush1.bf16.msra.mxu0 %v9400_v35  ;;  %v8446_v35 = vcombine.high %v1206_v32, %v1210_v33  ;;  %v8445_v40 = vcombine.low %v1206_v32, %v1210_v33 }
 0x1c7   : > { %2045 = vmatpush1.bf16.msra.mxu1 %v8521_v41  ;;  %v9401_v41 = vld [vmem:[%s10336_s20 + $0xb4] ss:$8 sps:$4 sm:$0xff]  }
 0x1c8   : > { %2055 = vmatprep.subr.bf16.mxu1 %v8404_v43  ;;  %v9403_v43 = vld [vmem:[%s10336_s20 + $0xb0] ss:$8 sps:$4 sm:$0xff]   ;;  %3003 = vmatprep.subr.bf16.mxu0 %v9401_v41 }
 0x1c9   : > { %3004 = vmatpush1.bf16.msra.mxu0 %v9403_v43  ;;  %v1226_v43 = vld [vmem:[%s10326_s6 + $0x1f8] sm:$0xff] }
 0x1ca   : > { %2047 = vmatmul.mubr.bf16.vlgmr.msra.gmra.mrb[4].mxu1 %v10521_v37 }
 0x1cb   : > { %2056 = vmatpush1.bf16.msra.mxu1 %v8403_v47  ;;  %2087 = vmatprep.mubr.bf16.mxu1 %v10519_v36  ;;  %v9404_v47 = vld [vmem:[%s10336_s20 + $0xc4] ss:$8 sps:$4 sm:$0xff]  }
 0x1cc   : > { %2057 = vmatprep.subr.bf16.mxu1 %v8412_v49  ;;  %v9406_v49 = vld [vmem:[%s10336_s20 + $0xc0] ss:$8 sps:$4 sm:$0xff]   ;;  %3005 = vmatprep.subr.bf16.mxu0 %v9404_v47  ;;  %v1234_v47 = vld [vmem:[%s10326_s6 + $0x238] sm:$0xff] }
 0x1cd   : > { %3006 = vmatpush1.bf16.msra.mxu0 %v9406_v49  ;;  %v8470_v49 = vcombine.high %v1230_v46, %v1234_v47 }
 0x1ce   : > { %3007 = vmatprep.subr.bf16.mxu0 %v9407_v53 }
 0x1cf   : > { %2058 = vmatpush1.bf16.msra.mxu1 %v8411_v55  ;;  %v9409_v55 = vld [vmem:[%s10336_s20 + $0xd0] ss:$8 sps:$4 sm:$0xff]  }
 0x1d0   : > { %2059 = vmatprep.subr.bf16.mxu1 %v8420_v56  ;;  %v8500_v56 = vcombine.high %v1261_v51, %v1265_v52  ;;  %v1242_v51 = vld [vmem:[%s10326_s6 + $0x278] sm:$0xff]  ;;  %v8469_v52 = vcombine.low %v1230_v46, %v1234_v47  ;;  %v9430_v46 = vld [vmem:[%s10336_s20 + $0x144] ss:$8 sps:$4 sm:$0xff]   ;;  %v9428_v47 = vld [vmem:[%s10336_s20 + $0x140] ss:$8 sps:$4 sm:$0xff]  }
 0x1d1   : > { %3008 = vmatpush1.bf16.msra.mxu0 %v9409_v55  ;;  %v1250_v55 = vld [vmem:[%s10326_s6 + $0x2b8] sm:$0xff] }
 0x1d2   : > { %3009 = vmatprep.subr.bf16.mxu0 %v9410_v59  ;;  %v1258_v59 = vld [vmem:[%s10326_s6 + $0x2f8] sm:$0xff] }
 0x1d3   : > { %2060 = vmatpush1.bf16.msra.mxu1 %v8419_v61  ;;  %v9412_v61 = vld [vmem:[%s10336_s20 + $0xe0] ss:$8 sps:$4 sm:$0xff]  }
 0x1d4   : > { %2061 = vmatprep.subr.bf16.mxu1 %v8428_v62  ;;  %v8508_v62 = vcombine.high %v1269_v57, %v1273_v58  ;;  %v1254_v58 = vld [vmem:[%s10326_s6 + $0x2d8] sm:$0xff] }
 0x1d5   : > { %3010 = vmatpush1.bf16.msra.mxu0 %v9412_v61  ;;  %v8494_v61 = vcombine.high %v1254_v58, %v1258_v59 }
 0x1d6   : > { %3011 = vmatprep.subr.bf16.mxu0 %v9413_v1 }
 0x1d7   : > { %2062 = vmatpush1.bf16.msra.mxu1 %v8427_v3  ;;  %v9415_v3 = vld [vmem:[%s10336_s20 + $0xf0] ss:$8 sps:$4 sm:$0xff]  }
 0x1d8   : > { %2063 = vmatprep.subr.bf16.mxu1 %v8436_v4  ;;  %v8516_v4 = vcombine.high %v1277_v63, %v1281_v0  ;;  %v1266_v63 = vld [vmem:[%s10326_s6 + $0x338] sm:$0xff]  ;;  %v8493_v0 = vcombine.low %v1254_v58, %v1258_v59 }
 0x1d9   : > { %3012 = vmatpush1.bf16.msra.mxu0 %v9415_v3  ;;  %v1274_v3 = vld [vmem:[%s10326_s6 + $0x378] sm:$0xff] }
 0x1da   : > { %3022 = vmatprep.subr.bf16.mxu0 %v9418_v7  ;;  %v1282_v7 = vld [vmem:[%s10326_s6 + $0x3b8] sm:$0xff] }
 0x1db   : > { %2064 = vmatpush1.bf16.msra.mxu1 %v8435_v9  ;;  %v8524_v9 = vcombine.high %v1285_v5, %v1289_v6  ;;  %v1278_v6 = vld [vmem:[%s10326_s6 + $0x398] sm:$0xff] }
 0x1dc   : > { %2065 = vmatprep.subr.bf16.mxu1 %v8444_v10  ;;  %v1166_v10 = vld [vmem:[%s10326_s6 + $0x18] sm:$0xff] }
 0x1dd   : > { %v8406_v13 = vcombine.high %v1166_v10, %v1170_v11  ;;  %v8405_v16 = vcombine.low %v1166_v10, %v1170_v11  ;;  %v1286_v10 = vld [vmem:[%s10326_s6 + $0x3d8] sm:$0xff] }
 0x1de   : > { %v1290_v11 = vld [vmem:[%s10326_s6 + $0x3f8] sm:$0xff] }
 0x1df   : > { %2066 = vmatpush1.bf16.msra.mxu1 %v8443_v14  ;;  %v1174_v14 = vld [vmem:[%s10326_s6 + $0x58] sm:$0xff] }
 0x1e0   : > { %2067 = vmatprep.subr.bf16.mxu1 %v8452_v15  ;;  %v1178_v15 = vld [vmem:[%s10326_s6 + $0x78] sm:$0xff] }
 0x1e1   : > { %v8414_v17 = vcombine.high %v1174_v14, %v1178_v15  ;;  %v8413_v23 = vcombine.low %v1174_v14, %v1178_v15  ;;  %v8525_v14 = vcombine.low %v1286_v10, %v1290_v11  ;;  %v10657_v15 = vld [vmem:[%s10331_s12] sm:$0xff] }
 0x1e3   : > { %2068 = vmatpush1.bf16.msra.mxu1 %v8451_v22  ;;  %v1186_v22 = vld [vmem:[%s10326_s6 + $0xb8] sm:$0xff] }
 0x1e4   : > { %2069 = vmatprep.subr.bf16.mxu1 %v8460_v24  ;;  %v8422_v24 = vcombine.high %v1182_v21, %v1186_v22  ;;  %v8421_v27 = vcombine.low %v1182_v21, %v1186_v22 }
 0x1e7   : > { %2070 = vmatpush1.bf16.msra.mxu1 %v8459_v28  ;;  %v8430_v28 = vcombine.high %v1190_v25, %v1194_v26 }
 0x1e8   : > { %2071 = vmatprep.subr.bf16.mxu1 %v8468_v30  ;;  %v1202_v30 = vld [vmem:[%s10326_s6 + $0x138] sm:$0xff] }
 0x1eb   : > { %2072 = vmatpush1.bf16.msra.mxu1 %v8467_v34  ;;  %v8437_v34 = vcombine.low %v1198_v29, %v1202_v30 }
 0x1ec   : > { %2073 = vmatprep.subr.bf16.mxu1 %v8476_v38  ;;  %v1214_v38 = vld [vmem:[%s10326_s6 + $0x198] sm:$0xff] }
 0x1ed   : > { %v8454_v41 = vcombine.high %v1214_v38, %v1218_v39 }
 0x1ef   : > { %2074 = vmatpush1.bf16.msra.mxu1 %v8475_v42  ;;  %v1222_v42 = vld [vmem:[%s10326_s6 + $0x1d8] sm:$0xff] }
 0x1f0   : > { %2075 = vmatprep.subr.bf16.mxu1 %v8484_v44  ;;  %v8453_v44 = vcombine.low %v1214_v38, %v1218_v39  ;;  %v8462_v45 = vcombine.high %v1222_v42, %v1226_v43  ;;  %v9416_v38 = vld [vmem:[%s10336_s20 + $0x100] ss:$8 sps:$4 sm:$0xff]  }
 0x1f3   : > { %2076 = vmatpush1.bf16.msra.mxu1 %v8483_v48  ;;  %v8461_v48 = vcombine.low %v1222_v42, %v1226_v43  ;;  %v9424_v42 = vld [vmem:[%s10336_s20 + $0x124] ss:$8 sps:$4 sm:$0xff]   ;;  %v9422_v43 = vld [vmem:[%s10336_s20 + $0x120] ss:$8 sps:$4 sm:$0xff]  }
 0x1f4   : > { %2077 = vmatprep.subr.bf16.mxu1 %v8492_v50  ;;  %v1238_v50 = vld [vmem:[%s10326_s6 + $0x258] sm:$0xff] }
 0x1f5   : > { %v8478_v53 = vcombine.high %v1238_v50, %v1242_v51 }
 0x1f7   : > { %2078 = vmatpush1.bf16.msra.mxu1 %v8491_v54  ;;  %v1246_v54 = vld [vmem:[%s10326_s6 + $0x298] sm:$0xff] }
 0x1f8   : > { %2079 = vmatprep.subr.bf16.mxu1 %v8500_v56  ;;  %v8477_v56 = vcombine.low %v1238_v50, %v1242_v51  ;;  %v8486_v57 = vcombine.high %v1246_v54, %v1250_v55  ;;  %v9436_v50 = vld [vmem:[%s10336_s20 + $0x164] ss:$8 sps:$4 sm:$0xff]   ;;  %v9434_v51 = vld [vmem:[%s10336_s20 + $0x160] ss:$8 sps:$4 sm:$0xff]  }
 0x1fb   : > { %2080 = vmatpush1.bf16.msra.mxu1 %v8499_v60  ;;  %v8485_v60 = vcombine.low %v1246_v54, %v1250_v55  ;;  %v10681_v54 = vsub.s32 3, %v10503_v18  ;;  %v9437_v55 = vld [vmem:[%s10336_s20 + $0x170] ss:$8 sps:$4 sm:$0xff]  }
 0x1fc   : > { %2081 = vmatprep.subr.bf16.mxu1 %v8508_v62  ;;  %v1262_v62 = vld [vmem:[%s10326_s6 + $0x318] sm:$0xff] }
 0x1fd   : > { %v8502_v1 = vcombine.high %v1262_v62, %v1266_v63  ;;  %v1308_v58 = vrot.slane %v10657_v15, %v10681_v54 }
 0x1ff   : > { %2082 = vmatpush1.bf16.msra.mxu1 %v8507_v2  ;;  %v1270_v2 = vld [vmem:[%s10326_s6 + $0x358] sm:$0xff] }
 0x200   : > { %2083 = vmatprep.subr.bf16.mxu1 %v8516_v4  ;;  %v8501_v4 = vcombine.low %v1262_v62, %v1266_v63  ;;  %v8510_v5 = vcombine.high %v1270_v2, %v1274_v3  ;;  %v9445_v63 = vld [vmem:[%s10336_s20 + $0x194] ss:$8 sps:$4 sm:$0xff]  }
 0x203   : > { %2084 = vmatpush1.bf16.msra.mxu1 %v8515_v8  ;;  %v8509_v8 = vcombine.low %v1270_v2, %v1274_v3 }
 0x204   : > { %2085 = vmatprep.subr.bf16.mxu1 %v8524_v9  ;;  %v8518_v9 = vcombine.high %v1278_v6, %v1282_v7 }
 0x207   : > { %2086 = vmatpush1.bf16.msra.mxu1 %v8523_v12  ;;  %v8517_v12 = vcombine.low %v1278_v6, %v1282_v7  ;;  %v9448_v6 = vld [vmem:[%s10336_s20 + $0x1a4] ss:$8 sps:$4 sm:$0xff]   ;;  %v9446_v7 = vld [vmem:[%s10336_s20 + $0x1a0] ss:$8 sps:$4 sm:$0xff]  }
 0x208   : > { %2096 = vmatprep.subr.bf16.mxu1 %v8406_v13  ;;  %v8526_v13 = vcombine.high %v1286_v10, %v1290_v11  ;;  %v9454_v10 = vld [vmem:[%s10336_s20 + $0x1c4] ss:$8 sps:$4 sm:$0xff]  }
 0x20a   : > { %2088 = vmatmul.mubr.bf16.vlgmr.msra.gmra.mrb[8].mxu1 %v10521_v37 }
 0x20b   : > { %2097 = vmatpush1.bf16.msra.mxu1 %v8405_v16  ;;  %2128 = vmatprep.mubr.bf16.mxu1 %v10519_v36  ;;  %v8438_v36 = vcombine.high %v1198_v29, %v1202_v30  ;;  %v1296_v16 = vrot.slane %v10657_v15, %v10506_v19 }
 0x20c   : > { %2098 = vmatprep.subr.bf16.mxu1 %v8414_v17  ;;  %v1300_v17 = vrot.slane %v10657_v15, %v10509_v20 }
 0x20f   : > { %2099 = vmatpush1.bf16.msra.mxu1 %v8413_v23 }
 0x210   : > { %2100 = vmatprep.subr.bf16.mxu1 %v8422_v24 }
 0x213   : > { %2101 = vmatpush1.bf16.msra.mxu1 %v8421_v27 }
 0x214   : > { %2102 = vmatprep.subr.bf16.mxu1 %v8430_v28 }
 0x217   : > { %2103 = vmatpush1.bf16.msra.mxu1 %v8429_v31 }
 0x218   : > { %2104 = vmatprep.subr.bf16.mxu1 %v8438_v36 }
 0x21b   : > { %2105 = vmatpush1.bf16.msra.mxu1 %v8437_v34 }
 0x21c   : > { %2106 = vmatprep.subr.bf16.mxu1 %v8446_v35 }
 0x21f   : > { %2107 = vmatpush1.bf16.msra.mxu1 %v8445_v40  ;;  %v9421_v40 = vld [vmem:[%s10336_s20 + $0x114] ss:$8 sps:$4 sm:$0xff]  }
 0x220   : > { %2108 = vmatprep.subr.bf16.mxu1 %v8454_v41  ;;  %v9419_v41 = vld [vmem:[%s10336_s20 + $0x110] ss:$8 sps:$4 sm:$0xff]  }
 0x223   : > { %2109 = vmatpush1.bf16.msra.mxu1 %v8453_v44  ;;  %v9427_v44 = vld [vmem:[%s10336_s20 + $0x134] ss:$8 sps:$4 sm:$0xff]  }
 0x224   : > { %2110 = vmatprep.subr.bf16.mxu1 %v8462_v45  ;;  %v9425_v45 = vld [vmem:[%s10336_s20 + $0x130] ss:$8 sps:$4 sm:$0xff]  }
 0x227   : > { %2111 = vmatpush1.bf16.msra.mxu1 %v8461_v48  ;;  %v9433_v48 = vld [vmem:[%s10336_s20 + $0x154] ss:$8 sps:$4 sm:$0xff]  }
 0x228   : > { %2112 = vmatprep.subr.bf16.mxu1 %v8470_v49  ;;  %v9431_v49 = vld [vmem:[%s10336_s20 + $0x150] ss:$8 sps:$4 sm:$0xff]  }
 0x22b   : > { %2113 = vmatpush1.bf16.msra.mxu1 %v8469_v52  ;;  %v9439_v52 = vld [vmem:[%s10336_s20 + $0x174] ss:$8 sps:$4 sm:$0xff]  }
 0x22c   : > { %2114 = vmatprep.subr.bf16.mxu1 %v8478_v53  ;;  %v10678_v53 = vsub.s32 2, %v10503_v18 }
 0x22f   : > { %2115 = vmatpush1.bf16.msra.mxu1 %v8477_v56  ;;  %v1304_v56 = vrot.slane %v10657_v15, %v10678_v53 }
 0x230   : > { %2116 = vmatprep.subr.bf16.mxu1 %v8486_v57  ;;  %v9442_v57 = vld [vmem:[%s10336_s20 + $0x184] ss:$8 sps:$4 sm:$0xff]  }
 0x233   : > { %2117 = vmatpush1.bf16.msra.mxu1 %v8485_v60  ;;  %v9440_v60 = vld [vmem:[%s10336_s20 + $0x180] ss:$8 sps:$4 sm:$0xff]  }
 0x234   : > { %2118 = vmatprep.subr.bf16.mxu1 %v8494_v61 }
 0x237   : > { %2119 = vmatpush1.bf16.msra.mxu1 %v8493_v0 }
 0x238   : > { %2120 = vmatprep.subr.bf16.mxu1 %v8502_v1 }
 0x23b   : > { %2121 = vmatpush1.bf16.msra.mxu1 %v8501_v4 }
 0x23c   : > { %2122 = vmatprep.subr.bf16.mxu1 %v8510_v5  ;;  %v9443_v5 = vld [vmem:[%s10336_s20 + $0x190] ss:$8 sps:$4 sm:$0xff]  }
 0x23f   : > { %2123 = vmatpush1.bf16.msra.mxu1 %v8509_v8  ;;  %v9451_v8 = vld [vmem:[%s10336_s20 + $0x1b4] ss:$8 sps:$4 sm:$0xff]  }
 0x240   : > { %2124 = vmatprep.subr.bf16.mxu1 %v8518_v9  ;;  %v9449_v9 = vld [vmem:[%s10336_s20 + $0x1b0] ss:$8 sps:$4 sm:$0xff]  }
 0x243   : > { %2125 = vmatpush1.bf16.msra.mxu1 %v8517_v12 }
 0x244   : > { %2126 = vmatprep.subr.bf16.mxu1 %v8526_v13 }
 0x247   : > { %2127 = vmatpush1.bf16.msra.mxu1 %v8525_v14  ;;  %v9452_v14 = vld [vmem:[%s10336_s20 + $0x1c0] ss:$8 sps:$4 sm:$0xff]  }
 0x24a   : > { %2129 = vmatmul.mubr.bf16.vlgmr.msra.gmra.mrb[12].mxu1 %v10521_v37 }
 0x25d   : > { %v2007_v21 = vpop.f32.mrb[0].mxu1 }
 0x25e   : > { %v2008_v22 = vadd.f32 %v2007_v21, %v1296_v16  ;;  %v2009_v23 = vpop.f32.mrb[1].mxu1  ;;  %v9455_v21 = vld [vmem:[%s10336_s20 + $0x1d0] ss:$8 sps:$4 sm:$0xff]  }
 0x25f   : > { %v2010_v24 = vadd.f32 %v2009_v23, %v1300_v17  ;;  %v2011_v25 = vpop.f32.mrb[2].mxu1  ;;  %v9457_v17 = vld [vmem:[%s10336_s20 + $0x1d4] ss:$8 sps:$4 sm:$0xff]   ;;  %v9458_v23 = vld [vmem:[%s10336_s20 + $0x1e0] ss:$8 sps:$4 sm:$0xff]  }
 0x260   : > { %v8527_v26 = vmul.f32 -1.442695, %v2008_v22  ;;  %v2012_v27 = vpop.f32.mrb[3].mxu1 }
 0x261   : > { %v8528_v28 = vmul.f32 -1.442695, %v2010_v24 }
 0x262   : > { %10091 = vpow2.f32 %v8527_v26  ;;  %v9461_v26 = vld [vmem:[%s10336_s20 + $0x1f0] ss:$8 sps:$4 sm:$0xff]  }
 0x263   : > { %10093 = vpow2.f32 %v8528_v28 }
 0x26c   : > { %v10092_v37 = vpop.eup %10091 }
 0x26d   : > { %v10094_v29 = vpop.eup %10093  ;;  %v2161_v30 = vadd.f32 1.0, %v10092_v37  ;;  %v9466_v37 = vld [vmem:[%s10336_s20 + $0x204] ss:$8 sps:$4 sm:$0xff]  }
 0x26e   : > { %v2162_v31 = vadd.f32 1.0, %v10094_v29 }
 0x26f   : > { %10095 = vrcp.f32 %v2161_v30 }
 0x270   : > { %10097 = vrcp.f32 %v2162_v31  ;;  %v9464_v31 = vld [vmem:[%s10336_s20 + $0x200] ss:$8 sps:$4 sm:$0xff]  }
 0x279   : > { %v10096_v36 = vpop.eup %10095 }
 0x27a   : > { %v10098_v32 = vpop.eup %10097  ;;  %v2185_v33 = vmul.f32 %v10096_v36, %v2008_v22  ;;  %v9460_v22 = vld [vmem:[%s10336_s20 + $0x1e4] ss:$8 sps:$4 sm:$0xff]  }
 0x27b   : > { %v2186_v34 = vmul.f32 %v10098_v32, %v2010_v24  ;;  %v9463_v24 = vld [vmem:[%s10336_s20 + $0x1f4] ss:$8 sps:$4 sm:$0xff]  }
 0x27c   : > { %v2193_v39 = vpack.c.bf16 %v2185_v33, %v2185_v33  ;;  %v9469_v32 = vld [vmem:[%s10336_s20 + $0x214] ss:$8 sps:$4 sm:$0xff]   ;;  %v9467_v33 = vld [vmem:[%s10336_s20 + $0x210] ss:$8 sps:$4 sm:$0xff]  }
 0x27d   : > { %v2194_v35 = vpack.c.bf16 %v2186_v34, %v2186_v34  ;;  %v9472_v34 = vld [vmem:[%s10336_s20 + $0x224] ss:$8 sps:$4 sm:$0xff]  }
 0x27f   : > { %3013 = vmatprep.mubr.bf16.mxu0 %v2194_v35  ;;  %v9470_v35 = vld [vmem:[%s10336_s20 + $0x220] ss:$8 sps:$4 sm:$0xff]  }
 0x280   : > { %3014 = vmatmul.mubr.bf16.vlgmr.msra.gmra.mrb[0].mxu0 %v2193_v39  ;;  %v9473_v39 = vld [vmem:[%s10336_s20 + $0x230] ss:$8 sps:$4 sm:$0xff]  }
 0x281   : > { %3023 = vmatpush1.bf16.msra.mxu0 %v9416_v38  ;;  %v9475_v38 = vld [vmem:[%s10336_s20 + $0x234] ss:$8 sps:$4 sm:$0xff]  }
 0x282   : > { %3024 = vmatprep.subr.bf16.mxu0 %v9421_v40  ;;  %v9478_v40 = vld [vmem:[%s10336_s20 + $0x244] ss:$8 sps:$4 sm:$0xff]  }
 0x285   : > { %3025 = vmatpush1.bf16.msra.mxu0 %v9419_v41  ;;  %v9476_v41 = vld [vmem:[%s10336_s20 + $0x240] ss:$8 sps:$4 sm:$0xff]  }
 0x286   : > { %3026 = vmatprep.subr.bf16.mxu0 %v9424_v42  ;;  %v9481_v42 = vld [vmem:[%s10336_s20 + $0x254] ss:$8 sps:$4 sm:$0xff]  }
 0x289   : > { %3027 = vmatpush1.bf16.msra.mxu0 %v9422_v43  ;;  %v9479_v43 = vld [vmem:[%s10336_s20 + $0x250] ss:$8 sps:$4 sm:$0xff]  }
 0x28a   : > { %3028 = vmatprep.subr.bf16.mxu0 %v9427_v44  ;;  %v9484_v44 = vld [vmem:[%s10336_s20 + $0x264] ss:$8 sps:$4 sm:$0xff]  }
 0x28d   : > { %3029 = vmatpush1.bf16.msra.mxu0 %v9425_v45  ;;  %v9482_v45 = vld [vmem:[%s10336_s20 + $0x260] ss:$8 sps:$4 sm:$0xff]  }
 0x28e   : > { %3030 = vmatprep.subr.bf16.mxu0 %v9430_v46  ;;  %v9487_v46 = vld [vmem:[%s10336_s20 + $0x274] ss:$8 sps:$4 sm:$0xff]  }
 0x291   : > { %3031 = vmatpush1.bf16.msra.mxu0 %v9428_v47  ;;  %v10720_v47 = vsub.s32 4, %v10503_v18 }
 0x292   : > { %3032 = vmatprep.subr.bf16.mxu0 %v9433_v48  ;;  %v10723_v48 = vsub.s32 5, %v10503_v18 }
 0x295   : > { %3033 = vmatpush1.bf16.msra.mxu0 %v9431_v49  ;;  %v9485_v49 = vld [vmem:[%s10336_s20 + $0x270] ss:$8 sps:$4 sm:$0xff]  }
 0x296   : > { %3034 = vmatprep.subr.bf16.mxu0 %v9436_v50  ;;  %v1312_v50 = vrot.slane %v10657_v15, %v10720_v47 }
 0x299   : > { %3035 = vmatpush1.bf16.msra.mxu0 %v9434_v51  ;;  %v9490_v51 = vld [vmem:[%s10336_s20 + $0x284] ss:$8 sps:$4 sm:$0xff]  }
 0x29a   : > { %3036 = vmatprep.subr.bf16.mxu0 %v9439_v52  ;;  %v1316_v52 = vrot.slane %v10657_v15, %v10723_v48 }
 0x29d   : > { %v2048_v59 = vpop.f32.mrb[4].mxu1  ;;  %3037 = vmatpush1.bf16.msra.mxu0 %v9437_v55 }
 0x29e   : > { %v2049_v61 = vadd.f32 %v2048_v59, %v1304_v56  ;;  %v2050_v62 = vpop.f32.mrb[5].mxu1  ;;  %3038 = vmatprep.subr.bf16.mxu0 %v9442_v57  ;;  %v9488_v56 = vld [vmem:[%s10336_s20 + $0x280] ss:$8 sps:$4 sm:$0xff]   ;;  %v9493_v59 = vld [vmem:[%s10336_s20 + $0x294] ss:$8 sps:$4 sm:$0xff]  }
 0x29f   : > { %v2051_v0 = vadd.f32 %v2050_v62, %v1308_v58  ;;  %v2052_v1 = vpop.f32.mrb[6].mxu1 }
 0x2a0   : > { %v8529_v2 = vmul.f32 -1.442695, %v2049_v61  ;;  %v2053_v3 = vpop.f32.mrb[7].mxu1  ;;  %v9491_v1 = vld [vmem:[%s10336_s20 + $0x290] ss:$8 sps:$4 sm:$0xff]  }
 0x2a1   : > { %v8530_v4 = vmul.f32 -1.442695, %v2051_v0  ;;  %3039 = vmatpush1.bf16.msra.mxu0 %v9440_v60  ;;  %v9494_v3 = vld [vmem:[%s10336_s20 + $0x2a0] ss:$8 sps:$4 sm:$0xff]  }
 0x2a2   : > { %10099 = vpow2.f32 %v8529_v2  ;;  %3040 = vmatprep.subr.bf16.mxu0 %v9445_v63  ;;  %v9496_v2 = vld [vmem:[%s10336_s20 + $0x2a4] ss:$8 sps:$4 sm:$0xff]  }
 0x2a3   : > { %10101 = vpow2.f32 %v8530_v4  ;;  %v9499_v4 = vld [vmem:[%s10336_s20 + $0x2b4] ss:$8 sps:$4 sm:$0xff]  }
 0x2a5   : > { %3041 = vmatpush1.bf16.msra.mxu0 %v9443_v5  ;;  %v9497_v5 = vld [vmem:[%s10336_s20 + $0x2b0] ss:$8 sps:$4 sm:$0xff]  }
 0x2a6   : > { %3042 = vmatprep.subr.bf16.mxu0 %v9448_v6  ;;  %v9502_v6 = vld [vmem:[%s10336_s20 + $0x2c4] ss:$8 sps:$4 sm:$0xff]  }
 0x2a9   : > { %3043 = vmatpush1.bf16.msra.mxu0 %v9446_v7 }
 0x2aa   : > { %3044 = vmatprep.subr.bf16.mxu0 %v9451_v8 }
 0x2ac   : > { %v10100_v11 = vpop.eup %10099 }
 0x2ad   : > { %v10102_v12 = vpop.eup %10101  ;;  %v2163_v13 = vadd.f32 1.0, %v10100_v11  ;;  %3045 = vmatpush1.bf16.msra.mxu0 %v9449_v9 }
 0x2ae   : > { %v2164_v16 = vadd.f32 1.0, %v10102_v12  ;;  %3046 = vmatprep.subr.bf16.mxu0 %v9454_v10  ;;  %v9500_v10 = vld [vmem:[%s10336_s20 + $0x2c0] ss:$8 sps:$4 sm:$0xff]   ;;  %v9505_v12 = vld [vmem:[%s10336_s20 + $0x2d4] ss:$8 sps:$4 sm:$0xff]  }
 0x2af   : > { %10103 = vrcp.f32 %v2163_v13  ;;  %v9503_v13 = vld [vmem:[%s10336_s20 + $0x2d0] ss:$8 sps:$4 sm:$0xff]  }
 0x2b0   : > { %10105 = vrcp.f32 %v2164_v16  ;;  %v9506_v16 = vld [vmem:[%s10336_s20 + $0x2e0] ss:$8 sps:$4 sm:$0xff]  }
 0x2b1   : > { %3047 = vmatpush1.bf16.msra.mxu0 %v9452_v14  ;;  %v9508_v14 = vld [vmem:[%s10336_s20 + $0x2e4] ss:$8 sps:$4 sm:$0xff]  }
 0x2b2   : > { %3048 = vmatprep.subr.bf16.mxu0 %v9457_v17  ;;  %v9511_v17 = vld [vmem:[%s10336_s20 + $0x2f4] ss:$8 sps:$4 sm:$0xff]  }
 0x2b5   : > { %3049 = vmatpush1.bf16.msra.mxu0 %v9455_v21 }
 0x2b6   : > { %3050 = vmatprep.subr.bf16.mxu0 %v9460_v22  ;;  %v9509_v22 = vld [vmem:[%s10336_s20 + $0x2f0] ss:$8 sps:$4 sm:$0xff]  }
 0x2b9   : > { %v10104_v25 = vpop.eup %10103  ;;  %3051 = vmatpush1.bf16.msra.mxu0 %v9458_v23 }
 0x2ba   : > { %v10106_v27 = vpop.eup %10105  ;;  %v2187_v28 = vmul.f32 %v10104_v25, %v2049_v61  ;;  %3052 = vmatprep.subr.bf16.mxu0 %v9463_v24  ;;  %v9514_v25 = vld [vmem:[%s10336_s20 + $0x304] ss:$8 sps:$4 sm:$0xff]  }
 0x2bb   : > { %v2188_v29 = vmul.f32 %v10106_v27, %v2051_v0 }
 0x2bc   : > { %v2195_v36 = vpack.c.bf16 %v2187_v28, %v2187_v28  ;;  %v9512_v28 = vld [vmem:[%s10336_s20 + $0x300] ss:$8 sps:$4 sm:$0xff]  }
 0x2bd   : > { %v2196_v30 = vpack.c.bf16 %v2188_v29, %v2188_v29  ;;  %3053 = vmatpush1.bf16.msra.mxu0 %v9461_v26  ;;  %v9517_v29 = vld [vmem:[%s10336_s20 + $0x314] ss:$8 sps:$4 sm:$0xff]  }
 0x2be   : > { %3063 = vmatprep.subr.bf16.mxu0 %v9466_v37 }
 0x2bf   : > { %3054 = vmatprep.mubr.bf16.mxu0 %v2196_v30  ;;  %v9515_v30 = vld [vmem:[%s10336_s20 + $0x310] ss:$8 sps:$4 sm:$0xff]  }
 0x2c0   : > { %3055 = vmatmul.mubr.bf16.vlgmr.msra.gmra.mrb[0].mxu0 %v2195_v36  ;;  %v9518_v36 = vld [vmem:[%s10336_s20 + $0x320] ss:$8 sps:$4 sm:$0xff]  }
 0x2c1   : > { %3064 = vmatpush1.bf16.msra.mxu0 %v9464_v31  ;;  %v9520_v31 = vld [vmem:[%s10336_s20 + $0x324] ss:$8 sps:$4 sm:$0xff]  }
 0x2c2   : > { %3065 = vmatprep.subr.bf16.mxu0 %v9469_v32  ;;  %v9523_v32 = vld [vmem:[%s10336_s20 + $0x334] ss:$8 sps:$4 sm:$0xff]  }
 0x2c5   : > { %3066 = vmatpush1.bf16.msra.mxu0 %v9467_v33  ;;  %v9521_v33 = vld [vmem:[%s10336_s20 + $0x330] ss:$8 sps:$4 sm:$0xff]  }
 0x2c6   : > { %3067 = vmatprep.subr.bf16.mxu0 %v9472_v34  ;;  %v9526_v34 = vld [vmem:[%s10336_s20 + $0x344] ss:$8 sps:$4 sm:$0xff]  }
 0x2c9   : > { %3068 = vmatpush1.bf16.msra.mxu0 %v9470_v35  ;;  %v9524_v35 = vld [vmem:[%s10336_s20 + $0x340] ss:$8 sps:$4 sm:$0xff]  }
 0x2ca   : > { %3069 = vmatprep.subr.bf16.mxu0 %v9475_v38  ;;  %v9529_v38 = vld [vmem:[%s10336_s20 + $0x354] ss:$8 sps:$4 sm:$0xff]  }
 0x2cd   : > { %3070 = vmatpush1.bf16.msra.mxu0 %v9473_v39  ;;  %v9527_v39 = vld [vmem:[%s10336_s20 + $0x350] ss:$8 sps:$4 sm:$0xff]  }
 0x2ce   : > { %3071 = vmatprep.subr.bf16.mxu0 %v9478_v40  ;;  %v9532_v40 = vld [vmem:[%s10336_s20 + $0x364] ss:$8 sps:$4 sm:$0xff]  }
 0x2d1   : > { %3072 = vmatpush1.bf16.msra.mxu0 %v9476_v41  ;;  %v9530_v41 = vld [vmem:[%s10336_s20 + $0x360] ss:$8 sps:$4 sm:$0xff]  }
 0x2d2   : > { %3073 = vmatprep.subr.bf16.mxu0 %v9481_v42  ;;  %v9535_v42 = vld [vmem:[%s10336_s20 + $0x374] ss:$8 sps:$4 sm:$0xff]  }
 0x2d5   : > { %3074 = vmatpush1.bf16.msra.mxu0 %v9479_v43  ;;  %v10762_v43 = vsub.s32 6, %v10503_v18 }
 0x2d6   : > { %3075 = vmatprep.subr.bf16.mxu0 %v9484_v44  ;;  %v10765_v44 = vsub.s32 7, %v10503_v18 }
 0x2d9   : > { %3076 = vmatpush1.bf16.msra.mxu0 %v9482_v45  ;;  %v9533_v45 = vld [vmem:[%s10336_s20 + $0x370] ss:$8 sps:$4 sm:$0xff]  }
 0x2da   : > { %3077 = vmatprep.subr.bf16.mxu0 %v9487_v46  ;;  %v1320_v46 = vrot.slane %v10657_v15, %v10762_v43 }
 0x2dd   : > { %v2089_v55 = vpop.f32.mrb[8].mxu1  ;;  %3078 = vmatpush1.bf16.msra.mxu0 %v9485_v49  ;;  %v9538_v49 = vld [vmem:[%s10336_s20 + $0x384] ss:$8 sps:$4 sm:$0xff]  }
 0x2de   : > { %v2090_v57 = vadd.f32 %v2089_v55, %v1312_v50  ;;  %v2091_v58 = vpop.f32.mrb[9].mxu1  ;;  %3079 = vmatprep.subr.bf16.mxu0 %v9490_v51  ;;  %v1324_v50 = vrot.slane %v10657_v15, %v10765_v44  ;;  %v9544_v15 = vld [vmem:[%s10336_s20 + $0x3a4] ss:$8 sps:$4 sm:$0xff]  }
 0x2df   : > { %v2092_v60 = vadd.f32 %v2091_v58, %v1316_v52  ;;  %v2093_v61 = vpop.f32.mrb[10].mxu1  ;;  %v9536_v52 = vld [vmem:[%s10336_s20 + $0x380] ss:$8 sps:$4 sm:$0xff]  }
 0x2e0   : > { %v8531_v62 = vmul.f32 -1.442695, %v2090_v57  ;;  %v2094_v63 = vpop.f32.mrb[11].mxu1 }
 0x2e1   : > { %v8532_v0 = vmul.f32 -1.442695, %v2092_v60  ;;  %3080 = vmatpush1.bf16.msra.mxu0 %v9488_v56  ;;  %v9539_v63 = vld [vmem:[%s10336_s20 + $0x390] ss:$8 sps:$4 sm:$0xff]  }
 0x2e2   : > { %10107 = vpow2.f32 %v8531_v62  ;;  %3081 = vmatprep.subr.bf16.mxu0 %v9493_v59 }
 0x2e3   : > { %10109 = vpow2.f32 %v8532_v0  ;;  %v9542_v0 = vld [vmem:[%s10336_s20 + $0x3a0] ss:$8 sps:$4 sm:$0xff]  }
 0x2e5   : > { %3082 = vmatpush1.bf16.msra.mxu0 %v9491_v1  ;;  %v9547_v1 = vld [vmem:[%s10336_s20 + $0x3b4] ss:$8 sps:$4 sm:$0xff]  }
 0x2e6   : > { %3083 = vmatprep.subr.bf16.mxu0 %v9496_v2  ;;  %v9545_v2 = vld [vmem:[%s10336_s20 + $0x3b0] ss:$8 sps:$4 sm:$0xff]  }
 0x2e9   : > { %3084 = vmatpush1.bf16.msra.mxu0 %v9494_v3  ;;  %v9550_v3 = vld [vmem:[%s10336_s20 + $0x3c4] ss:$8 sps:$4 sm:$0xff]  }
 0x2ea   : > { %3085 = vmatprep.subr.bf16.mxu0 %v9499_v4 }
 0x2ec   : > { %v10108_v7 = vpop.eup %10107 }
 0x2ed   : > { %v10110_v8 = vpop.eup %10109  ;;  %v2165_v9 = vadd.f32 1.0, %v10108_v7  ;;  %3086 = vmatpush1.bf16.msra.mxu0 %v9497_v5  ;;  %v9548_v7 = vld [vmem:[%s10336_s20 + $0x3c0] ss:$8 sps:$4 sm:$0xff]  }
 0x2ee   : > { %v2166_v11 = vadd.f32 1.0, %v10110_v8  ;;  %3087 = vmatprep.subr.bf16.mxu0 %v9502_v6 }
 0x2ef   : > { %10111 = vrcp.f32 %v2165_v9  ;;  %v9553_v9 = vld [vmem:[%s10336_s20 + $0x3d4] ss:$8 sps:$4 sm:$0xff]  }
 0x2f0   : > { %10113 = vrcp.f32 %v2166_v11  ;;  %v9556_v11 = vld [vmem:[%s10336_s20 + $0x3e4] ss:$8 sps:$4 sm:$0xff]  }
 0x2f1   : > { %3088 = vmatpush1.bf16.msra.mxu0 %v9500_v10  ;;  %v9551_v10 = vld [vmem:[%s10336_s20 + $0x3d0] ss:$8 sps:$4 sm:$0xff]  }
 0x2f2   : > { %3089 = vmatprep.subr.bf16.mxu0 %v9505_v12  ;;  %v9554_v12 = vld [vmem:[%s10336_s20 + $0x3e0] ss:$8 sps:$4 sm:$0xff]  }
 0x2f5   : > { %3090 = vmatpush1.bf16.msra.mxu0 %v9503_v13  ;;  %v9559_v13 = vld [vmem:[%s10336_s20 + $0x3f4] ss:$8 sps:$4 sm:$0xff]  }
 0x2f6   : > { %3091 = vmatprep.subr.bf16.mxu0 %v9508_v14 }
 0x2f9   : > { %v10112_v21 = vpop.eup %10111  ;;  %3092 = vmatpush1.bf16.msra.mxu0 %v9506_v16  ;;  %v9557_v16 = vld [vmem:[%s10336_s20 + $0x3f0] ss:$8 sps:$4 sm:$0xff]  }
 0x2fa   : > { %v10114_v23 = vpop.eup %10113  ;;  %v2189_v24 = vmul.f32 %v10112_v21, %v2090_v57  ;;  %3093 = vmatprep.subr.bf16.mxu0 %v9511_v17  ;;  %v9541_v57 = vld [vmem:[%s10336_s20 + $0x394] ss:$8 sps:$4 sm:$0xff]  }
 0x2fb   : > { %v2190_v26 = vmul.f32 %v10114_v23, %v2092_v60 }
 0x2fc   : > { %v2197_v37 = vpack.c.bf16 %v2189_v24, %v2189_v24 }
 0x2fd   : > { %v2198_v27 = vpack.c.bf16 %v2190_v26, %v2190_v26  ;;  %3094 = vmatpush1.bf16.msra.mxu0 %v9509_v22 }
 0x2fe   : > { %3104 = vmatprep.subr.bf16.mxu0 %v9514_v25  ;;  %v2329_v25 = vld [vmem:[%s10341_s27] sm:$0x3] }
 0x2ff   : > { %3095 = vmatprep.mubr.bf16.mxu0 %v2198_v27  ;;  %v2334_v26 = vrot.slane %v2329_v25, %v10506_v19  ;;  %v2338_v27 = vrot.slane %v2329_v25, %v10509_v20  ;;  %v9610_v25 = vld [vmem:[%s10346_s4 + $0xc] ss:$24 sps:$4 sm:$0xff]  }
 0x300   : > { %3096 = vmatmul.mubr.bf16.vlgmr.msra.gmra.mrb[0].mxu0 %v2197_v37 }
 0x301   : > { %3105 = vmatpush1.bf16.msra.mxu0 %v9512_v28 }
 0x302   : > { %3106 = vmatprep.subr.bf16.mxu0 %v9517_v29 }
 0x305   : > { %3107 = vmatpush1.bf16.msra.mxu0 %v9515_v30 }
 0x306   : > { %3108 = vmatprep.subr.bf16.mxu0 %v9520_v31 }
 0x309   : > { %3109 = vmatpush1.bf16.msra.mxu0 %v9518_v36 }
 0x30a   : > { %3110 = vmatprep.subr.bf16.mxu0 %v9523_v32 }
 0x30d   : > { %3111 = vmatpush1.bf16.msra.mxu0 %v9521_v33 }
 0x30e   : > { %3112 = vmatprep.subr.bf16.mxu0 %v9526_v34  ;;  %v10195_v34 = vld [vmem:[%s10457_s2] sm:$0xff] }
 0x311   : > { %3113 = vmatpush1.bf16.msra.mxu0 %v9524_v35 }
 0x312   : > { %3114 = vmatprep.subr.bf16.mxu0 %v9529_v38  ;;  %v10196_v38 = vld [vmem:[%s10457_s2 + $0x8] sm:$0xff]  ;;  %s10251_s2 = smov 121  }
 0x315   : > { %3115 = vmatpush1.bf16.msra.mxu0 %v9527_v39 }
 0x316   : > { %3116 = vmatprep.subr.bf16.mxu0 %v9532_v40 }
 0x319   : > { %3117 = vmatpush1.bf16.msra.mxu0 %v9530_v41  ;;  %v9560_v41 = vld [vmem:[%s10346_s4] ss:$24 sps:$4 sm:$0xff]  }
 0x31a   : > { %3118 = vmatprep.subr.bf16.mxu0 %v9535_v42  ;;  %v9562_v42 = vld [vmem:[%s10346_s4 + $0x4] ss:$24 sps:$4 sm:$0xff]  }
 0x31b   : > { %3771 = vmatprep.subr.bf16.mxu1 %v9562_v42 }
 0x31c   : > { %3772 = vmatpush1.bf16.msra.mxu1 %v9560_v41 }
 0x31d   : > { %v2130_v51 = vpop.f32.mrb[12].mxu1  ;;  %3119 = vmatpush1.bf16.msra.mxu0 %v9533_v45  ;;  %v9565_v45 = vld [vmem:[%s10346_s4 + $0x34] ss:$24 sps:$4 sm:$0xff]  }
 0x31e   : > { %v2131_v55 = vadd.f32 %v2130_v51, %v1320_v46  ;;  %v2132_v56 = vpop.f32.mrb[13].mxu1  ;;  %3120 = vmatprep.subr.bf16.mxu0 %v9538_v49  ;;  %v9563_v46 = vld [vmem:[%s10346_s4 + $0x30] ss:$24 sps:$4 sm:$0xff]   ;;  %3773 = vmatprep.subr.bf16.mxu1 %v9565_v45  ;;  %v9568_v49 = vld [vmem:[%s10346_s4 + $0x64] ss:$24 sps:$4 sm:$0xff]  }
 0x31f   : > { %v2133_v58 = vadd.f32 %v2132_v56, %v1324_v50  ;;  %v2134_v59 = vpop.f32.mrb[14].mxu1  ;;  %v9566_v50 = vld [vmem:[%s10346_s4 + $0x60] ss:$24 sps:$4 sm:$0xff]   ;;  %v9571_v51 = vld [vmem:[%s10346_s4 + $0x94] ss:$24 sps:$4 sm:$0xff]  }
 0x320   : > { %v8533_v60 = vmul.f32 -1.442695, %v2131_v55  ;;  %v2135_v61 = vpop.f32.mrb[15].mxu1  ;;  %3774 = vmatpush1.bf16.msra.mxu1 %v9563_v46  ;;  %v9572_v56 = vld [vmem:[%s10346_s4 + $0xc0] ss:$24 sps:$4 sm:$0xff]  }
 0x321   : > { %v8534_v62 = vmul.f32 -1.442695, %v2133_v58  ;;  %3121 = vmatpush1.bf16.msra.mxu0 %v9536_v52  ;;  %3775 = vmatprep.subr.bf16.mxu1 %v9568_v49  ;;  %v9569_v52 = vld [vmem:[%s10346_s4 + $0x90] ss:$24 sps:$4 sm:$0xff]   ;;  %v9580_v59 = vld [vmem:[%s10346_s4 + $0x124] ss:$24 sps:$4 sm:$0xff]  }
 0x322   : > { %10115 = vpow2.f32 %v8533_v60  ;;  %3122 = vmatprep.subr.bf16.mxu0 %v9541_v57  ;;  %v9577_v57 = vld [vmem:[%s10346_s4 + $0xf4] ss:$24 sps:$4 sm:$0xff]   ;;  %v9578_v60 = vld [vmem:[%s10346_s4 + $0x120] ss:$24 sps:$4 sm:$0xff]  }
 0x323   : > { %10117 = vpow2.f32 %v8534_v62  ;;  %v9583_v61 = vld [vmem:[%s10346_s4 + $0x154] ss:$24 sps:$4 sm:$0xff]   ;;  %v9581_v62 = vld [vmem:[%s10346_s4 + $0x150] ss:$24 sps:$4 sm:$0xff]  }
 0x324   : > { %3776 = vmatpush1.bf16.msra.mxu1 %v9566_v50  ;;  %v9608_v49 = vld [vmem:[%s10346_s4 + $0x8] ss:$24 sps:$4 sm:$0xff]  }
 0x325   : > { %3123 = vmatpush1.bf16.msra.mxu0 %v9539_v63  ;;  %3777 = vmatprep.subr.bf16.mxu1 %v9571_v51  ;;  %v9586_v63 = vld [vmem:[%s10346_s4 + $0x184] ss:$24 sps:$4 sm:$0xff]  }
 0x326   : > { %3124 = vmatprep.subr.bf16.mxu0 %v9544_v15  ;;  %v9584_v15 = vld [vmem:[%s10346_s4 + $0x180] ss:$24 sps:$4 sm:$0xff]   ;;  %v9613_v51 = vld [vmem:[%s10346_s4 + $0x3c] ss:$24 sps:$4 sm:$0xff]  }
 0x328   : > { %3778 = vmatpush1.bf16.msra.mxu1 %v9569_v52  ;;  %v10849_v52 = vld [vmem:[%s10266_s9] sm:$0xff] }
 0x329   : > { %3125 = vmatpush1.bf16.msra.mxu0 %v9542_v0  ;;  %v9589_v0 = vld [vmem:[%s10346_s4 + $0x1b4] ss:$24 sps:$4 sm:$0xff]   ;;  %3952 = vrot.lane.b32.xlu0 %v10849_v52, %s10241_s7 }
 0x32a   : > { %3126 = vmatprep.subr.bf16.mxu0 %v9547_v1  ;;  %v9587_v1 = vld [vmem:[%s10346_s4 + $0x1b0] ss:$24 sps:$4 sm:$0xff]  }
 0x32c   : > { %v10116_v4 = vpop.eup %10115 }
 0x32d   : > { %v10118_v5 = vpop.eup %10117  ;;  %v2167_v6 = vadd.f32 1.0, %v10116_v4  ;;  %3127 = vmatpush1.bf16.msra.mxu0 %v9545_v2  ;;  %v9592_v2 = vld [vmem:[%s10346_s4 + $0x1e4] ss:$24 sps:$4 sm:$0xff]  }
 0x32e   : > { %v2168_v8 = vadd.f32 1.0, %v10118_v5  ;;  %3128 = vmatprep.subr.bf16.mxu0 %v9550_v3  ;;  %v9590_v3 = vld [vmem:[%s10346_s4 + $0x1e0] ss:$24 sps:$4 sm:$0xff]  }
 0x32f   : > { %10119 = vrcp.f32 %v2167_v6 }
 0x330   : > { %10121 = vrcp.f32 %v2168_v8 }
 0x331   : > { %3129 = vmatpush1.bf16.msra.mxu0 %v9548_v7 }
 0x332   : > { %3130 = vmatprep.subr.bf16.mxu0 %v9553_v9 }
 0x335   : > { %3131 = vmatpush1.bf16.msra.mxu0 %v9551_v10 }
 0x336   : > { %3132 = vmatprep.subr.bf16.mxu0 %v9556_v11  ;;  %v9595_v11 = vld [vmem:[%s10346_s4 + $0x214] ss:$24 sps:$4 sm:$0xff]  }
 0x339   : > { %v10120_v14 = vpop.eup %10119  ;;  %3133 = vmatpush1.bf16.msra.mxu0 %v9554_v12  ;;  %v9593_v12 = vld [vmem:[%s10346_s4 + $0x210] ss:$24 sps:$4 sm:$0xff]  }
 0x33a   : > { %v10122_v17 = vpop.eup %10121  ;;  %v2191_v21 = vmul.f32 %v10120_v14, %v2131_v55  ;;  %3134 = vmatprep.subr.bf16.mxu0 %v9559_v13  ;;  %v9574_v55 = vld [vmem:[%s10346_s4 + $0xc4] ss:$24 sps:$4 sm:$0xff]   ;;  %v9596_v13 = vld [vmem:[%s10346_s4 + $0x240] ss:$24 sps:$4 sm:$0xff]  }
 0x33b   : > { %v2192_v22 = vmul.f32 %v10122_v17, %v2133_v58  ;;  %3779 = vmatprep.subr.bf16.mxu1 %v9574_v55  ;;  %v9575_v58 = vld [vmem:[%s10346_s4 + $0xf0] ss:$24 sps:$4 sm:$0xff]   ;;  %v9598_v14 = vld [vmem:[%s10346_s4 + $0x244] ss:$24 sps:$4 sm:$0xff]  }
 0x33c   : > { %v2199_v24 = vpack.c.bf16 %v2191_v21, %v2191_v21  ;;  %3780 = vmatpush1.bf16.msra.mxu1 %v9572_v56  ;;  %v9599_v17 = vld [vmem:[%s10346_s4 + $0x270] ss:$24 sps:$4 sm:$0xff]   ;;  %v9604_v21 = vld [vmem:[%s10346_s4 + $0x2a4] ss:$24 sps:$4 sm:$0xff]  }
 0x33d   : > { %v2200_v23 = vpack.c.bf16 %v2192_v22, %v2192_v22  ;;  %3135 = vmatpush1.bf16.msra.mxu0 %v9557_v16  ;;  %3781 = vmatprep.subr.bf16.mxu1 %v9577_v57  ;;  %v9601_v16 = vld [vmem:[%s10346_s4 + $0x274] ss:$24 sps:$4 sm:$0xff]   ;;  %v9602_v22 = vld [vmem:[%s10346_s4 + $0x2a0] ss:$24 sps:$4 sm:$0xff]  }
 0x33e   : > { %v10852_v55 = vld [vmem:[%s10266_s9 + $0x8] sm:$0xff]  ;;  %v9611_v56 = vld [vmem:[%s10346_s4 + $0x38] ss:$24 sps:$4 sm:$0xff]  }
 0x33f   : > { %3136 = vmatprep.mubr.bf16.mxu0 %v2200_v23  ;;  %v9607_v23 = vld [vmem:[%s10346_s4 + $0x2d4] ss:$24 sps:$4 sm:$0xff]   ;;  %v8767_v57 = vcombine.low %v10849_v52, %v10852_v55 }
 0x340   : > { %3137 = vmatmul.mubr.bf16.vlgmr.msra.gmra.mrb[0].mxu0 %v2199_v24  ;;  %3782 = vmatpush1.bf16.msra.mxu1 %v9575_v58  ;;  %v9605_v24 = vld [vmem:[%s10346_s4 + $0x2d0] ss:$24 sps:$4 sm:$0xff]   ;;  %v9616_v58 = vld [vmem:[%s10346_s4 + $0x6c] ss:$24 sps:$4 sm:$0xff]  }
 0x341   : > { %3783 = vmatprep.subr.bf16.mxu1 %v9580_v59  ;;  %v10242_v59 = vmov 0.0  }
 0x342   : > { %9255 = vmatprep.subr.bf16.mxu0 %v10242_v59  ;;  %9257 = vmatprep.mubr.msk.bf16.mxu0 %vm10243_vm0, %v10242_v59 }
 0x344   : > { %3784 = vmatpush1.bf16.msra.mxu1 %v9578_v60  ;;  %v9614_v60 = vld [vmem:[%s10346_s4 + $0x68] ss:$24 sps:$4 sm:$0xff]  }
 0x345   : > { %3785 = vmatprep.subr.bf16.mxu1 %v9583_v61  ;;  %v9619_v61 = vld [vmem:[%s10346_s4 + $0x9c] ss:$24 sps:$4 sm:$0xff]  }
 0x348   : > { %3786 = vmatpush1.bf16.msra.mxu1 %v9581_v62  ;;  %v9617_v62 = vld [vmem:[%s10346_s4 + $0x98] ss:$24 sps:$4 sm:$0xff]  }
 0x349   : > { %3787 = vmatprep.subr.bf16.mxu1 %v9586_v63  ;;  %v9622_v63 = vld [vmem:[%s10346_s4 + $0xcc] ss:$24 sps:$4 sm:$0xff]  }
 0x34c   : > { %3788 = vmatpush1.bf16.msra.mxu1 %v9584_v15  ;;  %v9620_v15 = vld [vmem:[%s10346_s4 + $0xc8] ss:$24 sps:$4 sm:$0xff]  }
 0x34d   : > { %3789 = vmatprep.subr.bf16.mxu1 %v9589_v0  ;;  %v9625_v0 = vld [vmem:[%s10346_s4 + $0xfc] ss:$24 sps:$4 sm:$0xff]  }
 0x350   : > { %3790 = vmatpush1.bf16.msra.mxu1 %v9587_v1  ;;  %v9623_v1 = vld [vmem:[%s10346_s4 + $0xf8] ss:$24 sps:$4 sm:$0xff]  }
 0x351   : > { %3791 = vmatprep.subr.bf16.mxu1 %v9592_v2  ;;  %v9628_v2 = vld [vmem:[%s10346_s4 + $0x12c] ss:$24 sps:$4 sm:$0xff]  }
 0x354   : > { %3792 = vmatpush1.bf16.msra.mxu1 %v9590_v3  ;;  %v9626_v3 = vld [vmem:[%s10346_s4 + $0x128] ss:$24 sps:$4 sm:$0xff]  }
 0x355   : > { %3793 = vmatprep.subr.bf16.mxu1 %v9595_v11  ;;  %v9638_v11 = vld [vmem:[%s10346_s4 + $0x1e8] ss:$24 sps:$4 sm:$0xff]  }
 0x358   : > { %3794 = vmatpush1.bf16.msra.mxu1 %v9593_v12  ;;  %v9643_v12 = vld [vmem:[%s10346_s4 + $0x21c] ss:$24 sps:$4 sm:$0xff]  }
 0x359   : > { %3795 = vmatprep.subr.bf16.mxu1 %v9598_v14  ;;  %v9646_v14 = vld [vmem:[%s10346_s4 + $0x24c] ss:$24 sps:$4 sm:$0xff]  }
 0x35c   : > { %3796 = vmatpush1.bf16.msra.mxu1 %v9596_v13  ;;  %v9641_v13 = vld [vmem:[%s10346_s4 + $0x218] ss:$24 sps:$4 sm:$0xff]  }
 0x35d   : > { %3797 = vmatprep.subr.bf16.mxu1 %v9601_v16  ;;  %v9644_v16 = vld [vmem:[%s10346_s4 + $0x248] ss:$24 sps:$4 sm:$0xff]  }
 0x360   : > { %3798 = vmatpush1.bf16.msra.mxu1 %v9599_v17  ;;  %v9649_v17 = vld [vmem:[%s10346_s4 + $0x27c] ss:$24 sps:$4 sm:$0xff]  }
 0x361   : > { %3799 = vmatprep.subr.bf16.mxu1 %v9604_v21  ;;  %v9647_v21 = vld [vmem:[%s10346_s4 + $0x278] ss:$24 sps:$4 sm:$0xff]  }
 0x364   : > { %3800 = vmatpush1.bf16.msra.mxu1 %v9602_v22  ;;  %v9652_v22 = vld [vmem:[%s10346_s4 + $0x2ac] ss:$24 sps:$4 sm:$0xff]  }
 0x365   : > { %3801 = vmatprep.subr.bf16.mxu1 %v9607_v23  ;;  %v9650_v23 = vld [vmem:[%s10346_s4 + $0x2a8] ss:$24 sps:$4 sm:$0xff]  }
 0x368   : > { %3802 = vmatpush1.bf16.msra.mxu1 %v9605_v24  ;;  %v9655_v24 = vld [vmem:[%s10346_s4 + $0x2dc] ss:$24 sps:$4 sm:$0xff]  }
 0x369   : > { %3812 = vmatprep.subr.bf16.mxu1 %v9610_v25  ;;  %v9653_v25 = vld [vmem:[%s10346_s4 + $0x2d8] ss:$24 sps:$4 sm:$0xff]  }
 0x413   : > { %v3138_v28 = vpop.f32.mrb[0].mxu0 }
 0x414   : > { %v9279_v37 = vadd.f32 %v3138_v28, %v2334_v26  ;;  %v3140_v29 = vpop.f32.mrb[1].mxu0 }
 0x415   : > { %v9280_v30 = vadd.f32 %v3140_v29, %v2338_v27  ;;  %v3142_v31 = vpop.f32.mrb[2].mxu0  ;;  %v3150_v29 = vld [vmem:[%s10291_s29] sm:$0x3] }
 0x416   : > { %v3145_v36 = vmul.f32 0.5, %v9279_v37  ;;  %v3143_v32 = vpop.f32.mrb[3].mxu0  ;;  %v3149_v37 = vld [vmem:[%s10286_s25] sm:$0x3] }
 0x417   : > { %v3146_v33 = vmul.f32 0.5, %v9280_v30  ;;  %v3171_v30 = vrot.slane %v3149_v37, %v10506_v19  ;;  %v3175_v31 = vrot.slane %v3149_v37, %v10509_v20  ;;  %v9659_v37 = vld [vmem:[%s10346_s4 + $0x40] ss:$24 sps:$4 sm:$0xff]  }
 0x418   : > { %v10792_v35 = vadd.f32 %v10195_v34, %v3145_v36  ;;  %v3188_v34 = vrot.slane %v3150_v29, %v10509_v20 }
 0x419   : > { %v10795_v39 = vadd.f32 %v10196_v38, %v3146_v33  ;;  %v3184_v33 = vrot.slane %v3150_v29, %v10506_v19  ;;  %v9664_v29 = vld [vmem:[%s10346_s4 + $0x74] ss:$24 sps:$4 sm:$0xff]  }
 0x41b   : > { %v3151_v40 = vadd.f32 %v10795_v39, %v10792_v35 }
 0x41d   : > { %3152 = vadd.xlane.f32.xlu1 %v3151_v40 }
 0x4aa   : > { %v3153_v4 = vpop.xlane.xlu1 %3152 }
 0x4ab   : > { %v3154_v5 = vmul.f32 0.00390625, %v3153_v4  ;;  %v9631_v4 = vld [vmem:[%s10346_s4 + $0x15c] ss:$24 sps:$4 sm:$0xff]  }
 0x4ad   : > { %v3155_v6 = vsub.f32 %v10792_v35, %v3154_v5  ;;  %v3156_v7 = vsub.f32 %v10795_v39, %v3154_v5  ;;  %v9629_v5 = vld [vmem:[%s10346_s4 + $0x158] ss:$24 sps:$4 sm:$0xff]  }
 0x4af   : > { %v3157_v8 = vmul.f32 %v3155_v6, %v3155_v6  ;;  %v3158_v9 = vmul.f32 %v3156_v7, %v3156_v7 }
 0x4b1   : > { %v3159_v10 = vadd.f32 %v3158_v9, %v3157_v8  ;;  %v9637_v8 = vld [vmem:[%s10346_s4 + $0x1bc] ss:$24 sps:$4 sm:$0xff]   ;;  %v9635_v9 = vld [vmem:[%s10346_s4 + $0x1b8] ss:$24 sps:$4 sm:$0xff]  }
 0x4b3   : > { %3160 = vadd.xlane.f32.xlu1 %v3159_v10  ;;  %v9640_v10 = vld [vmem:[%s10346_s4 + $0x1ec] ss:$24 sps:$4 sm:$0xff]  }
 0x4c4   : > { %3954 = vrot.lane.b32.xlu1 %v10852_v55, %s10241_s7 }
 0x540   : > { %v3161_v26 = vpop.xlane.xlu1 %3160 }
 0x541   : > { %v3162_v27 = vmul.f32 0.00390625, %v3161_v26  ;;  %v9658_v26 = vld [vmem:[%s10346_s4 + $0x14] ss:$24 sps:$4 sm:$0xff]  }
 0x543   : > { %v3163_v28 = vadd.f32 1e-12, %v3162_v27  ;;  %v9656_v27 = vld [vmem:[%s10346_s4 + $0x10] ss:$24 sps:$4 sm:$0xff]  }
 0x545   : > { %10123 = vrsqrt.f32 %v3163_v28  ;;  %v9661_v28 = vld [vmem:[%s10346_s4 + $0x44] ss:$24 sps:$4 sm:$0xff]  }
 0x54f   : > { %v10124_v36 = vpop.eup %10123 }
 0x550   : > { %v3166_v32 = vmul.f32 %v10124_v36, %v3156_v7  ;;  %v3165_v38 = vmul.f32 %v10124_v36, %v3155_v6  ;;  %v9634_v6 = vld [vmem:[%s10346_s4 + $0x18c] ss:$24 sps:$4 sm:$0xff]   ;;  %v9632_v7 = vld [vmem:[%s10346_s4 + $0x188] ss:$24 sps:$4 sm:$0xff]  }
 0x551   : > { %v9665_v36 = vld [vmem:[%s10346_s4 + $0xa0] ss:$24 sps:$4 sm:$0xff]  }
 0x552   : > { %v3179_v40 = vmul.f32 %v3175_v31, %v3166_v32  ;;  %v3178_v41 = vmul.f32 %v3171_v30, %v3165_v38  ;;  %v9662_v30 = vld [vmem:[%s10346_s4 + $0x70] ss:$24 sps:$4 sm:$0xff]   ;;  %v9667_v31 = vld [vmem:[%s10346_s4 + $0xa4] ss:$24 sps:$4 sm:$0xff]   ;;  %v9670_v32 = vld [vmem:[%s10346_s4 + $0xd4] ss:$24 sps:$4 sm:$0xff]  }
 0x553   : > { %v9671_v38 = vld [vmem:[%s10346_s4 + $0x100] ss:$24 sps:$4 sm:$0xff]  }
 0x554   : > { %v3192_v42 = vadd.f32 %v3188_v34, %v3179_v40  ;;  %v3191_v45 = vadd.f32 %v3184_v33, %v3178_v41  ;;  %v9668_v33 = vld [vmem:[%s10346_s4 + $0xd0] ss:$24 sps:$4 sm:$0xff]   ;;  %v9673_v34 = vld [vmem:[%s10346_s4 + $0x104] ss:$24 sps:$4 sm:$0xff]   ;;  %v9676_v40 = vld [vmem:[%s10346_s4 + $0x134] ss:$24 sps:$4 sm:$0xff]  }
 0x555   : > { %v9674_v41 = vld [vmem:[%s10346_s4 + $0x130] ss:$24 sps:$4 sm:$0xff]  }
 0x556   : > { %v10840_v46 = vpack.c.bf16 %v3192_v42, %v3192_v42  ;;  %v10843_v50 = vpack.c.bf16 %v3191_v45, %v3191_v45  ;;  %v9679_v42 = vld [vmem:[%s10346_s4 + $0x164] ss:$24 sps:$4 sm:$0xff]   ;;  %v9677_v45 = vld [vmem:[%s10346_s4 + $0x160] ss:$24 sps:$4 sm:$0xff]  }
 0x558   : > { %3803 = vmatprep.mubr.bf16.mxu1 %v10840_v46 }
 0x559   : > { %3804 = vmatmul.mubr.bf16.vlgmr.msra.gmra.mrb[16].mxu1 %v10843_v50 }
 0x55a   : > { %3813 = vmatpush1.bf16.msra.mxu1 %v9608_v49  ;;  %3844 = vmatprep.mubr.bf16.mxu1 %v10840_v46  ;;  %v9680_v49 = vld [vmem:[%s10346_s4 + $0x190] ss:$24 sps:$4 sm:$0xff]  }
 0x55b   : > { %3814 = vmatprep.subr.bf16.mxu1 %v9613_v51  ;;  %v9685_v51 = vld [vmem:[%s10346_s4 + $0x1c4] ss:$24 sps:$4 sm:$0xff]  }
 0x55e   : > { %3815 = vmatpush1.bf16.msra.mxu1 %v9611_v56  ;;  %v9683_v56 = vld [vmem:[%s10346_s4 + $0x1c0] ss:$24 sps:$4 sm:$0xff]  }
 0x55f   : > { %3816 = vmatprep.subr.bf16.mxu1 %v9616_v58  ;;  %v9688_v58 = vld [vmem:[%s10346_s4 + $0x1f4] ss:$24 sps:$4 sm:$0xff]  }
 0x562   : > { %3817 = vmatpush1.bf16.msra.mxu1 %v9614_v60  ;;  %v9686_v60 = vld [vmem:[%s10346_s4 + $0x1f0] ss:$24 sps:$4 sm:$0xff]  }
 0x563   : > { %3818 = vmatprep.subr.bf16.mxu1 %v9619_v61  ;;  %v9691_v61 = vld [vmem:[%s10346_s4 + $0x224] ss:$24 sps:$4 sm:$0xff]  }
 0x566   : > { %3819 = vmatpush1.bf16.msra.mxu1 %v9617_v62  ;;  %v9689_v62 = vld [vmem:[%s10346_s4 + $0x220] ss:$24 sps:$4 sm:$0xff]  }
 0x567   : > { %3820 = vmatprep.subr.bf16.mxu1 %v9622_v63  ;;  %v9694_v63 = vld [vmem:[%s10346_s4 + $0x254] ss:$24 sps:$4 sm:$0xff]  }
 0x56a   : > { %3821 = vmatpush1.bf16.msra.mxu1 %v9620_v15  ;;  %v9692_v15 = vld [vmem:[%s10346_s4 + $0x250] ss:$24 sps:$4 sm:$0xff]  }
 0x56b   : > { %3822 = vmatprep.subr.bf16.mxu1 %v9625_v0  ;;  %v9697_v0 = vld [vmem:[%s10346_s4 + $0x284] ss:$24 sps:$4 sm:$0xff]  }
 0x56e   : > { %3823 = vmatpush1.bf16.msra.mxu1 %v9623_v1  ;;  %v9695_v1 = vld [vmem:[%s10346_s4 + $0x280] ss:$24 sps:$4 sm:$0xff]  }
 0x56f   : > { %3824 = vmatprep.subr.bf16.mxu1 %v9628_v2  ;;  %v9700_v2 = vld [vmem:[%s10346_s4 + $0x2b4] ss:$24 sps:$4 sm:$0xff]  }
 0x572   : > { %3825 = vmatpush1.bf16.msra.mxu1 %v9626_v3  ;;  %v9698_v3 = vld [vmem:[%s10346_s4 + $0x2b0] ss:$24 sps:$4 sm:$0xff]  }
 0x573   : > { %3826 = vmatprep.subr.bf16.mxu1 %v9631_v4  ;;  %v9703_v4 = vld [vmem:[%s10346_s4 + $0x2e4] ss:$24 sps:$4 sm:$0xff]  }
 0x576   : > { %3827 = vmatpush1.bf16.msra.mxu1 %v9629_v5  ;;  %v9701_v5 = vld [vmem:[%s10346_s4 + $0x2e0] ss:$24 sps:$4 sm:$0xff]  }
 0x577   : > { %3828 = vmatprep.subr.bf16.mxu1 %v9634_v6  ;;  %v4046_v6 = vsel %vm4041_vm1, %v8767_v57, 0 }
 0x57a   : > { %3829 = vmatpush1.bf16.msra.mxu1 %v9632_v7  ;;  %v3950_v7 = vrot.slane %v10849_v52, 4 }
 0x57b   : > { %3830 = vmatprep.subr.bf16.mxu1 %v9637_v8  ;;  %v3951_v8 = vrot.slane %v10852_v55, 4 }
 0x57e   : > { %3831 = vmatpush1.bf16.msra.mxu1 %v9635_v9  ;;  %v8771_v9 = vcombine.low %v3950_v7, %v3951_v8 }
 0x57f   : > { %3832 = vmatprep.subr.bf16.mxu1 %v9640_v10  ;;  %v3955_v10 = vpop.permute.xlu1 %3954 }
 0x582   : > { %3833 = vmatpush1.bf16.msra.mxu1 %v9638_v11  ;;  %v3953_v11 = vpop.permute.xlu0 %3952 }
 0x583   : > { %3834 = vmatprep.subr.bf16.mxu1 %v9643_v12  ;;  %v8769_v12 = vcombine.low %v3953_v11, %v3955_v10 }
 0x585   : > { %v4095_v55 = vsel %vm4041_vm1, %v8769_v12, 0 }
 0x586   : > { %3835 = vmatpush1.bf16.msra.mxu1 %v9641_v13 }
 0x587   : > { %3836 = vmatprep.subr.bf16.mxu1 %v9646_v14 }
 0x58a   : > { %3837 = vmatpush1.bf16.msra.mxu1 %v9644_v16 }
 0x58b   : > { %3838 = vmatprep.subr.bf16.mxu1 %v9649_v17 }
 0x58e   : > { %3839 = vmatpush1.bf16.msra.mxu1 %v9647_v21  ;;  %v3894_v21 = vld [vmem:[%s10361_s19] sm:$0x3] }
 0x58f   : > { %3840 = vmatprep.subr.bf16.mxu1 %v9652_v22  ;;  %v3899_v22 = vrot.slane %v3894_v21, %v10506_v19 }
 0x592   : > { %3841 = vmatpush1.bf16.msra.mxu1 %v9650_v23  ;;  %v3903_v23 = vrot.slane %v3894_v21, %v10509_v20 }
 0x593   : > { %3842 = vmatprep.subr.bf16.mxu1 %v9655_v24 }
 0x596   : > { %3843 = vmatpush1.bf16.msra.mxu1 %v9653_v25 }
 0x597   : > { %3853 = vmatprep.subr.bf16.mxu1 %v9658_v26 }
 0x599   : > { %3845 = vmatmul.mubr.bf16.vlgmr.msra.gmra.mrb[20].mxu1 %v10843_v50 }
 0x59a   : > { %3854 = vmatpush1.bf16.msra.mxu1 %v9656_v27  ;;  %3885 = vmatprep.mubr.bf16.mxu1 %v10840_v46  ;;  %v9682_v46 = vld [vmem:[%s10346_s4 + $0x194] ss:$24 sps:$4 sm:$0xff]  }
 0x59b   : > { %3855 = vmatprep.subr.bf16.mxu1 %v9661_v28 }
 0x59e   : > { %3856 = vmatpush1.bf16.msra.mxu1 %v9659_v37 }
 0x59f   : > { %3857 = vmatprep.subr.bf16.mxu1 %v9664_v29  ;;  %v8764_v29 = vld [vmem:[%s10356_s24 + $0x1] ss:$0 sm:$0xff] }
 0x5a2   : > { %3858 = vmatpush1.bf16.msra.mxu1 %v9662_v30 }
 0x5a3   : > { %3859 = vmatprep.subr.bf16.mxu1 %v9667_v31 }
 0x5a6   : > { %3860 = vmatpush1.bf16.msra.mxu1 %v9665_v36 }
 0x5a7   : > { %3861 = vmatprep.subr.bf16.mxu1 %v9670_v32  ;;  %v4144_v32 = vsel %vm4041_vm1, %v8771_v9, 0 }
 0x5aa   : > { %3862 = vmatpush1.bf16.msra.mxu1 %v9668_v33  ;;  %v8765_v33 = vld [vmem:[%s10356_s24 + $0x2] ss:$0 sm:$0xff] }
 0x5ab   : > { %3863 = vmatprep.subr.bf16.mxu1 %v9673_v34  ;;  %v3957_v34 = vrot.slane %v3955_v10, 4 }
 0x5ae   : > { %3864 = vmatpush1.bf16.msra.mxu1 %v9671_v38  ;;  %v3956_v38 = vrot.slane %v3953_v11, 4 }
 0x5af   : > { %3865 = vmatprep.subr.bf16.mxu1 %v9676_v40 }
 0x5b2   : > { %3866 = vmatpush1.bf16.msra.mxu1 %v9674_v41  ;;  %v3908_v41 = vld [vmem:[%s10366_s14] sm:$0x3] }
 0x5b3   : > { %3867 = vmatprep.subr.bf16.mxu1 %v9679_v42  ;;  %v8773_v42 = vcombine.low %v3956_v38, %v3957_v34 }
 0x5b6   : > { %3868 = vmatpush1.bf16.msra.mxu1 %v9677_v45  ;;  %v3913_v45 = vrot.slane %v3908_v41, %v10506_v19 }
 0x5b7   : > { %3869 = vmatprep.subr.bf16.mxu1 %v9682_v46 }
 0x5ba   : > { %3870 = vmatpush1.bf16.msra.mxu1 %v9680_v49  ;;  %v3917_v49 = vrot.slane %v3908_v41, %v10509_v20 }
 0x5bb   : > { %3871 = vmatprep.subr.bf16.mxu1 %v9685_v51  ;;  %v8766_v51 = vld [vmem:[%s10356_s24 + $0x3] ss:$0 sm:$0xff] }
 0x5be   : > { %3872 = vmatpush1.bf16.msra.mxu1 %v9683_v56 }
 0x5bf   : > { %3873 = vmatprep.subr.bf16.mxu1 %v9688_v58 }
 0x5c2   : > { %3874 = vmatpush1.bf16.msra.mxu1 %v9686_v60  ;;  %v4193_v60 = vsel %vm4041_vm1, %v8773_v42, 0 }
 0x5c3   : > { %3875 = vmatprep.subr.bf16.mxu1 %v9691_v61 }
 0x5c6   : > { %3876 = vmatpush1.bf16.msra.mxu1 %v9689_v62 }
 0x5c7   : > { %3877 = vmatprep.subr.bf16.mxu1 %v9694_v63 }
 0x5ca   : > { %3878 = vmatpush1.bf16.msra.mxu1 %v9692_v15 }
 0x5cb   : > { %3879 = vmatprep.subr.bf16.mxu1 %v9697_v0 }
 0x5ce   : > { %3880 = vmatpush1.bf16.msra.mxu1 %v9695_v1 }
 0x5cf   : > { %3881 = vmatprep.subr.bf16.mxu1 %v9700_v2 }
 0x5d2   : > { %3882 = vmatpush1.bf16.msra.mxu1 %v9698_v3 }
 0x5d3   : > { %3883 = vmatprep.subr.bf16.mxu1 %v9703_v4 }
 0x5d6   : > { %3884 = vmatpush1.bf16.msra.mxu1 %v9701_v5 }
 0x5d7   : > { %9207 = vmatprep.subr.bf16.mxu1 %v10242_v59 }
 0x5d9   : > { %3886 = vmatmul.mubr.bf16.vlgmr.msra.gmra.mrb[24].mxu1 %v10843_v50  ;;  %v8763_v50 = vld [vmem:[%s10356_s24] ss:$0 sm:$0xff] }
 0x5da   : > { %9209 = vmatprep.mubr.msk.bf16.mxu1 %vm10243_vm0, %v10242_v59 }
 0x5df   : > { %9208 = vmatpush3.bf16.xpose.msra.mxu1 %v4046_v6  ;;  %v8759_v6 = vld [vmem:[%s11949_s10] ss:$0 sm:$0xff] }
 0x5e0   : > { %9213 = vmatprep.subr.bf16.mxu1 %v10242_v59 }
 0x62c   : > { %v10939_v13 = vpop.f32.mrb[16].mxu1 }
 0x62d   : > { %v4022_v14 = vadd.f32 %v8763_v50, %v10939_v13  ;;  %3925 = vrot.lane.b32.xlu1 %v10939_v13, %s10241_s7  ;;  %v10944_v57 = vpop.f32.mrb[17].mxu1  ;;  %v3986_v8 = vadd.f32 %v8759_v6, %v10939_v13  ;;  %v8760_v50 = vld [vmem:[%s11949_s10 + $0x1] ss:$0 sm:$0xff] }
 0x62e   : > { %v3809_v16 = vpop.f32.mrb[18].mxu1  ;;  %v4024_v40 = vadd.f32 %v8765_v33, %v10944_v57 }
 0x62f   : > { %v4026_v17 = vpack.c.bf16 %v4022_v14, %v4022_v14  ;;  %v3810_v52 = vpop.f32.mrb[19].mxu1  ;;  %v3990_v9 = vpack.c.bf16 %v3986_v8, %v3986_v8 }
 0x630   : > { %v4028_v46 = vpack.c.bf16 %v4024_v40, %v4024_v40 }
 0x631   : > { %9210 = vmatmul.mubr.msk.bf16.vlgmr.msra.gmra.mrb[28].mxu1 %vm4041_vm1, %v4026_v17  ;;  %3929 = vrot.lane.b32.xlu1 %v10944_v57, %s10241_s7  ;;  %v8761_v17 = vld [vmem:[%s11949_s10 + $0x2] ss:$0 sm:$0xff] }
 0x632   : > { %9214 = vmatpush3.bf16.xpose.msra.mxu1 %v4095_v55  ;;  %9215 = vmatprep.mubr.msk.bf16.mxu1 %vm10243_vm0, %v10242_v59  ;;  %v3988_v21 = vadd.f32 %v8761_v17, %v10944_v57 }
 0x633   : > { %9219 = vmatprep.subr.bf16.mxu1 %v10242_v59 }
 0x66c   : > { %v3846_v24 = vpop.f32.mrb[20].mxu1 }
 0x66d   : > { %v3906_v25 = vadd.f32 %v3899_v22, %v3846_v24  ;;  %v3848_v26 = vpop.f32.mrb[21].mxu1  ;;  %v8762_v24 = vld [vmem:[%s11949_s10 + $0x3] ss:$0 sm:$0xff] }
 0x66e   : > { %v10956_v27 = vadd.f32 %v3903_v23, %v3848_v26  ;;  %v3850_v28 = vpop.f32.mrb[22].mxu1  ;;  %v3992_v23 = vpack.c.bf16 %v3988_v21, %v3988_v21 }
 0x66f   : > { %3933 = vrot.lane.b32.xlu0 %v3906_v25, %s10241_s7  ;;  %v3851_v37 = vpop.f32.mrb[23].mxu1  ;;  %v4030_v3 = vpack.c.bf16 %v3906_v25, %v3906_v25 }
 0x670   : > { %3937 = vrot.lane.b32.xlu1 %v10956_v27, %s10241_s7  ;;  %v4032_v13 = vpack.c.bf16 %v10956_v27, %v10956_v27 }
 0x671   : > { %v4368_v7 = vsel %vm4041_vm1, %v4030_v3, 0 }
 0x672   : > { %v4468_v52 = vsel %vm4041_vm1, %v4032_v13, 0 }
 0x69f   : > { %v3926_v30 = vpop.permute.xlu1 %3925 }
 0x6a0   : > { %v4023_v31 = vadd.f32 %v8764_v29, %v3926_v30  ;;  %v3987_v14 = vadd.f32 %v8760_v50, %v3926_v30 }
 0x6a2   : > { %v4027_v36 = vpack.c.bf16 %v4023_v31, %v4023_v31  ;;  %v3991_v16 = vpack.c.bf16 %v3987_v14, %v3987_v14 }
 0x6a3   : > { %v3930_v56 = vpop.permute.xlu1 %3929 }
 0x6a4   : > { %9216 = vmatmul.mubr.msk.bf16.vlgmr.msra.gmra.mrb[32].mxu1 %vm4041_vm1, %v4027_v36  ;;  %v4025_v63 = vadd.f32 %v8766_v51, %v3930_v56  ;;  %v3989_v26 = vadd.f32 %v8762_v24, %v3930_v56 }
 0x6a5   : > { %9220 = vmatpush3.bf16.xpose.msra.mxu1 %v4144_v32  ;;  %9221 = vmatprep.mubr.msk.bf16.mxu1 %vm10243_vm0, %v10242_v59 }
 0x6a6   : > { %9225 = vmatprep.subr.bf16.mxu1 %v10242_v59  ;;  %v4029_v5 = vpack.c.bf16 %v4025_v63, %v4025_v63  ;;  %v3993_v27 = vpack.c.bf16 %v3989_v26, %v3989_v26 }
 0x6ac   : > { %v3887_v58 = vpop.f32.mrb[24].mxu1  ;;  %9222 = vmatmul.mubr.msk.bf16.vlgmr.msra.gmra.mrb[36].mxu1 %vm4041_vm1, %v4028_v46 }
 0x6ad   : > { %v10975_v61 = vadd.f32 %v3913_v45, %v3887_v58  ;;  %v3889_v62 = vpop.f32.mrb[25].mxu1  ;;  %9226 = vmatpush3.bf16.xpose.msra.mxu1 %v4193_v60  ;;  %9227 = vmatprep.mubr.msk.bf16.mxu1 %vm10243_vm0, %v10242_v59 }
 0x6ae   : > { %v10979_v15 = vadd.f32 %v3917_v49, %v3889_v62  ;;  %v3891_v0 = vpop.f32.mrb[26].mxu1  ;;  %9231 = vmatprep.subr.bf16.mxu1 %v10242_v59 }
 0x6af   : > { %v4034_v1 = vpack.c.bf16 %v10975_v61, %v10975_v61  ;;  %v3892_v2 = vpop.f32.mrb[27].mxu1 }
 0x6b1   : > { %v4631_v4 = vsel %vm4338_vm2, %v4034_v1, 0 }
 0x6b2   : > { %9256 = vmatpush3.bf16.msra.mxu0 %v4631_v4 }
 0x6b3   : > { %9267 = vmatprep.subr.bf16.mxu0 %v10242_v59 }
 0x6b4   : > { %9228 = vmatmul.mubr.msk.bf16.vlgmr.msra.gmra.mrb[40].mxu1 %vm4041_vm1, %v4029_v5 }
 0x6b5   : > { %9232 = vmatpush3.bf16.xpose.msra.mxu1 %v4368_v7  ;;  %9233 = vmatprep.mubr.msk.bf16.mxu1 %vm10243_vm0, %v10242_v59 }
 0x6b6   : > { %9237 = vmatprep.subr.bf16.mxu1 %v10242_v59 }
 0x6bc   : > { %9234 = vmatmul.mubr.msk.bf16.vlgmr.msra.gmra.mrb[44].mxu1 %vm4041_vm1, %v3990_v9 }
 0x6bd   : > { %9239 = vmatprep.mubr.msk.bf16.mxu1 %vm10243_vm0, %v10242_v59 }
 0x6e1   : > { %v3934_v10 = vpop.permute.xlu0 %3933 }
 0x6e2   : > { %v4031_v11 = vpack.c.bf16 %v3934_v10, %v3934_v10  ;;  %v3938_v55 = vpop.permute.xlu1 %3937 }
 0x6e3   : > { %v4033_v22 = vpack.c.bf16 %v3938_v55, %v3938_v55 }
 0x6e4   : > { %v4418_v12 = vsel %vm4041_vm1, %v4031_v11, 0 }
 0x6e5   : > { %9238 = vmatpush3.bf16.xpose.msra.mxu1 %v4418_v12  ;;  %v4518_v25 = vsel %vm4041_vm1, %v4033_v22, 0 }
 0x6e6   : > { %9243 = vmatprep.subr.bf16.mxu1 %v10242_v59 }
 0x6ec   : > { %9240 = vmatmul.mubr.msk.bf16.vlgmr.msra.gmra.mrb[48].mxu1 %vm4041_vm1, %v3991_v16 }
 0x6ed   : > { %9244 = vmatpush3.bf16.xpose.msra.mxu1 %v4468_v52  ;;  %9245 = vmatprep.mubr.msk.bf16.mxu1 %vm10243_vm0, %v10242_v59 }
 0x6ee   : > { %9249 = vmatprep.subr.bf16.mxu1 %v10242_v59 }
 0x6f4   : > { %9246 = vmatmul.mubr.msk.bf16.vlgmr.msra.gmra.mrb[52].mxu1 %vm4041_vm1, %v3992_v23 }
 0x6f5   : > { %9250 = vmatpush3.bf16.xpose.msra.mxu1 %v4518_v25  ;;  %9251 = vmatprep.mubr.msk.bf16.mxu1 %vm10243_vm0, %v10242_v59 }
 0x6f6   : > { %9261 = vmatprep.subr.bf16.mxu1 %v10242_v59 }
 0x6fc   : > { %9252 = vmatmul.mubr.msk.bf16.vlgmr.msra.gmra.mrb[56].mxu1 %vm4041_vm1, %v3993_v27 }
 0x6fd   : > { %9263 = vmatprep.mubr.msk.bf16.mxu1 %vm10243_vm0, %v10242_v59 }
 0x704   : > { %v11017_v57 = vpop.f32.mrb[28].mxu1 }
 0x705   : > { %v9211_v28 = vpop.f32.mrb[29].mxu1 }
 0x706   : > { %v4085_v37 = vpop.f32.mrb[30].mxu1 }
 0x707   : > { %v9212_v29 = vpop.f32.mrb[31].mxu1 }
 0x777   : > { %v11019_v30 = vpop.f32.mrb[32].mxu1 }
 0x778   : > { %4253 = vrot.lane.b32.xlu1 %v11019_v30, %s10244_s11  ;;  %4241 = vrot.lane.b32.xlu0 %v11019_v30, %s10245_s15  ;;  %v9217_v31 = vpop.f32.mrb[33].mxu1 }
 0x779   : > { %v4134_v36 = vpop.f32.mrb[34].mxu1 }
 0x77a   : > { %v9218_v32 = vpop.f32.mrb[35].mxu1 }
 0x77c   : > { %4277 = vrot.lane.b32.xlu1 %v11019_v30, %s10246_s16  ;;  %4265 = vrot.lane.b32.xlu0 %v11019_v30, %s10247_s18 }
 0x77f   : > { %v11029_v33 = vpop.f32.mrb[36].mxu1 }
 0x780   : > { %4301 = vrot.lane.b32.xlu1 %v11019_v30, %s10248_s22  ;;  %4289 = vrot.lane.b32.xlu0 %v11019_v30, %s10249_s23  ;;  %v9223_v34 = vpop.f32.mrb[37].mxu1 }
 0x781   : > { %v4183_v38 = vpop.f32.mrb[38].mxu1 }
 0x782   : > { %v9224_v40 = vpop.f32.mrb[39].mxu1 }
 0x784   : > { %4313 = vrot.lane.b32.xlu0 %v11019_v30, %s10250_s26 }
 0x787   : > { %v11036_v41 = vpop.f32.mrb[40].mxu1 }
 0x788   : > { %4257 = vrot.lane.b32.xlu0 %v11036_v41, %s10244_s11  ;;  %4245 = vrot.lane.b32.xlu1 %v11036_v41, %s10245_s15  ;;  %v9229_v42 = vpop.f32.mrb[41].mxu1 }
 0x789   : > { %v4232_v45 = vpop.f32.mrb[42].mxu1 }
 0x78a   : > { %v9230_v46 = vpop.f32.mrb[43].mxu1 }
 0x78c   : > { %4281 = vrot.lane.b32.xlu0 %v11036_v41, %s10246_s16  ;;  %4269 = vrot.lane.b32.xlu1 %v11036_v41, %s10247_s18 }
 0x78f   : > { %v11046_v49 = vpop.f32.mrb[44].mxu1 }
 0x790   : > { %4305 = vrot.lane.b32.xlu0 %v11036_v41, %s10248_s22  ;;  %4293 = vrot.lane.b32.xlu1 %v11036_v41, %s10249_s23  ;;  %v9235_v51 = vpop.f32.mrb[45].mxu1 }
 0x791   : > { %v4407_v56 = vpop.f32.mrb[46].mxu1 }
 0x792   : > { %v9236_v58 = vpop.f32.mrb[47].mxu1 }
 0x794   : > { %4239 = vrot.lane.b32.xlu0 %v11017_v57, %s10245_s15  ;;  %4317 = vrot.lane.b32.xlu1 %v11036_v41, %s10250_s26 }
 0x798   : > { %4263 = vrot.lane.b32.xlu0 %v11017_v57, %s10247_s18  ;;  %4251 = vrot.lane.b32.xlu1 %v11017_v57, %s10244_s11 }
 0x79c   : > { %4287 = vrot.lane.b32.xlu0 %v11017_v57, %s10249_s23  ;;  %4275 = vrot.lane.b32.xlu1 %v11017_v57, %s10246_s16 }
 0x7a0   : > { %4311 = vrot.lane.b32.xlu0 %v11017_v57, %s10250_s26  ;;  %4299 = vrot.lane.b32.xlu1 %v11017_v57, %s10248_s22 }
 0x7a4   : > { %4243 = vrot.lane.b32.xlu0 %v11029_v33, %s10245_s15  ;;  %4255 = vrot.lane.b32.xlu1 %v11029_v33, %s10244_s11  ;;  %s11950_s11 = sld [smem:[#allocation2_spill]] }
 0x7a8   : > { %4267 = vrot.lane.b32.xlu0 %v11029_v33, %s10247_s18  ;;  %4279 = vrot.lane.b32.xlu1 %v11029_v33, %s10246_s16  ;;  %s11953_s16 = sld [smem:[#allocation10_spill]]  ;;  %s11954_s18 = sld [smem:[#allocation11_spill]] }
 0x7aa   : > { %s1107_s15 = scalar_lea.vmem %s11950_s11, %s11974_s1  ;;  %s11960_s11 = sld [smem:[#allocation14_spill]] }
 0x7ac   : > { %4291 = vrot.lane.b32.xlu0 %v11029_v33, %s10249_s23  ;;  %s11957_s23 = sld [smem:[#allocation4_spill]] }
 0x7b0   : > { %4315 = vrot.lane.b32.xlu0 %v11029_v33, %s10250_s26  ;;  %s11958_s26 = sld [smem:[#allocation18_spill]] }
 0x7bf   : > { %v11077_v60 = vpop.f32.mrb[48].mxu1 }
 0x7c0   : > { %v9241_v62 = vpop.f32.mrb[49].mxu1 }
 0x7c1   : > { %v4457_v63 = vpop.f32.mrb[50].mxu1 }
 0x7c2   : > { %v9242_v0 = vpop.f32.mrb[51].mxu1 }
 0x7c7   : > { %v11079_v1 = vpop.f32.mrb[52].mxu1 }
 0x7c8   : > { %v9247_v2 = vpop.f32.mrb[53].mxu1 }
 0x7c9   : > { %v4507_v3 = vpop.f32.mrb[54].mxu1 }
 0x7ca   : > { %v9248_v4 = vpop.f32.mrb[55].mxu1 }
 0x7cf   : > { %v11081_v5 = vpop.f32.mrb[56].mxu1 }
 0x7d0   : > { %v9253_v6 = vpop.f32.mrb[57].mxu1 }
 0x7d1   : > { %v4557_v7 = vpop.f32.mrb[58].mxu1 }
 0x7d2   : > { %v9254_v8 = vpop.f32.mrb[59].mxu1 }
 0x7ea   : > { %v4254_v9 = vpop.permute.xlu1 %4253  ;;  %v4242_v10 = vpop.permute.xlu0 %4241 }
 0x7eb   : > { %v4325_v11 = vsel %vm4323_vm3, %v11019_v30, %v4242_v10 }
 0x7ec   : > { %v4330_v12 = vsel %vm4328_vm4, %v4325_v11, %v4254_v9 }
 0x7ee   : > { %v4278_v50 = vpop.permute.xlu1 %4277  ;;  %v4266_v14 = vpop.permute.xlu0 %4265 }
 0x7ef   : > { %v4335_v13 = vsel %vm4333_vm5, %v4330_v12, %v4266_v14 }
 0x7f0   : > { %v4340_v16 = vsel %vm4338_vm2, %v4335_v13, %v4278_v50 }
 0x7f2   : > { %v4290_v17 = vpop.permute.xlu0 %4289  ;;  %v4302_v52 = vpop.permute.xlu1 %4301 }
 0x7f3   : > { %v4345_v55 = vsel %vm4343_vm6, %v4340_v16, %v4290_v17  ;;  %v4358_v16 = vld [vmem:[%s1107_s15] sm:$0x1]  ;;  %v10252_v17 = vmov 0   ;;  %s11964_s15 = sld [smem:[#allocation15_spill]] }
 0x7f4   : > { %v4350_v22 = vsel %vm4348_vm7, %v4345_v55, %v4302_v52  ;;  %vm4359_vm9 = vcmp.gt.f32.partialorder %v4358_v16, 0.5 }
 0x7f5   : > { %v4564_v52 = vsel %vm4359_vm9, 1, %v10252_v17 }
 0x7f6   : > { %v4314_v21 = vpop.permute.xlu0 %4313  ;;  %v4568_v55 = vrot.slane %v4564_v52, %v10506_v19 }
 0x7f7   : > { %v4355_v23 = vsel %vm4353_vm8, %v4350_v22, %v4314_v21  ;;  %v9711_v22 = vld [vmem:[%s11953_s16 + $0x20] ss:$8 sps:$4 sm:$0xff]  }
 0x7f8   : > { %4411 = vrot.lane.b32.xlu1 %v4355_v23, %s10251_s2  ;;  %vm11122_vm10 = vcmp.eq.s32.totalorder %v4568_v55, 1 }
 0x7fa   : > { %v4246_v24 = vpop.permute.xlu1 %4245  ;;  %v4258_v25 = vpop.permute.xlu0 %4257 }
 0x7fb   : > { %v4327_v26 = vsel %vm4323_vm3, %v11036_v41, %v4246_v24 }
 0x7fc   : > { %4303 = vrot.lane.b32.xlu1 %v11029_v33, %s10248_s22  ;;  %v4332_v27 = vsel %vm4328_vm4, %v4327_v26, %v4258_v25  ;;  %s11956_s22 = sld [smem:[#allocation3_spill]] }
 0x7fe   : > { %v4270_v28 = vpop.permute.xlu1 %4269  ;;  %v4282_v37 = vpop.permute.xlu0 %4281 }
 0x7ff   : > { %v4337_v29 = vsel %vm4333_vm5, %v4332_v27, %v4270_v28 }
 0x800   : > { %v4342_v30 = vsel %vm4338_vm2, %v4337_v29, %v4282_v37 }
 0x802   : > { %v4294_v31 = vpop.permute.xlu1 %4293  ;;  %v4306_v36 = vpop.permute.xlu0 %4305 }
 0x803   : > { %v4347_v32 = vsel %vm4343_vm6, %v4342_v30, %v4294_v31 }
 0x804   : > { %v4352_v34 = vsel %vm4348_vm7, %v4347_v32, %v4306_v36 }
 0x806   : > { %v4318_v38 = vpop.permute.xlu1 %4317  ;;  %v4240_v40 = vpop.permute.xlu0 %4239 }
 0x807   : > { %v4357_v41 = vsel %vm4353_vm8, %v4352_v34, %v4318_v38  ;;  %v4324_v42 = vsel %vm4323_vm3, %v11017_v57, %v4240_v40 }
 0x808   : > { %4511 = vrot.lane.b32.xlu1 %v4357_v41, %s10251_s2 }
 0x80a   : > { %v4252_v45 = vpop.permute.xlu1 %4251  ;;  %v4264_v46 = vpop.permute.xlu0 %4263 }
 0x80b   : > { %v4329_v51 = vsel %vm4328_vm4, %v4324_v42, %v4252_v45 }
 0x80c   : > { %v4334_v56 = vsel %vm4333_vm5, %v4329_v51, %v4264_v46 }
 0x80e   : > { %v4276_v58 = vpop.permute.xlu1 %4275  ;;  %v4288_v62 = vpop.permute.xlu0 %4287 }
 0x80f   : > { %v4339_v63 = vsel %vm4338_vm2, %v4334_v56, %v4276_v58 }
 0x810   : > { %v4344_v0 = vsel %vm4343_vm6, %v4339_v63, %v4288_v62 }
 0x812   : > { %v4300_v2 = vpop.permute.xlu1 %4299  ;;  %v4312_v3 = vpop.permute.xlu0 %4311 }
 0x813   : > { %v4349_v4 = vsel %vm4348_vm7, %v4344_v0, %v4300_v2 }
 0x814   : > { %v4354_v57 = vsel %vm4353_vm8, %v4349_v4, %v4312_v3 }
 0x815   : > { %4361 = vrot.lane.b32.xlu0 %v4354_v57, %s10251_s2 }
 0x816   : > { %v4256_v6 = vpop.permute.xlu1 %4255  ;;  %v4244_v7 = vpop.permute.xlu0 %4243 }
 0x817   : > { %v4326_v8 = vsel %vm4323_vm3, %v11029_v33, %v4244_v7 }
 0x818   : > { %v4331_v9 = vsel %vm4328_vm4, %v4326_v8, %v4256_v6 }
 0x81a   : > { %v4268_v10 = vpop.permute.xlu0 %4267  ;;  %v4280_v11 = vpop.permute.xlu1 %4279 }
 0x81b   : > { %v4336_v50 = vsel %vm4333_vm5, %v4331_v9, %v4268_v10 }
 0x81c   : > { %v4341_v12 = vsel %vm4338_vm2, %v4336_v50, %v4280_v11 }
 0x81e   : > { %v4292_v14 = vpop.permute.xlu0 %4291 }
 0x81f   : > { %v4346_v13 = vsel %vm4343_vm6, %v4341_v12, %v4292_v14 }
 0x822   : > { %v4316_v25 = vpop.permute.xlu0 %4315 }
 0x86a   : > { %v4412_v21 = vpop.permute.xlu1 %4411 }
 0x86b   : > { %v4455_v33 = vadd.f32 %v11077_v60, %v4412_v21 }
 0x86d   : > { %v4561_v23 = vmul.f32 0.125, %v4455_v33 }
 0x86e   : > { %v4304_v24 = vpop.permute.xlu1 %4303 }
 0x86f   : > { %v4351_v26 = vsel %vm4348_vm7, %v4346_v13, %v4304_v24  ;;  %v4571_v27 = vsel %vm11122_vm10, %v4561_v23, -1e+09 }
 0x870   : > { %v4578_v28 = vsel %vm4574_vm11, %v4571_v27, -inf  ;;  %v4356_v37 = vsel %vm4353_vm8, %v4351_v26, %v4316_v25 }
 0x871   : > { %4579 = vmax.xlane.f32.xlu1 %v4578_v28  ;;  %4461 = vrot.lane.b32.xlu0 %v4356_v37, %s10251_s2  ;;  %s11959_s2 = sld [smem:[#allocation13_spill]] }
 0x87a   : > { %v4512_v60 = vpop.permute.xlu1 %4511 }
 0x87b   : > { %v4555_v29 = vadd.f32 %v11081_v5, %v4512_v60 }
 0x87d   : > { %v4563_v31 = vmul.f32 0.125, %v4555_v29 }
 0x87f   : > { %v4573_v34 = vsel %vm11122_vm10, %v4563_v31, -1e+09 }
 0x880   : > { %v4584_v38 = vsel %vm4574_vm11, %v4573_v34, -inf }
 0x887   : > { %v4362_v30 = vpop.permute.xlu0 %4361 }
 0x888   : > { %v4405_v36 = vadd.f32 %v11046_v49, %v4362_v30 }
 0x88a   : > { %v4560_v32 = vmul.f32 0.125, %v4405_v36  ;;  %v4036_v36 = vpack.c.bf16 %v10979_v15, %v10979_v15 }
 0x88c   : > { %v4570_v40 = vsel %vm11122_vm10, %v4560_v32, -1e+09 }
 0x88d   : > { %v4575_v41 = vsel %vm4574_vm11, %v4570_v40, -inf }
 0x890   : > { %4585 = vmax.xlane.f32.xlu0 %v4584_v38  ;;  %v4723_v38 = vsel %vm4338_vm2, %v4036_v36, 0 }
 0x894   : > { %4576 = vmax.xlane.f32.xlu0 %v4575_v41 }
 0x8e3   : > { %v4462_v42 = vpop.permute.xlu0 %4461 }
 0x8e4   : > { %v4505_v5 = vadd.f32 %v11079_v1, %v4462_v42 }
 0x8e6   : > { %v4562_v45 = vmul.f32 0.125, %v4505_v5 }
 0x8e8   : > { %v4572_v49 = vsel %vm11122_vm10, %v4562_v45, -1e+09  ;;  %v9705_v45 = vld [vmem:[%s11953_s16] ss:$8 sps:$4 sm:$0xff]  }
 0x8e9   : > { %v4581_v46 = vsel %vm4574_vm11, %v4572_v49, -inf }
 0x8ea   : > { %4582 = vmax.xlane.f32.xlu1 %v4581_v46  ;;  %v9710_v46 = vld [vmem:[%s11953_s16 + $0x14] ss:$8 sps:$4 sm:$0xff]  }
 0x8fe   : > { %v4580_v51 = vpop.xlane.xlu1 %4579 }
 0x8ff   : > { %v4588_v56 = vsub.f32 %v4571_v27, %v4580_v51  ;;  %v9713_v51 = vld [vmem:[%s11953_s16 + $0x24] ss:$8 sps:$4 sm:$0xff]  }
 0x901   : > { %v4593_v58 = vmul.f32 1.442695, %v4588_v56  ;;  %v9716_v56 = vld [vmem:[%s11953_s16 + $0x34] ss:$8 sps:$4 sm:$0xff]  }
 0x903   : > { %10125 = vpow2.f32 %v4593_v58  ;;  %v9714_v58 = vld [vmem:[%s11953_s16 + $0x30] ss:$8 sps:$4 sm:$0xff]  }
 0x90d   : > { %v10126_v62 = vpop.eup %10125 }
 0x90e   : > { %v4602_v63 = vsel %vm4574_vm11, %v10126_v62, 0.0 }
 0x90f   : > { %4603 = vadd.xlane.f32.xlu0 %v4602_v63  ;;  %v9717_v63 = vld [vmem:[%s11953_s16 + $0x40] ss:$8 sps:$4 sm:$0xff]  }
 0x91d   : > { %v4586_v0 = vpop.xlane.xlu0 %4585 }
 0x91e   : > { %v4590_v2 = vsub.f32 %v4573_v34, %v4586_v0  ;;  %v9722_v0 = vld [vmem:[%s11953_s16 + $0x54] ss:$8 sps:$4 sm:$0xff]  }
 0x920   : > { %v4597_v3 = vmul.f32 1.442695, %v4590_v2  ;;  %v9720_v2 = vld [vmem:[%s11953_s16 + $0x50] ss:$8 sps:$4 sm:$0xff]  }
 0x921   : > { %v4577_v57 = vpop.xlane.xlu0 %4576 }
 0x922   : > { %10127 = vpow2.f32 %v4597_v3  ;;  %v4587_v6 = vsub.f32 %v4570_v40, %v4577_v57  ;;  %v9725_v3 = vld [vmem:[%s11953_s16 + $0x64] ss:$8 sps:$4 sm:$0xff]   ;;  %v9726_v57 = vld [vmem:[%s11953_s16 + $0x70] ss:$8 sps:$4 sm:$0xff]  }
 0x924   : > { %v4591_v7 = vmul.f32 1.442695, %v4587_v6  ;;  %v9731_v6 = vld [vmem:[%s11953_s16 + $0x84] ss:$8 sps:$4 sm:$0xff]  }
 0x925   : > { %3941 = vrot.lane.b32.xlu0 %v10975_v61, %s10241_s7 }
 0x926   : > { %10129 = vpow2.f32 %v4591_v7  ;;  %v9729_v7 = vld [vmem:[%s11953_s16 + $0x80] ss:$8 sps:$4 sm:$0xff]  }
 0x92c   : > { %v10128_v1 = vpop.eup %10127 }
 0x92d   : > { %v4608_v4 = vsel %vm4574_vm11, %v10128_v1, 0.0 }
 0x92e   : > { %4609 = vadd.xlane.f32.xlu1 %v4608_v4  ;;  %v9728_v4 = vld [vmem:[%s11953_s16 + $0x74] ss:$8 sps:$4 sm:$0xff]  }
 0x930   : > { %v10130_v8 = vpop.eup %10129 }
 0x931   : > { %v4599_v9 = vsel %vm4574_vm11, %v10130_v8, 0.0 }
 0x93f   : > { %3945 = vrot.lane.b32.xlu1 %v10979_v15, %s10241_s7 }
 0x963   : > { %4600 = vadd.xlane.f32.xlu1 %v4599_v9  ;;  %v9732_v9 = vld [vmem:[%s11953_s16 + $0x90] ss:$8 sps:$4 sm:$0xff]  }
 0x977   : > { %v4583_v10 = vpop.xlane.xlu1 %4582 }
 0x978   : > { %v4589_v11 = vsub.f32 %v4572_v49, %v4583_v10  ;;  %v9707_v49 = vld [vmem:[%s11953_s16 + $0x4] ss:$8 sps:$4 sm:$0xff]  }
 0x979   : > { %v9737_v10 = vld [vmem:[%s11953_s16 + $0xa4] ss:$8 sps:$4 sm:$0xff]  }
 0x97a   : > { %v4595_v50 = vmul.f32 1.442695, %v4589_v11 }
 0x97c   : > { %10131 = vpow2.f32 %v4595_v50 }
 0x986   : > { %v10132_v61 = vpop.eup %10131 }
 0x987   : > { %v4605_v12 = vsel %vm4574_vm11, %v10132_v61, 0.0 }
 0x988   : > { %4606 = vadd.xlane.f32.xlu0 %v4605_v12 }
 0x99c   : > { %v4604_v14 = vpop.xlane.xlu0 %4603 }
 0x99d   : > { %10133 = vrcp.f32 %v4604_v14  ;;  %v9740_v14 = vld [vmem:[%s11953_s16 + $0xb4] ss:$8 sps:$4 sm:$0xff]  }
 0x9a0   : > { %v3942_v13 = vpop.permute.xlu0 %3941 }
 0x9a1   : > { %v4035_v16 = vpack.c.bf16 %v3942_v13, %v3942_v13 }
 0x9a3   : > { %v4677_v17 = vsel %vm4338_vm2, %v4035_v16, 0  ;;  %v9738_v16 = vld [vmem:[%s11953_s16 + $0xb0] ss:$8 sps:$4 sm:$0xff]  }
 0x9a4   : > { %9262 = vmatpush3.bf16.msra.mxu1 %v4677_v17  ;;  %v9743_v17 = vld [vmem:[%s11953_s16 + $0xc4] ss:$8 sps:$4 sm:$0xff]  }
 0x9a5   : > { %9273 = vmatprep.subr.bf16.mxu1 %v10242_v59 }
 0x9a7   : > { %v10134_v52 = vpop.eup %10133 }
 0x9a8   : > { %v4614_v55 = vmul.f32 %v10134_v52, %v10126_v62  ;;  %v9719_v62 = vld [vmem:[%s11953_s16 + $0x44] ss:$8 sps:$4 sm:$0xff]   ;;  %v9741_v52 = vld [vmem:[%s11953_s16 + $0xc0] ss:$8 sps:$4 sm:$0xff]  }
 0x9aa   : > { %v4620_v21 = vsel %vm11122_vm10, %v4614_v55, 0.0  ;;  %v9746_v55 = vld [vmem:[%s11953_s16 + $0xd4] ss:$8 sps:$4 sm:$0xff]  }
 0x9ab   : > { %v4624_v33 = vpack.c.bf16 %v4620_v21, %v4620_v21  ;;  %v9744_v21 = vld [vmem:[%s11953_s16 + $0xd0] ss:$8 sps:$4 sm:$0xff]  }
 0x9ad   : > { %9264 = vmatmul.mubr.msk.bf16.vlgmr.msra.gmra.mrb[60].mxu1 %vm4574_vm11, %v4624_v33  ;;  %v9749_v33 = vld [vmem:[%s11953_s16 + $0xe4] ss:$8 sps:$4 sm:$0xff]  }
 0x9ae   : > { %9275 = vmatprep.mubr.msk.bf16.mxu1 %vm10243_vm0, %v10242_v59 }
 0x9bb   : > { %v4610_v23 = vpop.xlane.xlu1 %4609 }
 0x9bc   : > { %10135 = vrcp.f32 %v4610_v23  ;;  %v9747_v23 = vld [vmem:[%s11953_s16 + $0xe0] ss:$8 sps:$4 sm:$0xff]  }
 0x9bf   : > { %v3946_v24 = vpop.permute.xlu1 %3945 }
 0x9c0   : > { %v4037_v25 = vpack.c.bf16 %v3946_v24, %v3946_v24  ;;  %v9752_v24 = vld [vmem:[%s11953_s16 + $0xf4] ss:$8 sps:$4 sm:$0xff]  }
 0x9c2   : > { %v4769_v26 = vsel %vm4338_vm2, %v4037_v25, 0  ;;  %v9750_v25 = vld [vmem:[%s11953_s16 + $0xf0] ss:$8 sps:$4 sm:$0xff]  }
 0x9c3   : > { %9274 = vmatpush3.bf16.msra.mxu1 %v4769_v26 }
 0x9c6   : > { %v10136_v27 = vpop.eup %10135 }
 0x9c7   : > { %v4618_v28 = vmul.f32 %v10136_v27, %v10128_v1  ;;  %v9723_v1 = vld [vmem:[%s11953_s16 + $0x60] ss:$8 sps:$4 sm:$0xff]  }
 0x9c9   : > { %v4622_v37 = vsel %vm11122_vm10, %v4618_v28, 0.0 }
 0x9ca   : > { %v4626_v60 = vpack.c.bf16 %v4622_v37, %v4622_v37 }
 0x9cc   : > { %9276 = vmatmul.mubr.msk.bf16.vlgmr.msra.gmra.mrb[64].mxu1 %vm4574_vm11, %v4626_v60 }
 0x9f0   : > { %v4601_v29 = vpop.xlane.xlu1 %4600 }
 0x9f1   : > { %10137 = vrcp.f32 %v4601_v29 }
 0x9fb   : > { %v10138_v30 = vpop.eup %10137 }
 0x9fc   : > { %v4612_v31 = vmul.f32 %v10138_v30, %v10130_v8  ;;  %v9734_v8 = vld [vmem:[%s11953_s16 + $0x94] ss:$8 sps:$4 sm:$0xff]  }
 0x9fe   : > { %v4619_v32 = vsel %vm11122_vm10, %v4612_v31, 0.0 }
 0x9ff   : > { %v4623_v34 = vpack.c.bf16 %v4619_v32, %v4619_v32 }
 0xa01   : > { %9258 = vmatmul.mubr.msk.bf16.vlgmr.msra.gmra.mrb[4].mxu0 %vm4574_vm11, %v4623_v34 }
 0xa02   : > { %9268 = vmatpush3.bf16.msra.mxu0 %v4723_v38  ;;  %9269 = vmatprep.mubr.msk.bf16.mxu0 %vm10243_vm0, %v10242_v59  ;;  %v9708_v59 = vld [vmem:[%s11953_s16 + $0x10] ss:$8 sps:$4 sm:$0xff]  }
 0xa03   : > { %5027 = vmatprep.subr.bf16.mxu0 %v9707_v49 }
 0xa15   : > { %v4607_v40 = vpop.xlane.xlu0 %4606 }
 0xa16   : > { %10139 = vrcp.f32 %v4607_v40 }
 0xa20   : > { %v10140_v41 = vpop.eup %10139 }
 0xa21   : > { %v4616_v15 = vmul.f32 %v10140_v41, %v10132_v61  ;;  %v9735_v61 = vld [vmem:[%s11953_s16 + $0xa0] ss:$8 sps:$4 sm:$0xff]  }
 0xa23   : > { %v4621_v42 = vsel %vm11122_vm10, %v4616_v15, 0.0 }
 0xa24   : > { %v4625_v5 = vpack.c.bf16 %v4621_v42, %v4621_v42 }
 0xa26   : > { %9270 = vmatmul.mubr.msk.bf16.vlgmr.msra.gmra.mrb[8].mxu0 %vm4574_vm11, %v4625_v5 }
 0xa27   : > { %5028 = vmatpush1.bf16.msra.mxu0 %v9705_v45 }
 0xa28   : > { %5029 = vmatprep.subr.bf16.mxu0 %v9710_v46 }
 0xa2b   : > { %5030 = vmatpush1.bf16.msra.mxu0 %v9708_v59  ;;  %v4855_v59 = vld [vmem:[%s11954_s18] sm:$0x3]  ;;  %s11965_s18 = sld [smem:[#allocation16_spill]] }
 0xa2c   : > { %5031 = vmatprep.subr.bf16.mxu0 %v9713_v51  ;;  %v4860_v51 = vrot.slane %v4855_v59, %v10506_v19 }
 0xa2f   : > { %5032 = vmatpush1.bf16.msra.mxu0 %v9711_v22  ;;  %v4864_v22 = vrot.slane %v4855_v59, %v10509_v20 }
 0xa30   : > { %5033 = vmatprep.subr.bf16.mxu0 %v9716_v56 }
 0xa33   : > { %5034 = vmatpush1.bf16.msra.mxu0 %v9714_v58 }
 0xa34   : > { %5035 = vmatprep.subr.bf16.mxu0 %v9719_v62 }
 0xa37   : > { %5036 = vmatpush1.bf16.msra.mxu0 %v9717_v63 }
 0xa38   : > { %5037 = vmatprep.subr.bf16.mxu0 %v9722_v0 }
 0xa3b   : > { %5038 = vmatpush1.bf16.msra.mxu0 %v9720_v2 }
 0xa3c   : > { %5039 = vmatprep.subr.bf16.mxu0 %v9725_v3 }
 0xa3f   : > { %5040 = vmatpush1.bf16.msra.mxu0 %v9723_v1 }
 0xa40   : > { %5041 = vmatprep.subr.bf16.mxu0 %v9728_v4 }
 0xa43   : > { %5042 = vmatpush1.bf16.msra.mxu0 %v9726_v57 }
 0xa44   : > { %5043 = vmatprep.subr.bf16.mxu0 %v9731_v6 }
 0xa47   : > { %5044 = vmatpush1.bf16.msra.mxu0 %v9729_v7 }
 0xa48   : > { %5045 = vmatprep.subr.bf16.mxu0 %v9734_v8 }
 0xa4b   : > { %5046 = vmatpush1.bf16.msra.mxu0 %v9732_v9 }
 0xa4c   : > { %5047 = vmatprep.subr.bf16.mxu0 %v9737_v10 }
 0xa4f   : > { %5048 = vmatpush1.bf16.msra.mxu0 %v9735_v61 }
 0xa50   : > { %5049 = vmatprep.subr.bf16.mxu0 %v9740_v14 }
 0xa53   : > { %5050 = vmatpush1.bf16.msra.mxu0 %v9738_v16 }
 0xa54   : > { %5051 = vmatprep.subr.bf16.mxu0 %v9743_v17 }
 0xa57   : > { %5052 = vmatpush1.bf16.msra.mxu0 %v9741_v52 }
 0xa58   : > { %5053 = vmatprep.subr.bf16.mxu0 %v9746_v55 }
 0xa5b   : > { %5054 = vmatpush1.bf16.msra.mxu0 %v9744_v21 }
 0xa5c   : > { %5055 = vmatprep.subr.bf16.mxu0 %v9749_v33 }
 0xa5f   : > { %5056 = vmatpush1.bf16.msra.mxu0 %v9747_v23 }
 0xa60   : > { %5057 = vmatprep.subr.bf16.mxu0 %v9752_v24 }
 0xa63   : > { %5058 = vmatpush1.bf16.msra.mxu0 %v9750_v25 }
 0xa80   : > { %v4713_v11 = vpop.f32.mrb[60].mxu1 }
 0xa81   : > { %v9265_v50 = vpop.f32.mrb[61].mxu1 }
 0xa82   : > { %v4716_v12 = vpop.f32.mrb[62].mxu1 }
 0xa83   : > { %v9266_v13 = vpop.f32.mrb[63].mxu1 }
 0xa9f   : > { %v4805_v26 = vpop.f32.mrb[64].mxu1 }
 0xaa0   : > { %v9363_v27 = vpack.i.bf16 %v4713_v11, %v4805_v26  ;;  %v9277_v28 = vpop.f32.mrb[65].mxu1 }
 0xaa1   : > { %v4808_v37 = vpop.f32.mrb[66].mxu1 }
 0xaa2   : > { %9364 = vrot.lane.b32.xlu0 %v9363_v27, %s10241_s7  ;;  %v9278_v60 = vpop.f32.mrb[67].mxu1  ;;  %s11955_s7 = sld [smem:[#allocation12_spill]] }
 0xaa8   : > { %v9753_v57 = vld [vmem:[%s11955_s7] ss:$16 sps:$4 sm:$0xff]   ;;  %v9755_v6 = vld [vmem:[%s11955_s7 + $0x4] ss:$16 sps:$4 sm:$0xff]   ;;  %v9756_v7 = vld [vmem:[%s11955_s7 + $0x8] ss:$16 sps:$4 sm:$0xff]  }
 0xaa9   : > { %v9758_v8 = vld [vmem:[%s11955_s7 + $0xc] ss:$16 sps:$4 sm:$0xff]   ;;  %v9761_v9 = vld [vmem:[%s11955_s7 + $0x24] ss:$16 sps:$4 sm:$0xff]   ;;  %5522 = vmatprep.subr.bf16.mxu1 %v9755_v6  ;;  %v9762_v10 = vld [vmem:[%s11955_s7 + $0x28] ss:$16 sps:$4 sm:$0xff]  }
 0xaaa   : > { %5563 = vmatprep.subr.bf16.mxu0 %v9758_v8  ;;  %5523 = vmatpush1.bf16.msra.mxu1 %v9753_v57  ;;  %v9767_v11 = vld [vmem:[%s11955_s7 + $0x44] ss:$16 sps:$4 sm:$0xff]   ;;  %v9770_v50 = vld [vmem:[%s11955_s7 + $0x4c] ss:$16 sps:$4 sm:$0xff]   ;;  %v9765_v61 = vld [vmem:[%s11955_s7 + $0x40] ss:$16 sps:$4 sm:$0xff]  }
 0xaab   : > { %5524 = vmatprep.subr.bf16.mxu1 %v9761_v9  ;;  %v9768_v12 = vld [vmem:[%s11955_s7 + $0x48] ss:$16 sps:$4 sm:$0xff]   ;;  %v9773_v14 = vld [vmem:[%s11955_s7 + $0x64] ss:$16 sps:$4 sm:$0xff]   ;;  %v9776_v13 = vld [vmem:[%s11955_s7 + $0x6c] ss:$16 sps:$4 sm:$0xff]  }
 0xaac   : > { %v9771_v16 = vld [vmem:[%s11955_s7 + $0x60] ss:$16 sps:$4 sm:$0xff]   ;;  %v9774_v17 = vld [vmem:[%s11955_s7 + $0x68] ss:$16 sps:$4 sm:$0xff]   ;;  %v9779_v52 = vld [vmem:[%s11955_s7 + $0x84] ss:$16 sps:$4 sm:$0xff]  }
 0xaad   : > { %v9782_v55 = vld [vmem:[%s11955_s7 + $0x8c] ss:$16 sps:$4 sm:$0xff]   ;;  %v9777_v21 = vld [vmem:[%s11955_s7 + $0x80] ss:$16 sps:$4 sm:$0xff]   ;;  %v9780_v33 = vld [vmem:[%s11955_s7 + $0x88] ss:$16 sps:$4 sm:$0xff]  }
 0xaae   : > { %v9785_v23 = vld [vmem:[%s11955_s7 + $0xa4] ss:$16 sps:$4 sm:$0xff]   ;;  %v9788_v24 = vld [vmem:[%s11955_s7 + $0xac] ss:$16 sps:$4 sm:$0xff]   ;;  %v9783_v25 = vld [vmem:[%s11955_s7 + $0xa0] ss:$16 sps:$4 sm:$0xff]  }
 0xaaf   : > { %v9786_v26 = vld [vmem:[%s11955_s7 + $0xa8] ss:$16 sps:$4 sm:$0xff]   ;;  %v9791_v27 = vld [vmem:[%s11955_s7 + $0xc4] ss:$16 sps:$4 sm:$0xff]   ;;  %v9794_v28 = vld [vmem:[%s11955_s7 + $0xcc] ss:$16 sps:$4 sm:$0xff]  }
 0xab0   : > { %v9789_v37 = vld [vmem:[%s11955_s7 + $0xc0] ss:$16 sps:$4 sm:$0xff]   ;;  %v9792_v60 = vld [vmem:[%s11955_s7 + $0xc8] ss:$16 sps:$4 sm:$0xff]   ;;  %v9830_v8 = vld [vmem:[%s11955_s7 + $0x18c] ss:$16 sps:$4 sm:$0xff]  }
 0xab1   : > { %v9819_v57 = vld [vmem:[%s11955_s7 + $0x160] ss:$16 sps:$4 sm:$0xff]   ;;  %v9822_v6 = vld [vmem:[%s11955_s7 + $0x168] ss:$16 sps:$4 sm:$0xff]  }
 0xab2   : > { %v9825_v9 = vld [vmem:[%s11955_s7 + $0x180] ss:$16 sps:$4 sm:$0xff]  }
 0xad4   : > { %v4667_v29 = vpop.f32.mrb[4].mxu0 }
 0xad5   : > { %v9259_v30 = vpop.f32.mrb[5].mxu0 }
 0xad6   : > { %v4670_v31 = vpop.f32.mrb[6].mxu0  ;;  %v9800_v30 = vld [vmem:[%s11955_s7 + $0xec] ss:$16 sps:$4 sm:$0xff]  }
 0xad7   : > { %v9260_v36 = vpop.f32.mrb[7].mxu0  ;;  %v9795_v31 = vld [vmem:[%s11955_s7 + $0xe0] ss:$16 sps:$4 sm:$0xff]  }
 0xad8   : > { %v9798_v36 = vld [vmem:[%s11955_s7 + $0xe8] ss:$16 sps:$4 sm:$0xff]  }
 0xaf9   : > { %v4759_v32 = vpop.f32.mrb[8].mxu0 }
 0xafa   : > { %v9271_v34 = vpop.f32.mrb[9].mxu0 }
 0xafb   : > { %v4762_v38 = vpop.f32.mrb[10].mxu0  ;;  %v9806_v34 = vld [vmem:[%s11955_s7 + $0x10c] ss:$16 sps:$4 sm:$0xff]  }
 0xafc   : > { %v9272_v40 = vpop.f32.mrb[11].mxu0  ;;  %v9801_v38 = vld [vmem:[%s11955_s7 + $0x100] ss:$16 sps:$4 sm:$0xff]  }
 0xafd   : > { %v9804_v40 = vld [vmem:[%s11955_s7 + $0x108] ss:$16 sps:$4 sm:$0xff]  }
 0xb14   : > { %v9365_v41 = vpop.permute.xlu0 %9364 }
 0xb15   : > { %v9367_v15 = vunpack.i.h.bf16 %v9365_v41  ;;  %v9366_v42 = vunpack.i.l.bf16 %v9365_v41  ;;  %v9809_v41 = vld [vmem:[%s11955_s7 + $0x124] ss:$16 sps:$4 sm:$0xff]  }
 0xb17   : > { %v4819_v5 = vsel %vm4041_vm1, %v4667_v29, %v9367_v15  ;;  %v4820_v45 = vsel %vm4041_vm1, %v4759_v32, %v9366_v42  ;;  %v9797_v29 = vld [vmem:[%s11955_s7 + $0xe4] ss:$16 sps:$4 sm:$0xff]   ;;  %v9812_v15 = vld [vmem:[%s11955_s7 + $0x12c] ss:$16 sps:$4 sm:$0xff]   ;;  %v9807_v42 = vld [vmem:[%s11955_s7 + $0x120] ss:$16 sps:$4 sm:$0xff]  }
 0xb18   : > { %v4821_v49 = vpack.c.bf16 %v4819_v5, %v4819_v5  ;;  %v4822_v46 = vpack.c.bf16 %v4820_v45, %v4820_v45  ;;  %v9803_v32 = vld [vmem:[%s11955_s7 + $0x104] ss:$16 sps:$4 sm:$0xff]   ;;  %v9810_v5 = vld [vmem:[%s11955_s7 + $0x128] ss:$16 sps:$4 sm:$0xff]  }
 0xb1a   : > { %5059 = vmatprep.mubr.bf16.mxu0 %v4822_v46 }
 0xb1b   : > { %5060 = vmatmul.mubr.bf16.vlgmr.msra.gmra.mrb[12].mxu0 %v4821_v49 }
 0xb1c   : > { %5564 = vmatpush1.bf16.msra.mxu0 %v9756_v7  ;;  %v9827_v7 = vld [vmem:[%s11955_s7 + $0x184] ss:$16 sps:$4 sm:$0xff]  }
 0xbee   : > { %v5061_v56 = vpop.f32.mrb[12].mxu0 }
 0xbef   : > { %v5062_v58 = vadd.f32 %v5061_v56, %v4860_v51  ;;  %v5063_v62 = vpop.f32.mrb[13].mxu0 }
 0xbf0   : > { %v5064_v63 = vadd.f32 %v5063_v62, %v4864_v22  ;;  %v5065_v0 = vpop.f32.mrb[14].mxu0  ;;  %v9818_v62 = vld [vmem:[%s11955_s7 + $0x14c] ss:$16 sps:$4 sm:$0xff]  }
 0xbf1   : > { %v11213_v2 = vadd.f32 %v5062_v58, %v10792_v35  ;;  %v5066_v3 = vpop.f32.mrb[15].mxu0  ;;  %v9764_v35 = vld [vmem:[%s11955_s7 + $0x2c] ss:$16 sps:$4 sm:$0xff]   ;;  %v9815_v58 = vld [vmem:[%s11955_s7 + $0x144] ss:$16 sps:$4 sm:$0xff]  }
 0xbf2   : > { %v11216_v1 = vadd.f32 %v5064_v63, %v10795_v39  ;;  %v9759_v39 = vld [vmem:[%s11955_s7 + $0x20] ss:$16 sps:$4 sm:$0xff]   ;;  %5565 = vmatprep.subr.bf16.mxu0 %v9764_v35  ;;  %v9816_v0 = vld [vmem:[%s11955_s7 + $0x148] ss:$16 sps:$4 sm:$0xff]   ;;  %v9821_v3 = vld [vmem:[%s11955_s7 + $0x164] ss:$16 sps:$4 sm:$0xff]  }
 0xbf3   : > { %5525 = vmatpush1.bf16.msra.mxu1 %v9759_v39  ;;  %5566 = vmatpush1.bf16.msra.mxu0 %v9762_v10  ;;  %v9813_v63 = vld [vmem:[%s11955_s7 + $0x140] ss:$16 sps:$4 sm:$0xff]   ;;  %v9828_v35 = vld [vmem:[%s11955_s7 + $0x188] ss:$16 sps:$4 sm:$0xff]   ;;  %v9833_v39 = vld [vmem:[%s11955_s7 + $0x1a4] ss:$16 sps:$4 sm:$0xff]  }
 0xbf4   : > { %v5072_v4 = vadd.f32 %v11216_v1, %v11213_v2  ;;  %5526 = vmatprep.subr.bf16.mxu1 %v9767_v11  ;;  %5567 = vmatprep.subr.bf16.mxu0 %v9770_v50  ;;  %v9836_v10 = vld [vmem:[%s11955_s7 + $0x1ac] ss:$16 sps:$4 sm:$0xff]   ;;  %v9831_v11 = vld [vmem:[%s11955_s7 + $0x1a0] ss:$16 sps:$4 sm:$0xff]   ;;  %v9834_v50 = vld [vmem:[%s11955_s7 + $0x1a8] ss:$16 sps:$4 sm:$0xff]  }
 0xbf6   : > { %5073 = vadd.xlane.f32.xlu1 %v5072_v4  ;;  %v9824_v4 = vld [vmem:[%s11955_s7 + $0x16c] ss:$16 sps:$4 sm:$0xff]  }
 0xbf7   : > { %5527 = vmatpush1.bf16.msra.mxu1 %v9765_v61  ;;  %5568 = vmatpush1.bf16.msra.mxu0 %v9768_v12  ;;  %v9839_v61 = vld [vmem:[%s11955_s7 + $0x1c4] ss:$16 sps:$4 sm:$0xff]   ;;  %v9842_v12 = vld [vmem:[%s11955_s7 + $0x1cc] ss:$16 sps:$4 sm:$0xff]  }
 0xbf8   : > { %5528 = vmatprep.subr.bf16.mxu1 %v9773_v14  ;;  %5569 = vmatprep.subr.bf16.mxu0 %v9776_v13  ;;  %v9837_v14 = vld [vmem:[%s11955_s7 + $0x1c0] ss:$16 sps:$4 sm:$0xff]   ;;  %v9840_v13 = vld [vmem:[%s11955_s7 + $0x1c8] ss:$16 sps:$4 sm:$0xff]  }
 0xbfb   : > { %5529 = vmatpush1.bf16.msra.mxu1 %v9771_v16  ;;  %5570 = vmatpush1.bf16.msra.mxu0 %v9774_v17  ;;  %v9845_v16 = vld [vmem:[%s11955_s7 + $0x1e4] ss:$16 sps:$4 sm:$0xff]   ;;  %v9848_v17 = vld [vmem:[%s11955_s7 + $0x1ec] ss:$16 sps:$4 sm:$0xff]  }
 0xbfc   : > { %5530 = vmatprep.subr.bf16.mxu1 %v9779_v52  ;;  %5571 = vmatprep.subr.bf16.mxu0 %v9782_v55  ;;  %v9843_v52 = vld [vmem:[%s11955_s7 + $0x1e0] ss:$16 sps:$4 sm:$0xff]   ;;  %v9846_v55 = vld [vmem:[%s11955_s7 + $0x1e8] ss:$16 sps:$4 sm:$0xff]  }
 0xbff   : > { %5531 = vmatpush1.bf16.msra.mxu1 %v9777_v21  ;;  %5572 = vmatpush1.bf16.msra.mxu0 %v9780_v33 }
 0xc00   : > { %5532 = vmatprep.subr.bf16.mxu1 %v9785_v23  ;;  %5573 = vmatprep.subr.bf16.mxu0 %v9788_v24  ;;  %v5070_v24 = vld [vmem:[%s11956_s22] sm:$0x3]  ;;  %s11966_s22 = sld [smem:[#allocation17_spill]] }
 0xc03   : > { %5533 = vmatpush1.bf16.msra.mxu1 %v9783_v25  ;;  %5574 = vmatpush1.bf16.msra.mxu0 %v9786_v26  ;;  %v5071_v25 = vld [vmem:[%s11957_s23] sm:$0x3]  ;;  %v5092_v26 = vrot.slane %v5070_v24, %v10506_v19  ;;  %s11967_s23 = sld [smem:[#allocation19_spill]] }
 0xc04   : > { %5534 = vmatprep.subr.bf16.mxu1 %v9791_v27  ;;  %5575 = vmatprep.subr.bf16.mxu0 %v9794_v28  ;;  %v5096_v27 = vrot.slane %v5070_v24, %v10509_v20 }
 0xc07   : > { %5535 = vmatpush1.bf16.msra.mxu1 %v9789_v37  ;;  %5576 = vmatpush1.bf16.msra.mxu0 %v9792_v60  ;;  %v5105_v60 = vrot.slane %v5071_v25, %v10506_v19 }
 0xc08   : > { %5536 = vmatprep.subr.bf16.mxu1 %v9797_v29  ;;  %5577 = vmatprep.subr.bf16.mxu0 %v9800_v30  ;;  %v5109_v29 = vrot.slane %v5071_v25, %v10509_v20 }
 0xc0b   : > { %5537 = vmatpush1.bf16.msra.mxu1 %v9795_v31  ;;  %5578 = vmatpush1.bf16.msra.mxu0 %v9798_v36 }
 0xc0c   : > { %5538 = vmatprep.subr.bf16.mxu1 %v9803_v32  ;;  %5579 = vmatprep.subr.bf16.mxu0 %v9806_v34 }
 0xc0f   : > { %5539 = vmatpush1.bf16.msra.mxu1 %v9801_v38  ;;  %5580 = vmatpush1.bf16.msra.mxu0 %v9804_v40 }
 0xc10   : > { %5540 = vmatprep.subr.bf16.mxu1 %v9809_v41  ;;  %5581 = vmatprep.subr.bf16.mxu0 %v9812_v15  ;;  %v9849_v41 = vld [vmem:[%s11958_s26] ss:$8 sps:$4 sm:$0xff]   ;;  %v9851_v15 = vld [vmem:[%s11958_s26 + $0x4] ss:$8 sps:$4 sm:$0xff]  }
 0xc13   : > { %5541 = vmatpush1.bf16.msra.mxu1 %v9807_v42  ;;  %5582 = vmatpush1.bf16.msra.mxu0 %v9810_v5  ;;  %v9854_v42 = vld [vmem:[%s11958_s26 + $0x14] ss:$8 sps:$4 sm:$0xff]   ;;  %v9852_v5 = vld [vmem:[%s11958_s26 + $0x10] ss:$8 sps:$4 sm:$0xff]  }
 0xc14   : > { %5542 = vmatprep.subr.bf16.mxu1 %v9815_v58  ;;  %5583 = vmatprep.subr.bf16.mxu0 %v9818_v62  ;;  %v9864_v58 = vld [vmem:[%s11958_s26 + $0x50] ss:$8 sps:$4 sm:$0xff]   ;;  %v9869_v62 = vld [vmem:[%s11958_s26 + $0x64] ss:$8 sps:$4 sm:$0xff]  }
 0xc17   : > { %5543 = vmatpush1.bf16.msra.mxu1 %v9813_v63  ;;  %5584 = vmatpush1.bf16.msra.mxu0 %v9816_v0  ;;  %v9867_v63 = vld [vmem:[%s11958_s26 + $0x60] ss:$8 sps:$4 sm:$0xff]   ;;  %v9872_v0 = vld [vmem:[%s11958_s26 + $0x74] ss:$8 sps:$4 sm:$0xff]  }
 0xc18   : > { %5544 = vmatprep.subr.bf16.mxu1 %v9821_v3  ;;  %5585 = vmatprep.subr.bf16.mxu0 %v9824_v4  ;;  %v9870_v3 = vld [vmem:[%s11958_s26 + $0x70] ss:$8 sps:$4 sm:$0xff]   ;;  %v9875_v4 = vld [vmem:[%s11958_s26 + $0x84] ss:$8 sps:$4 sm:$0xff]  }
 0xc1b   : > { %5545 = vmatpush1.bf16.msra.mxu1 %v9819_v57  ;;  %5586 = vmatpush1.bf16.msra.mxu0 %v9822_v6  ;;  %v9873_v57 = vld [vmem:[%s11958_s26 + $0x80] ss:$8 sps:$4 sm:$0xff]   ;;  %v9878_v6 = vld [vmem:[%s11958_s26 + $0x94] ss:$8 sps:$4 sm:$0xff]  }
 0xc1c   : > { %5546 = vmatprep.subr.bf16.mxu1 %v9827_v7  ;;  %5587 = vmatprep.subr.bf16.mxu0 %v9830_v8  ;;  %v9876_v7 = vld [vmem:[%s11958_s26 + $0x90] ss:$8 sps:$4 sm:$0xff]   ;;  %v9881_v8 = vld [vmem:[%s11958_s26 + $0xa4] ss:$8 sps:$4 sm:$0xff]  }
 0xc1f   : > { %5547 = vmatpush1.bf16.msra.mxu1 %v9825_v9  ;;  %5588 = vmatpush1.bf16.msra.mxu0 %v9828_v35  ;;  %v9879_v9 = vld [vmem:[%s11958_s26 + $0xa0] ss:$8 sps:$4 sm:$0xff]   ;;  %v9884_v35 = vld [vmem:[%s11958_s26 + $0xb4] ss:$8 sps:$4 sm:$0xff]  }
 0xc20   : > { %5548 = vmatprep.subr.bf16.mxu1 %v9833_v39  ;;  %5589 = vmatprep.subr.bf16.mxu0 %v9836_v10  ;;  %v9882_v39 = vld [vmem:[%s11958_s26 + $0xb0] ss:$8 sps:$4 sm:$0xff]   ;;  %v9887_v10 = vld [vmem:[%s11958_s26 + $0xc4] ss:$8 sps:$4 sm:$0xff]  }
 0xc23   : > { %5549 = vmatpush1.bf16.msra.mxu1 %v9831_v11  ;;  %5590 = vmatpush1.bf16.msra.mxu0 %v9834_v50  ;;  %v9885_v11 = vld [vmem:[%s11958_s26 + $0xc0] ss:$8 sps:$4 sm:$0xff]   ;;  %v9890_v50 = vld [vmem:[%s11958_s26 + $0xd4] ss:$8 sps:$4 sm:$0xff]  }
 0xc24   : > { %5550 = vmatprep.subr.bf16.mxu1 %v9839_v61  ;;  %5591 = vmatprep.subr.bf16.mxu0 %v9842_v12  ;;  %v9888_v61 = vld [vmem:[%s11958_s26 + $0xd0] ss:$8 sps:$4 sm:$0xff]   ;;  %v9893_v12 = vld [vmem:[%s11958_s26 + $0xe4] ss:$8 sps:$4 sm:$0xff]  }
 0xc27   : > { %5551 = vmatpush1.bf16.msra.mxu1 %v9837_v14  ;;  %5592 = vmatpush1.bf16.msra.mxu0 %v9840_v13  ;;  %v9891_v14 = vld [vmem:[%s11958_s26 + $0xe0] ss:$8 sps:$4 sm:$0xff]   ;;  %v9896_v13 = vld [vmem:[%s11958_s26 + $0xf4] ss:$8 sps:$4 sm:$0xff]  }
 0xc28   : > { %5552 = vmatprep.subr.bf16.mxu1 %v9845_v16  ;;  %5593 = vmatprep.subr.bf16.mxu0 %v9848_v17  ;;  %v9894_v16 = vld [vmem:[%s11958_s26 + $0xf0] ss:$8 sps:$4 sm:$0xff]   ;;  %v5180_v17 = vld [vmem:[%s11959_s2] sm:$0xf]  ;;  %s11968_s2 = sld [smem:[#allocation20_spill]] }
 0xc2b   : > { %5553 = vmatpush1.bf16.msra.mxu1 %v9843_v52  ;;  %5594 = vmatpush1.bf16.msra.mxu0 %v9846_v55  ;;  %v5193_v52 = vrot.slane %v5180_v17, %v10678_v53  ;;  %v5197_v55 = vrot.slane %v5180_v17, %v10681_v54 }
 0xc2c   : > { %6169 = vmatprep.subr.bf16.mxu1 %v9851_v15 }
 0xc83   : > { %v5074_v45 = vpop.xlane.xlu1 %5073 }
 0xc84   : > { %v5075_v49 = vmul.f32 0.00390625, %v5074_v45  ;;  %v9857_v45 = vld [vmem:[%s11958_s26 + $0x24] ss:$8 sps:$4 sm:$0xff]  }
 0xc86   : > { %v11261_v46 = vsub.f32 %v11213_v2, %v5075_v49  ;;  %v5077_v59 = vsub.f32 %v11216_v1, %v5075_v49  ;;  %v9855_v49 = vld [vmem:[%s11958_s26 + $0x20] ss:$8 sps:$4 sm:$0xff]  }
 0xc88   : > { %v5078_v51 = vmul.f32 %v11261_v46, %v11261_v46  ;;  %v5079_v22 = vmul.f32 %v5077_v59, %v5077_v59 }
 0xc8a   : > { %v5080_v56 = vadd.f32 %v5079_v22, %v5078_v51  ;;  %v9863_v51 = vld [vmem:[%s11958_s26 + $0x44] ss:$8 sps:$4 sm:$0xff]   ;;  %v9861_v22 = vld [vmem:[%s11958_s26 + $0x40] ss:$8 sps:$4 sm:$0xff]  }
 0xc8c   : > { %5081 = vadd.xlane.f32.xlu1 %v5080_v56  ;;  %v9866_v56 = vld [vmem:[%s11958_s26 + $0x54] ss:$8 sps:$4 sm:$0xff]  }
 0xd19   : > { %v5082_v21 = vpop.xlane.xlu1 %5081 }
 0xd1a   : > { %v5083_v33 = vmul.f32 0.00390625, %v5082_v21 }
 0xd1c   : > { %v5084_v23 = vadd.f32 1e-12, %v5083_v33 }
 0xd1e   : > { %10141 = vrsqrt.f32 %v5084_v23 }
 0xd28   : > { %v10142_v28 = vpop.eup %10141 }
 0xd29   : > { %v5087_v37 = vmul.f32 %v10142_v28, %v5077_v59  ;;  %v5086_v30 = vmul.f32 %v10142_v28, %v11261_v46  ;;  %v9860_v46 = vld [vmem:[%s11958_s26 + $0x34] ss:$8 sps:$4 sm:$0xff]   ;;  %v9858_v59 = vld [vmem:[%s11958_s26 + $0x30] ss:$8 sps:$4 sm:$0xff]  }
 0xd2b   : > { %v5100_v31 = vmul.f32 %v5096_v27, %v5087_v37  ;;  %v5099_v36 = vmul.f32 %v5092_v26, %v5086_v30 }
 0xd2d   : > { %v5113_v32 = vadd.f32 %v5109_v29, %v5100_v31  ;;  %v5112_v34 = vadd.f32 %v5105_v60, %v5099_v36 }
 0xd2f   : > { %v5115_v38 = vpack.c.bf16 %v5113_v32, %v5113_v32  ;;  %v5114_v40 = vpack.c.bf16 %v5112_v34, %v5112_v34 }
 0xd31   : > { %5554 = vmatprep.mubr.bf16.mxu1 %v5115_v38  ;;  %5595 = vmatprep.mubr.bf16.mxu0 %v5115_v38  ;;  %v11333_v38 = vld [vmem:[%s11960_s11 + $0x10] sm:$0xff] }
 0xd32   : > { %5555 = vmatmul.mubr.bf16.vlgmr.msra.gmra.mrb[68].mxu1 %v5114_v40  ;;  %5596 = vmatmul.mubr.bf16.vlgmr.msra.gmra.mrb[16].mxu0 %v5114_v40  ;;  %v11336_v40 = vld [vmem:[%s11960_s11 + $0x18] sm:$0xff] }
 0xd33   : > { %6170 = vmatpush1.bf16.msra.mxu1 %v9849_v41  ;;  %v5772_v41 = vrot.slane %v11333_v38, %v10765_v44  ;;  %v5776_v15 = vrot.slane %v11336_v40, %v10765_v44 }
 0xd34   : > { %6171 = vmatprep.subr.bf16.mxu1 %v9854_v42  ;;  %v5185_v42 = vrot.slane %v5180_v17, %v10506_v19 }
 0xd37   : > { %6172 = vmatpush1.bf16.msra.mxu1 %v9852_v5  ;;  %v5189_v5 = vrot.slane %v5180_v17, %v10509_v20  ;;  %v11396_v17 = vadd.s32 2, %v10503_v18 }
 0xd38   : > { %6173 = vmatprep.subr.bf16.mxu1 %v9857_v45  ;;  %v5635_v45 = vrot.slane %v11333_v38, %v10506_v19 }
 0xd39   : > { %vm5801_vm4 = vcmp.le.s32.totalorder %v11396_v17, 7 }
 0xd3b   : > { %6174 = vmatpush1.bf16.msra.mxu1 %v9855_v49  ;;  %v5639_v49 = vrot.slane %v11336_v40, %v10506_v19 }
 0xd3c   : > { %6175 = vmatprep.subr.bf16.mxu1 %v9860_v46  ;;  %v5655_v46 = vrot.slane %v11333_v38, %v10509_v20 }
 0xd3f   : > { %6176 = vmatpush1.bf16.msra.mxu1 %v9858_v59  ;;  %v5675_v59 = vrot.slane %v11333_v38, %v10678_v53 }
 0xd40   : > { %6177 = vmatprep.subr.bf16.mxu1 %v9863_v51  ;;  %v5626_v51 = vadd.s32 4294967289, %v10503_v18 }
 0xd42   : > { %vm5627_vm12 = vcmp.ge.s32.totalorder %v5626_v51, 0 }
 0xd43   : > { %6178 = vmatpush1.bf16.msra.mxu1 %v9861_v22  ;;  %v5646_v22 = vadd.s32 4294967290, %v10503_v18 }
 0xd44   : > { %6179 = vmatprep.subr.bf16.mxu1 %v9866_v56  ;;  %v5659_v56 = vrot.slane %v11336_v40, %v10509_v20 }
 0xd45   : > { %vm5647_vm13 = vcmp.ge.s32.totalorder %v5646_v22, 0 }
 0xd47   : > { %6180 = vmatpush1.bf16.msra.mxu1 %v9864_v58  ;;  %v5679_v58 = vrot.slane %v11336_v40, %v10678_v53 }
 0xd48   : > { %6181 = vmatprep.subr.bf16.mxu1 %v9869_v62  ;;  %v5666_v62 = vadd.s32 4294967291, %v10503_v18 }
 0xd4a   : > { %vm5667_vm14 = vcmp.ge.s32.totalorder %v5666_v62, 0 }
 0xd4b   : > { %6182 = vmatpush1.bf16.msra.mxu1 %v9867_v63  ;;  %v5686_v63 = vadd.s32 4294967292, %v10503_v18 }
 0xd4c   : > { %6183 = vmatprep.subr.bf16.mxu1 %v9872_v0  ;;  %v5695_v0 = vrot.slane %v11333_v38, %v10681_v54 }
 0xd4d   : > { %vm5687_vm15 = vcmp.ge.s32.totalorder %v5686_v63, 0 }
 0xd4f   : > { %6184 = vmatpush1.bf16.msra.mxu1 %v9870_v3  ;;  %v11363_v3 = vadd.s32 4294967293, %v10503_v18 }
 0xd50   : > { %6185 = vmatprep.subr.bf16.mxu1 %v9875_v4  ;;  %v5699_v4 = vrot.slane %v11336_v40, %v10681_v54 }
 0xd51   : > { %vm5707_vm0 = vcmp.ge.s32.totalorder %v11363_v3, 0 }
 0xd53   : > { %6186 = vmatpush1.bf16.msra.mxu1 %v9873_v57  ;;  %v5715_v57 = vrot.slane %v11333_v38, %v10720_v47 }
 0xd54   : > { %6187 = vmatprep.subr.bf16.mxu1 %v9878_v6  ;;  %v5719_v6 = vrot.slane %v11336_v40, %v10720_v47 }
 0xd57   : > { %6188 = vmatpush1.bf16.msra.mxu1 %v9876_v7  ;;  %v11372_v7 = vadd.s32 4294967294, %v10503_v18 }
 0xd58   : > { %6189 = vmatprep.subr.bf16.mxu1 %v9881_v8  ;;  %v5735_v8 = vrot.slane %v11333_v38, %v10723_v48 }
 0xd59   : > { %vm5727_vm1 = vcmp.ge.s32.totalorder %v11372_v7, 0 }
 0xd5b   : > { %6190 = vmatpush1.bf16.msra.mxu1 %v9879_v9  ;;  %v5739_v9 = vrot.slane %v11336_v40, %v10723_v48 }
 0xd5c   : > { %6191 = vmatprep.subr.bf16.mxu1 %v9884_v35  ;;  %v11379_v35 = vadd.s32 4294967295, %v10503_v18 }
 0xd5e   : > { %vm5747_vm2 = vcmp.ge.s32.totalorder %v11379_v35, 0 }
 0xd5f   : > { %6192 = vmatpush1.bf16.msra.mxu1 %v9882_v39  ;;  %v5755_v39 = vrot.slane %v11333_v38, %v10762_v43  ;;  %v5871_v38 = vadd.s32 6, %v10503_v18 }
 0xd60   : > { %6193 = vmatprep.subr.bf16.mxu1 %v9887_v10 }
 0xd61   : > { %vm5873_vm8 = vcmp.le.s32.totalorder %v5871_v38, 7 }
 0xd63   : > { %6194 = vmatpush1.bf16.msra.mxu1 %v9885_v11  ;;  %v11384_v11 = vld [vmem:[%s11960_s11 + $0x28] sm:$0xff] }
 0xd64   : > { %6195 = vmatprep.subr.bf16.mxu1 %v9890_v50  ;;  %v5759_v50 = vrot.slane %v11336_v40, %v10762_v43  ;;  %v5848_v35 = vrot.slane %v11384_v11, %v10681_v54 }
 0xd67   : > { %6196 = vmatpush1.bf16.msra.mxu1 %v9888_v61 }
 0xd68   : > { %6197 = vmatprep.subr.bf16.mxu1 %v9893_v12 }
 0xd6b   : > { %6198 = vmatpush1.bf16.msra.mxu1 %v9891_v14 }
 0xd6c   : > { %6199 = vmatprep.subr.bf16.mxu1 %v9896_v13 }
 0xd6f   : > { %6200 = vmatpush1.bf16.msra.mxu1 %v9894_v16  ;;  %v11393_v16 = vadd.s32 1, %v10503_v18 }
 0xd71   : > { %vm5783_vm3 = vcmp.le.s32.totalorder %v11393_v16, 7  ;;  %v5884_v16 = vrot.slane %v11384_v11, %v10723_v48 }
 0xe05   : > { %v5556_v21 = vpop.f32.mrb[68].mxu1  ;;  %v5597_v33 = vpop.f32.mrb[16].mxu0 }
 0xe06   : > { %v5598_v23 = vadd.f32 %v5597_v33, %v5193_v52  ;;  %v5558_v24 = vpop.f32.mrb[69].mxu1  ;;  %v5599_v25 = vpop.f32.mrb[17].mxu0  ;;  %v5557_v10 = vadd.f32 %v5556_v21, %v5185_v42  ;;  %v11406_v33 = vadd.s32 3, %v10503_v18 }
 0xe07   : > { %v5600_v26 = vadd.f32 %v5599_v25, %v5197_v55  ;;  %v5560_v27 = vpop.f32.mrb[70].mxu1  ;;  %v5601_v28 = vpop.f32.mrb[18].mxu0  ;;  %v5559_v12 = vadd.f32 %v5558_v24, %v5189_v5  ;;  %v5794_v55 = vrot.slane %v11384_v11, %v10506_v19 }
 0xe08   : > { %v8879_v37 = vmul.f32 -1.442695, %v5598_v23  ;;  %v5561_v60 = vpop.f32.mrb[71].mxu1  ;;  %v5602_v29 = vpop.f32.mrb[19].mxu0  ;;  %vm5819_vm5 = vcmp.le.s32.totalorder %v11406_v33, 7 }
 0xe09   : > { %v8880_v30 = vmul.f32 -1.442695, %v5600_v26 }
 0xe0a   : > { %10143 = vpow2.f32 %v8879_v37 }
 0xe0b   : > { %10145 = vpow2.f32 %v8880_v30 }
 0xe14   : > { %v10144_v31 = vpop.eup %10143 }
 0xe15   : > { %v10146_v36 = vpop.eup %10145  ;;  %v5610_v32 = vadd.f32 1.0, %v10144_v31 }
 0xe16   : > { %v5611_v34 = vadd.f32 1.0, %v10146_v36 }
 0xe17   : > { %10147 = vrcp.f32 %v5610_v32 }
 0xe18   : > { %10149 = vrcp.f32 %v5611_v34 }
 0xe21   : > { %v10148_v61 = vpop.eup %10147 }
 0xe22   : > { %v10150_v14 = vpop.eup %10149  ;;  %v11389_v13 = vmul.f32 %v10148_v61, %v5557_v10 }
 0xe23   : > { %v11398_v52 = vmul.f32 %v10150_v14, %v5559_v12 }
 0xe24   : > { %v5624_v23 = vrot.slane %v11389_v13, 1  ;;  %v5644_v24 = vrot.slane %v11389_v13, 2  ;;  %v11928_v25 = vrot.slane %v11389_v13, 3  ;;  %v11929_v26 = vrot.slane %v11389_v13, 4 }
 0xe25   : > { %v5625_v27 = vrot.slane %v11398_v52, 1  ;;  %v5645_v28 = vrot.slane %v11398_v52, 2  ;;  %v5665_v37 = vrot.slane %v11398_v52, 3  ;;  %v5685_v60 = vrot.slane %v11398_v52, 4 }
 0xe26   : > { %v5630_v29 = vsel %vm5627_vm12, %v5624_v23, 0.0  ;;  %v5650_v30 = vsel %vm5647_vm13, %v5644_v24, 0.0  ;;  %v5670_v31 = vsel %vm5667_vm14, %v11928_v25, 0.0  ;;  %v5690_v36 = vsel %vm5687_vm15, %v11929_v26, 0.0 }
 0xe27   : > { %v5631_v32 = vsel %vm5627_vm12, %v5625_v27, 0.0  ;;  %v5640_v34 = vmul.f32 %v5635_v45, %v5630_v29  ;;  %v5651_v42 = vsel %vm5647_vm13, %v5645_v28, 0.0  ;;  %v5660_v5 = vmul.f32 %v5655_v46, %v5650_v30 }
 0xe28   : > { %v5641_v10 = vmul.f32 %v5639_v49, %v5631_v32  ;;  %v5661_v61 = vmul.f32 %v5659_v56, %v5651_v42  ;;  %v5671_v12 = vsel %vm5667_vm14, %v5665_v37, 0.0  ;;  %v5680_v14 = vmul.f32 %v5675_v59, %v5670_v31 }
 0xe29   : > { %v5662_v25 = vadd.f32 %v5660_v5, %v5640_v34  ;;  %v5681_v21 = vmul.f32 %v5679_v58, %v5671_v12  ;;  %v5691_v51 = vsel %vm5687_vm15, %v5685_v60, 0.0  ;;  %v5700_v26 = vmul.f32 %v5695_v0, %v5690_v36 }
 0xe2a   : > { %v5663_v45 = vadd.f32 %v5661_v61, %v5641_v10  ;;  %v5701_v29 = vmul.f32 %v5699_v4, %v5691_v51  ;;  %v5704_v22 = vrot.slane %v11389_v13, 5  ;;  %v5705_v46 = vrot.slane %v11398_v52, 5  ;;  %v11486_v10 = vld [vmem:[%s11960_s11 + $0x20] sm:$0xff] }
 0xe2b   : > { %v5682_v49 = vadd.f32 %v5680_v14, %v5662_v25  ;;  %v5724_v56 = vrot.slane %v11389_v13, 6  ;;  %v5725_v62 = vrot.slane %v11398_v52, 6  ;;  %v5744_v59 = vrot.slane %v11389_v13, 7 }
 0xe2c   : > { %v5683_v30 = vadd.f32 %v5681_v21, %v5663_v45  ;;  %v5710_v58 = vsel %vm5707_vm0, %v5704_v22, 0.0  ;;  %v5711_v63 = vsel %vm5707_vm0, %v5705_v46, 0.0  ;;  %v5745_v0 = vrot.slane %v11398_v52, 7 }
 0xe2d   : > { %v5702_v4 = vadd.f32 %v5700_v26, %v5682_v49  ;;  %v5720_v25 = vmul.f32 %v5715_v57, %v5710_v58  ;;  %v5730_v21 = vsel %vm5727_vm1, %v5724_v56, 0.0  ;;  %v5830_v31 = vrot.slane %v11384_v11, %v10678_v53 }
 0xe2e   : > { %v5703_v36 = vadd.f32 %v5701_v29, %v5683_v30  ;;  %v5721_v3 = vmul.f32 %v5719_v6, %v5711_v63  ;;  %v5731_v26 = vsel %vm5727_vm1, %v5725_v62, 0.0  ;;  %v5750_v57 = vsel %vm5747_vm2, %v5744_v59, 0.0 }
 0xe2f   : > { %v5722_v32 = vadd.f32 %v5720_v25, %v5702_v4  ;;  %v5740_v34 = vmul.f32 %v5735_v8, %v5730_v21  ;;  %v5751_v6 = vsel %vm5747_vm2, %v5745_v0, 0.0  ;;  %v5741_v7 = vmul.f32 %v5739_v9, %v5731_v26 }
 0xe30   : > { %v5723_v42 = vadd.f32 %v5721_v3, %v5703_v36  ;;  %v5835_v5 = vadd.s32 4, %v10503_v18  ;;  %v5760_v8 = vmul.f32 %v5755_v39, %v5750_v57  ;;  %v5761_v9 = vmul.f32 %v5759_v50, %v5751_v6 }
 0xe31   : > { %v5742_v61 = vadd.f32 %v5740_v34, %v5722_v32  ;;  %v5853_v14 = vadd.s32 5, %v10503_v18  ;;  %v5866_v51 = vrot.slane %v11384_v11, %v10720_v47  ;;  %v5777_v39 = vmul.f32 %v5772_v41, %v11389_v13 }
 0xe32   : > { %v5743_v12 = vadd.f32 %v5741_v7, %v5723_v42  ;;  %v5786_v29 = vsel %vm5783_vm3, %v5625_v27, 0.0  ;;  %v5790_v49 = vrot.slane %v11486_v10, %v10506_v19  ;;  %v5778_v50 = vmul.f32 %v5776_v15, %v11398_v52 }
 0xe33   : > { %v5762_v45 = vadd.f32 %v5760_v8, %v5742_v61  ;;  %v5785_v58 = vsel %vm5783_vm3, %v5624_v23, 0.0  ;;  %v5804_v27 = vsel %vm5801_vm4, %v5645_v28, 0.0  ;;  %vm5837_vm6 = vcmp.le.s32.totalorder %v5835_v5, 7 }
 0xe34   : > { %v5763_v30 = vadd.f32 %v5761_v9, %v5743_v12  ;;  %v5808_v63 = vrot.slane %v11486_v10, %v10509_v20  ;;  %v5796_v40 = vmul.f32 %v5794_v55, %v5786_v29  ;;  %v5803_v15 = vsel %vm5801_vm4, %v5644_v24, 0.0 }
 0xe35   : > { %v5779_v41 = vadd.f32 %v5777_v39, %v5762_v45  ;;  %v5822_v23 = vsel %vm5819_vm5, %v5665_v37, 0.0  ;;  %v5889_v28 = vadd.s32 7, %v10503_v18  ;;  %v5795_v25 = vmul.f32 %v5790_v49, %v5785_v58 }
 0xe36   : > { %v5780_v4 = vadd.f32 %v5778_v50, %v5763_v30  ;;  %v5826_v21 = vrot.slane %v11486_v10, %v10678_v53  ;;  %v11961_v36 = vrot.slane %v11384_v11, %v10509_v20  ;;  %v11962_v24 = vrot.slane %v11389_v13, 3 }
 0xe37   : > { %vm5855_vm7 = vcmp.le.s32.totalorder %v5853_v14, 7  ;;  %v5840_v37 = vsel %vm5837_vm6, %v5685_v60, 0.0  ;;  %v5797_v18 = vadd.f32 %v5795_v25, %v5779_v41  ;;  %v5813_v26 = vmul.f32 %v5808_v63, %v5803_v15 }
 0xe38   : > { %v5798_v55 = vadd.f32 %v5796_v40, %v5780_v4  ;;  %v5814_v17 = vmul.f32 %v11961_v36, %v5804_v27  ;;  %v5821_v3 = vsel %vm5819_vm5, %v11962_v24, 0.0  ;;  %v5844_v57 = vrot.slane %v11486_v10, %v10681_v54  ;;  %v5935_v4 = vld [vmem:[%s11966_s22] sm:$0x3]  ;;  %s11971_s22 = sld [smem:[#allocation7_spill]] }
 0xe39   : > { %v5832_v34 = vmul.f32 %v5830_v31, %v5822_v23  ;;  %v11963_v6 = vrot.slane %v11389_v13, 4  ;;  %v5858_v33 = vsel %vm5855_vm7, %v5705_v46, 0.0  ;;  %v5815_v7 = vadd.f32 %v5813_v26, %v5797_v18 }
 0xe3a   : > { %v5816_v32 = vadd.f32 %v5814_v17, %v5798_v55  ;;  %v5831_v61 = vmul.f32 %v5826_v21, %v5821_v3  ;;  %v5862_v60 = vrot.slane %v11486_v10, %v10720_v47  ;;  %v5850_v12 = vmul.f32 %v5848_v35, %v5840_v37 }
 0xe3b   : > { %v5839_v42 = vsel %vm5837_vm6, %v11963_v6, 0.0  ;;  %v5857_v9 = vsel %vm5855_vm7, %v5704_v22, 0.0  ;;  %vm5891_vm9 = vcmp.le.s32.totalorder %v5889_v28, 7  ;;  %v5876_v31 = vsel %vm5873_vm8, %v5725_v62, 0.0  ;;  %v5907_v62 = vld [vmem:[%s11964_s15] sm:$0x3] }
 0xe3c   : > { %v5834_v8 = vadd.f32 %v5832_v34, %v5816_v32  ;;  %v5833_v5 = vadd.f32 %v5831_v61, %v5815_v7  ;;  %v5849_v14 = vmul.f32 %v5844_v57, %v5839_v42  ;;  %v5880_v46 = vrot.slane %v11486_v10, %v10723_v48  ;;  %s11969_s15 = sld [smem:[#allocation5_spill]] }
 0xe3d   : > { %v5868_v39 = vmul.f32 %v5866_v51, %v5858_v33  ;;  %v5875_v29 = vsel %vm5873_vm8, %v5724_v56, 0.0  ;;  %v5902_v35 = vrot.slane %v11384_v11, %v10762_v43  ;;  %v5894_v22 = vsel %vm5891_vm9, %v5745_v0, 0.0  ;;  %v5921_v51 = vld [vmem:[%s11965_s18] sm:$0x3]  ;;  %s11970_s18 = sld [smem:[#allocation6_spill]] }
 0xe3e   : > { %v5852_v45 = vadd.f32 %v5850_v12, %v5834_v8  ;;  %v5851_v49 = vadd.f32 %v5849_v14, %v5833_v5  ;;  %v5867_v30 = vmul.f32 %v5862_v60, %v5857_v9  ;;  %v5898_v50 = vrot.slane %v11486_v10, %v10762_v43  ;;  %v5997_v60 = vld [vmem:[%s11967_s23] sm:$0x3]  ;;  %s11972_s23 = sld [smem:[#allocation8_spill]] }
 0xe3f   : > { %v5886_v38 = vmul.f32 %v5884_v16, %v5876_v31  ;;  %v5893_v56 = vsel %vm5891_vm9, %v5744_v59, 0.0  ;;  %v5885_v11 = vmul.f32 %v5880_v46, %v5875_v29  ;;  %v5904_v52 = vmul.f32 %v5902_v35, %v5894_v22  ;;  %v6258_v22 = vld [vmem:[%s11968_s2] sm:$0xff] }
 0xe40   : > { %v5870_v58 = vadd.f32 %v5868_v39, %v5852_v45  ;;  %v5869_v41 = vadd.f32 %v5867_v30, %v5851_v49  ;;  %v5916_v63 = vrot.slane %v5907_v62, %v10509_v20  ;;  %v5912_v0 = vrot.slane %v5907_v62, %v10506_v19  ;;  %v6262_v62 = vld [vmem:[%s11968_s2 + $0x20] sm:$0xff]  ;;  %v6259_v49 = vld [vmem:[%s11968_s2 + $0x8] sm:$0xff] }
 0xe41   : > { %v5903_v15 = vmul.f32 %v5898_v50, %v5893_v56  ;;  %v5930_v10 = vrot.slane %v5921_v51, %v10509_v20  ;;  %v5926_v16 = vrot.slane %v5921_v51, %v10506_v19  ;;  %v5944_v59 = vrot.slane %v5935_v4, %v10509_v20  ;;  %v6263_v50 = vld [vmem:[%s11968_s2 + $0x28] sm:$0xff] }
 0xe42   : > { %v5888_v27 = vadd.f32 %v5886_v38, %v5870_v58  ;;  %v5887_v40 = vadd.f32 %v5885_v11, %v5869_v41  ;;  %v5940_v25 = vrot.slane %v5935_v4, %v10506_v19  ;;  %v6002_v8 = vrot.slane %v5997_v60, %v10506_v19  ;;  %v6266_v58 = vld [vmem:[%s11968_s2 + $0x40] sm:$0xff]  ;;  %v6267_v41 = vld [vmem:[%s11968_s2 + $0x48] sm:$0xff] }
 0xe43   : > { %v6006_v12 = vrot.slane %v5997_v60, %v10509_v20  ;;  %v8915_v30 = vcombine.low %v6258_v22, %v6262_v62  ;;  %v6270_v38 = vld [vmem:[%s11968_s2 + $0x60] sm:$0xff]  ;;  %v8917_v56 = vcombine.low %v6259_v49, %v6263_v50  ;;  %v8918_v51 = vcombine.high %v6259_v49, %v6263_v50  ;;  %v6271_v11 = vld [vmem:[%s11968_s2 + $0x68] sm:$0xff] }
 0xe44   : > { %v5906_v23 = vadd.f32 %v5904_v52, %v5888_v27  ;;  %v5905_v13 = vadd.f32 %v5903_v15, %v5887_v40  ;;  %v6274_v27 = vld [vmem:[%s11968_s2 + $0x80] sm:$0xff]  ;;  %v8926_v52 = vcombine.high %v6267_v41, %v6271_v11  ;;  %v6279_v4 = vld [vmem:[%s11968_s2 + $0xa8] sm:$0xff]  ;;  %v8923_v40 = vcombine.low %v6266_v58, %v6270_v38 }
 0xe45   : > { %7109 = vmatprep.subr.bf16.mxu1 %v8918_v51  ;;  %v8925_v15 = vcombine.low %v6267_v41, %v6271_v11  ;;  %v6315_v49 = vld [vmem:[%s11968_s2 + $0x1c8] sm:$0xff]  ;;  %v6326_v51 = vld [vmem:[%s11968_s2 + $0x220] sm:$0xff] }
 0xe46   : > { %v5920_v28 = vadd.f32 %v5916_v63, %v5906_v23  ;;  %v5919_v21 = vadd.f32 %v5912_v0, %v5905_v13  ;;  %v6278_v63 = vld [vmem:[%s11968_s2 + $0xa0] sm:$0xff]  ;;  %v6275_v0 = vld [vmem:[%s11968_s2 + $0x88] sm:$0xff] }
 0xe47   : > { %v8932_v23 = vcombine.high %v6274_v27, %v6278_v63  ;;  %v6286_v13 = vld [vmem:[%s11968_s2 + $0xe0] sm:$0xff]  ;;  %v6327_v41 = vld [vmem:[%s11968_s2 + $0x228] sm:$0xff] }
 0xe48   : > { %v5934_v55 = vmul.f32 %v5930_v10, %v5920_v28  ;;  %v5933_v36 = vmul.f32 %v5926_v16, %v5919_v21  ;;  %v8934_v10 = vcombine.high %v6275_v0, %v6279_v4  ;;  %v6282_v16 = vld [vmem:[%s11968_s2 + $0xc0] sm:$0xff]  ;;  %v6283_v28 = vld [vmem:[%s11968_s2 + $0xc8] sm:$0xff]  ;;  %v8933_v21 = vcombine.low %v6275_v0, %v6279_v4 }
 0xe49   : > { %v6330_v0 = vld [vmem:[%s11968_s2 + $0x240] sm:$0xff] }
 0xe4a   : > { %v5948_v17 = vadd.f32 %v5944_v59, %v5934_v55  ;;  %v5947_v24 = vadd.f32 %v5940_v25, %v5933_v36  ;;  %v6287_v59 = vld [vmem:[%s11968_s2 + $0xe8] sm:$0xff]  ;;  %v8931_v25 = vcombine.low %v6274_v27, %v6278_v63  ;;  %v8940_v55 = vcombine.high %v6282_v16, %v6286_v13  ;;  %v6334_v4 = vld [vmem:[%s11968_s2 + $0x260] sm:$0xff] }
 0xe4b   : > { %v8942_v36 = vcombine.high %v6283_v28, %v6287_v59 }
 0xe4c   : > { %v8882_v3 = vmul.f32 -1.442695, %v5948_v17  ;;  %v8881_v37 = vmul.f32 -1.442695, %v5947_v24 }
 0xe4e   : > { %10151 = vpow2.f32 %v8882_v3  ;;  %v6291_v3 = vld [vmem:[%s11968_s2 + $0x108] sm:$0xff] }
 0xe4f   : > { %10153 = vpow2.f32 %v8881_v37  ;;  %v6295_v37 = vld [vmem:[%s11968_s2 + $0x128] sm:$0xff] }
 0xe58   : > { %v10152_v18 = vpop.eup %10151 }
 0xe59   : > { %v10154_v26 = vpop.eup %10153  ;;  %v5956_v57 = vadd.f32 1.0, %v10152_v18  ;;  %v8939_v18 = vcombine.low %v6282_v16, %v6286_v13  ;;  %v8988_v16 = vcombine.high %v6330_v0, %v6334_v4 }
 0xe5a   : > { %v5955_v32 = vadd.f32 1.0, %v10154_v26  ;;  %v8941_v26 = vcombine.low %v6283_v28, %v6287_v59  ;;  %v6338_v28 = vld [vmem:[%s11968_s2 + $0x280] sm:$0xff] }
 0xe5b   : > { %10155 = vrcp.f32 %v5956_v57  ;;  %v6342_v59 = vld [vmem:[%s11968_s2 + $0x2a0] sm:$0xff] }
 0xe5c   : > { %10157 = vrcp.f32 %v5955_v32  ;;  %v8950_v32 = vcombine.high %v6291_v3, %v6295_v37 }
 0xe65   : > { %v10156_v34 = vpop.eup %10155 }
 0xe66   : > { %v10158_v6 = vpop.eup %10157  ;;  %v5962_v42 = vmul.f32 %v10156_v34, %v5948_v17  ;;  %v6290_v17 = vld [vmem:[%s11968_s2 + $0x100] sm:$0xff] }
 0xe67   : > { %v5961_v33 = vmul.f32 %v10158_v6, %v5947_v24  ;;  %v6294_v24 = vld [vmem:[%s11968_s2 + $0x120] sm:$0xff] }
 0xe68   : > { %v5964_v7 = vpack.c.bf16 %v5962_v42, %v5962_v42  ;;  %v8948_v57 = vcombine.high %v6290_v17, %v6294_v24  ;;  %v6298_v34 = vld [vmem:[%s11968_s2 + $0x140] sm:$0xff]  ;;  %v6299_v42 = vld [vmem:[%s11968_s2 + $0x148] sm:$0xff] }
 0xe69   : > { %v5963_v61 = vpack.c.bf16 %v5961_v33, %v5961_v33  ;;  %v6302_v6 = vld [vmem:[%s11968_s2 + $0x160] sm:$0xff]  ;;  %v6303_v33 = vld [vmem:[%s11968_s2 + $0x168] sm:$0xff] }
 0xe6a   : > { %6201 = vmatprep.mubr.bf16.mxu1 %v5964_v7  ;;  %v8947_v7 = vcombine.low %v6290_v17, %v6294_v24  ;;  %v8956_v60 = vcombine.high %v6298_v34, %v6302_v6  ;;  %v8996_v17 = vcombine.high %v6338_v28, %v6342_v59 }
 0xe6b   : > { %6202 = vmatmul.mubr.bf16.vlgmr.msra.gmra.mrb[72].mxu1 %v5963_v61  ;;  %v8949_v61 = vcombine.low %v6291_v3, %v6295_v37  ;;  %v8995_v3 = vcombine.low %v6338_v28, %v6342_v59 }
 0xe6c   : > { %7110 = vmatpush1.bf16.msra.mxu1 %v8917_v56  ;;  %v6322_v56 = vld [vmem:[%s11968_s2 + $0x200] sm:$0xff] }
 0xe6d   : > { %7111 = vmatprep.subr.bf16.mxu1 %v8926_v52  ;;  %v8980_v52 = vcombine.high %v6322_v56, %v6326_v51 }
 0xe70   : > { %7112 = vmatpush1.bf16.msra.mxu1 %v8925_v15  ;;  %v6335_v15 = vld [vmem:[%s11968_s2 + $0x268] sm:$0xff] }
 0xe71   : > { %7113 = vmatprep.subr.bf16.mxu1 %v8934_v10 }
 0xe74   : > { %7114 = vmatpush1.bf16.msra.mxu1 %v8933_v21  ;;  %v6343_v21 = vld [vmem:[%s11968_s2 + $0x2a8] sm:$0xff] }
 0xe75   : > { %7115 = vmatprep.subr.bf16.mxu1 %v8942_v36 }
 0xe78   : > { %7116 = vmatpush1.bf16.msra.mxu1 %v8941_v26 }
 0xe79   : > { %7117 = vmatprep.subr.bf16.mxu1 %v8950_v32 }
 0xe7c   : > { %7118 = vmatpush1.bf16.msra.mxu1 %v8949_v61  ;;  %v6347_v61 = vld [vmem:[%s11968_s2 + $0x2c8] sm:$0xff] }
 0xf3e   : > { %v6203_v9 = vpop.f32.mrb[72].mxu1 }
 0xf3f   : > { %v6204_v31 = vadd.f32 %v6203_v9, %v6002_v8  ;;  %v6205_v5 = vpop.f32.mrb[73].mxu1  ;;  %v8958_v8 = vcombine.high %v6299_v42, %v6303_v33  ;;  %v6310_v9 = vld [vmem:[%s11968_s2 + $0x1a0] sm:$0xff] }
 0xf40   : > { %v6206_v14 = vadd.f32 %v6205_v5, %v6006_v12  ;;  %v6207_v46 = vpop.f32.mrb[74].mxu1  ;;  %v6306_v12 = vld [vmem:[%s11968_s2 + $0x180] sm:$0xff]  ;;  %v6311_v5 = vld [vmem:[%s11968_s2 + $0x1a8] sm:$0xff] }
 0xf41   : > { %v11589_v45 = vadd.f32 %v6204_v31, %v11213_v2  ;;  %v6208_v39 = vpop.f32.mrb[75].mxu1  ;;  %v8916_v2 = vcombine.high %v6258_v22, %v6262_v62  ;;  %v6307_v31 = vld [vmem:[%s11968_s2 + $0x188] sm:$0xff]  ;;  %v8957_v46 = vcombine.low %v6299_v42, %v6303_v33  ;;  %7119 = vmatprep.subr.bf16.mxu1 %v8958_v8  ;;  %v6314_v22 = vld [vmem:[%s11968_s2 + $0x1c0] sm:$0xff] }
 0xf42   : > { %v11592_v29 = vadd.f32 %v6206_v14, %v11216_v1  ;;  %v8924_v1 = vcombine.high %v6266_v58, %v6270_v38  ;;  %v8955_v14 = vcombine.low %v6298_v34, %v6302_v6  ;;  %v8964_v39 = vcombine.high %v6306_v12, %v6310_v9  ;;  %v6318_v62 = vld [vmem:[%s11968_s2 + $0x1e0] sm:$0xff] }
 0xf43   : > { %7068 = vmatprep.subr.bf16.mxu0 %v8916_v2  ;;  %v8963_v2 = vcombine.low %v6306_v12, %v6310_v9  ;;  %7120 = vmatpush1.bf16.msra.mxu1 %v8957_v46  ;;  %v8965_v50 = vcombine.low %v6307_v31, %v6311_v5  ;;  %v8972_v58 = vcombine.high %v6314_v22, %v6318_v62  ;;  %v6346_v33 = vld [vmem:[%s11968_s2 + $0x2c0] sm:$0xff]  ;;  %v6351_v12 = vld [vmem:[%s11968_s2 + $0x2e8] sm:$0xff] }
 0xf44   : > { %v6214_v35 = vadd.f32 %v11592_v29, %v11589_v45  ;;  %7069 = vmatpush1.bf16.msra.mxu0 %v8915_v30  ;;  %v6319_v30 = vld [vmem:[%s11968_s2 + $0x1e8] sm:$0xff]  ;;  %v8971_v11 = vcombine.low %v6314_v22, %v6318_v62  ;;  %v6354_v9 = vld [vmem:[%s11968_s2 + $0x300] sm:$0xff] }
 0xf45   : > { %7070 = vmatprep.subr.bf16.mxu0 %v8924_v1  ;;  %v8974_v38 = vcombine.high %v6315_v49, %v6319_v30  ;;  %v6323_v1 = vld [vmem:[%s11968_s2 + $0x208] sm:$0xff]  ;;  %v8973_v27 = vcombine.low %v6315_v49, %v6319_v30  ;;  %v6362_v22 = vld [vmem:[%s11968_s2 + $0x340] sm:$0xff] }
 0xf46   : > { %6215 = vadd.xlane.f32.xlu1 %v6214_v35  ;;  %v8966_v35 = vcombine.high %v6307_v31, %v6311_v5  ;;  %v8982_v63 = vcombine.high %v6323_v1, %v6327_v41  ;;  %v8981_v10 = vcombine.low %v6323_v1, %v6327_v41  ;;  %v6358_v31 = vld [vmem:[%s11968_s2 + $0x320] sm:$0xff]  ;;  %v9005_v5 = vcombine.low %v6347_v61, %v6351_v12  ;;  %v6363_v30 = vld [vmem:[%s11968_s2 + $0x348] sm:$0xff] }
 0xf47   : > { %v9012_v46 = vcombine.high %v6354_v9, %v6358_v31  ;;  %v6366_v49 = vld [vmem:[%s11968_s2 + $0x360] sm:$0xff]  ;;  %v6371_v41 = vld [vmem:[%s11968_s2 + $0x388] sm:$0xff] }
 0xf48   : > { %7071 = vmatpush1.bf16.msra.mxu0 %v8923_v40  ;;  %7121 = vmatprep.subr.bf16.mxu1 %v8966_v35  ;;  %v6331_v40 = vld [vmem:[%s11968_s2 + $0x248] sm:$0xff]  ;;  %v6374_v1 = vld [vmem:[%s11968_s2 + $0x3a0] sm:$0xff] }
 0xf49   : > { %7072 = vmatprep.subr.bf16.mxu0 %v8932_v23  ;;  %7122 = vmatpush1.bf16.msra.mxu1 %v8965_v50  ;;  %v8979_v23 = vcombine.low %v6322_v56, %v6326_v51  ;;  %v8990_v13 = vcombine.high %v6331_v40, %v6335_v15  ;;  %v8989_v36 = vcombine.low %v6331_v40, %v6335_v15  ;;  %v6359_v35 = vld [vmem:[%s11968_s2 + $0x328] sm:$0xff]  ;;  %v6370_v51 = vld [vmem:[%s11968_s2 + $0x380] sm:$0xff] }
 0xf4a   : > { %7123 = vmatprep.subr.bf16.mxu1 %v8974_v38  ;;  %v9011_v50 = vcombine.low %v6354_v9, %v6358_v31  ;;  %v9020_v38 = vcombine.high %v6362_v22, %v6366_v49  ;;  %v6382_v40 = vld [vmem:[%s11968_s2 + $0x3e0] sm:$0xff]  ;;  %v6379_v15 = vld [vmem:[%s11968_s2 + $0x3c8] sm:$0xff] }
 0xf4c   : > { %7073 = vmatpush1.bf16.msra.mxu0 %v8931_v25  ;;  %v6339_v25 = vld [vmem:[%s11968_s2 + $0x288] sm:$0xff] }
 0xf4d   : > { %7074 = vmatprep.subr.bf16.mxu0 %v8940_v55  ;;  %7124 = vmatpush1.bf16.msra.mxu1 %v8973_v27  ;;  %v8987_v55 = vcombine.low %v6330_v0, %v6334_v4  ;;  %v8998_v24 = vcombine.high %v6339_v25, %v6343_v21  ;;  %v8997_v37 = vcombine.low %v6339_v25, %v6343_v21  ;;  %v6378_v4 = vld [vmem:[%s11968_s2 + $0x3c0] sm:$0xff]  ;;  %v6260_v21 = vld [vmem:[%s11968_s2 + $0x10] sm:$0xff] }
 0xf4e   : > { %7125 = vmatprep.subr.bf16.mxu1 %v8982_v63  ;;  %v9019_v27 = vcombine.low %v6362_v22, %v6366_v49  ;;  %v9028_v63 = vcombine.high %v6370_v51, %v6374_v1  ;;  %v9035_v59 = vcombine.low %v6378_v4, %v6382_v40  ;;  %v6272_v22 = vld [vmem:[%s11968_s2 + $0x70] sm:$0xff]  ;;  %v6273_v49 = vld [vmem:[%s11968_s2 + $0x78] sm:$0xff] }
 0xf50   : > { %7075 = vmatpush1.bf16.msra.mxu0 %v8939_v18 }
 0xf51   : > { %7076 = vmatprep.subr.bf16.mxu0 %v8948_v57  ;;  %7126 = vmatpush1.bf16.msra.mxu1 %v8981_v10  ;;  %v9027_v10 = vcombine.low %v6370_v51, %v6374_v1 }
 0xf52   : > { %7127 = vmatprep.subr.bf16.mxu1 %v8990_v13  ;;  %v9036_v13 = vcombine.high %v6378_v4, %v6382_v40 }
 0xf54   : > { %7077 = vmatpush1.bf16.msra.mxu0 %v8947_v7  ;;  %v6350_v7 = vld [vmem:[%s11968_s2 + $0x2e0] sm:$0xff] }
 0xf55   : > { %7078 = vmatprep.subr.bf16.mxu0 %v8956_v60  ;;  %7128 = vmatpush1.bf16.msra.mxu1 %v8989_v36  ;;  %v9003_v60 = vcombine.low %v6346_v33, %v6350_v7  ;;  %v9004_v8 = vcombine.high %v6346_v33, %v6350_v7  ;;  %v6261_v36 = vld [vmem:[%s11968_s2 + $0x18] sm:$0xff]  ;;  %v6213_v33 = vld [vmem:[%s11970_s18] sm:$0x3] }
 0xf56   : > { %7129 = vmatprep.subr.bf16.mxu1 %v8998_v24  ;;  %v6247_v31 = vrot.slane %v6213_v33, %v10506_v19 }
 0xf58   : > { %7079 = vmatpush1.bf16.msra.mxu0 %v8955_v14  ;;  %v9006_v14 = vcombine.high %v6347_v61, %v6351_v12  ;;  %v6251_v12 = vrot.slane %v6213_v33, %v10509_v20  ;;  %v6309_v33 = vld [vmem:[%s11968_s2 + $0x198] sm:$0xff] }
 0xf59   : > { %7080 = vmatprep.subr.bf16.mxu0 %v8964_v39  ;;  %7130 = vmatpush1.bf16.msra.mxu1 %v8997_v37  ;;  %v6355_v39 = vld [vmem:[%s11968_s2 + $0x308] sm:$0xff] }
 0xf5a   : > { %v9014_v62 = vcombine.high %v6355_v39, %v6359_v35  ;;  %7131 = vmatprep.subr.bf16.mxu1 %v9006_v14 }
 0xf5c   : > { %7081 = vmatpush1.bf16.msra.mxu0 %v8963_v2  ;;  %v6367_v2 = vld [vmem:[%s11968_s2 + $0x368] sm:$0xff] }
 0xf5d   : > { %7082 = vmatprep.subr.bf16.mxu0 %v8972_v58  ;;  %7132 = vmatpush1.bf16.msra.mxu1 %v9005_v5  ;;  %v9013_v58 = vcombine.low %v6355_v39, %v6359_v35  ;;  %v9022_v56 = vcombine.high %v6363_v30, %v6367_v2  ;;  %v6268_v35 = vld [vmem:[%s11968_s2 + $0x50] sm:$0xff] }
 0xf5e   : > { %7133 = vmatprep.subr.bf16.mxu1 %v9014_v62  ;;  %v6269_v62 = vld [vmem:[%s11968_s2 + $0x58] sm:$0xff]  ;;  %v8927_v51 = vcombine.low %v6268_v35, %v6272_v22 }
 0xf5f   : > { %v8929_v1 = vcombine.low %v6269_v62, %v6273_v49 }
 0xf60   : > { %7083 = vmatpush1.bf16.msra.mxu0 %v8971_v11  ;;  %v6375_v11 = vld [vmem:[%s11968_s2 + $0x3a8] sm:$0xff] }
 0xf61   : > { %7084 = vmatprep.subr.bf16.mxu0 %v8980_v52  ;;  %7134 = vmatpush1.bf16.msra.mxu1 %v9013_v58  ;;  %v9021_v52 = vcombine.low %v6363_v30, %v6367_v2  ;;  %v9030_v0 = vcombine.high %v6371_v41, %v6375_v11  ;;  %v6280_v58 = vld [vmem:[%s11968_s2 + $0xb0] sm:$0xff] }
 0xf62   : > { %7135 = vmatprep.subr.bf16.mxu1 %v9022_v56  ;;  %v6281_v56 = vld [vmem:[%s11968_s2 + $0xb8] sm:$0xff] }
 0xf64   : > { %7085 = vmatpush1.bf16.msra.mxu0 %v8979_v23  ;;  %v6383_v23 = vld [vmem:[%s11968_s2 + $0x3e8] sm:$0xff] }
 0xf65   : > { %7086 = vmatprep.subr.bf16.mxu0 %v8988_v16  ;;  %7136 = vmatpush1.bf16.msra.mxu1 %v9021_v52  ;;  %v9029_v16 = vcombine.low %v6371_v41, %v6375_v11  ;;  %v9038_v28 = vcombine.high %v6379_v15, %v6383_v23  ;;  %v9037_v25 = vcombine.low %v6379_v15, %v6383_v23  ;;  %v6288_v52 = vld [vmem:[%s11968_s2 + $0xf0] sm:$0xff] }
 0xf66   : > { %7137 = vmatprep.subr.bf16.mxu1 %v9030_v0  ;;  %v6289_v0 = vld [vmem:[%s11968_s2 + $0xf8] sm:$0xff] }
 0xf68   : > { %7087 = vmatpush1.bf16.msra.mxu0 %v8987_v55  ;;  %v6264_v55 = vld [vmem:[%s11968_s2 + $0x30] sm:$0xff] }
 0xf69   : > { %7088 = vmatprep.subr.bf16.mxu0 %v8996_v17  ;;  %7138 = vmatpush1.bf16.msra.mxu1 %v9029_v16  ;;  %v8919_v17 = vcombine.low %v6260_v21, %v6264_v55  ;;  %v8920_v24 = vcombine.high %v6260_v21, %v6264_v55  ;;  %v6296_v16 = vld [vmem:[%s11968_s2 + $0x130] sm:$0xff] }
 0xf6a   : > { %7139 = vmatprep.subr.bf16.mxu1 %v9038_v28  ;;  %v6297_v28 = vld [vmem:[%s11968_s2 + $0x138] sm:$0xff] }
 0xf6c   : > { %7089 = vmatpush1.bf16.msra.mxu0 %v8995_v3  ;;  %v6265_v3 = vld [vmem:[%s11968_s2 + $0x38] sm:$0xff] }
 0xf6d   : > { %7090 = vmatprep.subr.bf16.mxu0 %v9004_v8  ;;  %7140 = vmatpush1.bf16.msra.mxu1 %v9037_v25  ;;  %v8921_v37 = vcombine.low %v6261_v36, %v6265_v3 }
 0xf70   : > { %7091 = vmatpush1.bf16.msra.mxu0 %v9003_v60 }
 0xf71   : > { %7092 = vmatprep.subr.bf16.mxu0 %v9012_v46 }
 0xf74   : > { %7093 = vmatpush1.bf16.msra.mxu0 %v9011_v50  ;;  %v8930_v50 = vcombine.high %v6269_v62, %v6273_v49  ;;  %v6324_v62 = vld [vmem:[%s11968_s2 + $0x210] sm:$0xff] }
 0xf75   : > { %7094 = vmatprep.subr.bf16.mxu0 %v9020_v38  ;;  %v6277_v38 = vld [vmem:[%s11968_s2 + $0x98] sm:$0xff]  ;;  %v6328_v49 = vld [vmem:[%s11968_s2 + $0x230] sm:$0xff] }
 0xf76   : > { %v8938_v11 = vcombine.high %v6277_v38, %v6281_v56  ;;  %v8937_v40 = vcombine.low %v6277_v38, %v6281_v56  ;;  %v6332_v56 = vld [vmem:[%s11968_s2 + $0x250] sm:$0xff] }
 0xf78   : > { %7095 = vmatpush1.bf16.msra.mxu0 %v9019_v27  ;;  %v6284_v27 = vld [vmem:[%s11968_s2 + $0xd0] sm:$0xff] }
 0xf79   : > { %7096 = vmatprep.subr.bf16.mxu0 %v9028_v63  ;;  %v6285_v63 = vld [vmem:[%s11968_s2 + $0xd8] sm:$0xff]  ;;  %v8944_v15 = vcombine.high %v6284_v27, %v6288_v52 }
 0xf7a   : > { %v8946_v23 = vcombine.high %v6285_v63, %v6289_v0  ;;  %v8945_v25 = vcombine.low %v6285_v63, %v6289_v0  ;;  %v6340_v0 = vld [vmem:[%s11968_s2 + $0x290] sm:$0xff] }
 0xf7c   : > { %7097 = vmatpush1.bf16.msra.mxu0 %v9027_v10  ;;  %v6292_v10 = vld [vmem:[%s11968_s2 + $0x110] sm:$0xff] }
 0xf7d   : > { %7098 = vmatprep.subr.bf16.mxu0 %v9036_v13  ;;  %v6293_v13 = vld [vmem:[%s11968_s2 + $0x118] sm:$0xff]  ;;  %v8952_v21 = vcombine.high %v6292_v10, %v6296_v16 }
 0xf7e   : > { %v8954_v55 = vcombine.high %v6293_v13, %v6297_v28 }
 0xf80   : > { %7099 = vmatpush1.bf16.msra.mxu0 %v9035_v59  ;;  %v8943_v59 = vcombine.low %v6284_v27, %v6288_v52 }
 0xf81   : > { %7150 = vmatprep.subr.bf16.mxu0 %v8920_v24  ;;  %v6301_v24 = vld [vmem:[%s11968_s2 + $0x158] sm:$0xff] }
 0xfd3   : > { %v6216_v18 = vpop.xlane.xlu1 %6215 }
 0xfd4   : > { %v6217_v26 = vmul.f32 0.00390625, %v6216_v18  ;;  %v8922_v18 = vcombine.high %v6261_v36, %v6265_v3  ;;  %v6300_v36 = vld [vmem:[%s11968_s2 + $0x150] sm:$0xff]  ;;  %v6305_v3 = vld [vmem:[%s11968_s2 + $0x178] sm:$0xff] }
 0xfd6   : > { %v11641_v57 = vsub.f32 %v11589_v45, %v6217_v26  ;;  %v11644_v32 = vsub.f32 %v11592_v29, %v6217_v26  ;;  %7191 = vmatprep.subr.bf16.mxu1 %v8922_v18  ;;  %v8953_v18 = vcombine.low %v6293_v13, %v6297_v28  ;;  %v6348_v28 = vld [vmem:[%s11968_s2 + $0x2d0] sm:$0xff] }
 0xfd8   : > { %v6220_v34 = vmul.f32 %v11641_v57, %v11641_v57  ;;  %v6221_v6 = vmul.f32 %v11644_v32, %v11644_v32 }
 0xfda   : > { %v6222_v42 = vadd.f32 %v6221_v6, %v6220_v34 }
 0xfdc   : > { %6223 = vadd.xlane.f32.xlu1 %v6222_v42  ;;  %v6212_v42 = vld [vmem:[%s11969_s15] sm:$0x3]  ;;  %s1112_s15 = scalar_lea.vmem %s10441_s13, %s9181_s0 }
 0xfdd   : > { %v6238_v7 = vrot.slane %v6212_v42, %v10509_v20  ;;  %v6234_v61 = vrot.slane %v6212_v42, %v10506_v19  ;;  %v6312_v42 = vld [vmem:[%s11968_s2 + $0x1b0] sm:$0xff] }
0x1069   : > { %v6224_v26 = vpop.xlane.xlu1 %6223 }
0x106a   : > { %v6225_v34 = vmul.f32 0.00390625, %v6224_v26 }
0x106c   : > { %v6226_v6 = vadd.f32 1e-12, %v6225_v34  ;;  %v8962_v34 = vcombine.high %v6301_v24, %v6305_v3 }
0x106e   : > { %10159 = vrsqrt.f32 %v6226_v6  ;;  %v6308_v6 = vld [vmem:[%s11968_s2 + $0x190] sm:$0xff] }
0x1078   : > { %v10160_v60 = vpop.eup %10159 }
0x1079   : > { %v6229_v8 = vmul.f32 %v10160_v60, %v11644_v32  ;;  %v6228_v9 = vmul.f32 %v10160_v60, %v11641_v57  ;;  %v6276_v32 = vld [vmem:[%s11968_s2 + $0x90] sm:$0xff]  ;;  %v8928_v57 = vcombine.high %v6268_v35, %v6272_v22  ;;  %v8961_v60 = vcombine.low %v6301_v24, %v6305_v3 }
0x107a   : > { %v8936_v41 = vcombine.high %v6276_v32, %v6280_v58  ;;  %v8935_v4 = vcombine.low %v6276_v32, %v6280_v58  ;;  %v6329_v32 = vld [vmem:[%s11968_s2 + $0x238] sm:$0xff]  ;;  %v8984_v58 = vcombine.high %v6324_v62, %v6328_v49  ;;  %v6356_v3 = vld [vmem:[%s11968_s2 + $0x310] sm:$0xff] }
0x107b   : > { %v6242_v5 = vmul.f32 %v6238_v7, %v6229_v8  ;;  %v6241_v14 = vmul.f32 %v6234_v61, %v6228_v9  ;;  %v6313_v7 = vld [vmem:[%s11968_s2 + $0x1b8] sm:$0xff]  ;;  %v8968_v8 = vcombine.high %v6308_v6, %v6312_v42  ;;  %v6316_v9 = vld [vmem:[%s11968_s2 + $0x1d0] sm:$0xff] }
0x107d   : > { %v6255_v46 = vadd.f32 %v6251_v12, %v6242_v5  ;;  %v6254_v39 = vadd.f32 %v6247_v31, %v6241_v14  ;;  %v8970_v12 = vcombine.high %v6309_v33, %v6313_v7  ;;  %v6320_v31 = vld [vmem:[%s11968_s2 + $0x1f0] sm:$0xff]  ;;  %v6317_v5 = vld [vmem:[%s11968_s2 + $0x1d8] sm:$0xff] }
0x107e   : > { %v6321_v14 = vld [vmem:[%s11968_s2 + $0x1f8] sm:$0xff]  ;;  %v8976_v35 = vcombine.high %v6316_v9, %v6320_v31 }
0x107f   : > { %v6257_v30 = vpack.c.bf16 %v6255_v46, %v6255_v46  ;;  %v11686_v2 = vpack.c.bf16 %v6254_v39, %v6254_v39  ;;  %v8967_v46 = vcombine.low %v6308_v6, %v6312_v42  ;;  %v8969_v39 = vcombine.low %v6309_v33, %v6313_v7  ;;  %v6364_v7 = vld [vmem:[%s11968_s2 + $0x350] sm:$0xff] }
0x1080   : > { %v8978_v22 = vcombine.high %v6317_v5, %v6321_v14 }
0x1081   : > { %7100 = vmatprep.mubr.bf16.mxu0 %v6257_v30  ;;  %7141 = vmatprep.mubr.bf16.mxu1 %v6257_v30 }
0x1082   : > { %7101 = vmatmul.mubr.bf16.vlgmr.msra.gmra.mrb[20].mxu0 %v11686_v2  ;;  %7142 = vmatmul.mubr.bf16.vlgmr.msra.gmra.mrb[76].mxu1 %v11686_v2 }
0x1083   : > { %7151 = vmatpush1.bf16.msra.mxu0 %v8919_v17  ;;  %7192 = vmatpush1.bf16.msra.mxu1 %v8921_v37  ;;  %v6304_v17 = vld [vmem:[%s11968_s2 + $0x170] sm:$0xff]  ;;  %v8951_v37 = vcombine.low %v6292_v10, %v6296_v16 }
0x1084   : > { %7182 = vmatprep.mubr.bf16.mxu0 %v6257_v30  ;;  %7223 = vmatprep.mubr.bf16.mxu1 %v6257_v30  ;;  %v8960_v26 = vcombine.high %v6300_v36, %v6304_v17  ;;  %v8959_v61 = vcombine.low %v6300_v36, %v6304_v17  ;;  %v6325_v30 = vld [vmem:[%s11968_s2 + $0x218] sm:$0xff] }
0x1085   : > { %7152 = vmatprep.subr.bf16.mxu0 %v8928_v57  ;;  %7193 = vmatprep.subr.bf16.mxu1 %v8930_v50  ;;  %v8975_v57 = vcombine.low %v6316_v9, %v6320_v31  ;;  %v8977_v50 = vcombine.low %v6317_v5, %v6321_v14  ;;  %v8986_v38 = vcombine.high %v6325_v30, %v6329_v32  ;;  %v6372_v14 = vld [vmem:[%s11968_s2 + $0x390] sm:$0xff] }
0x1086   : > { %v8985_v27 = vcombine.low %v6325_v30, %v6329_v32  ;;  %v6380_v32 = vld [vmem:[%s11968_s2 + $0x3d0] sm:$0xff] }
0x1087   : > { %7153 = vmatpush1.bf16.msra.mxu0 %v8927_v51  ;;  %7194 = vmatpush1.bf16.msra.mxu1 %v8929_v1  ;;  %v6336_v51 = vld [vmem:[%s11968_s2 + $0x270] sm:$0xff]  ;;  %v6333_v1 = vld [vmem:[%s11968_s2 + $0x258] sm:$0xff] }
0x1088   : > { %7154 = vmatprep.subr.bf16.mxu0 %v8936_v41  ;;  %7195 = vmatprep.subr.bf16.mxu1 %v8938_v11  ;;  %v6337_v41 = vld [vmem:[%s11968_s2 + $0x278] sm:$0xff]  ;;  %v8983_v11 = vcombine.low %v6324_v62, %v6328_v49  ;;  %v8992_v52 = vcombine.high %v6332_v56, %v6336_v51 }
0x1089   : > { %v8994_v63 = vcombine.high %v6333_v1, %v6337_v41  ;;  %v8993_v10 = vcombine.low %v6333_v1, %v6337_v41 }
0x108b   : > { %7155 = vmatpush1.bf16.msra.mxu0 %v8935_v4  ;;  %7196 = vmatpush1.bf16.msra.mxu1 %v8937_v40  ;;  %v6344_v4 = vld [vmem:[%s11968_s2 + $0x2b0] sm:$0xff]  ;;  %v6341_v40 = vld [vmem:[%s11968_s2 + $0x298] sm:$0xff] }
0x108c   : > { %7156 = vmatprep.subr.bf16.mxu0 %v8944_v15  ;;  %7197 = vmatprep.subr.bf16.mxu1 %v8946_v23  ;;  %v6345_v15 = vld [vmem:[%s11968_s2 + $0x2b8] sm:$0xff]  ;;  %v8991_v23 = vcombine.low %v6332_v56, %v6336_v51  ;;  %v9000_v16 = vcombine.high %v6340_v0, %v6344_v4 }
0x108d   : > { %v9002_v13 = vcombine.high %v6341_v40, %v6345_v15  ;;  %v9001_v36 = vcombine.low %v6341_v40, %v6345_v15  ;;  %v9903_v40 = vld [vmem:[%s10431_s8 + $0x20] ss:$8 sps:$4 sm:$0xff]   ;;  %v9908_v15 = vld [vmem:[%s10431_s8 + $0x34] ss:$8 sps:$4 sm:$0xff]  }
0x108f   : > { %7157 = vmatpush1.bf16.msra.mxu0 %v8943_v59  ;;  %7198 = vmatpush1.bf16.msra.mxu1 %v8945_v25  ;;  %v6352_v59 = vld [vmem:[%s11968_s2 + $0x2f0] sm:$0xff]  ;;  %v6349_v25 = vld [vmem:[%s11968_s2 + $0x2d8] sm:$0xff] }
0x1090   : > { %7158 = vmatprep.subr.bf16.mxu0 %v8952_v21  ;;  %7199 = vmatprep.subr.bf16.mxu1 %v8954_v55  ;;  %v6353_v21 = vld [vmem:[%s11968_s2 + $0x2f8] sm:$0xff]  ;;  %v8999_v55 = vcombine.low %v6340_v0, %v6344_v4  ;;  %v9008_v17 = vcombine.high %v6348_v28, %v6352_v59  ;;  %v9905_v4 = vld [vmem:[%s10431_s8 + $0x24] ss:$8 sps:$4 sm:$0xff]  }
0x1091   : > { %v9010_v24 = vcombine.high %v6349_v25, %v6353_v21  ;;  %v9009_v6 = vcombine.low %v6349_v25, %v6353_v21  ;;  %v9900_v0 = vld [vmem:[%s10431_s8 + $0x10] ss:$8 sps:$4 sm:$0xff]   ;;  %v9920_v25 = vld [vmem:[%s10431_s8 + $0x74] ss:$8 sps:$4 sm:$0xff]  }
0x1092   : > { %v9918_v21 = vld [vmem:[%s10431_s8 + $0x70] ss:$8 sps:$4 sm:$0xff]  }
0x1093   : > { %7159 = vmatpush1.bf16.msra.mxu0 %v8951_v37  ;;  %7200 = vmatpush1.bf16.msra.mxu1 %v8953_v18  ;;  %v6360_v37 = vld [vmem:[%s11968_s2 + $0x330] sm:$0xff]  ;;  %v6357_v18 = vld [vmem:[%s11968_s2 + $0x318] sm:$0xff] }
0x1094   : > { %7160 = vmatprep.subr.bf16.mxu0 %v8960_v26  ;;  %7201 = vmatprep.subr.bf16.mxu1 %v8962_v34  ;;  %v6361_v26 = vld [vmem:[%s11968_s2 + $0x338] sm:$0xff]  ;;  %v9007_v34 = vcombine.low %v6348_v28, %v6352_v59  ;;  %v9016_v42 = vcombine.high %v6356_v3, %v6360_v37  ;;  %v9917_v28 = vld [vmem:[%s10431_s8 + $0x64] ss:$8 sps:$4 sm:$0xff]   ;;  %v9915_v59 = vld [vmem:[%s10431_s8 + $0x60] ss:$8 sps:$4 sm:$0xff]  }
0x1095   : > { %v9018_v33 = vcombine.high %v6357_v18, %v6361_v26  ;;  %v9017_v9 = vcombine.low %v6357_v18, %v6361_v26  ;;  %v9932_v18 = vld [vmem:[%s10431_s8 + $0xb4] ss:$8 sps:$4 sm:$0xff]   ;;  %v9930_v26 = vld [vmem:[%s10431_s8 + $0xb0] ss:$8 sps:$4 sm:$0xff]  }
0x1097   : > { %7161 = vmatpush1.bf16.msra.mxu0 %v8959_v61  ;;  %7202 = vmatpush1.bf16.msra.mxu1 %v8961_v60  ;;  %v6368_v61 = vld [vmem:[%s11968_s2 + $0x370] sm:$0xff]  ;;  %v6365_v60 = vld [vmem:[%s11968_s2 + $0x358] sm:$0xff] }
0x1098   : > { %7162 = vmatprep.subr.bf16.mxu0 %v8968_v8  ;;  %7203 = vmatprep.subr.bf16.mxu1 %v8970_v12  ;;  %v6369_v8 = vld [vmem:[%s11968_s2 + $0x378] sm:$0xff]  ;;  %v9015_v12 = vcombine.low %v6356_v3, %v6360_v37  ;;  %v9024_v31 = vcombine.high %v6364_v7, %v6368_v61  ;;  %v9929_v3 = vld [vmem:[%s10431_s8 + $0xa4] ss:$8 sps:$4 sm:$0xff]   ;;  %v9927_v37 = vld [vmem:[%s10431_s8 + $0xa0] ss:$8 sps:$4 sm:$0xff]  }
0x1099   : > { %v9026_v5 = vcombine.high %v6365_v60, %v6369_v8  ;;  %v9025_v62 = vcombine.low %v6365_v60, %v6369_v8  ;;  %v9944_v60 = vld [vmem:[%s10431_s8 + $0xf4] ss:$8 sps:$4 sm:$0xff]   ;;  %v9942_v8 = vld [vmem:[%s10431_s8 + $0xf0] ss:$8 sps:$4 sm:$0xff]  }
0x109b   : > { %7163 = vmatpush1.bf16.msra.mxu0 %v8967_v46  ;;  %7204 = vmatpush1.bf16.msra.mxu1 %v8969_v39  ;;  %v6376_v46 = vld [vmem:[%s11968_s2 + $0x3b0] sm:$0xff]  ;;  %v6373_v39 = vld [vmem:[%s11968_s2 + $0x398] sm:$0xff] }
0x109c   : > { %7164 = vmatprep.subr.bf16.mxu0 %v8976_v35  ;;  %7205 = vmatprep.subr.bf16.mxu1 %v8978_v22  ;;  %v6377_v35 = vld [vmem:[%s11968_s2 + $0x3b8] sm:$0xff]  ;;  %v9023_v22 = vcombine.low %v6364_v7, %v6368_v61  ;;  %v9032_v49 = vcombine.high %v6372_v14, %v6376_v46  ;;  %v9941_v7 = vld [vmem:[%s10431_s8 + $0xe4] ss:$8 sps:$4 sm:$0xff]   ;;  %v9939_v61 = vld [vmem:[%s10431_s8 + $0xe0] ss:$8 sps:$4 sm:$0xff]  }
0x109d   : > { %v9034_v30 = vcombine.high %v6373_v39, %v6377_v35  ;;  %v9033_v56 = vcombine.low %v6373_v39, %v6377_v35 }
0x109f   : > { %7165 = vmatpush1.bf16.msra.mxu0 %v8975_v57  ;;  %7206 = vmatpush1.bf16.msra.mxu1 %v8977_v50  ;;  %v6384_v57 = vld [vmem:[%s11968_s2 + $0x3f0] sm:$0xff]  ;;  %v6381_v50 = vld [vmem:[%s11968_s2 + $0x3d8] sm:$0xff] }
0x10a0   : > { %7166 = vmatprep.subr.bf16.mxu0 %v8984_v58  ;;  %7207 = vmatprep.subr.bf16.mxu1 %v8986_v38  ;;  %v6385_v58 = vld [vmem:[%s11968_s2 + $0x3f8] sm:$0xff]  ;;  %v9031_v38 = vcombine.low %v6372_v14, %v6376_v46  ;;  %v9040_v51 = vcombine.high %v6380_v32, %v6384_v57  ;;  %v9039_v41 = vcombine.low %v6380_v32, %v6384_v57 }
0x10a1   : > { %v9042_v1 = vcombine.high %v6381_v50, %v6385_v58 }
0x10a3   : > { %7167 = vmatpush1.bf16.msra.mxu0 %v8983_v11  ;;  %7208 = vmatpush1.bf16.msra.mxu1 %v8985_v27  ;;  %v9041_v11 = vcombine.low %v6381_v50, %v6385_v58  ;;  %v9899_v27 = vld [vmem:[%s10431_s8 + $0x4] ss:$8 sps:$4 sm:$0xff]  }
0x10a4   : > { %7168 = vmatprep.subr.bf16.mxu0 %v8992_v52  ;;  %7209 = vmatprep.subr.bf16.mxu1 %v8994_v63  ;;  %v9897_v52 = vld [vmem:[%s10431_s8] ss:$8 sps:$4 sm:$0xff]   ;;  %v9902_v63 = vld [vmem:[%s10431_s8 + $0x14] ss:$8 sps:$4 sm:$0xff]  }
0x10a7   : > { %7169 = vmatpush1.bf16.msra.mxu0 %v8991_v23  ;;  %7210 = vmatpush1.bf16.msra.mxu1 %v8993_v10  ;;  %v9906_v23 = vld [vmem:[%s10431_s8 + $0x30] ss:$8 sps:$4 sm:$0xff]   ;;  %v9911_v10 = vld [vmem:[%s10431_s8 + $0x44] ss:$8 sps:$4 sm:$0xff]  }
0x10a8   : > { %7170 = vmatprep.subr.bf16.mxu0 %v9000_v16  ;;  %7211 = vmatprep.subr.bf16.mxu1 %v9002_v13  ;;  %v9914_v16 = vld [vmem:[%s10431_s8 + $0x54] ss:$8 sps:$4 sm:$0xff]   ;;  %v9912_v13 = vld [vmem:[%s10431_s8 + $0x50] ss:$8 sps:$4 sm:$0xff]  }
0x10ab   : > { %7171 = vmatpush1.bf16.msra.mxu0 %v8999_v55  ;;  %7212 = vmatpush1.bf16.msra.mxu1 %v9001_v36  ;;  %v9923_v55 = vld [vmem:[%s10431_s8 + $0x84] ss:$8 sps:$4 sm:$0xff]   ;;  %v9921_v36 = vld [vmem:[%s10431_s8 + $0x80] ss:$8 sps:$4 sm:$0xff]  }
0x10ac   : > { %7172 = vmatprep.subr.bf16.mxu0 %v9008_v17  ;;  %7213 = vmatprep.subr.bf16.mxu1 %v9010_v24  ;;  %v9926_v17 = vld [vmem:[%s10431_s8 + $0x94] ss:$8 sps:$4 sm:$0xff]   ;;  %v9924_v24 = vld [vmem:[%s10431_s8 + $0x90] ss:$8 sps:$4 sm:$0xff]  }
0x10af   : > { %7173 = vmatpush1.bf16.msra.mxu0 %v9007_v34  ;;  %7214 = vmatpush1.bf16.msra.mxu1 %v9009_v6  ;;  %v9933_v34 = vld [vmem:[%s10431_s8 + $0xc0] ss:$8 sps:$4 sm:$0xff]   ;;  %v9935_v6 = vld [vmem:[%s10431_s8 + $0xc4] ss:$8 sps:$4 sm:$0xff]  }
0x10b0   : > { %7174 = vmatprep.subr.bf16.mxu0 %v9016_v42  ;;  %7215 = vmatprep.subr.bf16.mxu1 %v9018_v33  ;;  %v9938_v42 = vld [vmem:[%s10431_s8 + $0xd4] ss:$8 sps:$4 sm:$0xff]   ;;  %v9936_v33 = vld [vmem:[%s10431_s8 + $0xd0] ss:$8 sps:$4 sm:$0xff]  }
0x10b3   : > { %7175 = vmatpush1.bf16.msra.mxu0 %v9015_v12  ;;  %7216 = vmatpush1.bf16.msra.mxu1 %v9017_v9  ;;  %v9947_v12 = vld [vmem:[%s10431_s8 + $0x104] ss:$8 sps:$4 sm:$0xff]  }
0x10b4   : > { %7176 = vmatprep.subr.bf16.mxu0 %v9024_v31  ;;  %7217 = vmatprep.subr.bf16.mxu1 %v9026_v5  ;;  %v11782_v9 = vld [vmem:[%s10426_s30] sm:$0xff] }
0x10b5   : > { %v6391_v31 = vrot.slane %v11782_v9, %v10506_v19  ;;  %v6395_v5 = vrot.slane %v11782_v9, %v10509_v20  ;;  %v6403_v14 = vrot.slane %v11782_v9, %v10681_v54 }
0x10b7   : > { %7177 = vmatpush1.bf16.msra.mxu0 %v9023_v22  ;;  %7218 = vmatpush1.bf16.msra.mxu1 %v9025_v62 }
0x10b8   : > { %7178 = vmatprep.subr.bf16.mxu0 %v9032_v49  ;;  %7219 = vmatprep.subr.bf16.mxu1 %v9034_v30 }
0x10bb   : > { %7179 = vmatpush1.bf16.msra.mxu0 %v9031_v38  ;;  %7220 = vmatpush1.bf16.msra.mxu1 %v9033_v56 }
0x10bc   : > { %7180 = vmatprep.subr.bf16.mxu0 %v9040_v51  ;;  %7221 = vmatprep.subr.bf16.mxu1 %v9042_v1 }
0x10bf   : > { %7181 = vmatpush1.bf16.msra.mxu0 %v9039_v41  ;;  %7222 = vmatpush1.bf16.msra.mxu1 %v9041_v11 }
0x10c0   : > { %8076 = vmatprep.subr.bf16.mxu0 %v9899_v27 }
0x10c2   : > { %7183 = vmatmul.mubr.bf16.vlgmr.msra.gmra.mrb[24].mxu0 %v11686_v2  ;;  %7224 = vmatmul.mubr.bf16.vlgmr.msra.gmra.mrb[80].mxu1 %v11686_v2  ;;  %v9909_v2 = vld [vmem:[%s10431_s8 + $0x40] ss:$8 sps:$4 sm:$0xff]  }
0x10c3   : > { %8077 = vmatpush1.bf16.msra.mxu0 %v9897_v52 }
0x10c4   : > { %8078 = vmatprep.subr.bf16.mxu0 %v9902_v63 }
0x10c7   : > { %8079 = vmatpush1.bf16.msra.mxu0 %v9900_v0 }
0x10c8   : > { %8080 = vmatprep.subr.bf16.mxu0 %v9905_v4 }
0x10cb   : > { %8081 = vmatpush1.bf16.msra.mxu0 %v9903_v40 }
0x10cc   : > { %8082 = vmatprep.subr.bf16.mxu0 %v9908_v15 }
0x10cf   : > { %8083 = vmatpush1.bf16.msra.mxu0 %v9906_v23 }
0x10d0   : > { %8084 = vmatprep.subr.bf16.mxu0 %v9911_v10 }
0x10d3   : > { %8085 = vmatpush1.bf16.msra.mxu0 %v9909_v2  ;;  %v9945_v2 = vld [vmem:[%s10431_s8 + $0x100] ss:$8 sps:$4 sm:$0xff]  }
0x10d4   : > { %8086 = vmatprep.subr.bf16.mxu0 %v9914_v16 }
0x10d7   : > { %8087 = vmatpush1.bf16.msra.mxu0 %v9912_v13  ;;  %v9950_v13 = vld [vmem:[%s10431_s8 + $0x114] ss:$8 sps:$4 sm:$0xff]  }
0x10d8   : > { %8088 = vmatprep.subr.bf16.mxu0 %v9917_v28 }
0x10db   : > { %8089 = vmatpush1.bf16.msra.mxu0 %v9915_v59  ;;  %v9948_v59 = vld [vmem:[%s10431_s8 + $0x110] ss:$8 sps:$4 sm:$0xff]  }
0x10dc   : > { %8090 = vmatprep.subr.bf16.mxu0 %v9920_v25  ;;  %v9953_v25 = vld [vmem:[%s10431_s8 + $0x124] ss:$8 sps:$4 sm:$0xff]  }
0x10df   : > { %8091 = vmatpush1.bf16.msra.mxu0 %v9918_v21  ;;  %v9951_v21 = vld [vmem:[%s10431_s8 + $0x120] ss:$8 sps:$4 sm:$0xff]  }
0x10e0   : > { %8092 = vmatprep.subr.bf16.mxu0 %v9923_v55  ;;  %v9956_v55 = vld [vmem:[%s10431_s8 + $0x134] ss:$8 sps:$4 sm:$0xff]  }
0x10e3   : > { %8093 = vmatpush1.bf16.msra.mxu0 %v9921_v36  ;;  %v9954_v36 = vld [vmem:[%s10431_s8 + $0x130] ss:$8 sps:$4 sm:$0xff]  }
0x10e4   : > { %8094 = vmatprep.subr.bf16.mxu0 %v9926_v17  ;;  %v9959_v17 = vld [vmem:[%s10431_s8 + $0x144] ss:$8 sps:$4 sm:$0xff]  }
0x10e7   : > { %8095 = vmatpush1.bf16.msra.mxu0 %v9924_v24  ;;  %v9957_v24 = vld [vmem:[%s10431_s8 + $0x140] ss:$8 sps:$4 sm:$0xff]  }
0x10e8   : > { %8096 = vmatprep.subr.bf16.mxu0 %v9929_v3  ;;  %v9962_v3 = vld [vmem:[%s10431_s8 + $0x154] ss:$8 sps:$4 sm:$0xff]  }
0x10eb   : > { %8097 = vmatpush1.bf16.msra.mxu0 %v9927_v37  ;;  %v6399_v37 = vrot.slane %v11782_v9, %v10678_v53 }
0x10ec   : > { %8098 = vmatprep.subr.bf16.mxu0 %v9932_v18  ;;  %v9960_v18 = vld [vmem:[%s10431_s8 + $0x150] ss:$8 sps:$4 sm:$0xff]  }
0x10ef   : > { %8099 = vmatpush1.bf16.msra.mxu0 %v9930_v26  ;;  %v9965_v26 = vld [vmem:[%s10431_s8 + $0x164] ss:$8 sps:$4 sm:$0xff]  }
0x10f0   : > { %8100 = vmatprep.subr.bf16.mxu0 %v9935_v6  ;;  %v9963_v6 = vld [vmem:[%s10431_s8 + $0x160] ss:$8 sps:$4 sm:$0xff]  }
0x10f3   : > { %8101 = vmatpush1.bf16.msra.mxu0 %v9933_v34 }
0x10f4   : > { %8102 = vmatprep.subr.bf16.mxu0 %v9938_v42  ;;  %v9968_v42 = vld [vmem:[%s10431_s8 + $0x174] ss:$8 sps:$4 sm:$0xff]  }
0x10f7   : > { %8103 = vmatpush1.bf16.msra.mxu0 %v9936_v33 }
0x10f8   : > { %8104 = vmatprep.subr.bf16.mxu0 %v9941_v7  ;;  %v9966_v7 = vld [vmem:[%s10431_s8 + $0x170] ss:$8 sps:$4 sm:$0xff]  }
0x10fb   : > { %8105 = vmatpush1.bf16.msra.mxu0 %v9939_v61  ;;  %v6411_v61 = vrot.slane %v11782_v9, %v10723_v48  ;;  %v9974_v48 = vld [vmem:[%s10431_s8 + $0x194] ss:$8 sps:$4 sm:$0xff]  }
0x10fc   : > { %8106 = vmatprep.subr.bf16.mxu0 %v9944_v60  ;;  %v9971_v60 = vld [vmem:[%s10431_s8 + $0x184] ss:$8 sps:$4 sm:$0xff]  }
0x10ff   : > { %8107 = vmatpush1.bf16.msra.mxu0 %v9942_v8 }
0x1100   : > { %8117 = vmatprep.subr.bf16.mxu0 %v9947_v12 }
0x1155   : > { %v7102_v46 = vpop.f32.mrb[20].mxu0  ;;  %v7143_v39 = vpop.f32.mrb[76].mxu1 }
0x1156   : > { %v7103_v35 = vadd.f32 %v7102_v46, %v6391_v31  ;;  %v7104_v22 = vpop.f32.mrb[21].mxu0  ;;  %v7145_v62 = vpop.f32.mrb[77].mxu1  ;;  %v7144_v34 = vadd.f32 %v7143_v39, %v6399_v37  ;;  %v6407_v37 = vrot.slane %v11782_v9, %v10720_v47 }
0x1157   : > { %v7105_v49 = vadd.f32 %v7104_v22, %v6395_v5  ;;  %v7146_v30 = vadd.f32 %v7145_v62, %v6403_v14  ;;  %v7106_v32 = vpop.f32.mrb[22].mxu0  ;;  %v7147_v57 = vpop.f32.mrb[78].mxu1  ;;  %v9969_v5 = vld [vmem:[%s10431_s8 + $0x180] ss:$8 sps:$4 sm:$0xff]  }
0x1158   : > { %v9043_v50 = vmul.f32 -1.442695, %v7103_v35  ;;  %v7107_v58 = vpop.f32.mrb[23].mxu0  ;;  %v7148_v38 = vpop.f32.mrb[79].mxu1  ;;  %v9045_v33 = vmul.f32 -1.442695, %v7144_v34 }
0x1159   : > { %v9044_v56 = vmul.f32 -1.442695, %v7105_v49  ;;  %v9046_v51 = vmul.f32 -1.442695, %v7146_v30  ;;  %v9975_v32 = vld [vmem:[%s10431_s8 + $0x1a0] ss:$8 sps:$4 sm:$0xff]  }
0x115a   : > { %10161 = vpow2.f32 %v9043_v50  ;;  %v9980_v50 = vld [vmem:[%s10431_s8 + $0x1b4] ss:$8 sps:$4 sm:$0xff]   ;;  %v9978_v38 = vld [vmem:[%s10431_s8 + $0x1b0] ss:$8 sps:$4 sm:$0xff]  }
0x115b   : > { %10163 = vpow2.f32 %v9044_v56  ;;  %v9983_v56 = vld [vmem:[%s10431_s8 + $0x1c4] ss:$8 sps:$4 sm:$0xff]  }
0x115c   : > { %10165 = vpow2.f32 %v9046_v51 }
0x1164   : > { %v10162_v1 = vpop.eup %10161 }
0x1165   : > { %v7256_v54 = vadd.f32 1.0, %v10162_v1  ;;  %v10164_v41 = vpop.eup %10163  ;;  %v9981_v1 = vld [vmem:[%s10431_s8 + $0x1c0] ss:$8 sps:$4 sm:$0xff]  }
0x1166   : > { %v10166_v11 = vpop.eup %10165  ;;  %v7257_v27 = vadd.f32 1.0, %v10164_v41  ;;  %v9986_v41 = vld [vmem:[%s10431_s8 + $0x1d4] ss:$8 sps:$4 sm:$0xff]  }
0x1167   : > { %10167 = vrcp.f32 %v7256_v54  ;;  %v7259_v52 = vadd.f32 1.0, %v10166_v11  ;;  %v9984_v11 = vld [vmem:[%s10431_s8 + $0x1d0] ss:$8 sps:$4 sm:$0xff]  }
0x1168   : > { %10169 = vrcp.f32 %v7257_v27  ;;  %v9989_v27 = vld [vmem:[%s10431_s8 + $0x1e4] ss:$8 sps:$4 sm:$0xff]  }
0x1169   : > { %10171 = vrcp.f32 %v7259_v52  ;;  %v9987_v52 = vld [vmem:[%s10431_s8 + $0x1e0] ss:$8 sps:$4 sm:$0xff]  }
0x116a   : > { %10173 = vpow2.f32 %v9045_v33  ;;  %v10011_v33 = vld [vmem:[%s10431_s8 + $0x260] ss:$8 sps:$4 sm:$0xff]  }
0x1171   : > { %v10168_v63 = vpop.eup %10167 }
0x1172   : > { %v10170_v0 = vpop.eup %10169  ;;  %v7280_v4 = vmul.f32 %v10168_v63, %v7103_v35  ;;  %v9992_v63 = vld [vmem:[%s10431_s8 + $0x1f4] ss:$8 sps:$4 sm:$0xff]  }
0x1173   : > { %v10172_v40 = vpop.eup %10171  ;;  %v7281_v15 = vmul.f32 %v10170_v0, %v7105_v49  ;;  %v9972_v49 = vld [vmem:[%s10431_s8 + $0x190] ss:$8 sps:$4 sm:$0xff]  }
0x1174   : > { %v7283_v23 = vmul.f32 %v10172_v40, %v7146_v30  ;;  %v7288_v16 = vpack.c.bf16 %v7280_v4, %v7280_v4  ;;  %v9977_v30 = vld [vmem:[%s10431_s8 + $0x1a4] ss:$8 sps:$4 sm:$0xff]   ;;  %v10174_v57 = vpop.eup %10173  ;;  %v9990_v4 = vld [vmem:[%s10431_s8 + $0x1f0] ss:$8 sps:$4 sm:$0xff]  }
0x1175   : > { %v7289_v10 = vpack.c.bf16 %v7281_v15, %v7281_v15  ;;  %v7258_v58 = vadd.f32 1.0, %v10174_v57  ;;  %v10032_v57 = vld [vmem:[%s10431_s8 + $0x2d0] ss:$8 sps:$4 sm:$0xff]  }
0x1176   : > { %v7291_v28 = vpack.c.bf16 %v7283_v23, %v7283_v23  ;;  %v9995_v23 = vld [vmem:[%s10431_s8 + $0x204] ss:$8 sps:$4 sm:$0xff]  }
0x1177   : > { %8108 = vmatprep.mubr.bf16.mxu0 %v7289_v10 }
0x1178   : > { %8109 = vmatmul.mubr.bf16.vlgmr.msra.gmra.mrb[28].mxu0 %v7288_v16 }
0x1179   : > { %8118 = vmatpush1.bf16.msra.mxu0 %v9945_v2  ;;  %8149 = vmatprep.mubr.bf16.mxu0 %v7291_v28  ;;  %v9993_v2 = vld [vmem:[%s10431_s8 + $0x200] ss:$8 sps:$4 sm:$0xff]  }
0x117a   : > { %8119 = vmatprep.subr.bf16.mxu0 %v9950_v13  ;;  %v9998_v13 = vld [vmem:[%s10431_s8 + $0x214] ss:$8 sps:$4 sm:$0xff]  }
0x117d   : > { %8120 = vmatpush1.bf16.msra.mxu0 %v9948_v59  ;;  %v9996_v59 = vld [vmem:[%s10431_s8 + $0x210] ss:$8 sps:$4 sm:$0xff]  }
0x117e   : > { %8121 = vmatprep.subr.bf16.mxu0 %v9953_v25  ;;  %v10001_v25 = vld [vmem:[%s10431_s8 + $0x224] ss:$8 sps:$4 sm:$0xff]  }
0x1181   : > { %8122 = vmatpush1.bf16.msra.mxu0 %v9951_v21  ;;  %v9999_v21 = vld [vmem:[%s10431_s8 + $0x220] ss:$8 sps:$4 sm:$0xff]  }
0x1182   : > { %8123 = vmatprep.subr.bf16.mxu0 %v9956_v55  ;;  %v10004_v55 = vld [vmem:[%s10431_s8 + $0x234] ss:$8 sps:$4 sm:$0xff]  }
0x1185   : > { %8124 = vmatpush1.bf16.msra.mxu0 %v9954_v36  ;;  %v10002_v36 = vld [vmem:[%s10431_s8 + $0x230] ss:$8 sps:$4 sm:$0xff]  }
0x1186   : > { %8125 = vmatprep.subr.bf16.mxu0 %v9959_v17  ;;  %v10007_v17 = vld [vmem:[%s10431_s8 + $0x244] ss:$8 sps:$4 sm:$0xff]  }
0x1189   : > { %8126 = vmatpush1.bf16.msra.mxu0 %v9957_v24  ;;  %v10005_v24 = vld [vmem:[%s10431_s8 + $0x240] ss:$8 sps:$4 sm:$0xff]  }
0x118a   : > { %8127 = vmatprep.subr.bf16.mxu0 %v9962_v3  ;;  %v10010_v3 = vld [vmem:[%s10431_s8 + $0x254] ss:$8 sps:$4 sm:$0xff]  }
0x118d   : > { %8128 = vmatpush1.bf16.msra.mxu0 %v9960_v18  ;;  %v6419_v18 = vrot.slane %v11782_v9, %v10765_v44  ;;  %v10014_v44 = vld [vmem:[%s10431_s8 + $0x270] ss:$8 sps:$4 sm:$0xff]  }
0x118e   : > { %8129 = vmatprep.subr.bf16.mxu0 %v9965_v26  ;;  %v10008_v26 = vld [vmem:[%s10431_s8 + $0x250] ss:$8 sps:$4 sm:$0xff]  }
0x1191   : > { %8130 = vmatpush1.bf16.msra.mxu0 %v9963_v6 }
0x1192   : > { %8131 = vmatprep.subr.bf16.mxu0 %v9968_v42 }
0x1195   : > { %v11810_v53 = vpop.f32.mrb[24].mxu0  ;;  %v11812_v8 = vpop.f32.mrb[80].mxu1  ;;  %8132 = vmatpush1.bf16.msra.mxu0 %v9966_v7  ;;  %v10016_v7 = vld [vmem:[%s10431_s8 + $0x274] ss:$8 sps:$4 sm:$0xff]  }
0x1196   : > { %v7186_v12 = vpop.f32.mrb[25].mxu0  ;;  %v11814_v31 = vpop.f32.mrb[81].mxu1  ;;  %8133 = vmatprep.subr.bf16.mxu0 %v9971_v60  ;;  %v7185_v6 = vadd.f32 %v11810_v53, %v6407_v37  ;;  %v10019_v60 = vld [vmem:[%s10431_s8 + $0x284] ss:$8 sps:$4 sm:$0xff]   ;;  %v10017_v53 = vld [vmem:[%s10431_s8 + $0x280] ss:$8 sps:$4 sm:$0xff]  }
0x1197   : > { %v7187_v14 = vadd.f32 %v7186_v12, %v6411_v61  ;;  %v7188_v46 = vpop.f32.mrb[26].mxu0  ;;  %v7229_v39 = vpop.f32.mrb[82].mxu1  ;;  %v7228_v42 = vadd.f32 %v11814_v31, %v6419_v18  ;;  %v10022_v12 = vld [vmem:[%s10431_s8 + $0x294] ss:$8 sps:$4 sm:$0xff]   ;;  %v10020_v31 = vld [vmem:[%s10431_s8 + $0x290] ss:$8 sps:$4 sm:$0xff]  }
0x1198   : > { %v7189_v35 = vpop.f32.mrb[27].mxu0  ;;  %v7230_v22 = vpop.f32.mrb[83].mxu1  ;;  %v9047_v47 = vmul.f32 -1.442695, %v7185_v6  ;;  %v10028_v39 = vld [vmem:[%s10431_s8 + $0x2b4] ss:$8 sps:$4 sm:$0xff]  }
0x1199   : > { %v9048_v62 = vmul.f32 -1.442695, %v7187_v14  ;;  %8134 = vmatpush1.bf16.msra.mxu0 %v9969_v5  ;;  %v9050_v61 = vmul.f32 -1.442695, %v7228_v42  ;;  %v10025_v5 = vld [vmem:[%s10431_s8 + $0x2a4] ss:$8 sps:$4 sm:$0xff]  }
0x119a   : > { %8135 = vmatprep.subr.bf16.mxu0 %v9974_v48  ;;  %v10026_v22 = vld [vmem:[%s10431_s8 + $0x2b0] ss:$8 sps:$4 sm:$0xff]   ;;  %v10073_v37 = vld [vmem:[%s10431_s8 + $0x3a4] ss:$8 sps:$4 sm:$0xff]   ;;  %v10071_v18 = vld [vmem:[%s10431_s8 + $0x3a0] ss:$8 sps:$4 sm:$0xff]  }
0x119b   : > { %10175 = vpow2.f32 %v9048_v62 }
0x119c   : > { %10177 = vrcp.f32 %v7258_v58  ;;  %v10035_v58 = vld [vmem:[%s10431_s8 + $0x2e0] ss:$8 sps:$4 sm:$0xff]  }
0x119d   : > { %8136 = vmatpush1.bf16.msra.mxu0 %v9972_v49  ;;  %v10031_v49 = vld [vmem:[%s10431_s8 + $0x2c4] ss:$8 sps:$4 sm:$0xff]  }
0x119e   : > { %8137 = vmatprep.subr.bf16.mxu0 %v9977_v30  ;;  %v10029_v30 = vld [vmem:[%s10431_s8 + $0x2c0] ss:$8 sps:$4 sm:$0xff]  }
0x11a1   : > { %8138 = vmatpush1.bf16.msra.mxu0 %v9975_v32  ;;  %v10034_v32 = vld [vmem:[%s10431_s8 + $0x2d4] ss:$8 sps:$4 sm:$0xff]  }
0x11a2   : > { %8139 = vmatprep.subr.bf16.mxu0 %v9980_v50  ;;  %v10037_v50 = vld [vmem:[%s10431_s8 + $0x2e4] ss:$8 sps:$4 sm:$0xff]  }
0x11a5   : > { %v10176_v51 = vpop.eup %10175  ;;  %8140 = vmatpush1.bf16.msra.mxu0 %v9978_v38  ;;  %v10040_v38 = vld [vmem:[%s10431_s8 + $0x2f4] ss:$8 sps:$4 sm:$0xff]  }
0x11a6   : > { %v7261_v54 = vadd.f32 1.0, %v10176_v51  ;;  %8141 = vmatprep.subr.bf16.mxu0 %v9983_v56  ;;  %v10178_v0 = vpop.eup %10177 }
0x11a7   : > { %v7282_v15 = vmul.f32 %v10178_v0, %v7144_v34  ;;  %v10013_v34 = vld [vmem:[%s10431_s8 + $0x264] ss:$8 sps:$4 sm:$0xff]  }
0x11a8   : > { %10179 = vrcp.f32 %v7261_v54 }
0x11a9   : > { %8142 = vmatpush1.bf16.msra.mxu0 %v9981_v1  ;;  %v7290_v16 = vpack.c.bf16 %v7282_v15, %v7282_v15  ;;  %10181 = vpow2.f32 %v9047_v47  ;;  %v10038_v1 = vld [vmem:[%s10431_s8 + $0x2f0] ss:$8 sps:$4 sm:$0xff]   ;;  %v10047_v15 = vld [vmem:[%s10431_s8 + $0x320] ss:$8 sps:$4 sm:$0xff]   ;;  %v10082_v47 = vld [vmem:[%s10431_s8 + $0x3d4] ss:$8 sps:$4 sm:$0xff]  }
0x11aa   : > { %8143 = vmatprep.subr.bf16.mxu0 %v9986_v41  ;;  %10183 = vpow2.f32 %v9050_v61  ;;  %v10043_v41 = vld [vmem:[%s10431_s8 + $0x304] ss:$8 sps:$4 sm:$0xff]   ;;  %v10080_v61 = vld [vmem:[%s10431_s8 + $0x3d0] ss:$8 sps:$4 sm:$0xff]  }
0x11ad   : > { %8144 = vmatpush1.bf16.msra.mxu0 %v9984_v11 }
0x11ae   : > { %8145 = vmatprep.subr.bf16.mxu0 %v9989_v27  ;;  %v10041_v27 = vld [vmem:[%s10431_s8 + $0x300] ss:$8 sps:$4 sm:$0xff]  }
0x11b1   : > { %8146 = vmatpush1.bf16.msra.mxu0 %v9987_v52 }
0x11b2   : > { %v10180_v40 = vpop.eup %10179  ;;  %8147 = vmatprep.subr.bf16.mxu0 %v9992_v63  ;;  %v10046_v63 = vld [vmem:[%s10431_s8 + $0x314] ss:$8 sps:$4 sm:$0xff]  }
0x11b3   : > { %v7285_v10 = vmul.f32 %v10180_v40, %v7187_v14  ;;  %v10023_v14 = vld [vmem:[%s10431_s8 + $0x2a0] ss:$8 sps:$4 sm:$0xff]   ;;  %v10182_v46 = vpop.eup %10181  ;;  %v10049_v40 = vld [vmem:[%s10431_s8 + $0x324] ss:$8 sps:$4 sm:$0xff]  }
0x11b4   : > { %v10184_v48 = vpop.eup %10183  ;;  %v7260_v35 = vadd.f32 1.0, %v10182_v46  ;;  %v7424_v46 = vld [vmem:[%s10436_s3] sm:$0x3] }
0x11b5   : > { %8148 = vmatpush1.bf16.msra.mxu0 %v9990_v4  ;;  %v7293_v28 = vpack.c.bf16 %v7285_v10, %v7285_v10  ;;  %v7263_v62 = vadd.f32 1.0, %v10184_v48  ;;  %v10044_v4 = vld [vmem:[%s10431_s8 + $0x310] ss:$8 sps:$4 sm:$0xff]   ;;  %v7433_v48 = vrot.slane %v7424_v46, %v10509_v20 }
0x11b6   : > { %8158 = vmatprep.subr.bf16.mxu0 %v9995_v23  ;;  %10185 = vrcp.f32 %v7260_v35  ;;  %v10052_v23 = vld [vmem:[%s10431_s8 + $0x334] ss:$8 sps:$4 sm:$0xff]   ;;  %v10050_v10 = vld [vmem:[%s10431_s8 + $0x330] ss:$8 sps:$4 sm:$0xff]  }
0x11b7   : > { %10187 = vrcp.f32 %v7263_v62 }
0x11b8   : > { %8150 = vmatmul.mubr.bf16.vlgmr.msra.gmra.mrb[28].mxu0 %v7290_v16  ;;  %v10053_v16 = vld [vmem:[%s10431_s8 + $0x340] ss:$8 sps:$4 sm:$0xff]  }
0x11b9   : > { %8159 = vmatpush1.bf16.msra.mxu0 %v9993_v2  ;;  %8190 = vmatprep.mubr.bf16.mxu0 %v7293_v28  ;;  %v10055_v2 = vld [vmem:[%s10431_s8 + $0x344] ss:$8 sps:$4 sm:$0xff]   ;;  %v6415_v28 = vrot.slane %v11782_v9, %v10762_v43  ;;  %v10065_v9 = vld [vmem:[%s10431_s8 + $0x380] ss:$8 sps:$4 sm:$0xff]  }
0x11ba   : > { %8160 = vmatprep.subr.bf16.mxu0 %v9998_v13  ;;  %v10058_v13 = vld [vmem:[%s10431_s8 + $0x354] ss:$8 sps:$4 sm:$0xff]   ;;  %v10067_v43 = vld [vmem:[%s10431_s8 + $0x384] ss:$8 sps:$4 sm:$0xff]  }
0x11bd   : > { %8161 = vmatpush1.bf16.msra.mxu0 %v9996_v59  ;;  %v10056_v59 = vld [vmem:[%s10431_s8 + $0x350] ss:$8 sps:$4 sm:$0xff]  }
0x11be   : > { %8162 = vmatprep.subr.bf16.mxu0 %v10001_v25  ;;  %v10061_v25 = vld [vmem:[%s10431_s8 + $0x364] ss:$8 sps:$4 sm:$0xff]  }
0x11c0   : > { %v10186_v56 = vpop.eup %10185 }
0x11c1   : > { %8163 = vmatpush1.bf16.msra.mxu0 %v9999_v21  ;;  %v10188_v51 = vpop.eup %10187  ;;  %v7284_v54 = vmul.f32 %v10186_v56, %v7185_v6  ;;  %v7226_v21 = vadd.f32 %v11812_v8, %v6415_v28  ;;  %v10070_v8 = vld [vmem:[%s10431_s8 + $0x394] ss:$8 sps:$4 sm:$0xff]  }
0x11c2   : > { %8164 = vmatprep.subr.bf16.mxu0 %v10004_v55  ;;  %v7287_v11 = vmul.f32 %v10188_v51, %v7228_v42  ;;  %v10059_v55 = vld [vmem:[%s10431_s8 + $0x360] ss:$8 sps:$4 sm:$0xff]   ;;  %v10074_v42 = vld [vmem:[%s10431_s8 + $0x3b0] ss:$8 sps:$4 sm:$0xff]  }
0x11c3   : > { %v7292_v52 = vpack.c.bf16 %v7284_v54, %v7284_v54 }
0x11c4   : > { %v7295_v0 = vpack.c.bf16 %v7287_v11, %v7287_v11 }
0x11c5   : > { %8165 = vmatpush1.bf16.msra.mxu0 %v10002_v36  ;;  %v10064_v36 = vld [vmem:[%s10431_s8 + $0x374] ss:$8 sps:$4 sm:$0xff]  }
0x11c6   : > { %8166 = vmatprep.subr.bf16.mxu0 %v10007_v17  ;;  %v9049_v17 = vmul.f32 -1.442695, %v7226_v21 }
0x11c8   : > { %10189 = vpow2.f32 %v9049_v17 }
0x11c9   : > { %8167 = vmatpush1.bf16.msra.mxu0 %v10005_v24  ;;  %v10062_v24 = vld [vmem:[%s10431_s8 + $0x370] ss:$8 sps:$4 sm:$0xff]  }
0x11ca   : > { %8168 = vmatprep.subr.bf16.mxu0 %v10010_v3  ;;  %v10068_v3 = vld [vmem:[%s10431_s8 + $0x390] ss:$8 sps:$4 sm:$0xff]  }
0x11cd   : > { %8169 = vmatpush1.bf16.msra.mxu0 %v10008_v26 }
0x11ce   : > { %8170 = vmatprep.subr.bf16.mxu0 %v10013_v34  ;;  %v10076_v34 = vld [vmem:[%s10431_s8 + $0x3b4] ss:$8 sps:$4 sm:$0xff]  }
0x11d1   : > { %8171 = vmatpush1.bf16.msra.mxu0 %v10011_v33  ;;  %v10079_v33 = vld [vmem:[%s10431_s8 + $0x3c4] ss:$8 sps:$4 sm:$0xff]  }
0x11d2   : > { %8172 = vmatprep.subr.bf16.mxu0 %v10016_v7  ;;  %v10190_v26 = vpop.eup %10189  ;;  %v10077_v7 = vld [vmem:[%s10431_s8 + $0x3c0] ss:$8 sps:$4 sm:$0xff]  }
0x11d3   : > { %v7262_v6 = vadd.f32 1.0, %v10190_v26 }
0x11d5   : > { %8173 = vmatpush1.bf16.msra.mxu0 %v10014_v44  ;;  %10191 = vrcp.f32 %v7262_v6  ;;  %v10085_v44 = vld [vmem:[%s10431_s8 + $0x3e4] ss:$8 sps:$4 sm:$0xff]  }
0x11d6   : > { %8174 = vmatprep.subr.bf16.mxu0 %v10019_v60  ;;  %v10083_v60 = vld [vmem:[%s10431_s8 + $0x3e0] ss:$8 sps:$4 sm:$0xff]  }
0x11d9   : > { %8175 = vmatpush1.bf16.msra.mxu0 %v10017_v53  ;;  %v10088_v53 = vld [vmem:[%s10431_s8 + $0x3f4] ss:$8 sps:$4 sm:$0xff]  }
0x11da   : > { %8176 = vmatprep.subr.bf16.mxu0 %v10022_v12 }
0x11dd   : > { %8177 = vmatpush1.bf16.msra.mxu0 %v10020_v31  ;;  %v10086_v31 = vld [vmem:[%s10431_s8 + $0x3f0] ss:$8 sps:$4 sm:$0xff]  }
0x11de   : > { %8178 = vmatprep.subr.bf16.mxu0 %v10025_v5 }
0x11df   : > { %v10192_v12 = vpop.eup %10191 }
0x11e0   : > { %v7286_v5 = vmul.f32 %v10192_v12, %v7226_v21 }
0x11e1   : > { %8179 = vmatpush1.bf16.msra.mxu0 %v10023_v14 }
0x11e2   : > { %8180 = vmatprep.subr.bf16.mxu0 %v10028_v39  ;;  %v7294_v14 = vpack.c.bf16 %v7286_v5, %v7286_v5  ;;  %v7429_v39 = vrot.slane %v7424_v46, %v10506_v19 }
0x11e5   : > { %8181 = vmatpush1.bf16.msra.mxu0 %v10026_v22 }
0x11e6   : > { %8182 = vmatprep.subr.bf16.mxu0 %v10031_v49 }
0x11e9   : > { %8183 = vmatpush1.bf16.msra.mxu0 %v10029_v30 }
0x11ea   : > { %8184 = vmatprep.subr.bf16.mxu0 %v10034_v32 }
0x11ed   : > { %8185 = vmatpush1.bf16.msra.mxu0 %v10032_v57 }
0x11ee   : > { %8186 = vmatprep.subr.bf16.mxu0 %v10037_v50 }
0x11f1   : > { %8187 = vmatpush1.bf16.msra.mxu0 %v10035_v58 }
0x11f2   : > { %8188 = vmatprep.subr.bf16.mxu0 %v10040_v38 }
0x11f5   : > { %8189 = vmatpush1.bf16.msra.mxu0 %v10038_v1 }
0x11f6   : > { %8199 = vmatprep.subr.bf16.mxu0 %v10043_v41 }
0x11f8   : > { %8191 = vmatmul.mubr.bf16.vlgmr.msra.gmra.mrb[28].mxu0 %v7292_v52 }
0x11f9   : > { %8200 = vmatpush1.bf16.msra.mxu0 %v10041_v27  ;;  %8231 = vmatprep.mubr.bf16.mxu0 %v7295_v0 }
0x11fa   : > { %8201 = vmatprep.subr.bf16.mxu0 %v10046_v63 }
0x11fd   : > { %8202 = vmatpush1.bf16.msra.mxu0 %v10044_v4 }
0x11fe   : > { %8203 = vmatprep.subr.bf16.mxu0 %v10049_v40  ;;  %v8245_v40 = vld [vmem:[%s11972_s23] sm:$0x3] }
0x1201   : > { %8204 = vmatpush1.bf16.msra.mxu0 %v10047_v15 }
0x1202   : > { %8205 = vmatprep.subr.bf16.mxu0 %v10052_v23 }
0x1205   : > { %8206 = vmatpush1.bf16.msra.mxu0 %v10050_v10  ;;  %v8279_v10 = vrot.slane %v8245_v40, %v10506_v19 }
0x1206   : > { %8207 = vmatprep.subr.bf16.mxu0 %v10055_v2  ;;  %v8283_v2 = vrot.slane %v8245_v40, %v10509_v20 }
0x1209   : > { %8208 = vmatpush1.bf16.msra.mxu0 %v10053_v16 }
0x120a   : > { %8209 = vmatprep.subr.bf16.mxu0 %v10058_v13 }
0x120d   : > { %8210 = vmatpush1.bf16.msra.mxu0 %v10056_v59 }
0x120e   : > { %8211 = vmatprep.subr.bf16.mxu0 %v10061_v25 }
0x1211   : > { %8212 = vmatpush1.bf16.msra.mxu0 %v10059_v55 }
0x1212   : > { %8213 = vmatprep.subr.bf16.mxu0 %v10064_v36 }
0x1215   : > { %8214 = vmatpush1.bf16.msra.mxu0 %v10062_v24 }
0x1216   : > { %8215 = vmatprep.subr.bf16.mxu0 %v10067_v43 }
0x1219   : > { %8216 = vmatpush1.bf16.msra.mxu0 %v10065_v9 }
0x121a   : > { %8217 = vmatprep.subr.bf16.mxu0 %v10070_v8 }
0x121d   : > { %8218 = vmatpush1.bf16.msra.mxu0 %v10068_v3 }
0x121e   : > { %8219 = vmatprep.subr.bf16.mxu0 %v10073_v37 }
0x1221   : > { %8220 = vmatpush1.bf16.msra.mxu0 %v10071_v18 }
0x1222   : > { %8221 = vmatprep.subr.bf16.mxu0 %v10076_v34 }
0x1225   : > { %8222 = vmatpush1.bf16.msra.mxu0 %v10074_v42 }
0x1226   : > { %8223 = vmatprep.subr.bf16.mxu0 %v10079_v33 }
0x1229   : > { %8224 = vmatpush1.bf16.msra.mxu0 %v10077_v7 }
0x122a   : > { %8225 = vmatprep.subr.bf16.mxu0 %v10082_v47 }
0x122d   : > { %8226 = vmatpush1.bf16.msra.mxu0 %v10080_v61 }
0x122e   : > { %8227 = vmatprep.subr.bf16.mxu0 %v10085_v44 }
0x1231   : > { %8228 = vmatpush1.bf16.msra.mxu0 %v10083_v60 }
0x1232   : > { %8229 = vmatprep.subr.bf16.mxu0 %v10088_v53 }
0x1235   : > { %8230 = vmatpush1.bf16.msra.mxu0 %v10086_v31 }
0x1238   : > { %8232 = vmatmul.mubr.bf16.vlgmr.msra.gmra.mrb[28].mxu0 %v7294_v14 }
0x130b   : > { %v8233_v35 = vpop.f32.mrb[28].mxu0 }
0x130c   : > { %v9281_v22 = vadd.f32 %v8233_v35, %v7429_v39  ;;  %v8235_v62 = vpop.f32.mrb[29].mxu0 }
0x130d   : > { %v9282_v49 = vadd.f32 %v8235_v62, %v7433_v48  ;;  %v8237_v30 = vpop.f32.mrb[30].mxu0 }
0x130e   : > { %v8240_v32 = vmul.f32 0.5, %v9281_v22  ;;  %v8238_v57 = vpop.f32.mrb[31].mxu0 }
0x130f   : > { %v8241_v50 = vmul.f32 0.5, %v9282_v49 }
0x1310   : > { %v8242_v58 = vadd.f32 %v8240_v32, %v11589_v45  ;;  %v8244_v45 = vld [vmem:[%s11971_s22] sm:$0x3] }
0x1311   : > { %v8243_v38 = vadd.f32 %v8241_v50, %v11592_v29  ;;  %v8266_v29 = vrot.slane %v8244_v45, %v10506_v19  ;;  %v8270_v15 = vrot.slane %v8244_v45, %v10509_v20 }
0x1313   : > { %v8246_v56 = vadd.f32 %v8243_v38, %v8242_v58 }
0x1315   : > { %8247 = vadd.xlane.f32.xlu1 %v8246_v56 }
0x13a2   : > { %v8248_v51 = vpop.xlane.xlu1 %8247 }
0x13a3   : > { %v8249_v1 = vmul.f32 0.00390625, %v8248_v51 }
0x13a5   : > { %v8250_v54 = vsub.f32 %v8242_v58, %v8249_v1  ;;  %v8251_v41 = vsub.f32 %v8243_v38, %v8249_v1 }
0x13a7   : > { %v8252_v11 = vmul.f32 %v8250_v54, %v8250_v54  ;;  %v8253_v27 = vmul.f32 %v8251_v41, %v8251_v41 }
0x13a9   : > { %v8254_v52 = vadd.f32 %v8253_v27, %v8252_v11 }
0x13ab   : > { %8255 = vadd.xlane.f32.xlu1 %v8254_v52 }
0x1438   : > { %v8256_v63 = vpop.xlane.xlu1 %8255 }
0x1439   : > { %v8257_v0 = vmul.f32 0.00390625, %v8256_v63 }
0x143b   : > { %v8258_v4 = vadd.f32 1e-12, %v8257_v0 }
0x143d   : > { %10193 = vrsqrt.f32 %v8258_v4 }
0x1447   : > { %v10194_v23 = vpop.eup %10193 }
0x1448   : > { %v8260_v16 = vmul.f32 %v10194_v23, %v8250_v54  ;;  %v8261_v13 = vmul.f32 %v10194_v23, %v8251_v41 }
0x144a   : > { %v8273_v28 = vmul.f32 %v8266_v29, %v8260_v16  ;;  %v8274_v59 = vmul.f32 %v8270_v15, %v8261_v13 }
0x144c   : > { %v8286_v25 = vadd.f32 %v8279_v10, %v8273_v28  ;;  %v8287_v21 = vadd.f32 %v8283_v2, %v8274_v59 }
0x144e   : > { %8288 = vst [vmem:[%s1112_s15] sm:$0xff] %v8286_v25  ;;  %8289 = vst [vmem:[%s1112_s15 + $0x8] sm:$0xff] %v8287_v21 }
0x144f PF: > { %s83_s28 = sadd.s32 1, %s10203_s28  }
0x1450   : > { %p80_p4 = scmp.ge.s32.totalorder %s83_s28, 4  }
0x1452   :  { %82 = sbr.rel (!%p80_p4) target bundleno = 60 (0x3c), region = 233 }

</bundles_post_ra>
